<compile_context>
chip_gen: v7x
topology: tpu7x:2x2x1
jax: 0.10.0
libtpu: 0.0.40
codegen_flags: <defaults>
</compile_context>

<pallas_src>
import jax
import jax.numpy as jnp
from jax.experimental import pallas as pl
from jax.experimental.pallas import tpu as pltpu

LEAKY_SLOPE = 0.01   # nn.LeakyReLU() default
BN_EPS = 1e-5        # nn.BatchNorm1d default
N_DECONV = 5         # number of ConvTranspose1d+BN+LeakyReLU blocks
L0 = 8               # spatial length right after the Linear + view


def _bitrev(x, bits):
    r = 0
    for _ in range(bits):
        r = (r << 1) | (x & 1)
        x >>= 1
    return r


def _shift_plus(q, bits, n):
    """Value at position l+1 (zero past the end), bit-reversed block layout.

    q: (2**bits * 8 * n, C).  Only static sublane slices / concats."""
    K = 2 ** bits
    R = q.shape[0] // K
    blks = [q[b * R:(b + 1) * R, :] for b in range(K)]
    zc = jnp.zeros((n, q.shape[1]), jnp.float32)
    parts = []
    for b in range(K):
        rb = _bitrev(b, bits)
        if rb == K - 1:
            parts.append(jnp.concatenate([blks[0][n:, :], zc], axis=0))
        else:
            parts.append(blks[_bitrev(rb + 1, bits)])
    return jnp.concatenate(parts, axis=0)


def _shift_minus(q, bits, n):
    """Value at position l-1 (zero before the start), bit-reversed block layout."""
    K = 2 ** bits
    R = q.shape[0] // K
    blks = [q[b * R:(b + 1) * R, :] for b in range(K)]
    zc = jnp.zeros((n, q.shape[1]), jnp.float32)
    parts = []
    for b in range(K):
        rb = _bitrev(b, bits)
        if rb == 0:
            parts.append(jnp.concatenate([zc, blks[K - 1][:-n, :]], axis=0))
        else:
            parts.append(blks[_bitrev(rb - 1, bits)])
    return jnp.concatenate(parts, axis=0)


# ----------------------------------------------------------------------------
# The single fused Pallas kernel
# ----------------------------------------------------------------------------
def _decoder_kernel(*refs):
    n_layers = (len(refs) - 8) // 5
    z_ref, lwr_ref, lbr_ref = refs[0], refs[1], refs[2]
    layer_refs = refs[3:3 + 5 * n_layers]
    cw0_ref, cw1_ref, cw2_ref, cb_ref = refs[3 + 5 * n_layers:7 + 5 * n_layers]
    o_ref = refs[-1]

    N = z_ref.shape[0]
    R = L0 * N                       # rows per block (block = 8 original positions)

    # -- decoder_input: Linear(latent -> C0*8), emitted directly in block layout:
    #    rows (j, n), cols = channels.
    z = z_ref[...]
    a = jnp.concatenate(
        [jnp.dot(z, lwr_ref[j], preferred_element_type=jnp.float32) + lbr_ref[j]
         for j in range(L0)],
        axis=0)                                                     # (8N, C0)

    # -- deconv / BN / LeakyReLU stack
    for i in range(n_layers):
        w0 = layer_refs[5 * i + 0][...]      # (Cin, Cout)  tap k=0
        w1 = layer_refs[5 * i + 1][...]      # (Cin, Cout)  tap k=1 (even outputs)
        w2 = layer_refs[5 * i + 2][...]      # (Cin, Cout)  tap k=2
        g = layer_refs[5 * i + 3][...]       # (1, Cout)
        be = layer_refs[5 * i + 4][...]      # (1, Cout)

        # ConvTranspose1d (bias dropped: cancels under training-mode BN).
        # Shift the narrow tap product, not the full-width activation:
        #   P_plus(a) @ w0 == P_plus(a @ w0)   (row permutation + zero rows)
        even = jnp.dot(a, w1, preferred_element_type=jnp.float32)
        t2 = jnp.dot(a, w2, preferred_element_type=jnp.float32)
        t0 = jnp.dot(a, w0, preferred_element_type=jnp.float32)
        odd = t2 + _shift_plus(t0, i, N)
        y = jnp.concatenate([even, odd], axis=0)        # new stage: 2K blocks

        # BatchNorm1d (training mode): biased stats over all N*L_out positions,
        # two-pass (x - mean)^2 form for numerical robustness.
        mean = jnp.mean(y, axis=0, keepdims=True)
        d = y - mean
        var = jnp.mean(d * d, axis=0, keepdims=True)
        yn = d * (g * jax.lax.rsqrt(var + BN_EPS)) + be
        a = jnp.maximum(yn, LEAKY_SLOPE * yn)           # LeakyReLU

    # -- final Conv1d(C -> 1, k=3, pad=1) + Sigmoid.
    #    Again shift the 1-column tap products rather than the activation.
    t0 = jnp.dot(a, cw0_ref[...], preferred_element_type=jnp.float32)
    t1 = jnp.dot(a, cw1_ref[...], preferred_element_type=jnp.float32)
    t2 = jnp.dot(a, cw2_ref[...], preferred_element_type=jnp.float32)
    pre = (_shift_minus(t0, n_layers, N) + t1 + _shift_plus(t2, n_layers, N)
           + cb_ref[...])
    sig = jax.nn.sigmoid(pre)                            # (K*R, 1)

    # -- reassemble into true position order, lane-dense (N, L_out)
    K = 2 ** n_layers
    cols = [sig[b * R:(b + 1) * R, :] for b in range(K)]
    m1 = jnp.concatenate([cols[_bitrev(r, n_layers)] for r in range(K)],
                         axis=1)                         # (R, K): [(j,n), r]
    rows = []
    for n in range(N):
        rows.append(jnp.concatenate(
            [m1[j * N + n: j * N + n + 1, :] for j in range(L0)], axis=1))
    o_ref[...] = jnp.concatenate(rows, axis=0)           # (N, L_out)


# ----------------------------------------------------------------------------
# Forward pass: lightweight weight-layout prep + one pallas_call
# ----------------------------------------------------------------------------
@jax.jit
def decoder_forward(params, z):
    n, latent = z.shape
    c0 = params["lin_w"].shape[1] // L0

    # Kernel-layout parameter prep (tiny, weight-only ops).
    lin_w_r = params["lin_w"].reshape(latent, c0, L0).transpose(2, 0, 1)  # (8, latent, C0)
    lin_b_r = params["lin_b"].reshape(c0, L0).T.reshape(L0, 1, c0)        # (8, 1, C0)

    args = [z, lin_w_r, lin_b_r]
    for layer in params["deconvs"]:
        w = layer["w"]                       # (Cin, Cout, 3), PyTorch layout
        # layer["b"] (ConvTranspose bias) intentionally not passed:
        # it cancels exactly under training-mode BatchNorm.
        args += [w[:, :, 0], w[:, :, 1], w[:, :, 2],
                 layer["gamma"].reshape(1, -1),
                 layer["beta"].reshape(1, -1)]
    cw = params["conv_w"]                    # (Cin, 1, 3)
    args += [cw[:, :, 0], cw[:, :, 1], cw[:, :, 2],
             params["conv_b"].reshape(1, 1)]

    l_out = L0 * 2 ** len(params["deconvs"])
    out = pl.pallas_call(
        _decoder_kernel,
        out_shape=jax.ShapeDtypeStruct((n, l_out), jnp.float32),
        compiler_params=pltpu.CompilerParams(vmem_limit_bytes=32 * 1024 * 1024),
    )(*args)
    return out.reshape(n, 1, l_out)          # PyTorch NCL convention (N, 1, L)


# ----------------------------------------------------------------------------
# Parameters (deterministic synthetic init, PyTorch layouts)
# ----------------------------------------------------------------------------
def init_params(key, latent_dim=16, sf=16):
    chans = [sf * 16, sf * 8, sf * 4, sf * 2, sf, sf]
    keys = iter(jax.random.split(key, 32))

    def nrm(shape, scale=0.1):
        return scale * jax.random.normal(next(keys), shape, jnp.float32)

    params = {
        "lin_w": nrm((latent_dim, chans[0] * L0)),   # Linear(latent, sf*16*8)
        "lin_b": nrm((chans[0] * L0,)),
        "deconvs": [],
        "conv_w": None,
        "conv_b": None,
    }
    for i in range(N_DECONV):
        cin, cout = chans[i], chans[i + 1]
        params["deconvs"].append(dict(
            w=nrm((cin, cout, 3)),                   # ConvTranspose1d weight layout
            b=nrm((cout,)),                          # kept for fidelity (cancels in BN)
            gamma=1.0 + nrm((cout,)),
            beta=nrm((cout,)),
        ))
    params["conv_w"] = nrm((sf, 1, 3))               # stored (Cin, Cout=1, K)
    params["conv_b"] = nrm((1,))
    return params


# ----------------------------------------------------------------------------
# Pure-JAX reference (same math, NCL layout) for correctness checking
# ----------------------------------------------------------------------------
def ref_decoder(params, z):
    hp = jax.lax.Precision.HIGHEST
    n = z.shape[0]
    c0 = params["lin_w"].shape[1] // L0
    x = jnp.dot(z, params["lin_w"], precision=hp) + params["lin_b"]
    x = x.reshape(n, c0, L0)                             # NCL
    for layer in params["deconvs"]:
        w, b, g, be = layer["w"], layer["b"], layer["gamma"], layer["beta"]
        cin = w.shape[0]
        l = x.shape[2]
        xs = jnp.concatenate([x[:, :, 1:], jnp.zeros((n, cin, 1), jnp.float32)], axis=2)
        even = jnp.einsum("ncl,co->nol", x, w[:, :, 1], precision=hp)
        odd = (jnp.einsum("ncl,co->nol", x, w[:, :, 2], precision=hp)
               + jnp.einsum("ncl,co->nol", xs, w[:, :, 0], precision=hp))
        y = jnp.zeros((n, w.shape[1], 2 * l), jnp.float32)
        y = y.at[:, :, 0::2].set(even).at[:, :, 1::2].set(odd) + b[None, :, None]
        mean = jnp.mean(y, axis=(0, 2), keepdims=True)
        var = jnp.mean((y - mean) ** 2, axis=(0, 2), keepdims=True)
        y = (y - mean) / jnp.sqrt(var + BN_EPS) * g[None, :, None] + be[None, :, None]
        x = jnp.maximum(y, LEAKY_SLOPE * y)
    w, b = params["conv_w"], params["conv_b"]
    xp = jnp.concatenate([jnp.zeros_like(x[:, :, :1]), x[:, :, :-1]], axis=2)
    xn = jnp.concatenate([x[:, :, 1:], jnp.zeros_like(x[:, :, :1])], axis=2)
    y = (jnp.einsum("ncl,co->nol", xp, w[:, :, 0], precision=hp)
         + jnp.einsum("ncl,co->nol", x, w[:, :, 1], precision=hp)
         + jnp.einsum("ncl,co->nol", xn, w[:, :, 2], precision=hp) + b[None, :, None])
    return jax.nn.sigmoid(y)


if __name__ == "__main__":
    key = jax.random.PRNGKey(0)
    pkey, zkey = jax.random.split(key)
    params = init_params(pkey, latent_dim=16, sf=16)
    z = jax.random.normal(zkey, (2, 16), jnp.float32)    # batch=2, latent_dim=16

    out = jax.block_until_ready(decoder_forward(params, z))
    assert out.shape == (2, 1, 256), out.shape

    ref = ref_decoder(params, z)
    err = float(jnp.max(jnp.abs(out - ref)))
    assert err < 1e-2, f"max abs err {err}"

    print("KERNEL_OK")
</pallas_src>

<mosaic_0001>
module attributes {stable_mosaic.version = 11 : i64} {
  func.func @_decoder_kernel(%arg0: memref<2x16xf32, #tpu.memory_space<vmem>>, %arg1: memref<8x16x256xf32, #tpu.memory_space<vmem>>, %arg2: memref<8x1x256xf32, #tpu.memory_space<vmem>>, %arg3: memref<256x128xf32, #tpu.memory_space<vmem>>, %arg4: memref<256x128xf32, #tpu.memory_space<vmem>>, %arg5: memref<256x128xf32, #tpu.memory_space<vmem>>, %arg6: memref<1x128xf32, #tpu.memory_space<vmem>>, %arg7: memref<1x128xf32, #tpu.memory_space<vmem>>, %arg8: memref<128x64xf32, #tpu.memory_space<vmem>>, %arg9: memref<128x64xf32, #tpu.memory_space<vmem>>, %arg10: memref<128x64xf32, #tpu.memory_space<vmem>>, %arg11: memref<1x64xf32, #tpu.memory_space<vmem>>, %arg12: memref<1x64xf32, #tpu.memory_space<vmem>>, %arg13: memref<64x32xf32, #tpu.memory_space<vmem>>, %arg14: memref<64x32xf32, #tpu.memory_space<vmem>>, %arg15: memref<64x32xf32, #tpu.memory_space<vmem>>, %arg16: memref<1x32xf32, #tpu.memory_space<vmem>>, %arg17: memref<1x32xf32, #tpu.memory_space<vmem>>, %arg18: memref<32x16xf32, #tpu.memory_space<vmem>>, %arg19: memref<32x16xf32, #tpu.memory_space<vmem>>, %arg20: memref<32x16xf32, #tpu.memory_space<vmem>>, %arg21: memref<1x16xf32, #tpu.memory_space<vmem>>, %arg22: memref<1x16xf32, #tpu.memory_space<vmem>>, %arg23: memref<16x16xf32, #tpu.memory_space<vmem>>, %arg24: memref<16x16xf32, #tpu.memory_space<vmem>>, %arg25: memref<16x16xf32, #tpu.memory_space<vmem>>, %arg26: memref<1x16xf32, #tpu.memory_space<vmem>>, %arg27: memref<1x16xf32, #tpu.memory_space<vmem>>, %arg28: memref<16x1xf32, #tpu.memory_space<vmem>>, %arg29: memref<16x1xf32, #tpu.memory_space<vmem>>, %arg30: memref<16x1xf32, #tpu.memory_space<vmem>>, %arg31: memref<1x1xf32, #tpu.memory_space<vmem>>, %arg32: memref<2x256xf32, #tpu.memory_space<vmem>>) attributes {dimension_semantics = [], scalar_prefetch = 0 : i64, scratch_operands = 0 : i64, tpu.core_type = #tpu.core_type<tc>} {
    %c0 = arith.constant 0 : index
    %c0_0 = arith.constant 0 : index
    %0 = vector.load %arg0[%c0, %c0_0] : memref<2x16xf32, #tpu.memory_space<vmem>>, vector<2x16xf32>
    %c0_1 = arith.constant 0 : index
    %c0_2 = arith.constant 0 : index
    %c0_3 = arith.constant 0 : index
    %1 = vector.load %arg1[%c0_1, %c0_2, %c0_3] : memref<8x16x256xf32, #tpu.memory_space<vmem>>, vector<1x16x256xf32>
    %2 = vector.shape_cast %1 : vector<1x16x256xf32> to vector<16x256xf32>
    %cst = arith.constant dense<0.000000e+00> : vector<2x256xf32>
    %3 = tpu.matmul %0, %2, %cst {dimension_numbers = #tpu.dot_dimension_numbers<[1], [0], [0], [1], [0, 0, 1, 1], [], []>} : vector<2x16xf32>, vector<16x256xf32>, vector<2x256xf32> -> vector<2x256xf32>
    %c0_4 = arith.constant 0 : index
    %c0_5 = arith.constant 0 : index
    %c0_6 = arith.constant 0 : index
    %4 = vector.load %arg2[%c0_4, %c0_5, %c0_6] : memref<8x1x256xf32, #tpu.memory_space<vmem>>, vector<1x1x256xf32>
    %5 = vector.shape_cast %4 : vector<1x1x256xf32> to vector<1x256xf32>
    %6 = vector.broadcast %5 : vector<1x256xf32> to vector<2x256xf32>
    %7 = arith.addf %3, %6 : vector<2x256xf32>
    %c1 = arith.constant 1 : index
    %c0_7 = arith.constant 0 : index
    %c0_8 = arith.constant 0 : index
    %8 = vector.load %arg1[%c1, %c0_7, %c0_8] : memref<8x16x256xf32, #tpu.memory_space<vmem>>, vector<1x16x256xf32>
    %9 = vector.shape_cast %8 : vector<1x16x256xf32> to vector<16x256xf32>
    %cst_9 = arith.constant dense<0.000000e+00> : vector<2x256xf32>
    %10 = tpu.matmul %0, %9, %cst_9 {dimension_numbers = #tpu.dot_dimension_numbers<[1], [0], [0], [1], [0, 0, 1, 1], [], []>} : vector<2x16xf32>, vector<16x256xf32>, vector<2x256xf32> -> vector<2x256xf32>
    %c1_10 = arith.constant 1 : index
    %c0_11 = arith.constant 0 : index
    %c0_12 = arith.constant 0 : index
    %11 = vector.load %arg2[%c1_10, %c0_11, %c0_12] : memref<8x1x256xf32, #tpu.memory_space<vmem>>, vector<1x1x256xf32>
    %12 = vector.shape_cast %11 : vector<1x1x256xf32> to vector<1x256xf32>
    %13 = vector.broadcast %12 : vector<1x256xf32> to vector<2x256xf32>
    %14 = arith.addf %10, %13 : vector<2x256xf32>
    %c2 = arith.constant 2 : index
    %c0_13 = arith.constant 0 : index
    %c0_14 = arith.constant 0 : index
    %15 = vector.load %arg1[%c2, %c0_13, %c0_14] : memref<8x16x256xf32, #tpu.memory_space<vmem>>, vector<1x16x256xf32>
    %16 = vector.shape_cast %15 : vector<1x16x256xf32> to vector<16x256xf32>
    %cst_15 = arith.constant dense<0.000000e+00> : vector<2x256xf32>
    %17 = tpu.matmul %0, %16, %cst_15 {dimension_numbers = #tpu.dot_dimension_numbers<[1], [0], [0], [1], [0, 0, 1, 1], [], []>} : vector<2x16xf32>, vector<16x256xf32>, vector<2x256xf32> -> vector<2x256xf32>
    %c2_16 = arith.constant 2 : index
    %c0_17 = arith.constant 0 : index
    %c0_18 = arith.constant 0 : index
    %18 = vector.load %arg2[%c2_16, %c0_17, %c0_18] : memref<8x1x256xf32, #tpu.memory_space<vmem>>, vector<1x1x256xf32>
    %19 = vector.shape_cast %18 : vector<1x1x256xf32> to vector<1x256xf32>
    %20 = vector.broadcast %19 : vector<1x256xf32> to vector<2x256xf32>
    %21 = arith.addf %17, %20 : vector<2x256xf32>
    %c3 = arith.constant 3 : index
    %c0_19 = arith.constant 0 : index
    %c0_20 = arith.constant 0 : index
    %22 = vector.load %arg1[%c3, %c0_19, %c0_20] : memref<8x16x256xf32, #tpu.memory_space<vmem>>, vector<1x16x256xf32>
    %23 = vector.shape_cast %22 : vector<1x16x256xf32> to vector<16x256xf32>
    %cst_21 = arith.constant dense<0.000000e+00> : vector<2x256xf32>
    %24 = tpu.matmul %0, %23, %cst_21 {dimension_numbers = #tpu.dot_dimension_numbers<[1], [0], [0], [1], [0, 0, 1, 1], [], []>} : vector<2x16xf32>, vector<16x256xf32>, vector<2x256xf32> -> vector<2x256xf32>
    %c3_22 = arith.constant 3 : index
    %c0_23 = arith.constant 0 : index
    %c0_24 = arith.constant 0 : index
    %25 = vector.load %arg2[%c3_22, %c0_23, %c0_24] : memref<8x1x256xf32, #tpu.memory_space<vmem>>, vector<1x1x256xf32>
    %26 = vector.shape_cast %25 : vector<1x1x256xf32> to vector<1x256xf32>
    %27 = vector.broadcast %26 : vector<1x256xf32> to vector<2x256xf32>
    %28 = arith.addf %24, %27 : vector<2x256xf32>
    %c4 = arith.constant 4 : index
    %c0_25 = arith.constant 0 : index
    %c0_26 = arith.constant 0 : index
    %29 = vector.load %arg1[%c4, %c0_25, %c0_26] : memref<8x16x256xf32, #tpu.memory_space<vmem>>, vector<1x16x256xf32>
    %30 = vector.shape_cast %29 : vector<1x16x256xf32> to vector<16x256xf32>
    %cst_27 = arith.constant dense<0.000000e+00> : vector<2x256xf32>
    %31 = tpu.matmul %0, %30, %cst_27 {dimension_numbers = #tpu.dot_dimension_numbers<[1], [0], [0], [1], [0, 0, 1, 1], [], []>} : vector<2x16xf32>, vector<16x256xf32>, vector<2x256xf32> -> vector<2x256xf32>
    %c4_28 = arith.constant 4 : index
    %c0_29 = arith.constant 0 : index
    %c0_30 = arith.constant 0 : index
    %32 = vector.load %arg2[%c4_28, %c0_29, %c0_30] : memref<8x1x256xf32, #tpu.memory_space<vmem>>, vector<1x1x256xf32>
    %33 = vector.shape_cast %32 : vector<1x1x256xf32> to vector<1x256xf32>
    %34 = vector.broadcast %33 : vector<1x256xf32> to vector<2x256xf32>
    %35 = arith.addf %31, %34 : vector<2x256xf32>
    %c5 = arith.constant 5 : index
    %c0_31 = arith.constant 0 : index
    %c0_32 = arith.constant 0 : index
    %36 = vector.load %arg1[%c5, %c0_31, %c0_32] : memref<8x16x256xf32, #tpu.memory_space<vmem>>, vector<1x16x256xf32>
    %37 = vector.shape_cast %36 : vector<1x16x256xf32> to vector<16x256xf32>
    %cst_33 = arith.constant dense<0.000000e+00> : vector<2x256xf32>
    %38 = tpu.matmul %0, %37, %cst_33 {dimension_numbers = #tpu.dot_dimension_numbers<[1], [0], [0], [1], [0, 0, 1, 1], [], []>} : vector<2x16xf32>, vector<16x256xf32>, vector<2x256xf32> -> vector<2x256xf32>
    %c5_34 = arith.constant 5 : index
    %c0_35 = arith.constant 0 : index
    %c0_36 = arith.constant 0 : index
    %39 = vector.load %arg2[%c5_34, %c0_35, %c0_36] : memref<8x1x256xf32, #tpu.memory_space<vmem>>, vector<1x1x256xf32>
    %40 = vector.shape_cast %39 : vector<1x1x256xf32> to vector<1x256xf32>
    %41 = vector.broadcast %40 : vector<1x256xf32> to vector<2x256xf32>
    %42 = arith.addf %38, %41 : vector<2x256xf32>
    %c6 = arith.constant 6 : index
    %c0_37 = arith.constant 0 : index
    %c0_38 = arith.constant 0 : index
    %43 = vector.load %arg1[%c6, %c0_37, %c0_38] : memref<8x16x256xf32, #tpu.memory_space<vmem>>, vector<1x16x256xf32>
    %44 = vector.shape_cast %43 : vector<1x16x256xf32> to vector<16x256xf32>
    %cst_39 = arith.constant dense<0.000000e+00> : vector<2x256xf32>
    %45 = tpu.matmul %0, %44, %cst_39 {dimension_numbers = #tpu.dot_dimension_numbers<[1], [0], [0], [1], [0, 0, 1, 1], [], []>} : vector<2x16xf32>, vector<16x256xf32>, vector<2x256xf32> -> vector<2x256xf32>
    %c6_40 = arith.constant 6 : index
    %c0_41 = arith.constant 0 : index
    %c0_42 = arith.constant 0 : index
    %46 = vector.load %arg2[%c6_40, %c0_41, %c0_42] : memref<8x1x256xf32, #tpu.memory_space<vmem>>, vector<1x1x256xf32>
    %47 = vector.shape_cast %46 : vector<1x1x256xf32> to vector<1x256xf32>
    %48 = vector.broadcast %47 : vector<1x256xf32> to vector<2x256xf32>
    %49 = arith.addf %45, %48 : vector<2x256xf32>
    %c7 = arith.constant 7 : index
    %c0_43 = arith.constant 0 : index
    %c0_44 = arith.constant 0 : index
    %50 = vector.load %arg1[%c7, %c0_43, %c0_44] : memref<8x16x256xf32, #tpu.memory_space<vmem>>, vector<1x16x256xf32>
    %51 = vector.shape_cast %50 : vector<1x16x256xf32> to vector<16x256xf32>
    %cst_45 = arith.constant dense<0.000000e+00> : vector<2x256xf32>
    %52 = tpu.matmul %0, %51, %cst_45 {dimension_numbers = #tpu.dot_dimension_numbers<[1], [0], [0], [1], [0, 0, 1, 1], [], []>} : vector<2x16xf32>, vector<16x256xf32>, vector<2x256xf32> -> vector<2x256xf32>
    %c7_46 = arith.constant 7 : index
    %c0_47 = arith.constant 0 : index
    %c0_48 = arith.constant 0 : index
    %53 = vector.load %arg2[%c7_46, %c0_47, %c0_48] : memref<8x1x256xf32, #tpu.memory_space<vmem>>, vector<1x1x256xf32>
    %54 = vector.shape_cast %53 : vector<1x1x256xf32> to vector<1x256xf32>
    %55 = vector.broadcast %54 : vector<1x256xf32> to vector<2x256xf32>
    %56 = arith.addf %52, %55 : vector<2x256xf32>
    %57 = tpu.concatenate %7, %14, %21, %28, %35, %42, %49, %56 in 0 : vector<2x256xf32>, vector<2x256xf32>, vector<2x256xf32>, vector<2x256xf32>, vector<2x256xf32>, vector<2x256xf32>, vector<2x256xf32>, vector<2x256xf32> -> vector<16x256xf32>
    %c0_49 = arith.constant 0 : index
    %c0_50 = arith.constant 0 : index
    %58 = vector.load %arg3[%c0_49, %c0_50] : memref<256x128xf32, #tpu.memory_space<vmem>>, vector<256x128xf32>
    %c0_51 = arith.constant 0 : index
    %c0_52 = arith.constant 0 : index
    %59 = vector.load %arg4[%c0_51, %c0_52] : memref<256x128xf32, #tpu.memory_space<vmem>>, vector<256x128xf32>
    %c0_53 = arith.constant 0 : index
    %c0_54 = arith.constant 0 : index
    %60 = vector.load %arg5[%c0_53, %c0_54] : memref<256x128xf32, #tpu.memory_space<vmem>>, vector<256x128xf32>
    %c0_55 = arith.constant 0 : index
    %c0_56 = arith.constant 0 : index
    %61 = vector.load %arg6[%c0_55, %c0_56] : memref<1x128xf32, #tpu.memory_space<vmem>>, vector<1x128xf32>
    %c0_57 = arith.constant 0 : index
    %c0_58 = arith.constant 0 : index
    %62 = vector.load %arg7[%c0_57, %c0_58] : memref<1x128xf32, #tpu.memory_space<vmem>>, vector<1x128xf32>
    %cst_59 = arith.constant dense<0.000000e+00> : vector<16x128xf32>
    %63 = tpu.matmul %57, %59, %cst_59 {dimension_numbers = #tpu.dot_dimension_numbers<[1], [0], [0], [1], [0, 0, 1, 1], [], []>} : vector<16x256xf32>, vector<256x128xf32>, vector<16x128xf32> -> vector<16x128xf32>
    %cst_60 = arith.constant dense<0.000000e+00> : vector<16x128xf32>
    %64 = tpu.matmul %57, %60, %cst_60 {dimension_numbers = #tpu.dot_dimension_numbers<[1], [0], [0], [1], [0, 0, 1, 1], [], []>} : vector<16x256xf32>, vector<256x128xf32>, vector<16x128xf32> -> vector<16x128xf32>
    %cst_61 = arith.constant dense<0.000000e+00> : vector<16x128xf32>
    %65 = tpu.matmul %57, %58, %cst_61 {dimension_numbers = #tpu.dot_dimension_numbers<[1], [0], [0], [1], [0, 0, 1, 1], [], []>} : vector<16x256xf32>, vector<256x128xf32>, vector<16x128xf32> -> vector<16x128xf32>
    %cst_62 = arith.constant 0.000000e+00 : f32
    %66 = vector.broadcast %cst_62 : f32 to vector<2x128xf32>
    %67 = vector.extract_strided_slice %65 {offsets = [2, 0], sizes = [14, 128], strides = [1, 1]} : vector<16x128xf32> to vector<14x128xf32>
    %68 = tpu.concatenate %67, %66 in 0 : vector<14x128xf32>, vector<2x128xf32> -> vector<16x128xf32>
    %69 = arith.addf %64, %68 : vector<16x128xf32>
    %70 = tpu.concatenate %63, %69 in 0 : vector<16x128xf32>, vector<16x128xf32> -> vector<32x128xf32>
    %cst_63 = arith.constant dense<0.000000e+00> : vector<128xf32>
    %71 = vector.multi_reduction <add>, %70, %cst_63 [0] : vector<32x128xf32> to vector<128xf32>
    %72 = vector.shape_cast %71 : vector<128xf32> to vector<1x128xf32>
    %cst_64 = arith.constant 3.200000e+01 : f32
    %73 = vector.broadcast %cst_64 : f32 to vector<1x128xf32>
    %74 = arith.divf %72, %73 : vector<1x128xf32>
    %75 = vector.broadcast %74 : vector<1x128xf32> to vector<32x128xf32>
    %76 = arith.subf %70, %75 : vector<32x128xf32>
    %77 = arith.mulf %76, %76 : vector<32x128xf32>
    %cst_65 = arith.constant dense<0.000000e+00> : vector<128xf32>
    %78 = vector.multi_reduction <add>, %77, %cst_65 [0] : vector<32x128xf32> to vector<128xf32>
    %79 = vector.shape_cast %78 : vector<128xf32> to vector<1x128xf32>
    %cst_66 = arith.constant 3.200000e+01 : f32
    %80 = vector.broadcast %cst_66 : f32 to vector<1x128xf32>
    %81 = arith.divf %79, %80 : vector<1x128xf32>
    %cst_67 = arith.constant 9.99999974E-6 : f32
    %82 = vector.broadcast %cst_67 : f32 to vector<1x128xf32>
    %83 = arith.addf %81, %82 : vector<1x128xf32>
    %84 = math.rsqrt %83 : vector<1x128xf32>
    %85 = arith.mulf %61, %84 : vector<1x128xf32>
    %86 = vector.broadcast %85 : vector<1x128xf32> to vector<32x128xf32>
    %87 = arith.mulf %76, %86 : vector<32x128xf32>
    %88 = vector.broadcast %62 : vector<1x128xf32> to vector<32x128xf32>
    %89 = arith.addf %87, %88 : vector<32x128xf32>
    %cst_68 = arith.constant 0.00999999977 : f32
    %90 = vector.broadcast %cst_68 : f32 to vector<32x128xf32>
    %91 = arith.mulf %90, %89 : vector<32x128xf32>
    %92 = arith.maximumf %89, %91 : vector<32x128xf32>
    %c0_69 = arith.constant 0 : index
    %c0_70 = arith.constant 0 : index
    %93 = vector.load %arg8[%c0_69, %c0_70] : memref<128x64xf32, #tpu.memory_space<vmem>>, vector<128x64xf32>
    %c0_71 = arith.constant 0 : index
    %c0_72 = arith.constant 0 : index
    %94 = vector.load %arg9[%c0_71, %c0_72] : memref<128x64xf32, #tpu.memory_space<vmem>>, vector<128x64xf32>
    %c0_73 = arith.constant 0 : index
    %c0_74 = arith.constant 0 : index
    %95 = vector.load %arg10[%c0_73, %c0_74] : memref<128x64xf32, #tpu.memory_space<vmem>>, vector<128x64xf32>
    %c0_75 = arith.constant 0 : index
    %c0_76 = arith.constant 0 : index
    %96 = vector.load %arg11[%c0_75, %c0_76] : memref<1x64xf32, #tpu.memory_space<vmem>>, vector<1x64xf32>
    %c0_77 = arith.constant 0 : index
    %c0_78 = arith.constant 0 : index
    %97 = vector.load %arg12[%c0_77, %c0_78] : memref<1x64xf32, #tpu.memory_space<vmem>>, vector<1x64xf32>
    %cst_79 = arith.constant dense<0.000000e+00> : vector<32x64xf32>
    %98 = tpu.matmul %92, %94, %cst_79 {dimension_numbers = #tpu.dot_dimension_numbers<[1], [0], [0], [1], [0, 0, 1, 1], [], []>} : vector<32x128xf32>, vector<128x64xf32>, vector<32x64xf32> -> vector<32x64xf32>
    %cst_80 = arith.constant dense<0.000000e+00> : vector<32x64xf32>
    %99 = tpu.matmul %92, %95, %cst_80 {dimension_numbers = #tpu.dot_dimension_numbers<[1], [0], [0], [1], [0, 0, 1, 1], [], []>} : vector<32x128xf32>, vector<128x64xf32>, vector<32x64xf32> -> vector<32x64xf32>
    %cst_81 = arith.constant dense<0.000000e+00> : vector<32x64xf32>
    %100 = tpu.matmul %92, %93, %cst_81 {dimension_numbers = #tpu.dot_dimension_numbers<[1], [0], [0], [1], [0, 0, 1, 1], [], []>} : vector<32x128xf32>, vector<128x64xf32>, vector<32x64xf32> -> vector<32x64xf32>
    %101 = vector.extract_strided_slice %100 {offsets = [0, 0], sizes = [16, 64], strides = [1, 1]} : vector<32x64xf32> to vector<16x64xf32>
    %102 = vector.extract_strided_slice %100 {offsets = [16, 0], sizes = [16, 64], strides = [1, 1]} : vector<32x64xf32> to vector<16x64xf32>
    %cst_82 = arith.constant 0.000000e+00 : f32
    %103 = vector.broadcast %cst_82 : f32 to vector<2x64xf32>
    %104 = vector.extract_strided_slice %101 {offsets = [2, 0], sizes = [14, 64], strides = [1, 1]} : vector<16x64xf32> to vector<14x64xf32>
    %105 = tpu.concatenate %104, %103 in 0 : vector<14x64xf32>, vector<2x64xf32> -> vector<16x64xf32>
    %106 = tpu.concatenate %102, %105 in 0 : vector<16x64xf32>, vector<16x64xf32> -> vector<32x64xf32>
    %107 = arith.addf %99, %106 : vector<32x64xf32>
    %108 = tpu.concatenate %98, %107 in 0 : vector<32x64xf32>, vector<32x64xf32> -> vector<64x64xf32>
    %cst_83 = arith.constant dense<0.000000e+00> : vector<64xf32>
    %109 = vector.multi_reduction <add>, %108, %cst_83 [0] : vector<64x64xf32> to vector<64xf32>
    %110 = vector.shape_cast %109 : vector<64xf32> to vector<1x64xf32>
    %cst_84 = arith.constant 6.400000e+01 : f32
    %111 = vector.broadcast %cst_84 : f32 to vector<1x64xf32>
    %112 = arith.divf %110, %111 : vector<1x64xf32>
    %113 = vector.broadcast %112 : vector<1x64xf32> to vector<64x64xf32>
    %114 = arith.subf %108, %113 : vector<64x64xf32>
    %115 = arith.mulf %114, %114 : vector<64x64xf32>
    %cst_85 = arith.constant dense<0.000000e+00> : vector<64xf32>
    %116 = vector.multi_reduction <add>, %115, %cst_85 [0] : vector<64x64xf32> to vector<64xf32>
    %117 = vector.shape_cast %116 : vector<64xf32> to vector<1x64xf32>
    %cst_86 = arith.constant 6.400000e+01 : f32
    %118 = vector.broadcast %cst_86 : f32 to vector<1x64xf32>
    %119 = arith.divf %117, %118 : vector<1x64xf32>
    %cst_87 = arith.constant 9.99999974E-6 : f32
    %120 = vector.broadcast %cst_87 : f32 to vector<1x64xf32>
    %121 = arith.addf %119, %120 : vector<1x64xf32>
    %122 = math.rsqrt %121 : vector<1x64xf32>
    %123 = arith.mulf %96, %122 : vector<1x64xf32>
    %124 = vector.broadcast %123 : vector<1x64xf32> to vector<64x64xf32>
    %125 = arith.mulf %114, %124 : vector<64x64xf32>
    %126 = vector.broadcast %97 : vector<1x64xf32> to vector<64x64xf32>
    %127 = arith.addf %125, %126 : vector<64x64xf32>
    %cst_88 = arith.constant 0.00999999977 : f32
    %128 = vector.broadcast %cst_88 : f32 to vector<64x64xf32>
    %129 = arith.mulf %128, %127 : vector<64x64xf32>
    %130 = arith.maximumf %127, %129 : vector<64x64xf32>
    %c0_89 = arith.constant 0 : index
    %c0_90 = arith.constant 0 : index
    %131 = vector.load %arg13[%c0_89, %c0_90] : memref<64x32xf32, #tpu.memory_space<vmem>>, vector<64x32xf32>
    %c0_91 = arith.constant 0 : index
    %c0_92 = arith.constant 0 : index
    %132 = vector.load %arg14[%c0_91, %c0_92] : memref<64x32xf32, #tpu.memory_space<vmem>>, vector<64x32xf32>
    %c0_93 = arith.constant 0 : index
    %c0_94 = arith.constant 0 : index
    %133 = vector.load %arg15[%c0_93, %c0_94] : memref<64x32xf32, #tpu.memory_space<vmem>>, vector<64x32xf32>
    %c0_95 = arith.constant 0 : index
    %c0_96 = arith.constant 0 : index
    %134 = vector.load %arg16[%c0_95, %c0_96] : memref<1x32xf32, #tpu.memory_space<vmem>>, vector<1x32xf32>
    %c0_97 = arith.constant 0 : index
    %c0_98 = arith.constant 0 : index
    %135 = vector.load %arg17[%c0_97, %c0_98] : memref<1x32xf32, #tpu.memory_space<vmem>>, vector<1x32xf32>
    %cst_99 = arith.constant dense<0.000000e+00> : vector<64x32xf32>
    %136 = tpu.matmul %130, %132, %cst_99 {dimension_numbers = #tpu.dot_dimension_numbers<[1], [0], [0], [1], [0, 0, 1, 1], [], []>} : vector<64x64xf32>, vector<64x32xf32>, vector<64x32xf32> -> vector<64x32xf32>
    %cst_100 = arith.constant dense<0.000000e+00> : vector<64x32xf32>
    %137 = tpu.matmul %130, %133, %cst_100 {dimension_numbers = #tpu.dot_dimension_numbers<[1], [0], [0], [1], [0, 0, 1, 1], [], []>} : vector<64x64xf32>, vector<64x32xf32>, vector<64x32xf32> -> vector<64x32xf32>
    %cst_101 = arith.constant dense<0.000000e+00> : vector<64x32xf32>
    %138 = tpu.matmul %130, %131, %cst_101 {dimension_numbers = #tpu.dot_dimension_numbers<[1], [0], [0], [1], [0, 0, 1, 1], [], []>} : vector<64x64xf32>, vector<64x32xf32>, vector<64x32xf32> -> vector<64x32xf32>
    %139 = vector.extract_strided_slice %138 {offsets = [0, 0], sizes = [16, 32], strides = [1, 1]} : vector<64x32xf32> to vector<16x32xf32>
    %140 = vector.extract_strided_slice %138 {offsets = [16, 0], sizes = [16, 32], strides = [1, 1]} : vector<64x32xf32> to vector<16x32xf32>
    %141 = vector.extract_strided_slice %138 {offsets = [32, 0], sizes = [16, 32], strides = [1, 1]} : vector<64x32xf32> to vector<16x32xf32>
    %142 = vector.extract_strided_slice %138 {offsets = [48, 0], sizes = [16, 32], strides = [1, 1]} : vector<64x32xf32> to vector<16x32xf32>
    %cst_102 = arith.constant 0.000000e+00 : f32
    %143 = vector.broadcast %cst_102 : f32 to vector<2x32xf32>
    %144 = vector.extract_strided_slice %139 {offsets = [2, 0], sizes = [14, 32], strides = [1, 1]} : vector<16x32xf32> to vector<14x32xf32>
    %145 = tpu.concatenate %144, %143 in 0 : vector<14x32xf32>, vector<2x32xf32> -> vector<16x32xf32>
    %146 = tpu.concatenate %141, %142, %140, %145 in 0 : vector<16x32xf32>, vector<16x32xf32>, vector<16x32xf32>, vector<16x32xf32> -> vector<64x32xf32>
    %147 = arith.addf %137, %146 : vector<64x32xf32>
    %148 = tpu.concatenate %136, %147 in 0 : vector<64x32xf32>, vector<64x32xf32> -> vector<128x32xf32>
    %cst_103 = arith.constant dense<0.000000e+00> : vector<32xf32>
    %149 = vector.multi_reduction <add>, %148, %cst_103 [0] : vector<128x32xf32> to vector<32xf32>
    %150 = vector.shape_cast %149 : vector<32xf32> to vector<1x32xf32>
    %cst_104 = arith.constant 1.280000e+02 : f32
    %151 = vector.broadcast %cst_104 : f32 to vector<1x32xf32>
    %152 = arith.divf %150, %151 : vector<1x32xf32>
    %153 = vector.broadcast %152 : vector<1x32xf32> to vector<128x32xf32>
    %154 = arith.subf %148, %153 : vector<128x32xf32>
    %155 = arith.mulf %154, %154 : vector<128x32xf32>
    %cst_105 = arith.constant dense<0.000000e+00> : vector<32xf32>
    %156 = vector.multi_reduction <add>, %155, %cst_105 [0] : vector<128x32xf32> to vector<32xf32>
    %157 = vector.shape_cast %156 : vector<32xf32> to vector<1x32xf32>
    %cst_106 = arith.constant 1.280000e+02 : f32
    %158 = vector.broadcast %cst_106 : f32 to vector<1x32xf32>
    %159 = arith.divf %157, %158 : vector<1x32xf32>
    %cst_107 = arith.constant 9.99999974E-6 : f32
    %160 = vector.broadcast %cst_107 : f32 to vector<1x32xf32>
    %161 = arith.addf %159, %160 : vector<1x32xf32>
    %162 = math.rsqrt %161 : vector<1x32xf32>
    %163 = arith.mulf %134, %162 : vector<1x32xf32>
    %164 = vector.broadcast %163 : vector<1x32xf32> to vector<128x32xf32>
    %165 = arith.mulf %154, %164 : vector<128x32xf32>
    %166 = vector.broadcast %135 : vector<1x32xf32> to vector<128x32xf32>
    %167 = arith.addf %165, %166 : vector<128x32xf32>
    %cst_108 = arith.constant 0.00999999977 : f32
    %168 = vector.broadcast %cst_108 : f32 to vector<128x32xf32>
    %169 = arith.mulf %168, %167 : vector<128x32xf32>
    %170 = arith.maximumf %167, %169 : vector<128x32xf32>
    %c0_109 = arith.constant 0 : index
    %c0_110 = arith.constant 0 : index
    %171 = vector.load %arg18[%c0_109, %c0_110] : memref<32x16xf32, #tpu.memory_space<vmem>>, vector<32x16xf32>
    %c0_111 = arith.constant 0 : index
    %c0_112 = arith.constant 0 : index
    %172 = vector.load %arg19[%c0_111, %c0_112] : memref<32x16xf32, #tpu.memory_space<vmem>>, vector<32x16xf32>
    %c0_113 = arith.constant 0 : index
    %c0_114 = arith.constant 0 : index
    %173 = vector.load %arg20[%c0_113, %c0_114] : memref<32x16xf32, #tpu.memory_space<vmem>>, vector<32x16xf32>
    %c0_115 = arith.constant 0 : index
    %c0_116 = arith.constant 0 : index
    %174 = vector.load %arg21[%c0_115, %c0_116] : memref<1x16xf32, #tpu.memory_space<vmem>>, vector<1x16xf32>
    %c0_117 = arith.constant 0 : index
    %c0_118 = arith.constant 0 : index
    %175 = vector.load %arg22[%c0_117, %c0_118] : memref<1x16xf32, #tpu.memory_space<vmem>>, vector<1x16xf32>
    %cst_119 = arith.constant dense<0.000000e+00> : vector<128x16xf32>
    %176 = tpu.matmul %170, %172, %cst_119 {dimension_numbers = #tpu.dot_dimension_numbers<[1], [0], [0], [1], [0, 0, 1, 1], [], []>} : vector<128x32xf32>, vector<32x16xf32>, vector<128x16xf32> -> vector<128x16xf32>
    %cst_120 = arith.constant dense<0.000000e+00> : vector<128x16xf32>
    %177 = tpu.matmul %170, %173, %cst_120 {dimension_numbers = #tpu.dot_dimension_numbers<[1], [0], [0], [1], [0, 0, 1, 1], [], []>} : vector<128x32xf32>, vector<32x16xf32>, vector<128x16xf32> -> vector<128x16xf32>
    %cst_121 = arith.constant dense<0.000000e+00> : vector<128x16xf32>
    %178 = tpu.matmul %170, %171, %cst_121 {dimension_numbers = #tpu.dot_dimension_numbers<[1], [0], [0], [1], [0, 0, 1, 1], [], []>} : vector<128x32xf32>, vector<32x16xf32>, vector<128x16xf32> -> vector<128x16xf32>
    %179 = vector.extract_strided_slice %178 {offsets = [0, 0], sizes = [16, 16], strides = [1, 1]} : vector<128x16xf32> to vector<16x16xf32>
    %180 = vector.extract_strided_slice %178 {offsets = [16, 0], sizes = [16, 16], strides = [1, 1]} : vector<128x16xf32> to vector<16x16xf32>
    %181 = vector.extract_strided_slice %178 {offsets = [32, 0], sizes = [16, 16], strides = [1, 1]} : vector<128x16xf32> to vector<16x16xf32>
    %182 = vector.extract_strided_slice %178 {offsets = [48, 0], sizes = [16, 16], strides = [1, 1]} : vector<128x16xf32> to vector<16x16xf32>
    %183 = vector.extract_strided_slice %178 {offsets = [64, 0], sizes = [16, 16], strides = [1, 1]} : vector<128x16xf32> to vector<16x16xf32>
    %184 = vector.extract_strided_slice %178 {offsets = [80, 0], sizes = [16, 16], strides = [1, 1]} : vector<128x16xf32> to vector<16x16xf32>
    %185 = vector.extract_strided_slice %178 {offsets = [96, 0], sizes = [16, 16], strides = [1, 1]} : vector<128x16xf32> to vector<16x16xf32>
    %186 = vector.extract_strided_slice %178 {offsets = [112, 0], sizes = [16, 16], strides = [1, 1]} : vector<128x16xf32> to vector<16x16xf32>
    %cst_122 = arith.constant 0.000000e+00 : f32
    %187 = vector.broadcast %cst_122 : f32 to vector<2x16xf32>
    %188 = vector.extract_strided_slice %179 {offsets = [2, 0], sizes = [14, 16], strides = [1, 1]} : vector<16x16xf32> to vector<14x16xf32>
    %189 = tpu.concatenate %188, %187 in 0 : vector<14x16xf32>, vector<2x16xf32> -> vector<16x16xf32>
    %190 = tpu.concatenate %183, %184, %185, %186, %181, %182, %180, %189 in 0 : vector<16x16xf32>, vector<16x16xf32>, vector<16x16xf32>, vector<16x16xf32>, vector<16x16xf32>, vector<16x16xf32>, vector<16x16xf32>, vector<16x16xf32> -> vector<128x16xf32>
    %191 = arith.addf %177, %190 : vector<128x16xf32>
    %192 = tpu.concatenate %176, %191 in 0 : vector<128x16xf32>, vector<128x16xf32> -> vector<256x16xf32>
    %cst_123 = arith.constant dense<0.000000e+00> : vector<16xf32>
    %193 = vector.multi_reduction <add>, %192, %cst_123 [0] : vector<256x16xf32> to vector<16xf32>
    %194 = vector.shape_cast %193 : vector<16xf32> to vector<1x16xf32>
    %cst_124 = arith.constant 2.560000e+02 : f32
    %195 = vector.broadcast %cst_124 : f32 to vector<1x16xf32>
    %196 = arith.divf %194, %195 : vector<1x16xf32>
    %197 = vector.broadcast %196 : vector<1x16xf32> to vector<256x16xf32>
    %198 = arith.subf %192, %197 : vector<256x16xf32>
    %199 = arith.mulf %198, %198 : vector<256x16xf32>
    %cst_125 = arith.constant dense<0.000000e+00> : vector<16xf32>
    %200 = vector.multi_reduction <add>, %199, %cst_125 [0] : vector<256x16xf32> to vector<16xf32>
    %201 = vector.shape_cast %200 : vector<16xf32> to vector<1x16xf32>
    %cst_126 = arith.constant 2.560000e+02 : f32
    %202 = vector.broadcast %cst_126 : f32 to vector<1x16xf32>
    %203 = arith.divf %201, %202 : vector<1x16xf32>
    %cst_127 = arith.constant 9.99999974E-6 : f32
    %204 = vector.broadcast %cst_127 : f32 to vector<1x16xf32>
    %205 = arith.addf %203, %204 : vector<1x16xf32>
    %206 = math.rsqrt %205 : vector<1x16xf32>
    %207 = arith.mulf %174, %206 : vector<1x16xf32>
    %208 = vector.broadcast %207 : vector<1x16xf32> to vector<256x16xf32>
    %209 = arith.mulf %198, %208 : vector<256x16xf32>
    %210 = vector.broadcast %175 : vector<1x16xf32> to vector<256x16xf32>
    %211 = arith.addf %209, %210 : vector<256x16xf32>
    %cst_128 = arith.constant 0.00999999977 : f32
    %212 = vector.broadcast %cst_128 : f32 to vector<256x16xf32>
    %213 = arith.mulf %212, %211 : vector<256x16xf32>
    %214 = arith.maximumf %211, %213 : vector<256x16xf32>
    %c0_129 = arith.constant 0 : index
    %c0_130 = arith.constant 0 : index
    %215 = vector.load %arg23[%c0_129, %c0_130] : memref<16x16xf32, #tpu.memory_space<vmem>>, vector<16x16xf32>
    %c0_131 = arith.constant 0 : index
    %c0_132 = arith.constant 0 : index
    %216 = vector.load %arg24[%c0_131, %c0_132] : memref<16x16xf32, #tpu.memory_space<vmem>>, vector<16x16xf32>
    %c0_133 = arith.constant 0 : index
    %c0_134 = arith.constant 0 : index
    %217 = vector.load %arg25[%c0_133, %c0_134] : memref<16x16xf32, #tpu.memory_space<vmem>>, vector<16x16xf32>
    %c0_135 = arith.constant 0 : index
    %c0_136 = arith.constant 0 : index
    %218 = vector.load %arg26[%c0_135, %c0_136] : memref<1x16xf32, #tpu.memory_space<vmem>>, vector<1x16xf32>
    %c0_137 = arith.constant 0 : index
    %c0_138 = arith.constant 0 : index
    %219 = vector.load %arg27[%c0_137, %c0_138] : memref<1x16xf32, #tpu.memory_space<vmem>>, vector<1x16xf32>
    %cst_139 = arith.constant dense<0.000000e+00> : vector<256x16xf32>
    %220 = tpu.matmul %214, %216, %cst_139 {dimension_numbers = #tpu.dot_dimension_numbers<[1], [0], [0], [1], [0, 0, 1, 1], [], []>} : vector<256x16xf32>, vector<16x16xf32>, vector<256x16xf32> -> vector<256x16xf32>
    %cst_140 = arith.constant dense<0.000000e+00> : vector<256x16xf32>
    %221 = tpu.matmul %214, %217, %cst_140 {dimension_numbers = #tpu.dot_dimension_numbers<[1], [0], [0], [1], [0, 0, 1, 1], [], []>} : vector<256x16xf32>, vector<16x16xf32>, vector<256x16xf32> -> vector<256x16xf32>
    %cst_141 = arith.constant dense<0.000000e+00> : vector<256x16xf32>
    %222 = tpu.matmul %214, %215, %cst_141 {dimension_numbers = #tpu.dot_dimension_numbers<[1], [0], [0], [1], [0, 0, 1, 1], [], []>} : vector<256x16xf32>, vector<16x16xf32>, vector<256x16xf32> -> vector<256x16xf32>
    %223 = vector.extract_strided_slice %222 {offsets = [0, 0], sizes = [16, 16], strides = [1, 1]} : vector<256x16xf32> to vector<16x16xf32>
    %224 = vector.extract_strided_slice %222 {offsets = [16, 0], sizes = [16, 16], strides = [1, 1]} : vector<256x16xf32> to vector<16x16xf32>
    %225 = vector.extract_strided_slice %222 {offsets = [32, 0], sizes = [16, 16], strides = [1, 1]} : vector<256x16xf32> to vector<16x16xf32>
    %226 = vector.extract_strided_slice %222 {offsets = [48, 0], sizes = [16, 16], strides = [1, 1]} : vector<256x16xf32> to vector<16x16xf32>
    %227 = vector.extract_strided_slice %222 {offsets = [64, 0], sizes = [16, 16], strides = [1, 1]} : vector<256x16xf32> to vector<16x16xf32>
    %228 = vector.extract_strided_slice %222 {offsets = [80, 0], sizes = [16, 16], strides = [1, 1]} : vector<256x16xf32> to vector<16x16xf32>
    %229 = vector.extract_strided_slice %222 {offsets = [96, 0], sizes = [16, 16], strides = [1, 1]} : vector<256x16xf32> to vector<16x16xf32>
    %230 = vector.extract_strided_slice %222 {offsets = [112, 0], sizes = [16, 16], strides = [1, 1]} : vector<256x16xf32> to vector<16x16xf32>
    %231 = vector.extract_strided_slice %222 {offsets = [128, 0], sizes = [16, 16], strides = [1, 1]} : vector<256x16xf32> to vector<16x16xf32>
    %232 = vector.extract_strided_slice %222 {offsets = [144, 0], sizes = [16, 16], strides = [1, 1]} : vector<256x16xf32> to vector<16x16xf32>
    %233 = vector.extract_strided_slice %222 {offsets = [160, 0], sizes = [16, 16], strides = [1, 1]} : vector<256x16xf32> to vector<16x16xf32>
    %234 = vector.extract_strided_slice %222 {offsets = [176, 0], sizes = [16, 16], strides = [1, 1]} : vector<256x16xf32> to vector<16x16xf32>
    %235 = vector.extract_strided_slice %222 {offsets = [192, 0], sizes = [16, 16], strides = [1, 1]} : vector<256x16xf32> to vector<16x16xf32>
    %236 = vector.extract_strided_slice %222 {offsets = [208, 0], sizes = [16, 16], strides = [1, 1]} : vector<256x16xf32> to vector<16x16xf32>
    %237 = vector.extract_strided_slice %222 {offsets = [224, 0], sizes = [16, 16], strides = [1, 1]} : vector<256x16xf32> to vector<16x16xf32>
    %238 = vector.extract_strided_slice %222 {offsets = [240, 0], sizes = [16, 16], strides = [1, 1]} : vector<256x16xf32> to vector<16x16xf32>
    %cst_142 = arith.constant 0.000000e+00 : f32
    %239 = vector.broadcast %cst_142 : f32 to vector<2x16xf32>
    %240 = vector.extract_strided_slice %223 {offsets = [2, 0], sizes = [14, 16], strides = [1, 1]} : vector<16x16xf32> to vector<14x16xf32>
    %241 = tpu.concatenate %240, %239 in 0 : vector<14x16xf32>, vector<2x16xf32> -> vector<16x16xf32>
    %242 = tpu.concatenate %231, %232, %233, %234, %235, %236, %237, %238, %227, %228, %229, %230, %225, %226, %224, %241 in 0 : vector<16x16xf32>, vector<16x16xf32>, vector<16x16xf32>, vector<16x16xf32>, vector<16x16xf32>, vector<16x16xf32>, vector<16x16xf32>, vector<16x16xf32>, vector<16x16xf32>, vector<16x16xf32>, vector<16x16xf32>, vector<16x16xf32>, vector<16x16xf32>, vector<16x16xf32>, vector<16x16xf32>, vector<16x16xf32> -> vector<256x16xf32>
    %243 = arith.addf %221, %242 : vector<256x16xf32>
    %244 = tpu.concatenate %220, %243 in 0 : vector<256x16xf32>, vector<256x16xf32> -> vector<512x16xf32>
    %cst_143 = arith.constant dense<0.000000e+00> : vector<16xf32>
    %245 = vector.multi_reduction <add>, %244, %cst_143 [0] : vector<512x16xf32> to vector<16xf32>
    %246 = vector.shape_cast %245 : vector<16xf32> to vector<1x16xf32>
    %cst_144 = arith.constant 5.120000e+02 : f32
    %247 = vector.broadcast %cst_144 : f32 to vector<1x16xf32>
    %248 = arith.divf %246, %247 : vector<1x16xf32>
    %249 = vector.broadcast %248 : vector<1x16xf32> to vector<512x16xf32>
    %250 = arith.subf %244, %249 : vector<512x16xf32>
    %251 = arith.mulf %250, %250 : vector<512x16xf32>
    %cst_145 = arith.constant dense<0.000000e+00> : vector<16xf32>
    %252 = vector.multi_reduction <add>, %251, %cst_145 [0] : vector<512x16xf32> to vector<16xf32>
    %253 = vector.shape_cast %252 : vector<16xf32> to vector<1x16xf32>
    %cst_146 = arith.constant 5.120000e+02 : f32
    %254 = vector.broadcast %cst_146 : f32 to vector<1x16xf32>
    %255 = arith.divf %253, %254 : vector<1x16xf32>
    %cst_147 = arith.constant 9.99999974E-6 : f32
    %256 = vector.broadcast %cst_147 : f32 to vector<1x16xf32>
    %257 = arith.addf %255, %256 : vector<1x16xf32>
    %258 = math.rsqrt %257 : vector<1x16xf32>
    %259 = arith.mulf %218, %258 : vector<1x16xf32>
    %260 = vector.broadcast %259 : vector<1x16xf32> to vector<512x16xf32>
    %261 = arith.mulf %250, %260 : vector<512x16xf32>
    %262 = vector.broadcast %219 : vector<1x16xf32> to vector<512x16xf32>
    %263 = arith.addf %261, %262 : vector<512x16xf32>
    %cst_148 = arith.constant 0.00999999977 : f32
    %264 = vector.broadcast %cst_148 : f32 to vector<512x16xf32>
    %265 = arith.mulf %264, %263 : vector<512x16xf32>
    %266 = arith.maximumf %263, %265 : vector<512x16xf32>
    %c0_149 = arith.constant 0 : index
    %c0_150 = arith.constant 0 : index
    %267 = vector.load %arg28[%c0_149, %c0_150] : memref<16x1xf32, #tpu.memory_space<vmem>>, vector<16x1xf32>
    %cst_151 = arith.constant dense<0.000000e+00> : vector<512x1xf32>
    %268 = tpu.matmul %266, %267, %cst_151 {dimension_numbers = #tpu.dot_dimension_numbers<[1], [0], [0], [1], [0, 0, 1, 1], [], []>} : vector<512x16xf32>, vector<16x1xf32>, vector<512x1xf32> -> vector<512x1xf32>
    %c0_152 = arith.constant 0 : index
    %c0_153 = arith.constant 0 : index
    %269 = vector.load %arg29[%c0_152, %c0_153] : memref<16x1xf32, #tpu.memory_space<vmem>>, vector<16x1xf32>
    %cst_154 = arith.constant dense<0.000000e+00> : vector<512x1xf32>
    %270 = tpu.matmul %266, %269, %cst_154 {dimension_numbers = #tpu.dot_dimension_numbers<[1], [0], [0], [1], [0, 0, 1, 1], [], []>} : vector<512x16xf32>, vector<16x1xf32>, vector<512x1xf32> -> vector<512x1xf32>
    %c0_155 = arith.constant 0 : index
    %c0_156 = arith.constant 0 : index
    %271 = vector.load %arg30[%c0_155, %c0_156] : memref<16x1xf32, #tpu.memory_space<vmem>>, vector<16x1xf32>
    %cst_157 = arith.constant dense<0.000000e+00> : vector<512x1xf32>
    %272 = tpu.matmul %266, %271, %cst_157 {dimension_numbers = #tpu.dot_dimension_numbers<[1], [0], [0], [1], [0, 0, 1, 1], [], []>} : vector<512x16xf32>, vector<16x1xf32>, vector<512x1xf32> -> vector<512x1xf32>
    %273 = vector.extract_strided_slice %268 {offsets = [0, 0], sizes = [16, 1], strides = [1, 1]} : vector<512x1xf32> to vector<16x1xf32>
    %274 = vector.extract_strided_slice %268 {offsets = [16, 0], sizes = [16, 1], strides = [1, 1]} : vector<512x1xf32> to vector<16x1xf32>
    %275 = vector.extract_strided_slice %268 {offsets = [32, 0], sizes = [16, 1], strides = [1, 1]} : vector<512x1xf32> to vector<16x1xf32>
    %276 = vector.extract_strided_slice %268 {offsets = [48, 0], sizes = [16, 1], strides = [1, 1]} : vector<512x1xf32> to vector<16x1xf32>
    %277 = vector.extract_strided_slice %268 {offsets = [64, 0], sizes = [16, 1], strides = [1, 1]} : vector<512x1xf32> to vector<16x1xf32>
    %278 = vector.extract_strided_slice %268 {offsets = [80, 0], sizes = [16, 1], strides = [1, 1]} : vector<512x1xf32> to vector<16x1xf32>
    %279 = vector.extract_strided_slice %268 {offsets = [96, 0], sizes = [16, 1], strides = [1, 1]} : vector<512x1xf32> to vector<16x1xf32>
    %280 = vector.extract_strided_slice %268 {offsets = [112, 0], sizes = [16, 1], strides = [1, 1]} : vector<512x1xf32> to vector<16x1xf32>
    %281 = vector.extract_strided_slice %268 {offsets = [128, 0], sizes = [16, 1], strides = [1, 1]} : vector<512x1xf32> to vector<16x1xf32>
    %282 = vector.extract_strided_slice %268 {offsets = [144, 0], sizes = [16, 1], strides = [1, 1]} : vector<512x1xf32> to vector<16x1xf32>
    %283 = vector.extract_strided_slice %268 {offsets = [160, 0], sizes = [16, 1], strides = [1, 1]} : vector<512x1xf32> to vector<16x1xf32>
    %284 = vector.extract_strided_slice %268 {offsets = [176, 0], sizes = [16, 1], strides = [1, 1]} : vector<512x1xf32> to vector<16x1xf32>
    %285 = vector.extract_strided_slice %268 {offsets = [192, 0], sizes = [16, 1], strides = [1, 1]} : vector<512x1xf32> to vector<16x1xf32>
    %286 = vector.extract_strided_slice %268 {offsets = [208, 0], sizes = [16, 1], strides = [1, 1]} : vector<512x1xf32> to vector<16x1xf32>
    %287 = vector.extract_strided_slice %268 {offsets = [224, 0], sizes = [16, 1], strides = [1, 1]} : vector<512x1xf32> to vector<16x1xf32>
    %288 = vector.extract_strided_slice %268 {offsets = [240, 0], sizes = [16, 1], strides = [1, 1]} : vector<512x1xf32> to vector<16x1xf32>
    %289 = vector.extract_strided_slice %268 {offsets = [256, 0], sizes = [16, 1], strides = [1, 1]} : vector<512x1xf32> to vector<16x1xf32>
    %290 = vector.extract_strided_slice %268 {offsets = [272, 0], sizes = [16, 1], strides = [1, 1]} : vector<512x1xf32> to vector<16x1xf32>
    %291 = vector.extract_strided_slice %268 {offsets = [288, 0], sizes = [16, 1], strides = [1, 1]} : vector<512x1xf32> to vector<16x1xf32>
    %292 = vector.extract_strided_slice %268 {offsets = [304, 0], sizes = [16, 1], strides = [1, 1]} : vector<512x1xf32> to vector<16x1xf32>
    %293 = vector.extract_strided_slice %268 {offsets = [320, 0], sizes = [16, 1], strides = [1, 1]} : vector<512x1xf32> to vector<16x1xf32>
    %294 = vector.extract_strided_slice %268 {offsets = [336, 0], sizes = [16, 1], strides = [1, 1]} : vector<512x1xf32> to vector<16x1xf32>
    %295 = vector.extract_strided_slice %268 {offsets = [352, 0], sizes = [16, 1], strides = [1, 1]} : vector<512x1xf32> to vector<16x1xf32>
    %296 = vector.extract_strided_slice %268 {offsets = [368, 0], sizes = [16, 1], strides = [1, 1]} : vector<512x1xf32> to vector<16x1xf32>
    %297 = vector.extract_strided_slice %268 {offsets = [384, 0], sizes = [16, 1], strides = [1, 1]} : vector<512x1xf32> to vector<16x1xf32>
    %298 = vector.extract_strided_slice %268 {offsets = [400, 0], sizes = [16, 1], strides = [1, 1]} : vector<512x1xf32> to vector<16x1xf32>
    %299 = vector.extract_strided_slice %268 {offsets = [416, 0], sizes = [16, 1], strides = [1, 1]} : vector<512x1xf32> to vector<16x1xf32>
    %300 = vector.extract_strided_slice %268 {offsets = [432, 0], sizes = [16, 1], strides = [1, 1]} : vector<512x1xf32> to vector<16x1xf32>
    %301 = vector.extract_strided_slice %268 {offsets = [448, 0], sizes = [16, 1], strides = [1, 1]} : vector<512x1xf32> to vector<16x1xf32>
    %302 = vector.extract_strided_slice %268 {offsets = [464, 0], sizes = [16, 1], strides = [1, 1]} : vector<512x1xf32> to vector<16x1xf32>
    %303 = vector.extract_strided_slice %268 {offsets = [480, 0], sizes = [16, 1], strides = [1, 1]} : vector<512x1xf32> to vector<16x1xf32>
    %304 = vector.extract_strided_slice %268 {offsets = [496, 0], sizes = [16, 1], strides = [1, 1]} : vector<512x1xf32> to vector<16x1xf32>
    %cst_158 = arith.constant 0.000000e+00 : f32
    %305 = vector.broadcast %cst_158 : f32 to vector<2x1xf32>
    %306 = vector.extract_strided_slice %304 {offsets = [0, 0], sizes = [14, 1], strides = [1, 1]} : vector<16x1xf32> to vector<14x1xf32>
    %307 = tpu.concatenate %305, %306 in 0 : vector<2x1xf32>, vector<14x1xf32> -> vector<16x1xf32>
    %308 = tpu.concatenate %307, %303, %301, %302, %297, %298, %299, %300, %289, %290, %291, %292, %293, %294, %295, %296 in 0 : vector<16x1xf32>, vector<16x1xf32>, vector<16x1xf32>, vector<16x1xf32>, vector<16x1xf32>, vector<16x1xf32>, vector<16x1xf32>, vector<16x1xf32>, vector<16x1xf32>, vector<16x1xf32>, vector<16x1xf32>, vector<16x1xf32>, vector<16x1xf32>, vector<16x1xf32>, vector<16x1xf32>, vector<16x1xf32> -> vector<256x1xf32>
    %309 = tpu.concatenate %273, %274, %275, %276, %277, %278, %279, %280, %281, %282, %283, %284, %285, %286, %287, %288 in 0 : vector<16x1xf32>, vector<16x1xf32>, vector<16x1xf32>, vector<16x1xf32>, vector<16x1xf32>, vector<16x1xf32>, vector<16x1xf32>, vector<16x1xf32>, vector<16x1xf32>, vector<16x1xf32>, vector<16x1xf32>, vector<16x1xf32>, vector<16x1xf32>, vector<16x1xf32>, vector<16x1xf32>, vector<16x1xf32> -> vector<256x1xf32>
    %310 = tpu.concatenate %308, %309 in 0 : vector<256x1xf32>, vector<256x1xf32> -> vector<512x1xf32>
    %311 = arith.addf %310, %270 : vector<512x1xf32>
    %312 = vector.extract_strided_slice %272 {offsets = [0, 0], sizes = [16, 1], strides = [1, 1]} : vector<512x1xf32> to vector<16x1xf32>
    %313 = vector.extract_strided_slice %272 {offsets = [16, 0], sizes = [16, 1], strides = [1, 1]} : vector<512x1xf32> to vector<16x1xf32>
    %314 = vector.extract_strided_slice %272 {offsets = [32, 0], sizes = [16, 1], strides = [1, 1]} : vector<512x1xf32> to vector<16x1xf32>
    %315 = vector.extract_strided_slice %272 {offsets = [48, 0], sizes = [16, 1], strides = [1, 1]} : vector<512x1xf32> to vector<16x1xf32>
    %316 = vector.extract_strided_slice %272 {offsets = [64, 0], sizes = [16, 1], strides = [1, 1]} : vector<512x1xf32> to vector<16x1xf32>
    %317 = vector.extract_strided_slice %272 {offsets = [80, 0], sizes = [16, 1], strides = [1, 1]} : vector<512x1xf32> to vector<16x1xf32>
    %318 = vector.extract_strided_slice %272 {offsets = [96, 0], sizes = [16, 1], strides = [1, 1]} : vector<512x1xf32> to vector<16x1xf32>
    %319 = vector.extract_strided_slice %272 {offsets = [112, 0], sizes = [16, 1], strides = [1, 1]} : vector<512x1xf32> to vector<16x1xf32>
    %320 = vector.extract_strided_slice %272 {offsets = [128, 0], sizes = [16, 1], strides = [1, 1]} : vector<512x1xf32> to vector<16x1xf32>
    %321 = vector.extract_strided_slice %272 {offsets = [144, 0], sizes = [16, 1], strides = [1, 1]} : vector<512x1xf32> to vector<16x1xf32>
    %322 = vector.extract_strided_slice %272 {offsets = [160, 0], sizes = [16, 1], strides = [1, 1]} : vector<512x1xf32> to vector<16x1xf32>
    %323 = vector.extract_strided_slice %272 {offsets = [176, 0], sizes = [16, 1], strides = [1, 1]} : vector<512x1xf32> to vector<16x1xf32>
    %324 = vector.extract_strided_slice %272 {offsets = [192, 0], sizes = [16, 1], strides = [1, 1]} : vector<512x1xf32> to vector<16x1xf32>
    %325 = vector.extract_strided_slice %272 {offsets = [208, 0], sizes = [16, 1], strides = [1, 1]} : vector<512x1xf32> to vector<16x1xf32>
    %326 = vector.extract_strided_slice %272 {offsets = [224, 0], sizes = [16, 1], strides = [1, 1]} : vector<512x1xf32> to vector<16x1xf32>
    %327 = vector.extract_strided_slice %272 {offsets = [240, 0], sizes = [16, 1], strides = [1, 1]} : vector<512x1xf32> to vector<16x1xf32>
    %328 = vector.extract_strided_slice %272 {offsets = [256, 0], sizes = [16, 1], strides = [1, 1]} : vector<512x1xf32> to vector<16x1xf32>
    %329 = vector.extract_strided_slice %272 {offsets = [272, 0], sizes = [16, 1], strides = [1, 1]} : vector<512x1xf32> to vector<16x1xf32>
    %330 = vector.extract_strided_slice %272 {offsets = [288, 0], sizes = [16, 1], strides = [1, 1]} : vector<512x1xf32> to vector<16x1xf32>
    %331 = vector.extract_strided_slice %272 {offsets = [304, 0], sizes = [16, 1], strides = [1, 1]} : vector<512x1xf32> to vector<16x1xf32>
    %332 = vector.extract_strided_slice %272 {offsets = [320, 0], sizes = [16, 1], strides = [1, 1]} : vector<512x1xf32> to vector<16x1xf32>
    %333 = vector.extract_strided_slice %272 {offsets = [336, 0], sizes = [16, 1], strides = [1, 1]} : vector<512x1xf32> to vector<16x1xf32>
    %334 = vector.extract_strided_slice %272 {offsets = [352, 0], sizes = [16, 1], strides = [1, 1]} : vector<512x1xf32> to vector<16x1xf32>
    %335 = vector.extract_strided_slice %272 {offsets = [368, 0], sizes = [16, 1], strides = [1, 1]} : vector<512x1xf32> to vector<16x1xf32>
    %336 = vector.extract_strided_slice %272 {offsets = [384, 0], sizes = [16, 1], strides = [1, 1]} : vector<512x1xf32> to vector<16x1xf32>
    %337 = vector.extract_strided_slice %272 {offsets = [400, 0], sizes = [16, 1], strides = [1, 1]} : vector<512x1xf32> to vector<16x1xf32>
    %338 = vector.extract_strided_slice %272 {offsets = [416, 0], sizes = [16, 1], strides = [1, 1]} : vector<512x1xf32> to vector<16x1xf32>
    %339 = vector.extract_strided_slice %272 {offsets = [432, 0], sizes = [16, 1], strides = [1, 1]} : vector<512x1xf32> to vector<16x1xf32>
    %340 = vector.extract_strided_slice %272 {offsets = [448, 0], sizes = [16, 1], strides = [1, 1]} : vector<512x1xf32> to vector<16x1xf32>
    %341 = vector.extract_strided_slice %272 {offsets = [464, 0], sizes = [16, 1], strides = [1, 1]} : vector<512x1xf32> to vector<16x1xf32>
    %342 = vector.extract_strided_slice %272 {offsets = [480, 0], sizes = [16, 1], strides = [1, 1]} : vector<512x1xf32> to vector<16x1xf32>
    %343 = vector.extract_strided_slice %272 {offsets = [496, 0], sizes = [16, 1], strides = [1, 1]} : vector<512x1xf32> to vector<16x1xf32>
    %cst_159 = arith.constant 0.000000e+00 : f32
    %344 = vector.broadcast %cst_159 : f32 to vector<2x1xf32>
    %345 = vector.extract_strided_slice %312 {offsets = [2, 0], sizes = [14, 1], strides = [1, 1]} : vector<16x1xf32> to vector<14x1xf32>
    %346 = tpu.concatenate %345, %344 in 0 : vector<14x1xf32>, vector<2x1xf32> -> vector<16x1xf32>
    %347 = tpu.concatenate %328, %329, %330, %331, %332, %333, %334, %335, %336, %337, %338, %339, %340, %341, %342, %343 in 0 : vector<16x1xf32>, vector<16x1xf32>, vector<16x1xf32>, vector<16x1xf32>, vector<16x1xf32>, vector<16x1xf32>, vector<16x1xf32>, vector<16x1xf32>, vector<16x1xf32>, vector<16x1xf32>, vector<16x1xf32>, vector<16x1xf32>, vector<16x1xf32>, vector<16x1xf32>, vector<16x1xf32>, vector<16x1xf32> -> vector<256x1xf32>
    %348 = tpu.concatenate %320, %321, %322, %323, %324, %325, %326, %327, %316, %317, %318, %319, %314, %315, %313, %346 in 0 : vector<16x1xf32>, vector<16x1xf32>, vector<16x1xf32>, vector<16x1xf32>, vector<16x1xf32>, vector<16x1xf32>, vector<16x1xf32>, vector<16x1xf32>, vector<16x1xf32>, vector<16x1xf32>, vector<16x1xf32>, vector<16x1xf32>, vector<16x1xf32>, vector<16x1xf32>, vector<16x1xf32>, vector<16x1xf32> -> vector<256x1xf32>
    %349 = tpu.concatenate %347, %348 in 0 : vector<256x1xf32>, vector<256x1xf32> -> vector<512x1xf32>
    %350 = arith.addf %311, %349 : vector<512x1xf32>
    %c0_160 = arith.constant 0 : index
    %c0_161 = arith.constant 0 : index
    %351 = vector.load %arg31[%c0_160, %c0_161] : memref<1x1xf32, #tpu.memory_space<vmem>>, vector<1x1xf32>
    %352 = vector.broadcast %351 : vector<1x1xf32> to vector<512x1xf32>
    %353 = arith.addf %350, %352 : vector<512x1xf32>
    %354 = arith.negf %353 : vector<512x1xf32>
    %355 = math.exp %354 : vector<512x1xf32>
    %cst_162 = arith.constant 1.000000e+00 : f32
    %356 = vector.broadcast %cst_162 : f32 to vector<512x1xf32>
    %357 = arith.addf %356, %355 : vector<512x1xf32>
    %358 = arith.divf %356, %357 : vector<512x1xf32>
    %359 = vector.extract_strided_slice %358 {offsets = [0, 0], sizes = [16, 1], strides = [1, 1]} : vector<512x1xf32> to vector<16x1xf32>
    %360 = vector.extract_strided_slice %358 {offsets = [16, 0], sizes = [16, 1], strides = [1, 1]} : vector<512x1xf32> to vector<16x1xf32>
    %361 = vector.extract_strided_slice %358 {offsets = [32, 0], sizes = [16, 1], strides = [1, 1]} : vector<512x1xf32> to vector<16x1xf32>
    %362 = vector.extract_strided_slice %358 {offsets = [48, 0], sizes = [16, 1], strides = [1, 1]} : vector<512x1xf32> to vector<16x1xf32>
    %363 = vector.extract_strided_slice %358 {offsets = [64, 0], sizes = [16, 1], strides = [1, 1]} : vector<512x1xf32> to vector<16x1xf32>
    %364 = vector.extract_strided_slice %358 {offsets = [80, 0], sizes = [16, 1], strides = [1, 1]} : vector<512x1xf32> to vector<16x1xf32>
    %365 = vector.extract_strided_slice %358 {offsets = [96, 0], sizes = [16, 1], strides = [1, 1]} : vector<512x1xf32> to vector<16x1xf32>
    %366 = vector.extract_strided_slice %358 {offsets = [112, 0], sizes = [16, 1], strides = [1, 1]} : vector<512x1xf32> to vector<16x1xf32>
    %367 = vector.extract_strided_slice %358 {offsets = [128, 0], sizes = [16, 1], strides = [1, 1]} : vector<512x1xf32> to vector<16x1xf32>
    %368 = vector.extract_strided_slice %358 {offsets = [144, 0], sizes = [16, 1], strides = [1, 1]} : vector<512x1xf32> to vector<16x1xf32>
    %369 = vector.extract_strided_slice %358 {offsets = [160, 0], sizes = [16, 1], strides = [1, 1]} : vector<512x1xf32> to vector<16x1xf32>
    %370 = vector.extract_strided_slice %358 {offsets = [176, 0], sizes = [16, 1], strides = [1, 1]} : vector<512x1xf32> to vector<16x1xf32>
    %371 = vector.extract_strided_slice %358 {offsets = [192, 0], sizes = [16, 1], strides = [1, 1]} : vector<512x1xf32> to vector<16x1xf32>
    %372 = vector.extract_strided_slice %358 {offsets = [208, 0], sizes = [16, 1], strides = [1, 1]} : vector<512x1xf32> to vector<16x1xf32>
    %373 = vector.extract_strided_slice %358 {offsets = [224, 0], sizes = [16, 1], strides = [1, 1]} : vector<512x1xf32> to vector<16x1xf32>
    %374 = vector.extract_strided_slice %358 {offsets = [240, 0], sizes = [16, 1], strides = [1, 1]} : vector<512x1xf32> to vector<16x1xf32>
    %375 = vector.extract_strided_slice %358 {offsets = [256, 0], sizes = [16, 1], strides = [1, 1]} : vector<512x1xf32> to vector<16x1xf32>
    %376 = vector.extract_strided_slice %358 {offsets = [272, 0], sizes = [16, 1], strides = [1, 1]} : vector<512x1xf32> to vector<16x1xf32>
    %377 = vector.extract_strided_slice %358 {offsets = [288, 0], sizes = [16, 1], strides = [1, 1]} : vector<512x1xf32> to vector<16x1xf32>
    %378 = vector.extract_strided_slice %358 {offsets = [304, 0], sizes = [16, 1], strides = [1, 1]} : vector<512x1xf32> to vector<16x1xf32>
    %379 = vector.extract_strided_slice %358 {offsets = [320, 0], sizes = [16, 1], strides = [1, 1]} : vector<512x1xf32> to vector<16x1xf32>
    %380 = vector.extract_strided_slice %358 {offsets = [336, 0], sizes = [16, 1], strides = [1, 1]} : vector<512x1xf32> to vector<16x1xf32>
    %381 = vector.extract_strided_slice %358 {offsets = [352, 0], sizes = [16, 1], strides = [1, 1]} : vector<512x1xf32> to vector<16x1xf32>
    %382 = vector.extract_strided_slice %358 {offsets = [368, 0], sizes = [16, 1], strides = [1, 1]} : vector<512x1xf32> to vector<16x1xf32>
    %383 = vector.extract_strided_slice %358 {offsets = [384, 0], sizes = [16, 1], strides = [1, 1]} : vector<512x1xf32> to vector<16x1xf32>
    %384 = vector.extract_strided_slice %358 {offsets = [400, 0], sizes = [16, 1], strides = [1, 1]} : vector<512x1xf32> to vector<16x1xf32>
    %385 = vector.extract_strided_slice %358 {offsets = [416, 0], sizes = [16, 1], strides = [1, 1]} : vector<512x1xf32> to vector<16x1xf32>
    %386 = vector.extract_strided_slice %358 {offsets = [432, 0], sizes = [16, 1], strides = [1, 1]} : vector<512x1xf32> to vector<16x1xf32>
    %387 = vector.extract_strided_slice %358 {offsets = [448, 0], sizes = [16, 1], strides = [1, 1]} : vector<512x1xf32> to vector<16x1xf32>
    %388 = vector.extract_strided_slice %358 {offsets = [464, 0], sizes = [16, 1], strides = [1, 1]} : vector<512x1xf32> to vector<16x1xf32>
    %389 = vector.extract_strided_slice %358 {offsets = [480, 0], sizes = [16, 1], strides = [1, 1]} : vector<512x1xf32> to vector<16x1xf32>
    %390 = vector.extract_strided_slice %358 {offsets = [496, 0], sizes = [16, 1], strides = [1, 1]} : vector<512x1xf32> to vector<16x1xf32>
    %391 = tpu.concatenate %359, %375, %367, %383, %363, %379, %371, %387, %361, %377, %369, %385, %365, %381, %373, %389 in 1 : vector<16x1xf32>, vector<16x1xf32>, vector<16x1xf32>, vector<16x1xf32>, vector<16x1xf32>, vector<16x1xf32>, vector<16x1xf32>, vector<16x1xf32>, vector<16x1xf32>, vector<16x1xf32>, vector<16x1xf32>, vector<16x1xf32>, vector<16x1xf32>, vector<16x1xf32>, vector<16x1xf32>, vector<16x1xf32> -> vector<16x16xf32>
    %392 = tpu.concatenate %360, %376, %368, %384, %364, %380, %372, %388, %362, %378, %370, %386, %366, %382, %374, %390 in 1 : vector<16x1xf32>, vector<16x1xf32>, vector<16x1xf32>, vector<16x1xf32>, vector<16x1xf32>, vector<16x1xf32>, vector<16x1xf32>, vector<16x1xf32>, vector<16x1xf32>, vector<16x1xf32>, vector<16x1xf32>, vector<16x1xf32>, vector<16x1xf32>, vector<16x1xf32>, vector<16x1xf32>, vector<16x1xf32> -> vector<16x16xf32>
    %393 = tpu.concatenate %391, %392 in 1 : vector<16x16xf32>, vector<16x16xf32> -> vector<16x32xf32>
    %394 = vector.extract_strided_slice %393 {offsets = [0, 0], sizes = [1, 32], strides = [1, 1]} : vector<16x32xf32> to vector<1x32xf32>
    %395 = vector.extract_strided_slice %393 {offsets = [2, 0], sizes = [1, 32], strides = [1, 1]} : vector<16x32xf32> to vector<1x32xf32>
    %396 = vector.extract_strided_slice %393 {offsets = [4, 0], sizes = [1, 32], strides = [1, 1]} : vector<16x32xf32> to vector<1x32xf32>
    %397 = vector.extract_strided_slice %393 {offsets = [6, 0], sizes = [1, 32], strides = [1, 1]} : vector<16x32xf32> to vector<1x32xf32>
    %398 = vector.extract_strided_slice %393 {offsets = [8, 0], sizes = [1, 32], strides = [1, 1]} : vector<16x32xf32> to vector<1x32xf32>
    %399 = vector.extract_strided_slice %393 {offsets = [10, 0], sizes = [1, 32], strides = [1, 1]} : vector<16x32xf32> to vector<1x32xf32>
    %400 = vector.extract_strided_slice %393 {offsets = [12, 0], sizes = [1, 32], strides = [1, 1]} : vector<16x32xf32> to vector<1x32xf32>
    %401 = vector.extract_strided_slice %393 {offsets = [14, 0], sizes = [1, 32], strides = [1, 1]} : vector<16x32xf32> to vector<1x32xf32>
    %402 = tpu.concatenate %394, %395, %396, %397, %398, %399, %400, %401 in 1 : vector<1x32xf32>, vector<1x32xf32>, vector<1x32xf32>, vector<1x32xf32>, vector<1x32xf32>, vector<1x32xf32>, vector<1x32xf32>, vector<1x32xf32> -> vector<1x256xf32>
    %403 = vector.extract_strided_slice %393 {offsets = [1, 0], sizes = [1, 32], strides = [1, 1]} : vector<16x32xf32> to vector<1x32xf32>
    %404 = vector.extract_strided_slice %393 {offsets = [3, 0], sizes = [1, 32], strides = [1, 1]} : vector<16x32xf32> to vector<1x32xf32>
    %405 = vector.extract_strided_slice %393 {offsets = [5, 0], sizes = [1, 32], strides = [1, 1]} : vector<16x32xf32> to vector<1x32xf32>
    %406 = vector.extract_strided_slice %393 {offsets = [7, 0], sizes = [1, 32], strides = [1, 1]} : vector<16x32xf32> to vector<1x32xf32>
    %407 = vector.extract_strided_slice %393 {offsets = [9, 0], sizes = [1, 32], strides = [1, 1]} : vector<16x32xf32> to vector<1x32xf32>
    %408 = vector.extract_strided_slice %393 {offsets = [11, 0], sizes = [1, 32], strides = [1, 1]} : vector<16x32xf32> to vector<1x32xf32>
    %409 = vector.extract_strided_slice %393 {offsets = [13, 0], sizes = [1, 32], strides = [1, 1]} : vector<16x32xf32> to vector<1x32xf32>
    %410 = vector.extract_strided_slice %393 {offsets = [15, 0], sizes = [1, 32], strides = [1, 1]} : vector<16x32xf32> to vector<1x32xf32>
    %411 = tpu.concatenate %403, %404, %405, %406, %407, %408, %409, %410 in 1 : vector<1x32xf32>, vector<1x32xf32>, vector<1x32xf32>, vector<1x32xf32>, vector<1x32xf32>, vector<1x32xf32>, vector<1x32xf32>, vector<1x32xf32> -> vector<1x256xf32>
    %412 = tpu.concatenate %402, %411 in 0 : vector<1x256xf32>, vector<1x256xf32> -> vector<2x256xf32>
    %c0_163 = arith.constant 0 : index
    %c0_164 = arith.constant 0 : index
    %413 = vector.load %arg32[%c0_163, %c0_164] : memref<2x256xf32, #tpu.memory_space<vmem>>, vector<2x256xf32>
    tpu.vector_store %arg32[%c0_163, %c0_164], %412 {strides = array<i32>} : memref<2x256xf32, #tpu.memory_space<vmem>>, vector<2x256xf32>,
    return
  }
}

</mosaic_0001>

<bundles_post_ra>
// kernel: decoder_forward.1
= control target key start
LH: loop header
LB: loop body
LE: loop exit
PB: predicated region body
PF: predicated region fallthrough
CT: control target
= control target key end

     0   :  { %s9553_s3 = smov 1   ;;  %v9554_v0 = vmov 0.0   ;;  %s9555_s10 = smov 4   ;;  %vm153_vm0 = vcmask 130048   ;;  %vm887_vm1 = vcmask 1041408   ;;  %vm890_vm2 = vcmask 1043456   ;;  %s13055_s0 = inlined_call_operand.smem [shape: u32[33], index: -1, kind: input, shape index: {}] }
   0x1   :  { %s9597_s6 = sld [smem:[%s13055_s0 + %s9553_s3]]   ;;  %221 = vmatprep.mubr.f32.mxu0 %v9554_v0  ;;  %310 = vmatprep.mubr.f32.mxu1 %v9554_v0  ;;  %s9556_s14 = smov 3   ;;  %vm893_vm3 = vcmask 1045504   ;;  %vm13118_vm4 = vcmask 523264   ;;  %vm13119_vm5 = vcmask 261120   ;;  %vm6657_vm6 = vcmask 7168  }
   0x2   :  { %s1_s9 = sld [smem:[%s13055_s0]]   ;;  %s9557_s18 = smov 5   ;;  %vm6660_vm7 = vcmask 15360   ;;  %vm6663_vm8 = vcmask 23552   ;;  %vm6666_vm9 = vcmask 31744   ;;  %vm6669_vm10 = vcmask 39936  }
   0x3   :  { %s9621_s13 = sld [smem:[%s13055_s0 + %s9555_s10]]   ;;  %s9558_s22 = smov 2   ;;  %vm6672_vm11 = vcmask 48128   ;;  %vm6675_vm12 = vcmask 56320   ;;  %vm6678_vm13 = vcmask 64512   ;;  %vm6681_vm14 = vcmask 72704  }
   0x4   :  { %s9630_s17 = sld [smem:[%s13055_s0 + %s9556_s14]]   ;;  %s9559_s26 = smov 8   ;;  %vm6684_vm15 = vcmask 80896  }
   0x5   :  { %s9730_s21 = sld [smem:[%s13055_s0 + %s9557_s18]]   ;;  %s9560_s30 = smov 9  }
   0x6   :  { %s9748_s25 = sld [smem:[%s13055_s0 + %s9558_s22]]   ;;  %s9561_s5 = smov 10  }
   0x7   :  { %v138_v1 = vld [vmem:[%s9597_s6 + $0x8] sm:$0xff]  ;;  %v140_v2 = vld [vmem:[%s9597_s6 + $0x18] sm:$0xff]  ;;  %v137_v6 = vld [vmem:[%s9597_s6] sm:$0xff]  ;;  %s9829_s29 = sld [smem:[%s13055_s0 + %s9559_s26]]   ;;  %s9563_s15 = smov 7  }
   0x8   :  { %v6945_v3 = vld [vmem:[%s9597_s6 + $0x28] sm:$0xff]  ;;  %v8749_v4 = vpack.c.bf16 %v140_v2, %v138_v1  ;;  %v6947_v5 = vld [vmem:[%s9597_s6 + $0x38] sm:$0xff]  ;;  %v139_v7 = vld [vmem:[%s9597_s6 + $0x10] sm:$0xff]  ;;  %s9835_s4 = sld [smem:[%s13055_s0 + %s9560_s30]]   ;;  %s9564_s20 = smov 14  }
   0x9   :  { %v8753_v8 = vpack.c.bf16 %v6947_v5, %v6945_v3  ;;  %v8751_v9 = vpack.c.bf16 %v139_v7, %v137_v6  ;;  %v6944_v10 = vld [vmem:[%s9597_s6 + $0x20] sm:$0xff]  ;;  %v6946_v11 = vld [vmem:[%s9597_s6 + $0x30] sm:$0xff]  ;;  %v6951_v14 = vld [vmem:[%s9597_s6 + $0x48] sm:$0xff]  ;;  %s9869_s8 = sld [smem:[%s13055_s0 + %s9561_s5]]   ;;  %s9566_s1 = smov 11  }
   0xa   :  { %v9612_v12 = vld [vmem:[%s1_s9] sm:$0x3]  ;;  %8750 = vmatprep.subr.bf16.mxu0 %v8749_v4  ;;  %v8755_v13 = vpack.c.bf16 %v6946_v11, %v6944_v10  ;;  %v6953_v15 = vld [vmem:[%s9597_s6 + $0x58] sm:$0xff]  ;;  %v6952_v18 = vld [vmem:[%s9597_s6 + $0x50] sm:$0xff]  ;;  %s9562_s9 = smov 6   ;;  %s6917_s19 = sld [smem:[%s13055_s0 + %s9563_s15]]  }
   0xb   :  { %v6950_v16 = vld [vmem:[%s9597_s6 + $0x40] sm:$0xff]  ;;  %8754 = vmatprep.subr.bf16.mxu1 %v8753_v8  ;;  %8752 = vmatpush1.bf16.msra.mxu0 %v8751_v9  ;;  %v8757_v17 = vpack.c.bf16 %v6953_v15, %v6951_v14  ;;  %v6957_v19 = vld [vmem:[%s9597_s6 + $0x68] sm:$0xff]  ;;  %v6959_v20 = vld [vmem:[%s9597_s6 + $0x78] sm:$0xff]  ;;  %s6924_s24 = sld [smem:[%s13055_s0 + %s9564_s20]]   ;;  %s9567_s7 = smov 12  }
   0xc   :  { %8756 = vmatpush1.bf16.msra.mxu1 %v8755_v13  ;;  %v8759_v21 = vpack.c.bf16 %v6952_v18, %v6950_v16  ;;  %v8761_v22 = vpack.c.bf16 %v6959_v20, %v6957_v19  ;;  %v6956_v23 = vld [vmem:[%s9597_s6 + $0x60] sm:$0xff]  ;;  %v6958_v24 = vld [vmem:[%s9597_s6 + $0x70] sm:$0xff]  ;;  %v6963_v25 = vld [vmem:[%s9597_s6 + $0x88] sm:$0xff]  ;;  %s6922_s12 = sld [smem:[%s13055_s0 + %s9567_s7]]   ;;  %s9570_s28 = smov 18  }
   0xd   :  { %8758 = vmatprep.subr.bf16.mxu0 %v8757_v17  ;;  %v8763_v26 = vpack.c.bf16 %v6958_v24, %v6956_v23  ;;  %v6965_v27 = vld [vmem:[%s9597_s6 + $0x98] sm:$0xff]  ;;  %v6962_v28 = vld [vmem:[%s9597_s6 + $0x80] sm:$0xff]  ;;  %v6964_v29 = vld [vmem:[%s9597_s6 + $0x90] sm:$0xff]  ;;  %s9572_s16 = smov 17   ;;  %s9573_s23 = smov 20  }
   0xe   :  { %6943 = vmatmul.mubr.msk.f32.vlgmr.msra.gmra.mrb[0].mxu0 %vm153_vm0, %v9612_v12  ;;  %8762 = vmatprep.subr.bf16.mxu1 %v8761_v22  ;;  %v8765_v30 = vpack.c.bf16 %v6965_v27, %v6963_v25  ;;  %v6969_v31 = vld [vmem:[%s9597_s6 + $0xa8] sm:$0xff]  ;;  %v6971_v32 = vld [vmem:[%s9597_s6 + $0xb8] sm:$0xff]  ;;  %v6968_v33 = vld [vmem:[%s9597_s6 + $0xa0] sm:$0xff]  ;;  %v8767_v34 = vpack.c.bf16 %v6964_v29, %v6962_v28  ;;  %s9575_s11 = smov 24  }
   0xf   :  { %6949 = vmatmul.mubr.msk.f32.vlgmr.msra.gmra.mrb[0].mxu1 %vm153_vm0, %v9612_v12  ;;  %8760 = vmatpush1.bf16.msra.mxu0 %v8759_v21  ;;  %v8769_v35 = vpack.c.bf16 %v6971_v32, %v6969_v31  ;;  %v6970_v36 = vld [vmem:[%s9597_s6 + $0xb0] sm:$0xff]  ;;  %v6975_v37 = vld [vmem:[%s9597_s6 + $0xc8] sm:$0xff]  ;;  %v6977_v38 = vld [vmem:[%s9597_s6 + $0xd8] sm:$0xff] }
  0x10   :  { %8764 = vmatpush1.bf16.msra.mxu1 %v8763_v26  ;;  %399 = vmatprep.mubr.f32.mxu0 %v9554_v0  ;;  %v8771_v39 = vpack.c.bf16 %v6970_v36, %v6968_v33  ;;  %v6974_v40 = vld [vmem:[%s9597_s6 + $0xc0] sm:$0xff]  ;;  %v6976_v41 = vld [vmem:[%s9597_s6 + $0xd0] sm:$0xff]  ;;  %v6981_v42 = vld [vmem:[%s9597_s6 + $0xe8] sm:$0xff]  ;;  %v8773_v43 = vpack.c.bf16 %v6977_v38, %v6975_v37 }
  0x11   :  { %488 = vmatprep.mubr.f32.mxu1 %v9554_v0  ;;  %8766 = vmatprep.subr.bf16.mxu0 %v8765_v30  ;;  %v6983_v44 = vld [vmem:[%s9597_s6 + $0xf8] sm:$0xff]  ;;  %v6980_v45 = vld [vmem:[%s9597_s6 + $0xe0] sm:$0xff]  ;;  %v6982_v46 = vld [vmem:[%s9597_s6 + $0xf0] sm:$0xff]  ;;  %v8775_v50 = vpack.c.bf16 %v6976_v41, %v6974_v40  ;;  %s6921_s6 = sld [smem:[%s13055_s0 + %s9566_s1]]  }
  0x12   :  { %6955 = vmatmul.mubr.msk.f32.vlgmr.msra.gmra.mrb[2].mxu0 %vm153_vm0, %v9612_v12  ;;  %8770 = vmatprep.subr.bf16.mxu1 %v8769_v35  ;;  %v8777_v47 = vpack.c.bf16 %v6983_v44, %v6981_v42  ;;  %v950_v48 = vld [vmem:[%s9621_s13 + $0x80] sm:$0xff]  ;;  %v951_v49 = vld [vmem:[%s9621_s13 + $0x88] sm:$0xff]  ;;  %v8779_v53 = vpack.c.bf16 %v6982_v46, %v6980_v45  ;;  %v952_v59 = vld [vmem:[%s9621_s13 + $0x90] sm:$0xff] }
  0x13   :  { %6961 = vmatmul.mubr.msk.f32.vlgmr.msra.gmra.mrb[2].mxu1 %vm153_vm0, %v9612_v12  ;;  %8768 = vmatpush1.bf16.msra.mxu0 %v8767_v34  ;;  %v918_v51 = vld [vmem:[%s9630_s17 + $0x80] sm:$0xff]  ;;  %v919_v52 = vld [vmem:[%s9630_s17 + $0x88] sm:$0xff]  ;;  %v8781_v57 = vpack.c.bf16 %v951_v49, %v950_v48  ;;  %v953_v60 = vld [vmem:[%s9621_s13 + $0x98] sm:$0xff] }
  0x14   :  { %8772 = vmatpush1.bf16.msra.mxu1 %v8771_v39  ;;  %577 = vmatprep.mubr.f32.mxu0 %v9554_v0  ;;  %v934_v54 = vld [vmem:[%s9621_s13] sm:$0xff]  ;;  %v935_v55 = vld [vmem:[%s9621_s13 + $0x8] sm:$0xff]  ;;  %v8813_v61 = vpack.c.bf16 %v919_v52, %v918_v51  ;;  %v920_v62 = vld [vmem:[%s9630_s17 + $0x90] sm:$0xff]  ;;  %v8785_v3 = vpack.c.bf16 %v953_v60, %v952_v59 }
  0x15   :  { %v902_v56 = vld [vmem:[%s9630_s17] sm:$0xff]  ;;  %666 = vmatprep.mubr.f32.mxu1 %v9554_v0  ;;  %8774 = vmatprep.subr.bf16.mxu0 %v8773_v43  ;;  %v903_v58 = vld [vmem:[%s9630_s17 + $0x8] sm:$0xff]  ;;  %v921_v63 = vld [vmem:[%s9630_s17 + $0x98] sm:$0xff]  ;;  %v8783_v1 = vpack.c.bf16 %v935_v55, %v934_v54 }
  0x16   :  { %6967 = vmatmul.mubr.msk.f32.vlgmr.msra.gmra.mrb[4].mxu0 %vm153_vm0, %v9612_v12  ;;  %8778 = vmatprep.subr.bf16.mxu1 %v8777_v47  ;;  %v8815_v2 = vpack.c.bf16 %v903_v58, %v902_v56  ;;  %v936_v4 = vld [vmem:[%s9621_s13 + $0x10] sm:$0xff]  ;;  %v937_v5 = vld [vmem:[%s9621_s13 + $0x18] sm:$0xff]  ;;  %v8817_v7 = vpack.c.bf16 %v921_v63, %v920_v62  ;;  %v954_v9 = vld [vmem:[%s9621_s13 + $0xa0] sm:$0xff] }
  0x17   :  { %6973 = vmatmul.mubr.msk.f32.vlgmr.msra.gmra.mrb[4].mxu1 %vm153_vm0, %v9612_v12  ;;  %8776 = vmatpush1.bf16.msra.mxu0 %v8775_v50  ;;  %v904_v6 = vld [vmem:[%s9630_s17 + $0x10] sm:$0xff]  ;;  %v905_v8 = vld [vmem:[%s9630_s17 + $0x18] sm:$0xff]  ;;  %v955_v10 = vld [vmem:[%s9621_s13 + $0xa8] sm:$0xff] }
  0x18   :  { %8780 = vmatpush1.bf16.msra.mxu1 %v8779_v53  ;;  %755 = vmatprep.mubr.f32.mxu0 %v9554_v0  ;;  %v922_v11 = vld [vmem:[%s9630_s17 + $0xa0] sm:$0xff]  ;;  %v923_v13 = vld [vmem:[%s9630_s17 + $0xa8] sm:$0xff]  ;;  %v8819_v14 = vpack.c.bf16 %v905_v8, %v904_v6  ;;  %v8789_v15 = vpack.c.bf16 %v955_v10, %v954_v9  ;;  %v956_v21 = vld [vmem:[%s9621_s13 + $0xb0] sm:$0xff] }
  0x19   :  { %844 = vmatprep.mubr.f32.mxu1 %v9554_v0  ;;  %8782 = vmatprep.subr.bf16.mxu0 %v8781_v57  ;;  %v8787_v0 = vpack.c.bf16 %v937_v5, %v936_v4  ;;  %v938_v16 = vld [vmem:[%s9621_s13 + $0x20] sm:$0xff]  ;;  %v939_v17 = vld [vmem:[%s9621_s13 + $0x28] sm:$0xff]  ;;  %v8821_v19 = vpack.c.bf16 %v923_v13, %v922_v11  ;;  %v924_v22 = vld [vmem:[%s9630_s17 + $0xb0] sm:$0xff] }
  0x1a   :  { %6979 = vmatmul.mubr.msk.f32.vlgmr.msra.gmra.mrb[6].mxu0 %vm153_vm0, %v9612_v12  ;;  %8814 = vmatprep.subr.bf16.mxu1 %v8813_v61  ;;  %v906_v18 = vld [vmem:[%s9630_s17 + $0x20] sm:$0xff]  ;;  %v907_v20 = vld [vmem:[%s9630_s17 + $0x28] sm:$0xff]  ;;  %v925_v23 = vld [vmem:[%s9630_s17 + $0xb8] sm:$0xff]  ;;  %v8791_v24 = vpack.c.bf16 %v939_v17, %v938_v16 }
  0x1b   :  { %6985 = vmatmul.mubr.msk.f32.vlgmr.msra.gmra.mrb[6].mxu1 %vm153_vm0, %v9612_v12  ;;  %8784 = vmatpush3.bf16.msra.mxu0 %v8783_v1  ;;  %v957_v12 = vld [vmem:[%s9621_s13 + $0xb8] sm:$0xff]  ;;  %v8823_v25 = vpack.c.bf16 %v907_v20, %v906_v18  ;;  %v940_v27 = vld [vmem:[%s9621_s13 + $0x30] sm:$0xff]  ;;  %v8825_v30 = vpack.c.bf16 %v925_v23, %v924_v22  ;;  %v958_v32 = vld [vmem:[%s9621_s13 + $0xc0] sm:$0xff] }
  0x1c   :  { %8816 = vmatpush3.bf16.msra.mxu1 %v8815_v2  ;;  %8786 = vmatprep.subr.bf16.mxu0 %v8785_v3  ;;  %v8793_v26 = vpack.c.bf16 %v957_v12, %v956_v21  ;;  %v941_v28 = vld [vmem:[%s9621_s13 + $0x38] sm:$0xff]  ;;  %v908_v29 = vld [vmem:[%s9630_s17 + $0x30] sm:$0xff]  ;;  %v959_v33 = vld [vmem:[%s9621_s13 + $0xc8] sm:$0xff]  ;;  %v143_v12 = vlaneseq }
  0x1d   :  { %8818 = vmatprep.subr.bf16.mxu1 %v8817_v7  ;;  %v909_v31 = vld [vmem:[%s9630_s17 + $0x38] sm:$0xff]  ;;  %v926_v34 = vld [vmem:[%s9630_s17 + $0xc0] sm:$0xff]  ;;  %v927_v35 = vld [vmem:[%s9630_s17 + $0xc8] sm:$0xff]  ;;  %v8795_v36 = vpack.c.bf16 %v941_v28, %v940_v27  ;;  %v8797_v38 = vpack.c.bf16 %v959_v33, %v958_v32 }
  0x1e   :  { %v8827_v37 = vpack.c.bf16 %v909_v31, %v908_v29  ;;  %v942_v39 = vld [vmem:[%s9621_s13 + $0x40] sm:$0xff]  ;;  %v943_v40 = vld [vmem:[%s9621_s13 + $0x48] sm:$0xff]  ;;  %v8829_v41 = vpack.c.bf16 %v927_v35, %v926_v34  ;;  %v960_v46 = vld [vmem:[%s9621_s13 + $0xd0] sm:$0xff]  ;;  %v144_v22 = vshrl.u32 %v143_v12, 7 }
  0x1f   :  { %8788 = vmatpush3.bf16.msra.mxu0 %v8787_v0  ;;  %v910_v42 = vld [vmem:[%s9630_s17 + $0x40] sm:$0xff]  ;;  %v911_v43 = vld [vmem:[%s9630_s17 + $0x48] sm:$0xff]  ;;  %v8799_v44 = vpack.c.bf16 %v943_v40, %v942_v39  ;;  %v961_v47 = vld [vmem:[%s9621_s13 + $0xd8] sm:$0xff] }
  0x20   :  { %8820 = vmatpush3.bf16.msra.mxu1 %v8819_v14  ;;  %8790 = vmatprep.subr.bf16.mxu0 %v8789_v15  ;;  %v8831_v45 = vpack.c.bf16 %v911_v43, %v910_v42  ;;  %v8801_v48 = vpack.c.bf16 %v961_v47, %v960_v46  ;;  %v944_v49 = vld [vmem:[%s9621_s13 + $0x50] sm:$0xff]  ;;  %v945_v50 = vld [vmem:[%s9621_s13 + $0x58] sm:$0xff]  ;;  %v962_v58 = vld [vmem:[%s9621_s13 + $0xe0] sm:$0xff]  ;;  %v9750_v23 = vsub.s32 0, %v144_v22 }
  0x21   :  { %8822 = vmatprep.subr.bf16.mxu1 %v8821_v19  ;;  %v8803_v51 = vpack.c.bf16 %v945_v50, %v944_v49  ;;  %v928_v52 = vld [vmem:[%s9630_s17 + $0xd0] sm:$0xff]  ;;  %v929_v53 = vld [vmem:[%s9630_s17 + $0xd8] sm:$0xff]  ;;  %v963_v59 = vld [vmem:[%s9621_s13 + $0xe8] sm:$0xff] }
  0x22   :  { %v912_v54 = vld [vmem:[%s9630_s17 + $0x50] sm:$0xff]  ;;  %v8833_v55 = vpack.c.bf16 %v929_v53, %v928_v52  ;;  %v913_v56 = vld [vmem:[%s9630_s17 + $0x58] sm:$0xff]  ;;  %v8805_v60 = vpack.c.bf16 %v963_v59, %v962_v58  ;;  %v946_v61 = vld [vmem:[%s9621_s13 + $0x60] sm:$0xff]  ;;  %13120 = vst [vmem:[#allocation3_spill] sm:$0xff] %v9750_v23 }
  0x23   :  { %8792 = vmatpush3.bf16.msra.mxu0 %v8791_v24  ;;  %v8835_v57 = vpack.c.bf16 %v913_v56, %v912_v54  ;;  %v947_v62 = vld [vmem:[%s9621_s13 + $0x68] sm:$0xff]  ;;  %v930_v1 = vld [vmem:[%s9630_s17 + $0xe0] sm:$0xff]  ;;  %v964_v7 = vld [vmem:[%s9621_s13 + $0xf0] sm:$0xff] }
  0x24   :  { %8824 = vmatpush3.bf16.msra.mxu1 %v8823_v25  ;;  %8794 = vmatprep.subr.bf16.mxu0 %v8793_v26  ;;  %v8807_v63 = vpack.c.bf16 %v947_v62, %v946_v61  ;;  %v931_v2 = vld [vmem:[%s9630_s17 + $0xe8] sm:$0xff]  ;;  %v914_v4 = vld [vmem:[%s9630_s17 + $0x60] sm:$0xff]  ;;  %v965_v8 = vld [vmem:[%s9621_s13 + $0xf8] sm:$0xff]  ;;  %v9753_v25 = vsub.s32 1, %v144_v22 }
  0x25   :  { %8826 = vmatprep.subr.bf16.mxu1 %v8825_v30  ;;  %v8837_v3 = vpack.c.bf16 %v931_v2, %v930_v1  ;;  %v915_v5 = vld [vmem:[%s9630_s17 + $0x68] sm:$0xff]  ;;  %v8809_v9 = vpack.c.bf16 %v965_v8, %v964_v7  ;;  %v948_v10 = vld [vmem:[%s9621_s13 + $0x70] sm:$0xff]  ;;  %v949_v11 = vld [vmem:[%s9621_s13 + $0x78] sm:$0xff]  ;;  %s6916_s13 = sld [smem:[%s13055_s0 + %s9562_s9]]  }
  0x26   :  { %v8839_v6 = vpack.c.bf16 %v915_v5, %v914_v4  ;;  %v932_v13 = vld [vmem:[%s9630_s17 + $0xf0] sm:$0xff]  ;;  %v8811_v0 = vpack.c.bf16 %v949_v11, %v948_v10  ;;  %v933_v14 = vld [vmem:[%s9630_s17 + $0xf8] sm:$0xff]  ;;  %v982_v19 = vld [vmem:[%s9730_s21 + $0x80] sm:$0xff] }
  0x27   :  { %8796 = vmatpush3.bf16.msra.mxu0 %v8795_v36  ;;  %v916_v15 = vld [vmem:[%s9630_s17 + $0x70] sm:$0xff]  ;;  %v917_v16 = vld [vmem:[%s9630_s17 + $0x78] sm:$0xff]  ;;  %v8841_v17 = vpack.c.bf16 %v933_v14, %v932_v13  ;;  %v983_v20 = vld [vmem:[%s9730_s21 + $0x88] sm:$0xff]  ;;  %s6934_s17 = sld [smem:[%s13055_s0 + %s9575_s11]]   ;;  %s9582_s11 = smov 26  }
  0x28   :  { %8828 = vmatpush3.bf16.msra.mxu1 %v8827_v37  ;;  %8798 = vmatprep.subr.bf16.mxu0 %v8797_v38  ;;  %v8843_v18 = vpack.c.bf16 %v917_v16, %v916_v15  ;;  %v8845_v21 = vpack.c.bf16 %v983_v20, %v982_v19  ;;  %v6948_v24 = vld [vmem:[%s9748_s25 + $0x2] sm:$0x3]  ;;  %v141_v26 = vld [vmem:[%s9748_s25] sm:$0x3]  ;;  %v6954_v28 = vld [vmem:[%s9748_s25 + $0x4] sm:$0x3] }
  0x29   :  { %8830 = vmatprep.subr.bf16.mxu1 %v8829_v41  ;;  %v239_v27 = vrot.slane %v6948_v24, %v9750_v23  ;;  %v243_v29 = vrot.slane %v6948_v24, %v9753_v25  ;;  %v6960_v30 = vld [vmem:[%s9748_s25 + $0x6] sm:$0x3]  ;;  %v146_v31 = vrot.slane %v141_v26, %v9750_v23  ;;  %v6966_v33 = vld [vmem:[%s9748_s25 + $0x8] sm:$0x3]  ;;  %v150_v35 = vrot.slane %v141_v26, %v9753_v25  ;;  %v6972_v42 = vld [vmem:[%s9748_s25 + $0xa] sm:$0x3] }
  0x2a   :  { %v328_v37 = vrot.slane %v6954_v28, %v9750_v23  ;;  %v332_v40 = vrot.slane %v6954_v28, %v9753_v25  ;;  %v417_v41 = vrot.slane %v6960_v30, %v9750_v23  ;;  %v510_v49 = vrot.slane %v6966_v33, %v9753_v25  ;;  %v966_v50 = vld [vmem:[%s9730_s21] sm:$0xff]  ;;  %v6978_v58 = vld [vmem:[%s9748_s25 + $0xc] sm:$0x3]  ;;  %v6984_v1 = vld [vmem:[%s9748_s25 + $0xe] sm:$0x3]  ;;  %s9565_s25 = smov 13  }
  0x2b   :  { %8800 = vmatpush3.bf16.msra.mxu0 %v8799_v44  ;;  %v421_v44 = vrot.slane %v6960_v30, %v9753_v25  ;;  %v688_v10 = vrot.slane %v6978_v58, %v9753_v25  ;;  %v984_v11 = vld [vmem:[%s9730_s21 + $0x90] sm:$0xff]  ;;  %v985_v13 = vld [vmem:[%s9730_s21 + $0x98] sm:$0xff] }
  0x2c   :  { %8832 = vmatpush3.bf16.msra.mxu1 %v8831_v45  ;;  %8802 = vmatprep.subr.bf16.mxu0 %v8801_v48  ;;  %v506_v45 = vrot.slane %v6966_v33, %v9750_v23  ;;  %v8849_v28 = vpack.c.bf16 %v985_v13, %v984_v11  ;;  %v969_v30 = vld [vmem:[%s9730_s21 + $0x18] sm:$0xff]  ;;  %v987_v33 = vld [vmem:[%s9730_s21 + $0xa8] sm:$0xff]  ;;  %v994_v11 = vld [vmem:[%s9730_s21 + $0xe0] sm:$0xff] }
  0x2d   :  { %8834 = vmatprep.subr.bf16.mxu1 %v8833_v55  ;;  %v995_v13 = vld [vmem:[%s9730_s21 + $0xe8] sm:$0xff] }
  0x2f   :  { %8804 = vmatpush3.bf16.msra.mxu0 %v8803_v51  ;;  %v967_v51 = vld [vmem:[%s9730_s21 + $0x8] sm:$0xff] }
  0x30   :  { %8836 = vmatpush3.bf16.msra.mxu1 %v8835_v57  ;;  %8806 = vmatprep.subr.bf16.mxu0 %v8805_v60  ;;  %v595_v57 = vrot.slane %v6972_v42, %v9750_v23  ;;  %v8847_v5 = vpack.c.bf16 %v967_v51, %v966_v50  ;;  %v988_v51 = vld [vmem:[%s9730_s21 + $0xb0] sm:$0xff] }
  0x31   :  { %8838 = vmatprep.subr.bf16.mxu1 %v8837_v3 }
  0x33   :  { %8808 = vmatpush3.bf16.msra.mxu0 %v8807_v63  ;;  %v599_v63 = vrot.slane %v6972_v42, %v9753_v25 }
  0x34   :  { %8840 = vmatpush3.bf16.msra.mxu1 %v8839_v6  ;;  %8810 = vmatprep.subr.bf16.mxu0 %v8809_v9  ;;  %v684_v9 = vrot.slane %v6978_v58, %v9750_v23 }
  0x35   :  { %8842 = vmatprep.subr.bf16.mxu1 %v8841_v17  ;;  %v773_v17 = vrot.slane %v6984_v1, %v9750_v23 }
  0x37   :  { %8812 = vmatpush3.bf16.msra.mxu0 %v8811_v0 }
  0x38   :  { %8844 = vmatpush3.bf16.msra.mxu1 %v8843_v18  ;;  %8846 = vmatprep.subr.bf16.mxu0 %v8845_v21  ;;  %v777_v18 = vrot.slane %v6984_v1, %v9753_v25  ;;  %v986_v25 = vld [vmem:[%s9730_s21 + $0xa0] sm:$0xff] }
  0xe1   :  { %v223_v32 = vpop.f32.mrb[0].mxu0 }
  0xe2   :  { %v312_v34 = vpop.f32.mrb[0].mxu1  ;;  %v225_v36 = vpop.f32.mrb[1].mxu0  ;;  %v224_v46 = vadd.f32 %v223_v32, %v146_v31 }
  0xe3   :  { %v313_v38 = vadd.f32 %v312_v34, %v239_v27  ;;  %v314_v39 = vpop.f32.mrb[1].mxu1  ;;  %v226_v52 = vadd.f32 %v225_v36, %v150_v35 }
  0xe4   :  { %v315_v43 = vadd.f32 %v314_v39, %v243_v29  ;;  %v968_v29 = vld [vmem:[%s9730_s21 + $0x10] sm:$0xff] }
  0xe5   :  { %v853_v47 = vrot.slane %v313_v38, 6  ;;  %v401_v48 = vpop.f32.mrb[2].mxu0  ;;  %v8851_v42 = vpack.c.bf16 %v969_v30, %v968_v29  ;;  %v1310_v29 = vld [vmem:[%s9835_s4 + $0x8] sm:$0xff] }
  0xe6   :  { %v854_v53 = vrot.slane %v315_v43, 6  ;;  %v402_v54 = vadd.f32 %v401_v48, %v328_v37  ;;  %v403_v55 = vpop.f32.mrb[3].mxu0  ;;  %v490_v56 = vpop.f32.mrb[2].mxu1  ;;  %v971_v48 = vld [vmem:[%s9730_s21 + $0x28] sm:$0xff] }
  0xe7   :  { %v888_v59 = vsel %vm887_vm1, %v224_v46, %v853_v47  ;;  %v404_v60 = vadd.f32 %v403_v55, %v332_v40  ;;  %v491_v61 = vadd.f32 %v490_v56, %v417_v41  ;;  %v492_v62 = vpop.f32.mrb[3].mxu1  ;;  %v8853_v46 = vpack.c.bf16 %v987_v33, %v986_v25  ;;  %v970_v47 = vld [vmem:[%s9730_s21 + $0x20] sm:$0xff]  ;;  %v1311_v33 = vld [vmem:[%s9835_s4 + $0x10] sm:$0xff] }
  0xe8   :  { %v889_v2 = vsel %vm887_vm1, %v226_v52, %v854_v53  ;;  %v859_v3 = vrot.slane %v402_v54, 4  ;;  %v493_v4 = vadd.f32 %v492_v62, %v421_v44  ;;  %v989_v52 = vld [vmem:[%s9730_s21 + $0xb8] sm:$0xff]  ;;  %v990_v62 = vld [vmem:[%s9730_s21 + $0xc0] sm:$0xff] }
  0xe9   :  { %v860_v6 = vrot.slane %v404_v60, 4  ;;  %v865_v7 = vrot.slane %v491_v61, 2  ;;  %v579_v8 = vpop.f32.mrb[4].mxu0  ;;  %v972_v60 = vld [vmem:[%s9730_s21 + $0x30] sm:$0xff]  ;;  %v973_v61 = vld [vmem:[%s9730_s21 + $0x38] sm:$0xff] }
  0xea   :  { %v891_v0 = vsel %vm890_vm2, %v888_v59, %v859_v3  ;;  %v866_v14 = vrot.slane %v493_v4, 2  ;;  %v581_v15 = vpop.f32.mrb[5].mxu0  ;;  %v668_v16 = vpop.f32.mrb[4].mxu1  ;;  %v580_v19 = vadd.f32 %v579_v8, %v506_v45  ;;  %v8857_v59 = vpack.c.bf16 %v989_v52, %v988_v51  ;;  %v974_v3 = vld [vmem:[%s9730_s21 + $0x40] sm:$0xff]  ;;  %v975_v4 = vld [vmem:[%s9730_s21 + $0x48] sm:$0xff] }
  0xeb   :  { %v669_v20 = vadd.f32 %v668_v16, %v595_v57  ;;  %v670_v21 = vpop.f32.mrb[5].mxu1  ;;  %v892_v12 = vsel %vm890_vm2, %v889_v2, %v860_v6  ;;  %v9787_v22 = vsel %vm893_vm3, %v891_v0, %v865_v7  ;;  %v582_v24 = vadd.f32 %v581_v15, %v510_v49  ;;  %v993_v6 = vld [vmem:[%s9730_s21 + $0xd8] sm:$0xff]  ;;  %v978_v15 = vld [vmem:[%s9730_s21 + $0x60] sm:$0xff]  ;;  %v979_v16 = vld [vmem:[%s9730_s21 + $0x68] sm:$0xff] }
  0xec   :  { %v671_v26 = vadd.f32 %v670_v21, %v599_v63  ;;  %v895_v27 = vsel %vm893_vm3, %v892_v12, %v866_v14  ;;  %v8855_v57 = vpack.c.bf16 %v971_v48, %v970_v47  ;;  %v991_v63 = vld [vmem:[%s9730_s21 + $0xc8] sm:$0xff]  ;;  %v8859_v1 = vpack.c.bf16 %v973_v61, %v972_v60  ;;  %v980_v21 = vld [vmem:[%s9730_s21 + $0x70] sm:$0xff]  ;;  %v981_v12 = vld [vmem:[%s9730_s21 + $0x78] sm:$0xff] }
  0xed   :  { %v871_v31 = vrot.slane %v669_v20, 6  ;;  %v757_v32 = vpop.f32.mrb[6].mxu0  ;;  %1064 = vmatprep.mubr.f32.mxu0 %v895_v27  ;;  %1139 = vmatprep.mubr.f32.mxu1 %v895_v27  ;;  %v8861_v2 = vpack.c.bf16 %v991_v63, %v990_v62  ;;  %v8863_v7 = vpack.c.bf16 %v975_v4, %v974_v3  ;;  %v8869_v14 = vpack.c.bf16 %v995_v13, %v994_v11  ;;  %v1301_v48 = vld [vmem:[%s9829_s29 + $0x40] sm:$0xff]  ;;  %v1318_v52 = vld [vmem:[%s9835_s4 + $0x48] sm:$0xff]  ;;  %v1307_v3 = vld [vmem:[%s9829_s29 + $0x70] sm:$0xff] }
  0xee   :  { %v872_v34 = vrot.slane %v671_v26, 6  ;;  %v758_v35 = vadd.f32 %v757_v32, %v684_v9  ;;  %v759_v36 = vpop.f32.mrb[7].mxu0  ;;  %v846_v37 = vpop.f32.mrb[6].mxu1  ;;  %1065 = vmatmul.mubr.f32.vlgmr.msra.gmra.mrb[8].mxu0 %v9787_v22  ;;  %1140 = vmatmul.mubr.f32.vlgmr.msra.gmra.mrb[8].mxu1 %v9787_v22  ;;  %v976_v9 = vld [vmem:[%s9730_s21 + $0x50] sm:$0xff]  ;;  %v1294_v26 = vld [vmem:[%s9829_s29 + $0x8] sm:$0xff]  ;;  %v1296_v32 = vld [vmem:[%s9829_s29 + $0x18] sm:$0xff] }
  0xef   :  { %v896_v38 = vsel %vm887_vm1, %v580_v19, %v871_v31  ;;  %v760_v39 = vadd.f32 %v759_v36, %v688_v10  ;;  %v847_v40 = vadd.f32 %v846_v37, %v773_v17  ;;  %8848 = vmatpush3.bf16.msra.mxu0 %v8847_v5  ;;  %v848_v41 = vpop.f32.mrb[7].mxu1  ;;  %v992_v5 = vld [vmem:[%s9730_s21 + $0xd0] sm:$0xff]  ;;  %v977_v10 = vld [vmem:[%s9730_s21 + $0x58] sm:$0xff]  ;;  %v8871_v19 = vpack.c.bf16 %v979_v16, %v978_v15  ;;  %v1297_v36 = vld [vmem:[%s9829_s29 + $0x20] sm:$0xff] }
  0xf0   :  { %v897_v43 = vsel %vm887_vm1, %v582_v24, %v872_v34  ;;  %v877_v44 = vrot.slane %v758_v35, 4  ;;  %v849_v45 = vadd.f32 %v848_v41, %v777_v18  ;;  %8850 = vmatprep.subr.bf16.mxu0 %v8849_v28  ;;  %v8865_v8 = vpack.c.bf16 %v993_v6, %v992_v5  ;;  %v996_v17 = vld [vmem:[%s9730_s21 + $0xf0] sm:$0xff]  ;;  %v997_v18 = vld [vmem:[%s9730_s21 + $0xf8] sm:$0xff]  ;;  %v1309_v28 = vld [vmem:[%s9835_s4] sm:$0xff]  ;;  %s9569_s21 = smov 19  }
  0xf1   :  { %v878_v49 = vrot.slane %v760_v39, 4  ;;  %v883_v50 = vrot.slane %v847_v40, 2  ;;  %v8867_v0 = vpack.c.bf16 %v977_v10, %v976_v9  ;;  %v8873_v20 = vpack.c.bf16 %v997_v18, %v996_v17  ;;  %v1295_v31 = vld [vmem:[%s9829_s29 + $0x10] sm:$0xff]  ;;  %v1312_v34 = vld [vmem:[%s9835_s4 + $0x18] sm:$0xff]  ;;  %v1298_v37 = vld [vmem:[%s9829_s29 + $0x28] sm:$0xff]  ;;  %s6929_s27 = sld [smem:[%s13055_s0 + %s9569_s21]]  }
  0xf2   :  { %v884_v53 = vrot.slane %v849_v45, 2  ;;  %v898_v54 = vsel %vm890_vm2, %v896_v38, %v877_v44  ;;  %v8875_v24 = vpack.c.bf16 %v981_v12, %v980_v21  ;;  %v8877_v30 = vpack.c.bf16 %v1310_v29, %v1309_v28  ;;  %v1313_v39 = vld [vmem:[%s9835_s4 + $0x20] sm:$0xff]  ;;  %v1314_v40 = vld [vmem:[%s9835_s4 + $0x28] sm:$0xff]  ;;  %v1315_v45 = vld [vmem:[%s9835_s4 + $0x30] sm:$0xff]  ;;  %s6927_s21 = sld [smem:[%s13055_s0 + %s9572_s16]]   ;;  %s9579_s16 = smov 29  }
  0xf3   :  { %8852 = vmatpush3.bf16.msra.mxu0 %v8851_v42  ;;  %v899_v55 = vsel %vm890_vm2, %v897_v43, %v878_v49  ;;  %v900_v56 = vsel %vm893_vm3, %v898_v54, %v883_v50  ;;  %v8913_v25 = vpack.c.bf16 %v1296_v32, %v1295_v31  ;;  %v8881_v35 = vpack.c.bf16 %v1312_v34, %v1311_v33  ;;  %v1299_v42 = vld [vmem:[%s9829_s29 + $0x30] sm:$0xff]  ;;  %v1300_v43 = vld [vmem:[%s9829_s29 + $0x38] sm:$0xff]  ;;  %v1302_v49 = vld [vmem:[%s9829_s29 + $0x48] sm:$0xff] }
  0xf4   :  { %v901_v58 = vsel %vm893_vm3, %v899_v55, %v884_v53  ;;  %8854 = vmatprep.subr.bf16.mxu0 %v8853_v46  ;;  %8878 = vmatprep.subr.bf16.mxu1 %v8877_v30  ;;  %v8917_v38 = vpack.c.bf16 %v1298_v37, %v1297_v36  ;;  %v8885_v41 = vpack.c.bf16 %v1314_v40, %v1313_v39  ;;  %v1316_v46 = vld [vmem:[%s9835_s4 + $0x38] sm:$0xff]  ;;  %v1317_v51 = vld [vmem:[%s9835_s4 + $0x40] sm:$0xff]  ;;  %v1303_v54 = vld [vmem:[%s9829_s29 + $0x50] sm:$0xff]  ;;  %vm6690_vm2 = vcmask 97280  }
  0xf5   :  { %1069 = vmatprep.mubr.f32.mxu0 %v901_v58  ;;  %1144 = vmatprep.mubr.f32.mxu1 %v901_v58  ;;  %v8921_v44 = vpack.c.bf16 %v1300_v43, %v1299_v42  ;;  %v8889_v47 = vpack.c.bf16 %v1316_v46, %v1315_v45  ;;  %v8925_v50 = vpack.c.bf16 %v1302_v49, %v1301_v48  ;;  %v1304_v55 = vld [vmem:[%s9829_s29 + $0x58] sm:$0xff]  ;;  %v1305_v60 = vld [vmem:[%s9829_s29 + $0x60] sm:$0xff]  ;;  %v1306_v61 = vld [vmem:[%s9829_s29 + $0x68] sm:$0xff] }
  0xf6   :  { %1070 = vmatmul.mubr.f32.gmra.mrb[10].mxu0 %v900_v56  ;;  %1145 = vmatmul.mubr.f32.gmra.mrb[10].mxu1 %v900_v56  ;;  %v8893_v53 = vpack.c.bf16 %v1318_v52, %v1317_v51  ;;  %v8933_v62 = vpack.c.bf16 %v1306_v61, %v1305_v60  ;;  %v1321_v63 = vld [vmem:[%s9835_s4 + $0x60] sm:$0xff]  ;;  %v1308_v4 = vld [vmem:[%s9829_s29 + $0x78] sm:$0xff]  ;;  %v1323_v5 = vld [vmem:[%s9835_s4 + $0x70] sm:$0xff] }
  0xf7   :  { %8856 = vmatpush3.bf16.msra.mxu0 %v8855_v57  ;;  %1222 = vmatprep.mubr.f32.mxu0 %v895_v27  ;;  %v1319_v57 = vld [vmem:[%s9835_s4 + $0x50] sm:$0xff]  ;;  %v8937_v6 = vpack.c.bf16 %v1308_v4, %v1307_v3  ;;  %v1325_v9 = vld [vmem:[%s9869_s8] sm:$0xff]  ;;  %v1326_v10 = vld [vmem:[%s9869_s8 + $0x8] sm:$0xff] }
  0xf8   :  { %8858 = vmatprep.subr.bf16.mxu0 %v8857_v59  ;;  %8880 = vmatpush3.bf16.msra.mxu1 %v8877_v30  ;;  %v9877_v11 = vpack.c.bf16 %v1326_v10, %v1325_v9 }
  0xf9   :  { %8882 = vmatprep.subr.bf16.mxu1 %v8881_v35 }
  0xfb   :  { %8860 = vmatpush3.bf16.msra.mxu0 %v8859_v1  ;;  %v1322_v1 = vld [vmem:[%s9835_s4 + $0x68] sm:$0xff] }
  0xfc   :  { %8862 = vmatprep.subr.bf16.mxu0 %v8861_v2  ;;  %8884 = vmatpush3.bf16.msra.mxu1 %v8881_v35  ;;  %v8901_v2 = vpack.c.bf16 %v1322_v1, %v1321_v63 }
  0xfd   :  { %8886 = vmatprep.subr.bf16.mxu1 %v8885_v41 }
  0xff   :  { %8864 = vmatpush3.bf16.msra.mxu0 %v8863_v7  ;;  %v1324_v7 = vld [vmem:[%s9835_s4 + $0x78] sm:$0xff] }
 0x100   :  { %8866 = vmatprep.subr.bf16.mxu0 %v8865_v8  ;;  %8888 = vmatpush3.bf16.msra.mxu1 %v8885_v41  ;;  %v8905_v8 = vpack.c.bf16 %v1324_v7, %v1323_v5 }
 0x101   :  { %8890 = vmatprep.subr.bf16.mxu1 %v8889_v47 }
 0x103   :  { %8868 = vmatpush3.bf16.msra.mxu0 %v8867_v0 }
 0x104   :  { %8870 = vmatprep.subr.bf16.mxu0 %v8869_v14  ;;  %8892 = vmatpush3.bf16.msra.mxu1 %v8889_v47 }
 0x105   :  { %8894 = vmatprep.subr.bf16.mxu1 %v8893_v53 }
 0x107   :  { %8872 = vmatpush3.bf16.msra.mxu0 %v8871_v19 }
 0x108   :  { %8874 = vmatprep.subr.bf16.mxu0 %v8873_v20  ;;  %8896 = vmatpush3.bf16.msra.mxu1 %v8893_v53 }
 0x10b   :  { %8876 = vmatpush3.bf16.msra.mxu0 %v8875_v24 }
 0x10e   :  { %1223 = vmatmul.mubr.f32.vlgmr.msra.gmra.mrb[12].mxu0 %v9787_v22  ;;  %v1293_v22 = vld [vmem:[%s9829_s29] sm:$0xff]  ;;  %s9914_s29 = sld [smem:[%s13055_s0 + %s9565_s25]]  }
 0x10f   :  { %1227 = vmatprep.mubr.f32.mxu0 %v901_v58  ;;  %v8909_v27 = vpack.c.bf16 %v1294_v26, %v1293_v22  ;;  %v1320_v58 = vld [vmem:[%s9835_s4 + $0x58] sm:$0xff]  ;;  %s10046_s4 = sld [smem:[%s13055_s0 + %s9570_s28]]  }
 0x110   :  { %v8897_v59 = vpack.c.bf16 %v1320_v58, %v1319_v57  ;;  %s10161_s28 = sld [smem:[%s13055_s0 + %s9573_s23]]   ;;  %s9580_s23 = smov 28  }
 0x111   :  { %8910 = vmatprep.subr.bf16.mxu0 %v8909_v27 }
 0x112   :  { %1228 = vmatmul.mubr.f32.gmra.mrb[14].mxu0 %v900_v56  ;;  %v8929_v56 = vpack.c.bf16 %v1304_v55, %v1303_v54  ;;  %8898 = vmatprep.subr.bf16.mxu1 %v8897_v59 }
 0x113   :  { %8912 = vmatpush3.bf16.msra.mxu0 %v8909_v27  ;;  %8900 = vmatpush3.bf16.msra.mxu1 %v8897_v59 }
 0x114   :  { %8914 = vmatprep.subr.bf16.mxu0 %v8913_v25  ;;  %8902 = vmatprep.subr.bf16.mxu1 %v8901_v2 }
 0x117   :  { %8916 = vmatpush3.bf16.msra.mxu0 %v8913_v25  ;;  %8904 = vmatpush3.bf16.msra.mxu1 %v8901_v2  ;;  %v998_v2 = vld [vmem:[%s6916_s13] sm:$0x1]  ;;  %s9568_s13 = smov 15  }
 0x118   :  { %8918 = vmatprep.subr.bf16.mxu0 %v8917_v38  ;;  %8906 = vmatprep.subr.bf16.mxu1 %v8905_v8 }
 0x11b   :  { %8920 = vmatpush3.bf16.msra.mxu0 %v8917_v38  ;;  %8908 = vmatpush3.bf16.msra.mxu1 %v8905_v8 }
 0x11c   :  { %8922 = vmatprep.subr.bf16.mxu0 %v8921_v44 }
 0x11f   :  { %8924 = vmatpush3.bf16.msra.mxu0 %v8921_v44 }
 0x120   :  { %8926 = vmatprep.subr.bf16.mxu0 %v8925_v50 }
 0x123   :  { %8928 = vmatpush3.bf16.msra.mxu0 %v8925_v50 }
 0x124   :  { %8930 = vmatprep.subr.bf16.mxu0 %v8929_v56 }
 0x127   :  { %8932 = vmatpush3.bf16.msra.mxu0 %v8929_v56 }
 0x128   :  { %8934 = vmatprep.subr.bf16.mxu0 %v8933_v62 }
 0x12b   :  { %8936 = vmatpush3.bf16.msra.mxu0 %v8933_v62 }
 0x12c   :  { %8938 = vmatprep.subr.bf16.mxu0 %v8937_v6 }
 0x12f   :  { %8940 = vmatpush3.bf16.msra.mxu0 %v8937_v6  ;;  %v6986_v6 = vld [vmem:[%s6917_s19] ss:$0 sm:$0xff]  ;;  %s9964_s19 = sld [smem:[%s13055_s0 + %s9568_s13]]  }
 0x130   :  { %8942 = vmatprep.subr.bf16.mxu0 %v9877_v11 }
 0x1c1   :  { %v7449_v13 = vpop.f32.mrb[8].mxu0  ;;  %v7487_v0 = vpop.f32.mrb[8].mxu1 }
 0x1c2   :  { %v7450_v14 = vpop.f32.mrb[9].mxu0  ;;  %v7488_v15 = vpop.f32.mrb[9].mxu1 }
 0x1c3   :  { %v7451_v16 = vadd.f32 %v7450_v14, %v7449_v13  ;;  %v7489_v17 = vadd.f32 %v7488_v15, %v7487_v0  ;;  %v1327_v15 = vld [vmem:[%s9869_s8 + $0x10] sm:$0xff] }
 0x1c5   :  { %v1152_v22 = vrot.slane %v7489_v17, 2 }
 0x1c9   :  { %v7452_v18 = vpop.f32.mrb[10].mxu0  ;;  %v7490_v19 = vpop.f32.mrb[10].mxu1 }
 0x1ca   :  { %v7453_v20 = vpop.f32.mrb[11].mxu0  ;;  %v7491_v21 = vpop.f32.mrb[11].mxu1 }
 0x1cb   :  { %v7454_v12 = vadd.f32 %v7453_v20, %v7452_v18  ;;  %v7492_v24 = vadd.f32 %v7491_v21, %v7490_v19 }
 0x1cd   :  { %v1233_v26 = vadd.f32 %v7454_v12, %v7451_v16  ;;  %v1153_v27 = vrot.slane %v7492_v24, 2 }
 0x1cf   :  { %v1154_v28 = vsel %vm893_vm3, %v1152_v22, %v1153_v27  ;;  %v1157_v36 = vsel %vm893_vm3, %v1153_v27, 0.0  ;;  %v1329_v27 = vld [vmem:[%s9869_s8 + $0x20] sm:$0xff] }
 0x1e1   :  { %v7525_v29 = vpop.f32.mrb[12].mxu0 }
 0x1e2   :  { %v7526_v30 = vpop.f32.mrb[13].mxu0 }
 0x1e3   :  { %v7527_v31 = vadd.f32 %v7526_v30, %v7525_v29 }
 0x1e5   :  { %v1225_v32 = vadd.f32 %v7527_v31, %v1154_v28  ;;  %v7528_v25 = vpop.f32.mrb[14].mxu0  ;;  %v1330_v28 = vld [vmem:[%s9869_s8 + $0x28] sm:$0xff]  ;;  %v1331_v31 = vld [vmem:[%s9869_s8 + $0x30] sm:$0xff] }
 0x1e6   :  { %v7529_v33 = vpop.f32.mrb[15].mxu0  ;;  %v8949_v30 = vpack.c.bf16 %v1330_v28, %v1329_v27 }
 0x1e7   :  { %v1234_v34 = vadd.f32 %v1233_v26, %v1225_v32  ;;  %v7530_v35 = vadd.f32 %v7529_v33, %v7528_v25  ;;  %v1333_v33 = vld [vmem:[%s9869_s8 + $0x40] sm:$0xff] }
 0x1e9   :  { %v1230_v37 = vadd.f32 %v7530_v35, %v1157_v36  ;;  %v1335_v35 = vld [vmem:[%s9869_s8 + $0x50] sm:$0xff]  ;;  %v1336_v36 = vld [vmem:[%s9869_s8 + $0x58] sm:$0xff] }
 0x1eb   :  { %v1235_v38 = vadd.f32 %v1234_v34, %v1230_v37 }
 0x1ed   :  { %v1236_v39 = vrot.slane %v1235_v38, 4 }
 0x1ef   :  { %v1237_v40 = vadd.f32 %v1236_v39, %v1235_v38  ;;  %v1337_v38 = vld [vmem:[%s9869_s8 + $0x60] sm:$0xff]  ;;  %v1338_v39 = vld [vmem:[%s9869_s8 + $0x68] sm:$0xff] }
 0x1f1   :  { %v1238_v41 = vrot.slane %v1237_v40, 2 }
 0x1f3   :  { %v1239_v42 = vadd.f32 %v1238_v41, %v1237_v40  ;;  %v8965_v40 = vpack.c.bf16 %v1338_v39, %v1337_v38  ;;  %v1339_v41 = vld [vmem:[%s9869_s8 + $0x70] sm:$0xff] }
 0x1f5   :  { %v1240_v43 = vrot.slane %v1239_v42, 1 }
 0x1f7   :  { %v1241_v44 = vadd.f32 %v1240_v43, %v1239_v42  ;;  %v1340_v42 = vld [vmem:[%s9869_s8 + $0x78] sm:$0xff] }
 0x1f8   :  { %v8969_v43 = vpack.c.bf16 %v1340_v42, %v1339_v41 }
 0x1f9   :  { %v1243_v45 = vmul.f32 0.03125, %v1241_v44  ;;  %v1723_v44 = vld [vmem:[%s6924_s24] sm:$0xff] }
 0x1fb   :  { %v1244_v46 = vsub.f32 %v7451_v16, %v1243_v45  ;;  %v1245_v47 = vsub.f32 %v7454_v12, %v1243_v45  ;;  %v1246_v48 = vsub.f32 %v1225_v32, %v1243_v45  ;;  %v1247_v49 = vsub.f32 %v1230_v37, %v1243_v45  ;;  %v1328_v16 = vld [vmem:[%s9869_s8 + $0x18] sm:$0xff]  ;;  %v1724_v45 = vld [vmem:[%s6924_s24 + $0x8] sm:$0xff] }
 0x1fc   :  { %v8945_v24 = vpack.c.bf16 %v1328_v16, %v1327_v15  ;;  %v1332_v32 = vld [vmem:[%s9869_s8 + $0x38] sm:$0xff]  ;;  %v8961_v37 = vpack.c.bf16 %v1336_v36, %v1335_v35 }
 0x1fd   :  { %v1248_v50 = vmul.f32 %v1244_v46, %v1244_v46  ;;  %v1249_v51 = vmul.f32 %v1245_v47, %v1245_v47  ;;  %v1250_v52 = vmul.f32 %v1246_v48, %v1246_v48  ;;  %v1251_v54 = vmul.f32 %v1247_v49, %v1247_v49 }
 0x1fe   :  { %v8953_v25 = vpack.c.bf16 %v1332_v32, %v1331_v31 }
 0x1ff   :  { %v1252_v53 = vadd.f32 %v1249_v51, %v1248_v50  ;;  %v1727_v50 = vld [vmem:[%s6924_s24 + $0x20] sm:$0xff]  ;;  %v1728_v51 = vld [vmem:[%s6924_s24 + $0x28] sm:$0xff] }
 0x201   :  { %v1253_v55 = vadd.f32 %v1252_v53, %v1250_v52  ;;  %v8981_v52 = vpack.c.bf16 %v1728_v51, %v1727_v50  ;;  %v1729_v53 = vld [vmem:[%s6924_s24 + $0x30] sm:$0xff] }
 0x203   :  { %v1254_v56 = vadd.f32 %v1253_v55, %v1251_v54  ;;  %v1730_v54 = vld [vmem:[%s6924_s24 + $0x38] sm:$0xff] }
 0x204   :  { %v8985_v55 = vpack.c.bf16 %v1730_v54, %v1729_v53 }
 0x205   :  { %v1255_v57 = vrot.slane %v1254_v56, 4 }
 0x207   :  { %v1256_v58 = vadd.f32 %v1255_v57, %v1254_v56  ;;  %v1715_v56 = vld [vmem:[%s9914_s29] sm:$0xff]  ;;  %v1716_v57 = vld [vmem:[%s9914_s29 + $0x8] sm:$0xff] }
 0x209   :  { %v1257_v59 = vrot.slane %v1256_v58, 2 }
 0x20b   :  { %v1258_v60 = vadd.f32 %v1257_v59, %v1256_v58  ;;  %v9918_v58 = vpack.c.bf16 %v1716_v57, %v1715_v56 }
 0x20d   :  { %v1259_v61 = vrot.slane %v1258_v60, 1 }
 0x20f   :  { %v1260_v62 = vadd.f32 %v1259_v61, %v1258_v60 }
 0x211   :  { %v1261_v63 = vmul.f32 0.03125, %v1260_v62 }
 0x213   :  { %v1262_v1 = vadd.f32 1e-05, %v1261_v63 }
 0x215   :  { %9286 = vrsqrt.f32 %v1262_v1 }
 0x21f   :  { %v9287_v3 = vpop.eup %9286 }
 0x220   :  { %v1264_v4 = vmul.f32 %v9287_v3, %v998_v2 }
 0x222   :  { %v1269_v5 = vrot.slane %v1264_v4, %v9750_v23 }
 0x224   :  { %v1274_v7 = vmul.f32 %v1269_v5, %v1247_v49  ;;  %v1271_v8 = vmul.f32 %v1269_v5, %v1244_v46  ;;  %v1272_v9 = vmul.f32 %v1269_v5, %v1245_v47  ;;  %v1273_v10 = vmul.f32 %v1269_v5, %v1246_v48  ;;  %v1725_v47 = vld [vmem:[%s6924_s24 + $0x10] sm:$0xff]  ;;  %v1726_v48 = vld [vmem:[%s6924_s24 + $0x18] sm:$0xff] }
 0x225   :  { %v8973_v46 = vpack.c.bf16 %v1724_v45, %v1723_v44  ;;  %v8977_v49 = vpack.c.bf16 %v1726_v48, %v1725_v47 }
 0x226   :  { %v1281_v13 = vadd.f32 %v6986_v6, %v1271_v8  ;;  %v1282_v0 = vadd.f32 %v6986_v6, %v1272_v9  ;;  %v1283_v14 = vadd.f32 %v6986_v6, %v1273_v10  ;;  %v1284_v17 = vadd.f32 %v6986_v6, %v1274_v7 }
 0x227   :  { %8974 = vmatprep.subr.bf16.mxu1 %v8973_v46 }
 0x228   :  { %v1285_v18 = vmul.f32 0.01, %v1281_v13  ;;  %v1286_v19 = vmul.f32 0.01, %v1282_v0  ;;  %v1287_v20 = vmul.f32 0.01, %v1283_v14 }
 0x229   :  { %v1288_v22 = vmul.f32 0.01, %v1284_v17 }
 0x22a   :  { %v1289_v21 = vmax.f32 %v1281_v13, %v1285_v18  ;;  %v1290_v12 = vmax.f32 %v1282_v0, %v1286_v19  ;;  %v1291_v26 = vmax.f32 %v1283_v14, %v1287_v20 }
 0x22b   :  { %v1292_v29 = vmax.f32 %v1284_v17, %v1288_v22 }
 0x22c   :  { %8031 = vmatprep.mubr.f32.mxu1 %v1289_v21  ;;  %8069 = vmatprep.mubr.f32.mxu0 %v1289_v21 }
 0x22d   :  { %8032 = vmatmul.mubr.f32.vlgmr.msra.gmra.mrb[12].mxu1 %v1290_v12  ;;  %8070 = vmatmul.mubr.f32.vlgmr.msra.gmra.mrb[16].mxu0 %v1290_v12 }
 0x22e   :  { %8944 = vmatpush3.bf16.msra.mxu0 %v9877_v11  ;;  %8034 = vmatprep.mubr.f32.mxu1 %v1291_v26  ;;  %v1334_v11 = vld [vmem:[%s9869_s8 + $0x48] sm:$0xff] }
 0x22f   :  { %8072 = vmatprep.mubr.f32.mxu0 %v1291_v26  ;;  %8946 = vmatprep.subr.bf16.mxu0 %v8945_v24  ;;  %v8957_v34 = vpack.c.bf16 %v1334_v11, %v1333_v33 }
 0x230   :  { %8976 = vmatpush3.bf16.msra.mxu1 %v8973_v46 }
 0x231   :  { %8035 = vmatmul.mubr.f32.gmra.mrb[14].mxu1 %v1292_v29  ;;  %8073 = vmatmul.mubr.f32.gmra.mrb[18].mxu0 %v1292_v29 }
 0x232   :  { %8948 = vmatpush3.bf16.msra.mxu0 %v8945_v24  ;;  %8107 = vmatprep.mubr.f32.mxu0 %v1289_v21 }
 0x233   :  { %8950 = vmatprep.subr.bf16.mxu0 %v8949_v30  ;;  %8978 = vmatprep.subr.bf16.mxu1 %v8977_v49 }
 0x234   :  { %8980 = vmatpush3.bf16.msra.mxu1 %v8977_v49 }
 0x235   :  { %8982 = vmatprep.subr.bf16.mxu1 %v8981_v52 }
 0x236   :  { %8952 = vmatpush3.bf16.msra.mxu0 %v8949_v30 }
 0x237   :  { %8954 = vmatprep.subr.bf16.mxu0 %v8953_v25 }
 0x238   :  { %8984 = vmatpush3.bf16.msra.mxu1 %v8981_v52 }
 0x239   :  { %8986 = vmatprep.subr.bf16.mxu1 %v8985_v55 }
 0x23a   :  { %8956 = vmatpush3.bf16.msra.mxu0 %v8953_v25 }
 0x23b   :  { %8958 = vmatprep.subr.bf16.mxu0 %v8957_v34 }
 0x23c   :  { %8988 = vmatpush3.bf16.msra.mxu1 %v8985_v55 }
 0x23d   :  { %8990 = vmatprep.subr.bf16.mxu1 %v9918_v58 }
 0x23e   :  { %8960 = vmatpush3.bf16.msra.mxu0 %v8957_v34 }
 0x23f   :  { %8962 = vmatprep.subr.bf16.mxu0 %v8961_v37 }
 0x242   :  { %8964 = vmatpush3.bf16.msra.mxu0 %v8961_v37 }
 0x243   :  { %8966 = vmatprep.subr.bf16.mxu0 %v8965_v40 }
 0x246   :  { %8968 = vmatpush3.bf16.msra.mxu0 %v8965_v40 }
 0x247   :  { %8970 = vmatprep.subr.bf16.mxu0 %v8969_v43 }
 0x24a   :  { %8972 = vmatpush3.bf16.msra.mxu0 %v8969_v43 }
 0x24d   :  { %8108 = vmatmul.mubr.f32.vlgmr.msra.gmra.mrb[18].mxu0 %v1290_v12 }
 0x24e   :  { %8110 = vmatprep.mubr.f32.mxu0 %v1291_v26 }
 0x251   :  { %8111 = vmatmul.mubr.f32.gmra.mrb[20].mxu0 %v1292_v29 }
 0x300   :  { %v8033_v59 = vpop.f32.mrb[12].mxu1  ;;  %v8071_v60 = vpop.f32.mrb[16].mxu0 }
 0x301   :  { %v1608_v61 = vsel %vm13118_vm4, %v8033_v59, 0.0  ;;  %v1516_v62 = vrot.slane %v8071_v60, 2  ;;  %v1409_v63 = vpop.f32.mrb[13].mxu1  ;;  %v1494_v1 = vpop.f32.mrb[17].mxu0 }
 0x302   :  { %v1607_v2 = vsel %vm13118_vm4, %v1409_v63, 0.0  ;;  %v1515_v3 = vrot.slane %v1494_v1, 2 }
 0x303   :  { %v1609_v4 = vadd.f32 %v1608_v61, %v1607_v2  ;;  %v1520_v18 = vsel %vm893_vm3, %v1516_v62, 0.0 }
 0x304   :  { %v8036_v5 = vpop.f32.mrb[14].mxu1  ;;  %v1517_v6 = vsel %vm893_vm3, %v1515_v3, %v1516_v62 }
 0x305   :  { %v1419_v7 = vpop.f32.mrb[15].mxu1  ;;  %v1612_v10 = vsel %vm13118_vm4, %v8036_v5, 0.0 }
 0x306   :  { %v1610_v8 = vsel %vm13118_vm4, %v1419_v7, 0.0 }
 0x307   :  { %v1611_v9 = vadd.f32 %v1610_v8, %v1609_v4 }
 0x309   :  { %v1613_v13 = vadd.f32 %v1612_v10, %v1611_v9 }
 0x320   :  { %v8109_v0 = vpop.f32.mrb[18].mxu0 }
 0x321   :  { %v1587_v14 = vpop.f32.mrb[19].mxu0  ;;  %v1616_v17 = vsel %vm13118_vm4, %v8109_v0, 0.0 }
 0x322   :  { %v1614_v15 = vsel %vm13118_vm4, %v1587_v14, 0.0 }
 0x323   :  { %v1615_v16 = vadd.f32 %v1614_v15, %v1613_v13  ;;  %v1341_v13 = vld [vmem:[%s6921_s6] sm:$0x1]  ;;  %s9571_s6 = smov 16  }
 0x324   :  { %v8112_v19 = vpop.f32.mrb[20].mxu0 }
 0x325   :  { %v1617_v20 = vadd.f32 %v1616_v17, %v1615_v16  ;;  %v1603_v21 = vadd.f32 %v8112_v19, %v1520_v18  ;;  %v1597_v12 = vpop.f32.mrb[21].mxu0  ;;  %v6987_v16 = vld [vmem:[%s6922_s12] ss:$0 sm:$0xff]  ;;  %s6926_s12 = sld [smem:[%s13055_s0 + %s9571_s6]]  }
 0x326   :  { %v1598_v24 = vadd.f32 %v1597_v12, %v1517_v6 }
 0x327   :  { %v1620_v27 = vsel %vm13118_vm4, %v1603_v21, 0.0 }
 0x328   :  { %v1618_v22 = vsel %vm13118_vm4, %v1598_v24, 0.0 }
 0x329   :  { %v1619_v26 = vadd.f32 %v1618_v22, %v1617_v20 }
 0x32b   :  { %v1621_v28 = vadd.f32 %v1620_v27, %v1619_v26 }
 0x32d   :  { %v1622_v29 = vrot.slane %v1621_v28, 4 }
 0x32f   :  { %v1623_v30 = vadd.f32 %v1622_v29, %v1621_v28 }
 0x331   :  { %v1624_v31 = vrot.slane %v1623_v30, 2 }
 0x333   :  { %v1625_v32 = vadd.f32 %v1624_v31, %v1623_v30 }
 0x335   :  { %v1626_v25 = vrot.slane %v1625_v32, 1 }
 0x337   :  { %v1627_v33 = vadd.f32 %v1626_v25, %v1625_v32  ;;  %v1717_v32 = vld [vmem:[%s9914_s29 + $0x10] sm:$0xff]  ;;  %v1718_v25 = vld [vmem:[%s9914_s29 + $0x18] sm:$0xff] }
 0x339   :  { %v1629_v11 = vmul.f32 0.015625, %v1627_v33 }
 0x33b   :  { %v1630_v34 = vsub.f32 %v1409_v63, %v1629_v11  ;;  %v1631_v35 = vsub.f32 %v8033_v59, %v1629_v11  ;;  %v1632_v36 = vsub.f32 %v1419_v7, %v1629_v11  ;;  %v1633_v37 = vsub.f32 %v8036_v5, %v1629_v11 }
 0x33c   :  { %v1634_v38 = vsub.f32 %v1587_v14, %v1629_v11  ;;  %v1635_v39 = vsub.f32 %v8109_v0, %v1629_v11  ;;  %v1636_v40 = vsub.f32 %v1598_v24, %v1629_v11  ;;  %v1637_v41 = vsub.f32 %v1603_v21, %v1629_v11 }
 0x33d   :  { %v1638_v42 = vmul.f32 %v1630_v34, %v1630_v34  ;;  %v1639_v43 = vmul.f32 %v1631_v35, %v1631_v35  ;;  %v1640_v44 = vmul.f32 %v1632_v36, %v1632_v36  ;;  %v1641_v45 = vmul.f32 %v1633_v37, %v1633_v37 }
 0x33e   :  { %v1642_v49 = vmul.f32 %v1634_v38, %v1634_v38  ;;  %v1643_v52 = vmul.f32 %v1635_v39, %v1635_v39  ;;  %v1644_v55 = vmul.f32 %v1636_v40, %v1636_v40  ;;  %v1645_v59 = vmul.f32 %v1637_v41, %v1637_v41 }
 0x33f   :  { %v1646_v46 = vsel %vm13118_vm4, %v1638_v42, 0.0  ;;  %v1647_v47 = vsel %vm13118_vm4, %v1639_v43, 0.0  ;;  %v1649_v50 = vsel %vm13118_vm4, %v1640_v44, 0.0  ;;  %v1651_v53 = vsel %vm13118_vm4, %v1641_v45, 0.0  ;;  %v1719_v42 = vld [vmem:[%s9914_s29 + $0x20] sm:$0xff]  ;;  %v1720_v43 = vld [vmem:[%s9914_s29 + $0x28] sm:$0xff] }
 0x340   :  { %v1648_v48 = vadd.f32 %v1647_v47, %v1646_v46  ;;  %v1653_v56 = vsel %vm13118_vm4, %v1642_v49, 0.0  ;;  %v1655_v60 = vsel %vm13118_vm4, %v1643_v52, 0.0  ;;  %v1657_v62 = vsel %vm13118_vm4, %v1644_v55, 0.0  ;;  %v1731_v55 = vld [vmem:[%s9964_s19] sm:$0xff] }
 0x341   :  { %v1659_v1 = vsel %vm13118_vm4, %v1645_v59, 0.0  ;;  %v8997_v46 = vpack.c.bf16 %v1720_v43, %v1719_v42 }
 0x342   :  { %v1650_v51 = vadd.f32 %v1649_v50, %v1648_v48  ;;  %v1721_v50 = vld [vmem:[%s9914_s29 + $0x30] sm:$0xff] }
 0x344   :  { %v1652_v54 = vadd.f32 %v1651_v53, %v1650_v51  ;;  %v1722_v51 = vld [vmem:[%s9914_s29 + $0x38] sm:$0xff]  ;;  %s9574_s29 = smov 23  }
 0x345   :  { %v9001_v53 = vpack.c.bf16 %v1722_v51, %v1721_v50  ;;  %s6933_s8 = sld [smem:[%s13055_s0 + %s9574_s29]]   ;;  %s9581_s29 = smov 30  }
 0x346   :  { %v1654_v57 = vadd.f32 %v1653_v56, %v1652_v54  ;;  %v1732_v56 = vld [vmem:[%s9964_s19 + $0x8] sm:$0xff] }
 0x347   :  { %v9005_v59 = vpack.c.bf16 %v1732_v56, %v1731_v55 }
 0x348   :  { %v1656_v61 = vadd.f32 %v1655_v60, %v1654_v57  ;;  %v1733_v60 = vld [vmem:[%s9964_s19 + $0x10] sm:$0xff] }
 0x34a   :  { %v1658_v63 = vadd.f32 %v1657_v62, %v1656_v61  ;;  %v1734_v61 = vld [vmem:[%s9964_s19 + $0x18] sm:$0xff] }
 0x34b   :  { %v9009_v62 = vpack.c.bf16 %v1734_v61, %v1733_v60 }
 0x34c   :  { %v1660_v2 = vadd.f32 %v1659_v1, %v1658_v63  ;;  %v1735_v63 = vld [vmem:[%s9964_s19 + $0x20] sm:$0xff]  ;;  %v1736_v1 = vld [vmem:[%s9964_s19 + $0x28] sm:$0xff] }
 0x34e   :  { %v1661_v3 = vrot.slane %v1660_v2, 4 }
 0x350   :  { %v1662_v4 = vadd.f32 %v1661_v3, %v1660_v2  ;;  %v9013_v2 = vpack.c.bf16 %v1736_v1, %v1735_v63  ;;  %v1737_v3 = vld [vmem:[%s9964_s19 + $0x30] sm:$0xff] }
 0x352   :  { %v1663_v5 = vrot.slane %v1662_v4, 2 }
 0x354   :  { %v1664_v6 = vadd.f32 %v1663_v5, %v1662_v4  ;;  %v1738_v4 = vld [vmem:[%s9964_s19 + $0x38] sm:$0xff]  ;;  %s9576_s19 = smov 25  }
 0x355   :  { %v9017_v5 = vpack.c.bf16 %v1738_v4, %v1737_v3  ;;  %s6935_s24 = sld [smem:[%s13055_s0 + %s9576_s19]]   ;;  %s9583_s19 = smov 27  }
 0x356   :  { %v1665_v7 = vrot.slane %v1664_v6, 1 }
 0x358   :  { %v1666_v8 = vadd.f32 %v1665_v7, %v1664_v6 }
 0x35a   :  { %v1667_v9 = vmul.f32 0.015625, %v1666_v8 }
 0x35c   :  { %v1668_v10 = vadd.f32 1e-05, %v1667_v9 }
 0x35e   :  { %9288 = vrsqrt.f32 %v1668_v10 }
 0x368   :  { %v9289_v0 = vpop.eup %9288 }
 0x369   :  { %v1670_v14 = vmul.f32 %v9289_v0, %v1341_v13 }
 0x36b   :  { %v1675_v15 = vrot.slane %v1670_v14, %v9750_v23 }
 0x36d   :  { %v1683_v17 = vmul.f32 %v1675_v15, %v1636_v40  ;;  %v1677_v18 = vmul.f32 %v1675_v15, %v1630_v34  ;;  %v1678_v19 = vmul.f32 %v1675_v15, %v1631_v35  ;;  %v1679_v20 = vmul.f32 %v1675_v15, %v1632_v36 }
 0x36e   :  { %v1680_v21 = vmul.f32 %v1675_v15, %v1633_v37  ;;  %v1681_v12 = vmul.f32 %v1675_v15, %v1634_v38  ;;  %v1682_v24 = vmul.f32 %v1675_v15, %v1635_v39  ;;  %v1684_v22 = vmul.f32 %v1675_v15, %v1637_v41 }
 0x36f   :  { %v1691_v26 = vadd.f32 %v6987_v16, %v1677_v18  ;;  %v1692_v27 = vadd.f32 %v6987_v16, %v1678_v19  ;;  %v1693_v28 = vadd.f32 %v6987_v16, %v1679_v20  ;;  %v8993_v36 = vpack.c.bf16 %v1718_v25, %v1717_v32 }
 0x370   :  { %v1694_v29 = vadd.f32 %v6987_v16, %v1680_v21  ;;  %v1695_v33 = vadd.f32 %v6987_v16, %v1681_v12  ;;  %v1696_v37 = vadd.f32 %v6987_v16, %v1682_v24  ;;  %v1697_v38 = vadd.f32 %v6987_v16, %v1683_v17  ;;  %v2281_v12 = vld [vmem:[%s6929_s27] sm:$0xff]  ;;  %v2282_v24 = vld [vmem:[%s6929_s27 + $0x8] sm:$0xff] }
 0x371   :  { %v1699_v30 = vmul.f32 0.01, %v1691_v26  ;;  %v1700_v31 = vmul.f32 0.01, %v1692_v27  ;;  %v1701_v11 = vmul.f32 0.01, %v1693_v28  ;;  %v1698_v47 = vadd.f32 %v6987_v16, %v1684_v22 }
 0x372   :  { %v1702_v35 = vmul.f32 0.01, %v1694_v29  ;;  %v1703_v41 = vmul.f32 0.01, %v1695_v33  ;;  %v1704_v45 = vmul.f32 0.01, %v1696_v37 }
 0x373   :  { %v9950_v40 = vmax.f32 %v1691_v26, %v1699_v30  ;;  %v9952_v34 = vmax.f32 %v1692_v27, %v1700_v31  ;;  %v9956_v39 = vmax.f32 %v1693_v28, %v1701_v11  ;;  %v1705_v48 = vmul.f32 0.01, %v1697_v38  ;;  %v2283_v30 = vld [vmem:[%s6929_s27 + $0x10] sm:$0xff]  ;;  %v2284_v31 = vld [vmem:[%s6929_s27 + $0x18] sm:$0xff]  ;;  %s9577_s27 = smov 21  }
 0x374   :  { %v1710_v44 = vmax.f32 %v1694_v29, %v1702_v35  ;;  %v1711_v49 = vmax.f32 %v1695_v33, %v1703_v41  ;;  %v1712_v52 = vmax.f32 %v1696_v37, %v1704_v45  ;;  %v9021_v27 = vpack.c.bf16 %v2282_v24, %v2281_v12  ;;  %v2278_v41 = vld [vmem:[%s10046_s4 + $0x8] sm:$0xff]  ;;  %s6931_s2 = sld [smem:[%s13055_s0 + %s9577_s27]]   ;;  %s9584_s27 = smov 31  }
 0x375   :  { %8129 = vmatprep.mubr.msk.f32.mxu1 %vm13118_vm4, %v9950_v40  ;;  %v1713_v54 = vmax.f32 %v1697_v38, %v1705_v48  ;;  %v9025_v25 = vpack.c.bf16 %v2284_v31, %v2283_v30 }
 0x376   :  { %8130 = vmatmul.mubr.msk.f32.vlgmr.msra.gmra.mrb[16].mxu1 %vm13118_vm4, %v9952_v34  ;;  %9022 = vmatprep.subr.bf16.mxu0 %v9021_v27 }
 0x377   :  { %8132 = vmatprep.mubr.msk.f32.mxu1 %vm13118_vm4, %v9956_v39  ;;  %8992 = vmatpush3.bf16.msra.mxu1 %v9918_v58  ;;  %v1706_v58 = vmul.f32 0.01, %v1698_v47 }
 0x378   :  { %8994 = vmatprep.subr.bf16.mxu1 %v8993_v36  ;;  %9024 = vmatpush3.bf16.msra.mxu0 %v9021_v27 }
 0x379   :  { %v1714_v57 = vmax.f32 %v1698_v47, %v1706_v58  ;;  %9026 = vmatprep.subr.bf16.mxu0 %v9025_v25 }
 0x37a   :  { %8133 = vmatmul.mubr.msk.f32.gmra.mrb[18].mxu1 %vm13118_vm4, %v1710_v44 }
 0x37b   :  { %8135 = vmatprep.mubr.msk.f32.mxu1 %vm13118_vm4, %v1711_v49  ;;  %8996 = vmatpush3.bf16.msra.mxu1 %v8993_v36 }
 0x37c   :  { %8998 = vmatprep.subr.bf16.mxu1 %v8997_v46  ;;  %9028 = vmatpush3.bf16.msra.mxu0 %v9025_v25 }
 0x37e   :  { %8136 = vmatmul.mubr.msk.f32.gmra.mrb[20].mxu1 %vm13118_vm4, %v1712_v52 }
 0x37f   :  { %8138 = vmatprep.mubr.msk.f32.mxu1 %vm13118_vm4, %v1713_v54  ;;  %9000 = vmatpush3.bf16.msra.mxu1 %v8997_v46 }
 0x380   :  { %9002 = vmatprep.subr.bf16.mxu1 %v9001_v53 }
 0x382   :  { %8139 = vmatmul.mubr.msk.f32.gmra.mrb[22].mxu1 %vm13118_vm4, %v1714_v57 }
 0x383   :  { %9004 = vmatpush3.bf16.msra.mxu1 %v9001_v53  ;;  %8157 = vmatprep.mubr.msk.f32.mxu1 %vm13118_vm4, %v9950_v40 }
 0x384   :  { %9006 = vmatprep.subr.bf16.mxu1 %v9005_v59 }
 0x386   :  { %8158 = vmatmul.mubr.msk.f32.vlgmr.msra.gmra.mrb[24].mxu1 %vm13118_vm4, %v9952_v34 }
 0x387   :  { %8160 = vmatprep.mubr.msk.f32.mxu1 %vm13118_vm4, %v9956_v39  ;;  %9008 = vmatpush3.bf16.msra.mxu1 %v9005_v59 }
 0x388   :  { %9010 = vmatprep.subr.bf16.mxu1 %v9009_v62 }
 0x38a   :  { %8161 = vmatmul.mubr.msk.f32.gmra.mrb[26].mxu1 %vm13118_vm4, %v1710_v44 }
 0x38b   :  { %8163 = vmatprep.mubr.msk.f32.mxu1 %vm13118_vm4, %v1711_v49  ;;  %9012 = vmatpush3.bf16.msra.mxu1 %v9009_v62 }
 0x38c   :  { %9014 = vmatprep.subr.bf16.mxu1 %v9013_v2 }
 0x38e   :  { %8164 = vmatmul.mubr.msk.f32.gmra.mrb[28].mxu1 %vm13118_vm4, %v1712_v52 }
 0x38f   :  { %8166 = vmatprep.mubr.msk.f32.mxu1 %vm13118_vm4, %v1713_v54  ;;  %9016 = vmatpush3.bf16.msra.mxu1 %v9013_v2 }
 0x390   :  { %9018 = vmatprep.subr.bf16.mxu1 %v9017_v5 }
 0x392   :  { %8167 = vmatmul.mubr.msk.f32.gmra.mrb[30].mxu1 %vm13118_vm4, %v1714_v57 }
 0x393   :  { %9020 = vmatpush3.bf16.msra.mxu1 %v9017_v5  ;;  %8185 = vmatprep.mubr.msk.f32.mxu1 %vm13118_vm4, %v9950_v40 }
 0x394   :  { %9069 = vmatprep.subr.bf16.mxu1 %v9021_v27 }
 0x396   :  { %8186 = vmatmul.mubr.msk.f32.vlgmr.msra.gmra.mrb[28].mxu1 %vm13118_vm4, %v9952_v34 }
 0x397   :  { %8188 = vmatprep.mubr.msk.f32.mxu1 %vm13118_vm4, %v9956_v39  ;;  %9071 = vmatpush3.bf16.msra.mxu1 %v9021_v27  ;;  %v2277_v39 = vld [vmem:[%s10046_s4] sm:$0xff] }
 0x398   :  { %9070 = vmatprep.subr.bf16.mxu1 %v9025_v25  ;;  %v10051_v42 = vpack.c.bf16 %v2278_v41, %v2277_v39 }
 0x39a   :  { %8189 = vmatmul.mubr.msk.f32.gmra.mrb[30].mxu1 %vm13118_vm4, %v1710_v44  ;;  %9030 = vmatprep.subr.bf16.mxu0 %v10051_v42 }
 0x39b   :  { %8191 = vmatprep.mubr.msk.f32.mxu1 %vm13118_vm4, %v1711_v49  ;;  %9072 = vmatpush3.bf16.msra.mxu1 %v9025_v25 }
 0x39e   :  { %8192 = vmatmul.mubr.msk.f32.gmra.mrb[26].mxu1 %vm13118_vm4, %v1712_v52 }
 0x39f   :  { %8194 = vmatprep.mubr.msk.f32.mxu1 %vm13118_vm4, %v1713_v54 }
 0x3a2   :  { %8195 = vmatmul.mubr.msk.f32.gmra.mrb[32].mxu1 %vm13118_vm4, %v1714_v57  ;;  %vm6696_vm4 = vcmask 113664  }
 0x449   :  { %v10008_v6 = vpop.f32.mrb[16].mxu1 }
 0x44a   :  { %v2090_v7 = vsel %vm13119_vm5, %v10008_v6, 0.0  ;;  %v10012_v8 = vpop.f32.mrb[17].mxu1 }
 0x44b   :  { %v2089_v9 = vsel %vm13119_vm5, %v10012_v8, 0.0 }
 0x44c   :  { %v2091_v10 = vadd.f32 %v2090_v7, %v2089_v9 }
 0x44d   :  { %v10016_v13 = vpop.f32.mrb[18].mxu1 }
 0x44e   :  { %v10018_v0 = vpop.f32.mrb[19].mxu1  ;;  %v2094_v16 = vsel %vm13119_vm5, %v10016_v13, 0.0 }
 0x44f   :  { %v2092_v14 = vsel %vm13119_vm5, %v10018_v0, 0.0 }
 0x450   :  { %v2093_v15 = vadd.f32 %v2092_v14, %v2091_v10 }
 0x451   :  { %v10027_v17 = vpop.f32.mrb[20].mxu1 }
 0x452   :  { %v10029_v18 = vpop.f32.mrb[21].mxu1  ;;  %v2095_v19 = vadd.f32 %v2094_v16, %v2093_v15  ;;  %v2098_v22 = vsel %vm13119_vm5, %v10027_v17, 0.0 }
 0x453   :  { %v2096_v20 = vsel %vm13119_vm5, %v10029_v18, 0.0 }
 0x454   :  { %v2097_v21 = vadd.f32 %v2096_v20, %v2095_v19 }
 0x455   :  { %v10035_v26 = vpop.f32.mrb[22].mxu1 }
 0x456   :  { %v10037_v28 = vpop.f32.mrb[23].mxu1  ;;  %v2099_v29 = vadd.f32 %v2098_v22, %v2097_v21  ;;  %v2102_v11 = vsel %vm13119_vm5, %v10035_v26, 0.0 }
 0x457   :  { %v2100_v32 = vsel %vm13119_vm5, %v10037_v28, 0.0 }
 0x458   :  { %v2101_v33 = vadd.f32 %v2100_v32, %v2099_v29 }
 0x459   :  { %v8159_v40 = vpop.f32.mrb[24].mxu1 }
 0x45a   :  { %v1978_v34 = vrot.slane %v8159_v40, 2  ;;  %v1936_v35 = vpop.f32.mrb[25].mxu1  ;;  %v2103_v36 = vadd.f32 %v2102_v11, %v2101_v33 }
 0x45b   :  { %v1977_v37 = vrot.slane %v1936_v35, 2 }
 0x45c   :  { %v1982_v60 = vsel %vm893_vm3, %v1978_v34, 0.0 }
 0x45d   :  { %v1979_v38 = vsel %vm893_vm3, %v1977_v37, %v1978_v34 }
 0x469   :  { %v8187_v43 = vpop.f32.mrb[28].mxu1 }
 0x46a   :  { %v2049_v44 = vpop.f32.mrb[29].mxu1  ;;  %v2106_v47 = vsel %vm13119_vm5, %v8187_v43, 0.0 }
 0x46b   :  { %v2104_v45 = vsel %vm13119_vm5, %v2049_v44, 0.0 }
 0x46c   :  { %v2105_v46 = vadd.f32 %v2104_v45, %v2103_v36 }
 0x46d   :  { %v8190_v48 = vpop.f32.mrb[30].mxu1 }
 0x46e   :  { %v2059_v49 = vpop.f32.mrb[31].mxu1  ;;  %v2107_v50 = vadd.f32 %v2106_v47, %v2105_v46  ;;  %v2110_v58 = vsel %vm13119_vm5, %v8190_v48, 0.0 }
 0x46f   :  { %v2108_v51 = vsel %vm13119_vm5, %v2059_v49, 0.0 }
 0x470   :  { %v2109_v52 = vadd.f32 %v2108_v51, %v2107_v50 }
 0x471   :  { %v8193_v53 = vpop.f32.mrb[26].mxu1 }
 0x472   :  { %v2069_v54 = vpop.f32.mrb[27].mxu1  ;;  %v2111_v55 = vadd.f32 %v2110_v58, %v2109_v52  ;;  %v2114_v59 = vsel %vm13119_vm5, %v8193_v53, 0.0 }
 0x473   :  { %v2112_v56 = vsel %vm13119_vm5, %v2069_v54, 0.0 }
 0x474   :  { %v2113_v57 = vadd.f32 %v2112_v56, %v2111_v55 }
 0x475   :  { %v8196_v61 = vpop.f32.mrb[32].mxu1 }
 0x476   :  { %v2115_v62 = vadd.f32 %v2114_v59, %v2113_v57  ;;  %v2085_v63 = vadd.f32 %v8196_v61, %v1982_v60  ;;  %v2079_v1 = vpop.f32.mrb[33].mxu1 }
 0x477   :  { %v2080_v2 = vadd.f32 %v2079_v1, %v1979_v38 }
 0x478   :  { %v2118_v5 = vsel %vm13119_vm5, %v2085_v63, 0.0 }
 0x479   :  { %v2116_v3 = vsel %vm13119_vm5, %v2080_v2, 0.0 }
 0x47a   :  { %v2117_v4 = vadd.f32 %v2116_v3, %v2115_v62 }
 0x47c   :  { %v2119_v7 = vadd.f32 %v2118_v5, %v2117_v4 }
 0x47e   :  { %v2120_v9 = vrot.slane %v2119_v7, 4 }
 0x480   :  { %v2121_v10 = vadd.f32 %v2120_v9, %v2119_v7 }
 0x482   :  { %v2122_v14 = vrot.slane %v2121_v10, 2 }
 0x484   :  { %v2123_v15 = vadd.f32 %v2122_v14, %v2121_v10 }
 0x486   :  { %v2124_v16 = vrot.slane %v2123_v15, 1 }
 0x488   :  { %v2125_v19 = vadd.f32 %v2124_v16, %v2123_v15 }
 0x48a   :  { %v2127_v20 = vmul.f32 0.0078125, %v2125_v19 }
 0x48c   :  { %v10064_v21 = vsub.f32 %v10012_v8, %v2127_v20  ;;  %v10067_v12 = vsub.f32 %v10008_v6, %v2127_v20  ;;  %v10070_v24 = vsub.f32 %v10018_v0, %v2127_v20  ;;  %v10073_v22 = vsub.f32 %v10016_v13, %v2127_v20 }
 0x48d   :  { %v10076_v27 = vsub.f32 %v10029_v18, %v2127_v20  ;;  %v10079_v29 = vsub.f32 %v10027_v17, %v2127_v20  ;;  %v10082_v30 = vsub.f32 %v10037_v28, %v2127_v20  ;;  %v10085_v8 = vsub.f32 %v10035_v26, %v2127_v20 }
 0x48e   :  { %v10087_v6 = vsub.f32 %v2049_v44, %v2127_v20  ;;  %v10089_v31 = vsub.f32 %v8187_v43, %v2127_v20  ;;  %v10091_v0 = vsub.f32 %v2059_v49, %v2127_v20  ;;  %v10093_v13 = vsub.f32 %v8190_v48, %v2127_v20 }
 0x48f   :  { %v10095_v32 = vsub.f32 %v2069_v54, %v2127_v20  ;;  %v10097_v18 = vsub.f32 %v8193_v53, %v2127_v20  ;;  %v10099_v17 = vsub.f32 %v2080_v2, %v2127_v20  ;;  %v10101_v25 = vsub.f32 %v2085_v63, %v2127_v20 }
 0x490   :  { %v2144_v26 = vmul.f32 %v10064_v21, %v10064_v21  ;;  %v2145_v28 = vmul.f32 %v10067_v12, %v10067_v12  ;;  %v2146_v33 = vmul.f32 %v10070_v24, %v10070_v24  ;;  %v2147_v11 = vmul.f32 %v10073_v22, %v10073_v22 }
 0x491   :  { %v2148_v36 = vmul.f32 %v10076_v27, %v10076_v27  ;;  %v2149_v39 = vmul.f32 %v10079_v29, %v10079_v29  ;;  %v2150_v44 = vmul.f32 %v10082_v30, %v10082_v30  ;;  %v2151_v47 = vmul.f32 %v10085_v8, %v10085_v8 }
 0x492   :  { %v2160_v40 = vsel %vm13119_vm5, %v2144_v26, 0.0  ;;  %v2161_v34 = vsel %vm13119_vm5, %v2145_v28, 0.0  ;;  %v2163_v37 = vsel %vm13119_vm5, %v2146_v33, 0.0  ;;  %v2165_v41 = vsel %vm13119_vm5, %v2147_v11, 0.0 }
 0x493   :  { %v2162_v35 = vadd.f32 %v2161_v34, %v2160_v40  ;;  %v2167_v45 = vsel %vm13119_vm5, %v2148_v36, 0.0  ;;  %v2169_v48 = vsel %vm13119_vm5, %v2149_v39, 0.0  ;;  %v2152_v50 = vmul.f32 %v10087_v6, %v10087_v6 }
 0x494   :  { %v2171_v51 = vsel %vm13119_vm5, %v2150_v44, 0.0  ;;  %v2153_v58 = vmul.f32 %v10089_v31, %v10089_v31  ;;  %v2173_v53 = vsel %vm13119_vm5, %v2151_v47, 0.0  ;;  %v2154_v55 = vmul.f32 %v10091_v0, %v10091_v0  ;;  %v10166_v44 = vld [vmem:[%s6927_s21] ss:$0 sm:$0xff]  ;;  %s6939_s21 = sld [smem:[%s13055_s0 + %s9579_s16]]  }
 0x495   :  { %v2164_v38 = vadd.f32 %v2163_v37, %v2162_v35  ;;  %v2175_v56 = vsel %vm13119_vm5, %v2152_v50, 0.0  ;;  %v2155_v59 = vmul.f32 %v10093_v13, %v10093_v13  ;;  %v2156_v62 = vmul.f32 %v10095_v32, %v10095_v32 }
 0x496   :  { %v2177_v60 = vsel %vm13119_vm5, %v2153_v58, 0.0  ;;  %v2179_v63 = vsel %vm13119_vm5, %v2154_v55, 0.0  ;;  %v2157_v2 = vmul.f32 %v10097_v18, %v10097_v18  ;;  %v2158_v5 = vmul.f32 %v10099_v17, %v10099_v17 }
 0x497   :  { %v2166_v43 = vadd.f32 %v2165_v41, %v2164_v38  ;;  %v2181_v3 = vsel %vm13119_vm5, %v2155_v59, 0.0  ;;  %v2183_v7 = vsel %vm13119_vm5, %v2156_v62, 0.0  ;;  %v2159_v10 = vmul.f32 %v10101_v25, %v10101_v25  ;;  %v1739_v38 = vld [vmem:[%s6926_s12] sm:$0x1]  ;;  %v2286_v59 = vld [vmem:[%s10161_s28 + $0x8] sm:$0xff] }
 0x498   :  { %v2185_v14 = vsel %vm13119_vm5, %v2157_v2, 0.0  ;;  %v2187_v16 = vsel %vm13119_vm5, %v2158_v5, 0.0 }
 0x499   :  { %v2168_v46 = vadd.f32 %v2167_v45, %v2166_v43  ;;  %v2189_v20 = vsel %vm13119_vm5, %v2159_v10, 0.0 }
 0x49b   :  { %v2170_v49 = vadd.f32 %v2169_v48, %v2168_v46 }
 0x49d   :  { %v2172_v52 = vadd.f32 %v2171_v51, %v2170_v49 }
 0x49f   :  { %v2174_v54 = vadd.f32 %v2173_v53, %v2172_v52  ;;  %v2280_v52 = vld [vmem:[%s10046_s4 + $0x18] sm:$0xff] }
 0x4a1   :  { %v2176_v57 = vadd.f32 %v2175_v56, %v2174_v54 }
 0x4a3   :  { %v2178_v61 = vadd.f32 %v2177_v60, %v2176_v57  ;;  %v2285_v57 = vld [vmem:[%s10161_s28] sm:$0xff] }
 0x4a5   :  { %v2180_v1 = vadd.f32 %v2179_v63, %v2178_v61 }
 0x4a7   :  { %v2182_v4 = vadd.f32 %v2181_v3, %v2180_v1 }
 0x4a9   :  { %v2184_v9 = vadd.f32 %v2183_v7, %v2182_v4 }
 0x4ab   :  { %v2186_v15 = vadd.f32 %v2185_v14, %v2184_v9  ;;  %v9037_v9 = vpack.c.bf16 %v2286_v59, %v2285_v57 }
 0x4ad   :  { %v2188_v19 = vadd.f32 %v2187_v16, %v2186_v15 }
 0x4af   :  { %v2190_v26 = vadd.f32 %v2189_v20, %v2188_v19 }
 0x4b1   :  { %v2191_v28 = vrot.slane %v2190_v26, 4 }
 0x4b3   :  { %v2192_v33 = vadd.f32 %v2191_v28, %v2190_v26 }
 0x4b5   :  { %v2193_v11 = vrot.slane %v2192_v33, 2 }
 0x4b7   :  { %v2194_v40 = vadd.f32 %v2193_v11, %v2192_v33 }
 0x4b9   :  { %v2195_v34 = vrot.slane %v2194_v40, 1 }
 0x4bb   :  { %v2196_v35 = vadd.f32 %v2195_v34, %v2194_v40 }
 0x4bd   :  { %v2197_v36 = vmul.f32 0.0078125, %v2196_v35 }
 0x4bf   :  { %v2198_v37 = vadd.f32 1e-05, %v2197_v36 }
 0x4c1   :  { %9290 = vrsqrt.f32 %v2198_v37 }
 0x4cb   :  { %v9291_v39 = vpop.eup %9290 }
 0x4cc   :  { %v2200_v41 = vmul.f32 %v9291_v39, %v1739_v38 }
 0x4ce   :  { %v10164_v43 = vrot.slane %v2200_v41, %v9750_v23 }
 0x4d0   :  { %v2221_v45 = vmul.f32 %v10164_v43, %v10099_v17  ;;  %v2207_v46 = vmul.f32 %v10164_v43, %v10064_v21  ;;  %v2213_v47 = vmul.f32 %v10164_v43, %v10082_v30  ;;  %v2208_v48 = vmul.f32 %v10164_v43, %v10067_v12  ;;  %v2279_v17 = vld [vmem:[%s10046_s4 + $0x10] sm:$0xff]  ;;  %s9578_s4 = smov 22  }
 0x4d1   :  { %v2214_v49 = vmul.f32 %v10164_v43, %v10085_v8  ;;  %v2209_v50 = vmul.f32 %v10164_v43, %v10070_v24  ;;  %v2215_v51 = vmul.f32 %v10164_v43, %v10087_v6  ;;  %v2210_v21 = vmul.f32 %v10164_v43, %v10073_v22  ;;  %s6932_s12 = sld [smem:[%s13055_s0 + %s9578_s4]]  }
 0x4d2   :  { %v2229_v30 = vadd.f32 %v10166_v44, %v2207_v46  ;;  %v2235_v12 = vadd.f32 %v10166_v44, %v2213_v47  ;;  %v2230_v58 = vadd.f32 %v10166_v44, %v2208_v48  ;;  %v2216_v22 = vmul.f32 %v10164_v43, %v10089_v31 }
 0x4d3   :  { %v2236_v8 = vadd.f32 %v10166_v44, %v2214_v49  ;;  %v2231_v24 = vadd.f32 %v10166_v44, %v2209_v50  ;;  %v2237_v53 = vadd.f32 %v10166_v44, %v2215_v51  ;;  %v2232_v6 = vadd.f32 %v10166_v44, %v2210_v21  ;;  %v2287_v49 = vld [vmem:[%s10161_s28 + $0x10] sm:$0xff]  ;;  %v2288_v50 = vld [vmem:[%s10161_s28 + $0x18] sm:$0xff]  ;;  %s6938_s28 = sld [smem:[%s13055_s0 + %s9580_s23]]  }
 0x4d4   :  { %v2245_v54 = vmul.f32 0.01, %v2229_v30  ;;  %v2251_v55 = vmul.f32 0.01, %v2235_v12  ;;  %v9033_v56 = vpack.c.bf16 %v2280_v52, %v2279_v17  ;;  %v2246_v60 = vmul.f32 0.01, %v2230_v58 }
 0x4d5   :  { %v2252_v61 = vmul.f32 0.01, %v2236_v8  ;;  %v2247_v62 = vmul.f32 0.01, %v2231_v24  ;;  %v2211_v63 = vmul.f32 %v10164_v43, %v10076_v27  ;;  %v2253_v3 = vmul.f32 0.01, %v2237_v53 }
 0x4d6   :  { %v10199_v1 = vmax.f32 %v2229_v30, %v2245_v54  ;;  %v10201_v2 = vmax.f32 %v2235_v12, %v2251_v55  ;;  %v2248_v4 = vmul.f32 0.01, %v2232_v6  ;;  %v10203_v5 = vmax.f32 %v2230_v58, %v2246_v60 }
 0x4d7   :  { %v10205_v7 = vmax.f32 %v2236_v8, %v2252_v61  ;;  %v2238_v31 = vadd.f32 %v10166_v44, %v2216_v22  ;;  %v10212_v27 = vmax.f32 %v2231_v24, %v2247_v62  ;;  %v10214_v10 = vmax.f32 %v2237_v53, %v2253_v3 }
 0x4d8   :  { %8205 = vmatprep.mubr.msk.f32.mxu0 %vm13119_vm5, %v10199_v1  ;;  %8214 = vmatprep.mubr.msk.f32.mxu1 %vm13119_vm5, %v10201_v2  ;;  %v2233_v14 = vadd.f32 %v10166_v44, %v2211_v63  ;;  %v2217_v16 = vmul.f32 %v10164_v43, %v10091_v0  ;;  %v2212_v19 = vmul.f32 %v10164_v43, %v10079_v29 }
 0x4d9   :  { %8206 = vmatmul.mubr.msk.f32.vlgmr.msra.gmra.mrb[22].mxu0 %vm13119_vm5, %v10203_v5  ;;  %8215 = vmatmul.mubr.msk.f32.vlgmr.msra.gmra.mrb[34].mxu1 %vm13119_vm5, %v10205_v7  ;;  %v2254_v15 = vmul.f32 0.01, %v2238_v31  ;;  %v2218_v20 = vmul.f32 %v10164_v43, %v10093_v13  ;;  %v10231_v26 = vmax.f32 %v2232_v6, %v2248_v4  ;;  %v2219_v33 = vmul.f32 %v10164_v43, %v10095_v32 }
 0x4da   :  { %8208 = vmatprep.mubr.msk.f32.mxu0 %vm13119_vm5, %v10212_v27  ;;  %8217 = vmatprep.mubr.msk.f32.mxu1 %vm13119_vm5, %v10214_v10  ;;  %v2249_v28 = vmul.f32 0.01, %v2233_v14  ;;  %v2220_v0 = vmul.f32 %v10164_v43, %v10097_v18  ;;  %v2239_v13 = vadd.f32 %v10166_v44, %v2217_v16  ;;  %v2234_v11 = vadd.f32 %v10166_v44, %v2212_v19 }
 0x4db   :  { %9032 = vmatpush3.bf16.msra.mxu0 %v10051_v42  ;;  %v10238_v29 = vmax.f32 %v2238_v31, %v2254_v15  ;;  %v2240_v40 = vadd.f32 %v10166_v44, %v2218_v20  ;;  %v2241_v35 = vadd.f32 %v10166_v44, %v2219_v33  ;;  %v2222_v32 = vmul.f32 %v10164_v43, %v10101_v25 }
 0x4dc   :  { %v2265_v34 = vmax.f32 %v2233_v14, %v2249_v28  ;;  %9034 = vmatprep.subr.bf16.mxu0 %v9033_v56  ;;  %v2242_v36 = vadd.f32 %v10166_v44, %v2220_v0  ;;  %v2243_v18 = vadd.f32 %v10166_v44, %v2221_v45  ;;  %v2255_v42 = vmul.f32 0.01, %v2239_v13 }
 0x4dd   :  { %8209 = vmatmul.mubr.msk.f32.gmra.mrb[24].mxu0 %vm13119_vm5, %v10231_v26  ;;  %8218 = vmatmul.mubr.msk.f32.gmra.mrb[36].mxu1 %vm13119_vm5, %v10238_v29  ;;  %v2250_v37 = vmul.f32 0.01, %v2234_v11  ;;  %v2256_v38 = vmul.f32 0.01, %v2240_v40  ;;  %v2257_v39 = vmul.f32 0.01, %v2241_v35  ;;  %v2244_v45 = vadd.f32 %v10166_v44, %v2222_v32 }
 0x4de   :  { %8211 = vmatprep.mubr.msk.f32.mxu0 %vm13119_vm5, %v2265_v34  ;;  %v2271_v41 = vmax.f32 %v2239_v13, %v2255_v42  ;;  %v2258_v43 = vmul.f32 0.01, %v2242_v36  ;;  %v2259_v47 = vmul.f32 0.01, %v2243_v18  ;;  %v9041_v17 = vpack.c.bf16 %v2288_v50, %v2287_v49 }
 0x4df   :  { %9036 = vmatpush3.bf16.msra.mxu0 %v9033_v56  ;;  %v2266_v46 = vmax.f32 %v2234_v11, %v2250_v37  ;;  %v2272_v25 = vmax.f32 %v2240_v40, %v2256_v38  ;;  %v2273_v48 = vmax.f32 %v2241_v35, %v2257_v39  ;;  %v2260_v21 = vmul.f32 0.01, %v2244_v45 }
 0x4e0   :  { %9038 = vmatprep.subr.bf16.mxu0 %v9037_v9  ;;  %8220 = vmatprep.mubr.msk.f32.mxu1 %vm13119_vm5, %v2271_v41  ;;  %v2274_v51 = vmax.f32 %v2242_v36, %v2258_v43  ;;  %v2275_v44 = vmax.f32 %v2243_v18, %v2259_v47 }
 0x4e1   :  { %8212 = vmatmul.mubr.msk.f32.gmra.mrb[26].mxu0 %vm13119_vm5, %v2266_v46  ;;  %8221 = vmatmul.mubr.msk.f32.gmra.mrb[38].mxu1 %vm13119_vm5, %v2272_v25  ;;  %v2276_v52 = vmax.f32 %v2244_v45, %v2260_v21 }
 0x4e2   :  { %8237 = vmatprep.mubr.msk.f32.mxu0 %vm13119_vm5, %v10199_v1  ;;  %8223 = vmatprep.mubr.msk.f32.mxu1 %vm13119_vm5, %v2273_v48 }
 0x4e5   :  { %8238 = vmatmul.mubr.msk.f32.vlgmr.msra.gmra.mrb[28].mxu0 %vm13119_vm5, %v10203_v5  ;;  %8224 = vmatmul.mubr.msk.f32.gmra.mrb[40].mxu1 %vm13119_vm5, %v2274_v51 }
 0x4e6   :  { %8240 = vmatprep.mubr.msk.f32.mxu0 %vm13119_vm5, %v10212_v27  ;;  %8226 = vmatprep.mubr.msk.f32.mxu1 %vm13119_vm5, %v2275_v44 }
 0x4e7   :  { %9040 = vmatpush3.bf16.msra.mxu0 %v9037_v9 }
 0x4e8   :  { %9042 = vmatprep.subr.bf16.mxu0 %v9041_v17 }
 0x4e9   :  { %8241 = vmatmul.mubr.msk.f32.gmra.mrb[30].mxu0 %vm13119_vm5, %v10231_v26  ;;  %8227 = vmatmul.mubr.msk.f32.gmra.mrb[42].mxu1 %vm13119_vm5, %v2276_v52 }
 0x4ea   :  { %8243 = vmatprep.mubr.msk.f32.mxu0 %vm13119_vm5, %v2265_v34 }
 0x4eb   :  { %9044 = vmatpush3.bf16.msra.mxu0 %v9041_v17 }
 0x4ed   :  { %8244 = vmatmul.mubr.msk.f32.gmra.mrb[32].mxu0 %vm13119_vm5, %v2266_v46 }
 0x4ee   :  { %8246 = vmatprep.mubr.msk.f32.mxu0 %vm13119_vm5, %v10201_v2 }
 0x4f1   :  { %8247 = vmatmul.mubr.msk.f32.gmra.mrb[34].mxu0 %vm13119_vm5, %v10205_v7 }
 0x4f2   :  { %8249 = vmatprep.mubr.msk.f32.mxu0 %vm13119_vm5, %v10214_v10 }
 0x4f5   :  { %8250 = vmatmul.mubr.msk.f32.gmra.mrb[36].mxu0 %vm13119_vm5, %v10238_v29 }
 0x4f6   :  { %8252 = vmatprep.mubr.msk.f32.mxu0 %vm13119_vm5, %v2271_v41 }
 0x4f9   :  { %8253 = vmatmul.mubr.msk.f32.gmra.mrb[38].mxu0 %vm13119_vm5, %v2272_v25 }
 0x4fa   :  { %8255 = vmatprep.mubr.msk.f32.mxu0 %vm13119_vm5, %v2273_v48 }
 0x4fd   :  { %8256 = vmatmul.mubr.msk.f32.gmra.mrb[40].mxu0 %vm13119_vm5, %v2274_v51 }
 0x4fe   :  { %8258 = vmatprep.mubr.msk.f32.mxu0 %vm13119_vm5, %v2275_v44 }
 0x501   :  { %8259 = vmatmul.mubr.msk.f32.gmra.mrb[42].mxu0 %vm13119_vm5, %v2276_v52 }
 0x502   :  { %8269 = vmatprep.mubr.msk.f32.mxu0 %vm13119_vm5, %v10199_v1 }
 0x505   :  { %8270 = vmatmul.mubr.msk.f32.vlgmr.msra.gmra.mrb[36].mxu0 %vm13119_vm5, %v10203_v5 }
 0x506   :  { %8272 = vmatprep.mubr.msk.f32.mxu0 %vm13119_vm5, %v10212_v27 }
 0x509   :  { %8273 = vmatmul.mubr.msk.f32.gmra.mrb[38].mxu0 %vm13119_vm5, %v10231_v26 }
 0x50a   :  { %8275 = vmatprep.mubr.msk.f32.mxu0 %vm13119_vm5, %v2265_v34 }
 0x50d   :  { %8276 = vmatmul.mubr.msk.f32.gmra.mrb[40].mxu0 %vm13119_vm5, %v2266_v46 }
 0x50e   :  { %8278 = vmatprep.mubr.msk.f32.mxu0 %vm13119_vm5, %v10201_v2 }
 0x511   :  { %8279 = vmatmul.mubr.msk.f32.gmra.mrb[42].mxu0 %vm13119_vm5, %v10205_v7 }
 0x512   :  { %8281 = vmatprep.mubr.msk.f32.mxu0 %vm13119_vm5, %v10214_v10 }
 0x515   :  { %8282 = vmatmul.mubr.msk.f32.gmra.mrb[32].mxu0 %vm13119_vm5, %v10238_v29 }
 0x516   :  { %8284 = vmatprep.mubr.msk.f32.mxu0 %vm13119_vm5, %v2271_v41 }
 0x519   :  { %8285 = vmatmul.mubr.msk.f32.gmra.mrb[34].mxu0 %vm13119_vm5, %v2272_v25 }
 0x51a   :  { %8287 = vmatprep.mubr.msk.f32.mxu0 %vm13119_vm5, %v2273_v48 }
 0x51d   :  { %8288 = vmatmul.mubr.msk.f32.gmra.mrb[30].mxu0 %vm13119_vm5, %v2274_v51 }
 0x51e   :  { %8290 = vmatprep.mubr.msk.f32.mxu0 %vm13119_vm5, %v2275_v44 }
 0x521   :  { %8291 = vmatmul.mubr.msk.f32.gmra.mrb[44].mxu0 %vm13119_vm5, %v2276_v52  ;;  %vm6699_vm5 = vcmask 121856  }
 0x5ac   :  { %v10311_v30 = vpop.f32.mrb[22].mxu0  ;;  %v10313_v12 = vpop.f32.mrb[34].mxu1 }
 0x5ad   :  { %v2783_v58 = vsel %vm153_vm0, %v10311_v30, 0.0  ;;  %v10317_v8 = vpop.f32.mrb[23].mxu0  ;;  %v10319_v24 = vpop.f32.mrb[35].mxu1  ;;  %v2795_v20 = vsel %vm153_vm0, %v10313_v12, 0.0 }
 0x5ae   :  { %v2782_v53 = vsel %vm153_vm0, %v10317_v8, 0.0  ;;  %v2793_v14 = vsel %vm153_vm0, %v10319_v24, 0.0 }
 0x5af   :  { %v2784_v6 = vadd.f32 %v2783_v58, %v2782_v53 }
 0x5b0   :  { %v10323_v54 = vpop.f32.mrb[24].mxu0  ;;  %v10325_v55 = vpop.f32.mrb[36].mxu1 }
 0x5b1   :  { %v10327_v22 = vpop.f32.mrb[25].mxu0  ;;  %v10329_v56 = vpop.f32.mrb[37].mxu1  ;;  %v2787_v60 = vsel %vm153_vm0, %v10323_v54, 0.0  ;;  %v2799_v11 = vsel %vm153_vm0, %v10325_v55, 0.0 }
 0x5b2   :  { %v2785_v57 = vsel %vm153_vm0, %v10327_v22, 0.0  ;;  %v2797_v0 = vsel %vm153_vm0, %v10329_v56, 0.0 }
 0x5b3   :  { %v2786_v59 = vadd.f32 %v2785_v57, %v2784_v6 }
 0x5b4   :  { %v10335_v61 = vpop.f32.mrb[26].mxu0  ;;  %v10337_v62 = vpop.f32.mrb[38].mxu1 }
 0x5b5   :  { %v10339_v63 = vpop.f32.mrb[27].mxu0  ;;  %v2788_v1 = vadd.f32 %v2787_v60, %v2786_v59  ;;  %v10343_v3 = vpop.f32.mrb[39].mxu1  ;;  %v2791_v5 = vsel %vm153_vm0, %v10335_v61, 0.0  ;;  %v2803_v36 = vsel %vm153_vm0, %v10337_v62, 0.0 }
 0x5b6   :  { %v2789_v2 = vsel %vm153_vm0, %v10339_v63, 0.0  ;;  %v2801_v34 = vsel %vm153_vm0, %v10343_v3, 0.0 }
 0x5b7   :  { %v2790_v4 = vadd.f32 %v2789_v2, %v2788_v1 }
 0x5b8   :  { %v10347_v7 = vpop.f32.mrb[28].mxu0  ;;  %v10349_v9 = vpop.f32.mrb[40].mxu1 }
 0x5b9   :  { %v2792_v31 = vadd.f32 %v2791_v5, %v2790_v4  ;;  %v2632_v27 = vrot.slane %v10347_v7, 2  ;;  %v2550_v10 = vpop.f32.mrb[29].mxu0  ;;  %v10354_v15 = vpop.f32.mrb[41].mxu1  ;;  %v2807_v37 = vsel %vm153_vm0, %v10349_v9, 0.0 }
 0x5ba   :  { %v2631_v16 = vrot.slane %v2550_v10, 2  ;;  %v2805_v18 = vsel %vm153_vm0, %v10354_v15, 0.0 }
 0x5bb   :  { %v2794_v19 = vadd.f32 %v2793_v14, %v2792_v31 }
 0x5bc   :  { %v10361_v26 = vsel %vm893_vm3, %v2631_v16, %v2632_v27  ;;  %v10363_v33 = vpop.f32.mrb[42].mxu1 }
 0x5bd   :  { %v2796_v28 = vadd.f32 %v2795_v20, %v2794_v19  ;;  %v10367_v29 = vpop.f32.mrb[43].mxu1  ;;  %v2811_v46 = vsel %vm153_vm0, %v10363_v33, 0.0 }
 0x5be   :  { %v2809_v39 = vsel %vm153_vm0, %v10367_v29, 0.0 }
 0x5bf   :  { %v2798_v13 = vadd.f32 %v2797_v0, %v2796_v28 }
 0x5c1   :  { %v2800_v40 = vadd.f32 %v2799_v11, %v2798_v13 }
 0x5c3   :  { %v2802_v35 = vadd.f32 %v2801_v34, %v2800_v40 }
 0x5c5   :  { %v2804_v32 = vadd.f32 %v2803_v36, %v2802_v35 }
 0x5c7   :  { %v2806_v42 = vadd.f32 %v2805_v18, %v2804_v32 }
 0x5c9   :  { %v2808_v38 = vadd.f32 %v2807_v37, %v2806_v42 }
 0x5cb   :  { %v2810_v41 = vadd.f32 %v2809_v39, %v2808_v38 }
 0x5cd   :  { %v2812_v25 = vadd.f32 %v2811_v46, %v2810_v41  ;;  %v2636_v41 = vsel %vm893_vm3, %v2632_v27, 0.0 }
 0x5d8   :  { %v10383_v43 = vpop.f32.mrb[36].mxu0 }
 0x5d9   :  { %v10385_v45 = vpop.f32.mrb[37].mxu0  ;;  %v2815_v49 = vsel %vm153_vm0, %v10383_v43, 0.0 }
 0x5da   :  { %v2813_v47 = vsel %vm153_vm0, %v10385_v45, 0.0 }
 0x5db   :  { %v2814_v48 = vadd.f32 %v2813_v47, %v2812_v25 }
 0x5dc   :  { %v10391_v50 = vpop.f32.mrb[38].mxu0 }
 0x5dd   :  { %v10393_v51 = vpop.f32.mrb[39].mxu0  ;;  %v2816_v21 = vadd.f32 %v2815_v49, %v2814_v48  ;;  %v2819_v52 = vsel %vm153_vm0, %v10391_v50, 0.0 }
 0x5de   :  { %v2817_v17 = vsel %vm153_vm0, %v10393_v51, 0.0 }
 0x5df   :  { %v2818_v44 = vadd.f32 %v2817_v17, %v2816_v21 }
 0x5e0   :  { %v10399_v58 = vpop.f32.mrb[40].mxu0 }
 0x5e1   :  { %v10401_v53 = vpop.f32.mrb[41].mxu0  ;;  %v2820_v6 = vadd.f32 %v2819_v52, %v2818_v44  ;;  %v2823_v60 = vsel %vm153_vm0, %v10399_v58, 0.0 }
 0x5e2   :  { %v2821_v57 = vsel %vm153_vm0, %v10401_v53, 0.0 }
 0x5e3   :  { %v2822_v59 = vadd.f32 %v2821_v57, %v2820_v6 }
 0x5e4   :  { %v10407_v1 = vpop.f32.mrb[42].mxu0 }
 0x5e5   :  { %v10409_v2 = vpop.f32.mrb[43].mxu0  ;;  %v2824_v4 = vadd.f32 %v2823_v60, %v2822_v59  ;;  %v2827_v10 = vsel %vm153_vm0, %v10407_v1, 0.0  ;;  %v3130_v59 = vld [vmem:[%s6933_s8] sm:$0xff]  ;;  %v3131_v60 = vld [vmem:[%s6933_s8 + $0x8] sm:$0xff]  ;;  %s6940_s8 = sld [smem:[%s13055_s0 + %s9581_s29]]  }
 0x5e6   :  { %v2825_v5 = vsel %vm153_vm0, %v10409_v2, 0.0 }
 0x5e7   :  { %v2826_v31 = vadd.f32 %v2825_v5, %v2824_v4  ;;  %v9049_v4 = vpack.c.bf16 %v3131_v60, %v3130_v59 }
 0x5e8   :  { %v10415_v14 = vpop.f32.mrb[32].mxu0 }
 0x5e9   :  { %v10417_v16 = vpop.f32.mrb[33].mxu0  ;;  %v2828_v19 = vadd.f32 %v2827_v10, %v2826_v31  ;;  %v2831_v0 = vsel %vm153_vm0, %v10415_v14, 0.0  ;;  %9050 = vmatprep.subr.bf16.mxu0 %v9049_v4 }
 0x5ea   :  { %v2829_v20 = vsel %vm153_vm0, %v10417_v16, 0.0  ;;  %9052 = vmatpush3.bf16.msra.mxu0 %v9049_v4 }
 0x5eb   :  { %v2830_v28 = vadd.f32 %v2829_v20, %v2828_v19 }
 0x5ec   :  { %v10423_v13 = vpop.f32.mrb[34].mxu0 }
 0x5ed   :  { %v2753_v11 = vpop.f32.mrb[35].mxu0  ;;  %v2832_v40 = vadd.f32 %v2831_v0, %v2830_v28  ;;  %v2835_v36 = vsel %vm153_vm0, %v10423_v13, 0.0 }
 0x5ee   :  { %v2833_v34 = vsel %vm153_vm0, %v2753_v11, 0.0 }
 0x5ef   :  { %v2834_v35 = vadd.f32 %v2833_v34, %v2832_v40 }
 0x5f0   :  { %v8289_v32 = vpop.f32.mrb[30].mxu0 }
 0x5f1   :  { %v2763_v18 = vpop.f32.mrb[31].mxu0  ;;  %v2836_v42 = vadd.f32 %v2835_v36, %v2834_v35  ;;  %v2839_v39 = vsel %vm153_vm0, %v8289_v32, 0.0 }
 0x5f2   :  { %v2837_v37 = vsel %vm153_vm0, %v2763_v18, 0.0 }
 0x5f3   :  { %v2838_v38 = vadd.f32 %v2837_v37, %v2836_v42 }
 0x5f4   :  { %v8292_v46 = vpop.f32.mrb[44].mxu0 }
 0x5f5   :  { %v2840_v25 = vadd.f32 %v2839_v39, %v2838_v38  ;;  %v2779_v47 = vadd.f32 %v8292_v46, %v2636_v41  ;;  %v2773_v48 = vpop.f32.mrb[45].mxu0 }
 0x5f6   :  { %v2774_v49 = vadd.f32 %v2773_v48, %v10361_v26 }
 0x5f7   :  { %v2843_v44 = vsel %vm153_vm0, %v2779_v47, 0.0 }
 0x5f8   :  { %v2841_v21 = vsel %vm153_vm0, %v2774_v49, 0.0 }
 0x5f9   :  { %v2842_v17 = vadd.f32 %v2841_v21, %v2840_v25  ;;  %v3132_v25 = vld [vmem:[%s6934_s17] sm:$0xff] }
 0x5fa   :  { %v3134_v21 = vld [vmem:[%s6935_s24] sm:$0xff] }
 0x5fb   :  { %v2844_v52 = vadd.f32 %v2843_v44, %v2842_v17  ;;  %v3135_v17 = vld [vmem:[%s6935_s24 + $0x8] sm:$0xff]  ;;  %s6937_s24 = sld [smem:[%s13055_s0 + %s9583_s19]]  }
 0x5fd   :  { %v2845_v6 = vrot.slane %v2844_v52, 4 }
 0x5ff   :  { %v2846_v7 = vadd.f32 %v2845_v6, %v2844_v52 }
 0x601   :  { %v2847_v27 = vrot.slane %v2846_v7, 2 }
 0x603   :  { %v2848_v57 = vadd.f32 %v2847_v27, %v2846_v7 }
 0x605   :  { %v2849_v5 = vrot.slane %v2848_v57, 1 }
 0x607   :  { %v2850_v26 = vadd.f32 %v2849_v5, %v2848_v57  ;;  %v10558_v57 = vpack.c.bf16 %v3135_v17, %v3134_v21 }
 0x609   :  { %v2852_v31 = vmul.f32 0.00390625, %v2850_v26  ;;  %9054 = vmatprep.subr.bf16.mxu0 %v10558_v57 }
 0x60b   :  { %v10440_v10 = vsub.f32 %v10317_v8, %v2852_v31  ;;  %v10443_v19 = vsub.f32 %v10311_v30, %v2852_v31  ;;  %v10446_v20 = vsub.f32 %v10327_v22, %v2852_v31  ;;  %v10449_v28 = vsub.f32 %v10323_v54, %v2852_v31 }
 0x60c   :  { %v10452_v0 = vsub.f32 %v10339_v63, %v2852_v31  ;;  %v10455_v40 = vsub.f32 %v10335_v61, %v2852_v31  ;;  %v10458_v34 = vsub.f32 %v10319_v24, %v2852_v31  ;;  %v10461_v8 = vsub.f32 %v10313_v12, %v2852_v31 }
 0x60d   :  { %v10464_v30 = vsub.f32 %v10329_v56, %v2852_v31  ;;  %v10467_v22 = vsub.f32 %v10325_v55, %v2852_v31  ;;  %v10470_v54 = vsub.f32 %v10343_v3, %v2852_v31  ;;  %v10473_v63 = vsub.f32 %v10337_v62, %v2852_v31 }
 0x60e   :  { %v10476_v61 = vsub.f32 %v10354_v15, %v2852_v31  ;;  %v10479_v24 = vsub.f32 %v10349_v9, %v2852_v31  ;;  %v10482_v12 = vsub.f32 %v10367_v29, %v2852_v31  ;;  %v10485_v56 = vsub.f32 %v10363_v33, %v2852_v31 }
 0x60f   :  { %v10488_v55 = vsub.f32 %v10385_v45, %v2852_v31  ;;  %v10491_v3 = vsub.f32 %v10383_v43, %v2852_v31  ;;  %v10494_v62 = vsub.f32 %v10393_v51, %v2852_v31  ;;  %v10497_v15 = vsub.f32 %v10391_v50, %v2852_v31 }
 0x610   :  { %v10500_v9 = vsub.f32 %v10401_v53, %v2852_v31  ;;  %v10503_v29 = vsub.f32 %v10399_v58, %v2852_v31  ;;  %v10506_v33 = vsub.f32 %v10409_v2, %v2852_v31  ;;  %v10509_v45 = vsub.f32 %v10407_v1, %v2852_v31 }
 0x611   :  { %v10512_v43 = vsub.f32 %v10417_v16, %v2852_v31  ;;  %v10515_v51 = vsub.f32 %v10415_v14, %v2852_v31  ;;  %v10517_v50 = vsub.f32 %v2753_v11, %v2852_v31  ;;  %v10520_v53 = vsub.f32 %v10423_v13, %v2852_v31 }
 0x612   :  { %v10522_v35 = vsub.f32 %v2763_v18, %v2852_v31  ;;  %v10524_v58 = vsub.f32 %v8289_v32, %v2852_v31  ;;  %v10526_v2 = vsub.f32 %v2774_v49, %v2852_v31  ;;  %v10528_v36 = vsub.f32 %v2779_v47, %v2852_v31  ;;  %v3133_v49 = vld [vmem:[%s6934_s17 + $0x8] sm:$0xff]  ;;  %s6936_s17 = sld [smem:[%s13055_s0 + %s9582_s11]]  }
 0x613   :  { %v2885_v1 = vmul.f32 %v10440_v10, %v10440_v10  ;;  %v2886_v14 = vmul.f32 %v10443_v19, %v10443_v19  ;;  %v2887_v16 = vmul.f32 %v10446_v20, %v10446_v20  ;;  %v2888_v13 = vmul.f32 %v10449_v28, %v10449_v28 }
 0x614   :  { %v2889_v42 = vmul.f32 %v10452_v0, %v10452_v0  ;;  %v2890_v39 = vmul.f32 %v10455_v40, %v10455_v40  ;;  %v2891_v47 = vmul.f32 %v10458_v34, %v10458_v34  ;;  %v2892_v52 = vmul.f32 %v10461_v8, %v10461_v8 }
 0x615   :  { %v2917_v11 = vsel %vm153_vm0, %v2885_v1, 0.0  ;;  %v2918_v32 = vsel %vm153_vm0, %v2886_v14, 0.0  ;;  %v2920_v37 = vsel %vm153_vm0, %v2887_v16, 0.0  ;;  %v2922_v41 = vsel %vm153_vm0, %v2888_v13, 0.0 }
 0x616   :  { %v2919_v18 = vadd.f32 %v2918_v32, %v2917_v11  ;;  %v2924_v48 = vsel %vm153_vm0, %v2889_v42, 0.0  ;;  %v2926_v6 = vsel %vm153_vm0, %v2890_v39, 0.0  ;;  %v9045_v27 = vpack.c.bf16 %v3133_v49, %v3132_v25 }
 0x617   :  { %v2893_v59 = vmul.f32 %v10464_v30, %v10464_v30  ;;  %v2928_v60 = vsel %vm153_vm0, %v2891_v47, 0.0  ;;  %v2894_v5 = vmul.f32 %v10467_v22, %v10467_v22  ;;  %v2930_v26 = vsel %vm153_vm0, %v2892_v52, 0.0 }
 0x618   :  { %v2921_v38 = vadd.f32 %v2920_v37, %v2919_v18  ;;  %9046 = vmatprep.subr.bf16.mxu1 %v9045_v27  ;;  %v2895_v1 = vmul.f32 %v10470_v54, %v10470_v54  ;;  %v2896_v13 = vmul.f32 %v10473_v63, %v10473_v63  ;;  %v2897_v18 = vmul.f32 %v10476_v61, %v10476_v61 }
 0x619   :  { %9048 = vmatpush3.bf16.msra.mxu1 %v9045_v27  ;;  %v2932_v14 = vsel %vm153_vm0, %v2893_v59, 0.0  ;;  %v2934_v11 = vsel %vm153_vm0, %v2894_v5, 0.0  ;;  %v2901_v17 = vmul.f32 %v10488_v55, %v10488_v55  ;;  %v2903_v59 = vmul.f32 %v10494_v62, %v10494_v62 }
 0x61a   :  { %v2923_v46 = vadd.f32 %v2922_v41, %v2921_v38  ;;  %v2936_v42 = vsel %vm153_vm0, %v2895_v1, 0.0  ;;  %v2898_v38 = vmul.f32 %v10479_v24, %v10479_v24  ;;  %v2938_v39 = vsel %vm153_vm0, %v2896_v13, 0.0 }
 0x61b   :  { %v2940_v25 = vsel %vm153_vm0, %v2897_v18, 0.0  ;;  %v2904_v5 = vmul.f32 %v10497_v15, %v10497_v15  ;;  %v2905_v1 = vmul.f32 %v10500_v9, %v10500_v9  ;;  %v2906_v13 = vmul.f32 %v10503_v29, %v10503_v29 }
 0x61c   :  { %v2925_v44 = vadd.f32 %v2924_v48, %v2923_v46  ;;  %v2899_v46 = vmul.f32 %v10482_v12, %v10482_v12  ;;  %v2900_v48 = vmul.f32 %v10485_v56, %v10485_v56  ;;  %v2942_v49 = vsel %vm153_vm0, %v2898_v38, 0.0 }
 0x61d   :  { %v2907_v18 = vmul.f32 %v10506_v33, %v10506_v33  ;;  %v2908_v38 = vmul.f32 %v10509_v45, %v10509_v45 }
 0x61e   :  { %v2927_v7 = vadd.f32 %v2926_v6, %v2925_v44  ;;  %v2944_v44 = vsel %vm153_vm0, %v2899_v46, 0.0  ;;  %v2902_v6 = vmul.f32 %v10491_v3, %v10491_v3  ;;  %v2909_v46 = vmul.f32 %v10512_v43, %v10512_v43 }
 0x620   :  { %v2929_v4 = vadd.f32 %v2928_v60, %v2927_v7  ;;  %v2946_v7 = vsel %vm153_vm0, %v2900_v48, 0.0  ;;  %v2948_v60 = vsel %vm153_vm0, %v2901_v17, 0.0  ;;  %v2910_v48 = vmul.f32 %v10515_v51, %v10515_v51 }
 0x621   :  { %v2911_v17 = vmul.f32 %v10517_v50, %v10517_v50 }
 0x622   :  { %v2931_v31 = vadd.f32 %v2930_v26, %v2929_v4  ;;  %v2950_v26 = vsel %vm153_vm0, %v2902_v6, 0.0  ;;  %v2912_v6 = vmul.f32 %v10520_v53, %v10520_v53 }
 0x624   :  { %v2933_v16 = vadd.f32 %v2932_v14, %v2931_v31  ;;  %v2952_v14 = vsel %vm153_vm0, %v2903_v59, 0.0  ;;  %v2913_v59 = vmul.f32 %v10522_v35, %v10522_v35 }
 0x626   :  { %v2935_v32 = vadd.f32 %v2934_v11, %v2933_v16  ;;  %v2954_v11 = vsel %vm153_vm0, %v2904_v5, 0.0  ;;  %v2914_v5 = vmul.f32 %v10524_v58, %v10524_v58 }
 0x628   :  { %v2937_v37 = vadd.f32 %v2936_v42, %v2935_v32  ;;  %v2956_v42 = vsel %vm153_vm0, %v2905_v1, 0.0  ;;  %v2915_v1 = vmul.f32 %v10526_v2, %v10526_v2 }
 0x62a   :  { %v2939_v41 = vadd.f32 %v2938_v39, %v2937_v37  ;;  %v2958_v39 = vsel %vm153_vm0, %v2906_v13, 0.0  ;;  %v2916_v13 = vmul.f32 %v10528_v36, %v10528_v36 }
 0x62c   :  { %v2941_v47 = vadd.f32 %v2940_v25, %v2939_v41  ;;  %v2960_v25 = vsel %vm153_vm0, %v2907_v18, 0.0  ;;  %v2976_v18 = vsel %vm153_vm0, %v2915_v1, 0.0 }
 0x62e   :  { %v2943_v21 = vadd.f32 %v2942_v49, %v2941_v47  ;;  %v2962_v49 = vsel %vm153_vm0, %v2908_v38, 0.0 }
 0x630   :  { %v2945_v52 = vadd.f32 %v2944_v44, %v2943_v21  ;;  %v2964_v44 = vsel %vm153_vm0, %v2909_v46, 0.0 }
 0x632   :  { %v2947_v27 = vadd.f32 %v2946_v7, %v2945_v52  ;;  %v2966_v7 = vsel %vm153_vm0, %v2910_v48, 0.0 }
 0x634   :  { %v2949_v4 = vadd.f32 %v2948_v60, %v2947_v27  ;;  %v2968_v60 = vsel %vm153_vm0, %v2911_v17, 0.0 }
 0x636   :  { %v2951_v31 = vadd.f32 %v2950_v26, %v2949_v4  ;;  %v2970_v26 = vsel %vm153_vm0, %v2912_v6, 0.0 }
 0x638   :  { %v2953_v16 = vadd.f32 %v2952_v14, %v2951_v31  ;;  %v2972_v14 = vsel %vm153_vm0, %v2913_v59, 0.0  ;;  %v10648_v59 = vld [vmem:[%s6932_s12] ss:$0 sm:$0xff] }
 0x63a   :  { %v2955_v32 = vadd.f32 %v2954_v11, %v2953_v16  ;;  %v2974_v11 = vsel %vm153_vm0, %v2914_v5, 0.0 }
 0x63c   :  { %v2957_v37 = vadd.f32 %v2956_v42, %v2955_v32 }
 0x63e   :  { %v2959_v41 = vadd.f32 %v2958_v39, %v2957_v37  ;;  %v2978_v37 = vsel %vm153_vm0, %v2916_v13, 0.0 }
 0x640   :  { %v2961_v47 = vadd.f32 %v2960_v25, %v2959_v41 }
 0x642   :  { %v2963_v21 = vadd.f32 %v2962_v49, %v2961_v47 }
 0x644   :  { %v2965_v52 = vadd.f32 %v2964_v44, %v2963_v21  ;;  %v2289_v44 = vld [vmem:[%s6931_s2] sm:$0x1]  ;;  %s6941_s2 = sld [smem:[%s13055_s0 + %s9584_s27]]  }
 0x646   :  { %v2967_v27 = vadd.f32 %v2966_v7, %v2965_v52 }
 0x648   :  { %v2969_v4 = vadd.f32 %v2968_v60, %v2967_v27 }
 0x64a   :  { %v2971_v31 = vadd.f32 %v2970_v26, %v2969_v4 }
 0x64c   :  { %v2973_v16 = vadd.f32 %v2972_v14, %v2971_v31 }
 0x64e   :  { %v2975_v32 = vadd.f32 %v2974_v11, %v2973_v16 }
 0x650   :  { %v2977_v42 = vadd.f32 %v2976_v18, %v2975_v32 }
 0x652   :  { %v2979_v38 = vadd.f32 %v2978_v37, %v2977_v42 }
 0x654   :  { %v2980_v39 = vrot.slane %v2979_v38, 4 }
 0x656   :  { %v2981_v41 = vadd.f32 %v2980_v39, %v2979_v38 }
 0x658   :  { %v2982_v46 = vrot.slane %v2981_v41, 2 }
 0x65a   :  { %v2983_v25 = vadd.f32 %v2982_v46, %v2981_v41 }
 0x65c   :  { %v2984_v47 = vrot.slane %v2983_v25, 1 }
 0x65e   :  { %v2985_v48 = vadd.f32 %v2984_v47, %v2983_v25 }
 0x660   :  { %v2986_v49 = vmul.f32 0.00390625, %v2985_v48 }
 0x662   :  { %v2987_v21 = vadd.f32 1e-05, %v2986_v49 }
 0x664   :  { %9292 = vrsqrt.f32 %v2987_v21 }
 0x66e   :  { %v9293_v17 = vpop.eup %9292 }
 0x66f   :  { %v2989_v52 = vmul.f32 %v9293_v17, %v2289_v44 }
 0x671   :  { %v10642_v6 = vrot.slane %v2989_v52, %v9750_v23 }
 0x673   :  { %v2996_v7 = vmul.f32 %v10642_v6, %v10440_v10  ;;  %v2997_v27 = vmul.f32 %v10642_v6, %v10443_v19  ;;  %v2998_v60 = vmul.f32 %v10642_v6, %v10446_v20  ;;  %v2999_v4 = vmul.f32 %v10642_v6, %v10449_v28 }
 0x674   :  { %v3000_v31 = vmul.f32 %v10642_v6, %v10452_v0  ;;  %v3001_v19 = vmul.f32 %v10642_v6, %v10455_v40  ;;  %v3002_v20 = vmul.f32 %v10642_v6, %v10458_v34  ;;  %v3003_v0 = vmul.f32 %v10642_v6, %v10461_v8 }
 0x675   :  { %v3034_v5 = vadd.f32 %v10648_v59, %v2996_v7  ;;  %v3035_v26 = vadd.f32 %v10648_v59, %v2997_v27  ;;  %v3036_v10 = vadd.f32 %v10648_v59, %v2998_v60  ;;  %v3037_v1 = vadd.f32 %v10648_v59, %v2999_v4 }
 0x676   :  { %v3038_v28 = vadd.f32 %v10648_v59, %v3000_v31  ;;  %v3039_v18 = vadd.f32 %v10648_v59, %v3001_v19  ;;  %v3004_v42 = vmul.f32 %v10642_v6, %v10464_v30  ;;  %v3040_v37 = vadd.f32 %v10648_v59, %v3002_v20 }
 0x677   :  { %v3066_v14 = vmul.f32 0.01, %v3034_v5  ;;  %v3067_v16 = vmul.f32 0.01, %v3035_v26  ;;  %v3068_v13 = vmul.f32 0.01, %v3036_v10  ;;  %v3005_v8 = vmul.f32 %v10642_v6, %v10467_v22 }
 0x678   :  { %v3069_v40 = vmul.f32 0.01, %v3037_v1  ;;  %v3070_v38 = vmul.f32 0.01, %v3038_v28  ;;  %v3041_v30 = vadd.f32 %v10648_v59, %v3003_v0  ;;  %v3071_v39 = vmul.f32 0.01, %v3039_v18 }
 0x679   :  { %v10665_v11 = vmax.f32 %v3035_v26, %v3067_v16  ;;  %v10667_v32 = vmax.f32 %v3034_v5, %v3066_v14  ;;  %v10679_v34 = vmax.f32 %v3036_v10, %v3068_v13  ;;  %v3006_v46 = vmul.f32 %v10642_v6, %v10470_v54 }
 0x67a   :  { %v10693_v41 = vmax.f32 %v3037_v1, %v3069_v40  ;;  %v3042_v25 = vadd.f32 %v10648_v59, %v3004_v42  ;;  %v3072_v47 = vmul.f32 0.01, %v3040_v37  ;;  %v10698_v48 = vmax.f32 %v3038_v28, %v3070_v38 }
 0x67b   :  { %8297 = vmatprep.mubr.msk.f32.mxu1 %vm153_vm0, %v10667_v32  ;;  %8349 = vmatprep.mubr.msk.f32.mxu0 %vm153_vm0, %v10667_v32  ;;  %v3007_v22 = vmul.f32 %v10642_v6, %v10473_v63  ;;  %v3043_v54 = vadd.f32 %v10648_v59, %v3005_v8  ;;  %v10711_v49 = vmax.f32 %v3039_v18, %v3071_v39 }
 0x67c   :  { %8298 = vmatmul.mubr.msk.f32.vlgmr.msra.gmra.mrb[44].mxu1 %vm153_vm0, %v10665_v11  ;;  %8350 = vmatmul.mubr.msk.f32.vlgmr.msra.gmra.mrb[46].mxu0 %vm153_vm0, %v10665_v11  ;;  %v3008_v21 = vmul.f32 %v10642_v6, %v10476_v61  ;;  %v3044_v17 = vadd.f32 %v10648_v59, %v3006_v46  ;;  %v3074_v44 = vmul.f32 0.01, %v3042_v25  ;;  %v10716_v52 = vmax.f32 %v3040_v37, %v3072_v47 }
 0x67d   :  { %8300 = vmatprep.mubr.msk.f32.mxu1 %vm153_vm0, %v10679_v34  ;;  %8352 = vmatprep.mubr.msk.f32.mxu0 %vm153_vm0, %v10679_v34  ;;  %v3009_v63 = vmul.f32 %v10642_v6, %v10479_v24  ;;  %v3045_v61 = vadd.f32 %v10648_v59, %v3007_v22  ;;  %v3075_v7 = vmul.f32 0.01, %v3043_v54  ;;  %v3010_v60 = vmul.f32 %v10642_v6, %v10482_v12 }
 0x67e   :  { %9056 = vmatpush3.bf16.msra.mxu0 %v10558_v57  ;;  %v3073_v57 = vmul.f32 0.01, %v3041_v30  ;;  %v3046_v4 = vadd.f32 %v10648_v59, %v3008_v21  ;;  %v3076_v5 = vmul.f32 0.01, %v3044_v17  ;;  %v10734_v26 = vmax.f32 %v3042_v25, %v3074_v44 }
 0x67f   :  { %v3011_v24 = vmul.f32 %v10642_v6, %v10485_v56  ;;  %v3047_v12 = vadd.f32 %v10648_v59, %v3009_v63  ;;  %v3077_v31 = vmul.f32 0.01, %v3045_v61  ;;  %v10747_v10 = vmax.f32 %v3043_v54, %v3075_v7 }
 0x680   :  { %8301 = vmatmul.mubr.msk.f32.gmra.mrb[46].mxu1 %vm153_vm0, %v10693_v41  ;;  %8353 = vmatmul.mubr.msk.f32.gmra.mrb[48].mxu0 %vm153_vm0, %v10693_v41  ;;  %v10729_v27 = vmax.f32 %v3041_v30, %v3073_v57  ;;  %v3012_v19 = vmul.f32 %v10642_v6, %v10488_v55  ;;  %v3048_v1 = vadd.f32 %v10648_v59, %v3010_v60  ;;  %v3078_v14 = vmul.f32 0.01, %v3046_v4 }
 0x681   :  { %8303 = vmatprep.mubr.msk.f32.mxu1 %vm153_vm0, %v10698_v48  ;;  %8355 = vmatprep.mubr.msk.f32.mxu0 %vm153_vm0, %v10698_v48  ;;  %v10752_v16 = vmax.f32 %v3044_v17, %v3076_v5  ;;  %v3013_v56 = vmul.f32 %v10642_v6, %v10491_v3  ;;  %v3049_v55 = vadd.f32 %v10648_v59, %v3011_v24  ;;  %v3079_v20 = vmul.f32 0.01, %v3047_v12 }
 0x682   :  { %v10765_v28 = vmax.f32 %v3045_v61, %v3077_v31  ;;  %v3014_v13 = vmul.f32 %v10642_v6, %v10494_v62  ;;  %v3050_v0 = vadd.f32 %v10648_v59, %v3012_v19  ;;  %v3080_v18 = vmul.f32 0.01, %v3048_v1 }
 0x683   :  { %v10770_v40 = vmax.f32 %v3046_v4, %v3078_v14  ;;  %v3015_v3 = vmul.f32 %v10642_v6, %v10497_v15  ;;  %v3051_v62 = vadd.f32 %v10648_v59, %v3013_v56  ;;  %v3081_v42 = vmul.f32 0.01, %v3049_v55 }
 0x684   :  { %8304 = vmatmul.mubr.msk.f32.gmra.mrb[48].mxu1 %vm153_vm0, %v10711_v49  ;;  %8356 = vmatmul.mubr.msk.f32.gmra.mrb[50].mxu0 %vm153_vm0, %v10711_v49  ;;  %v10783_v37 = vmax.f32 %v3047_v12, %v3079_v20  ;;  %v3016_v38 = vmul.f32 %v10642_v6, %v10500_v9  ;;  %v3052_v8 = vadd.f32 %v10648_v59, %v3014_v13  ;;  %v3082_v30 = vmul.f32 0.01, %v3050_v0 }
 0x685   :  { %8306 = vmatprep.mubr.msk.f32.mxu1 %vm153_vm0, %v10716_v52  ;;  %8358 = vmatprep.mubr.msk.f32.mxu0 %vm153_vm0, %v10716_v52  ;;  %v10788_v39 = vmax.f32 %v3048_v1, %v3080_v18  ;;  %v3017_v15 = vmul.f32 %v10642_v6, %v10503_v29  ;;  %v3053_v9 = vadd.f32 %v10648_v59, %v3015_v3  ;;  %v3083_v46 = vmul.f32 0.01, %v3051_v62 }
 0x686   :  { %v10801_v25 = vmax.f32 %v3049_v55, %v3081_v42  ;;  %v3018_v47 = vmul.f32 %v10642_v6, %v10506_v33  ;;  %v3054_v22 = vadd.f32 %v10648_v59, %v3016_v38  ;;  %v3084_v54 = vmul.f32 0.01, %v3052_v8 }
 0x687   :  { %v10806_v57 = vmax.f32 %v3050_v0, %v3082_v30  ;;  %v3019_v29 = vmul.f32 %v10642_v6, %v10509_v45  ;;  %v3055_v33 = vadd.f32 %v10648_v59, %v3017_v15  ;;  %v3085_v21 = vmul.f32 0.01, %v3053_v9 }
 0x688   :  { %8307 = vmatmul.mubr.msk.f32.gmra.mrb[50].mxu1 %vm153_vm0, %v10729_v27  ;;  %8359 = vmatmul.mubr.msk.f32.gmra.mrb[52].mxu0 %vm153_vm0, %v10729_v27  ;;  %v10819_v17 = vmax.f32 %v3051_v62, %v3083_v46  ;;  %v3020_v44 = vmul.f32 %v10642_v6, %v10512_v43  ;;  %v3056_v63 = vadd.f32 %v10648_v59, %v3018_v47  ;;  %v3086_v61 = vmul.f32 0.01, %v3054_v22 }
 0x689   :  { %8309 = vmatprep.mubr.msk.f32.mxu1 %vm153_vm0, %v10734_v26  ;;  %8361 = vmatprep.mubr.msk.f32.mxu0 %vm153_vm0, %v10734_v26  ;;  %v10824_v7 = vmax.f32 %v3052_v8, %v3084_v54  ;;  %v3021_v45 = vmul.f32 %v10642_v6, %v10515_v51  ;;  %v3057_v43 = vadd.f32 %v10648_v59, %v3019_v29  ;;  %v3087_v60 = vmul.f32 0.01, %v3055_v33 }
 0x68a   :  { %v10837_v4 = vmax.f32 %v3053_v9, %v3085_v21  ;;  %v3022_v5 = vmul.f32 %v10642_v6, %v10517_v50  ;;  %v3058_v24 = vadd.f32 %v10648_v59, %v3020_v44  ;;  %v3088_v12 = vmul.f32 0.01, %v3056_v63 }
 0x68b   :  { %v10842_v31 = vmax.f32 %v3054_v22, %v3086_v61  ;;  %v3023_v51 = vmul.f32 %v10642_v6, %v10520_v53  ;;  %v3059_v50 = vadd.f32 %v10648_v59, %v3021_v45  ;;  %v3089_v19 = vmul.f32 0.01, %v3057_v43 }
 0x68c   :  { %8310 = vmatmul.mubr.msk.f32.gmra.mrb[52].mxu1 %vm153_vm0, %v10747_v10  ;;  %8362 = vmatmul.mubr.msk.f32.gmra.mrb[54].mxu0 %vm153_vm0, %v10747_v10  ;;  %v10855_v1 = vmax.f32 %v3055_v33, %v3087_v60  ;;  %v3024_v14 = vmul.f32 %v10642_v6, %v10522_v35  ;;  %v3060_v56 = vadd.f32 %v10648_v59, %v3022_v5  ;;  %v3090_v55 = vmul.f32 0.01, %v3058_v24 }
 0x68d   :  { %8312 = vmatprep.mubr.msk.f32.mxu1 %vm153_vm0, %v10752_v16  ;;  %8364 = vmatprep.mubr.msk.f32.mxu0 %vm153_vm0, %v10752_v16  ;;  %v10860_v20 = vmax.f32 %v3056_v63, %v3088_v12  ;;  %v3025_v53 = vmul.f32 %v10642_v6, %v10524_v58  ;;  %v3061_v35 = vadd.f32 %v10648_v59, %v3023_v51  ;;  %v3091_v13 = vmul.f32 0.01, %v3059_v50 }
 0x68e   :  { %v3121_v0 = vmax.f32 %v3057_v43, %v3089_v19  ;;  %v3026_v18 = vmul.f32 %v10642_v6, %v10526_v2  ;;  %v3062_v3 = vadd.f32 %v10648_v59, %v3024_v14  ;;  %v3092_v62 = vmul.f32 0.01, %v3060_v56 }
 0x68f   :  { %v3122_v42 = vmax.f32 %v3058_v24, %v3090_v55  ;;  %v3027_v58 = vmul.f32 %v10642_v6, %v10528_v36  ;;  %v3063_v38 = vadd.f32 %v10648_v59, %v3025_v53  ;;  %v3093_v8 = vmul.f32 0.01, %v3061_v35 }
 0x690   :  { %8313 = vmatmul.mubr.msk.f32.gmra.mrb[54].mxu1 %vm153_vm0, %v10765_v28  ;;  %8365 = vmatmul.mubr.msk.f32.gmra.mrb[56].mxu0 %vm153_vm0, %v10765_v28  ;;  %v3123_v30 = vmax.f32 %v3059_v50, %v3091_v13  ;;  %v3064_v2 = vadd.f32 %v10648_v59, %v3026_v18  ;;  %v3094_v15 = vmul.f32 0.01, %v3062_v3  ;;  %v3124_v9 = vmax.f32 %v3060_v56, %v3092_v62 }
 0x691   :  { %8315 = vmatprep.mubr.msk.f32.mxu1 %vm153_vm0, %v10770_v40  ;;  %8367 = vmatprep.mubr.msk.f32.mxu0 %vm153_vm0, %v10770_v40  ;;  %v3065_v46 = vadd.f32 %v10648_v59, %v3027_v58  ;;  %v3095_v47 = vmul.f32 0.01, %v3063_v38  ;;  %v3125_v36 = vmax.f32 %v3061_v35, %v3093_v8 }
 0x692   :  { %v3096_v6 = vmul.f32 0.01, %v3064_v2  ;;  %v3126_v22 = vmax.f32 %v3062_v3, %v3094_v15 }
 0x693   :  { %v3097_v54 = vmul.f32 0.01, %v3065_v46  ;;  %v3127_v29 = vmax.f32 %v3063_v38, %v3095_v47 }
 0x694   :  { %8316 = vmatmul.mubr.msk.f32.gmra.mrb[56].mxu1 %vm153_vm0, %v10783_v37  ;;  %8368 = vmatmul.mubr.msk.f32.gmra.mrb[58].mxu0 %vm153_vm0, %v10783_v37  ;;  %v3128_v33 = vmax.f32 %v3064_v2, %v3096_v6 }
 0x695   :  { %8318 = vmatprep.mubr.msk.f32.mxu1 %vm153_vm0, %v10788_v39  ;;  %8370 = vmatprep.mubr.msk.f32.mxu0 %vm153_vm0, %v10788_v39  ;;  %v3129_v59 = vmax.f32 %v3065_v46, %v3097_v54 }
 0x698   :  { %8319 = vmatmul.mubr.msk.f32.gmra.mrb[58].mxu1 %vm153_vm0, %v10801_v25  ;;  %8371 = vmatmul.mubr.msk.f32.gmra.mrb[60].mxu0 %vm153_vm0, %v10801_v25 }
 0x699   :  { %8321 = vmatprep.mubr.msk.f32.mxu1 %vm153_vm0, %v10806_v57  ;;  %8373 = vmatprep.mubr.msk.f32.mxu0 %vm153_vm0, %v10806_v57 }
 0x69c   :  { %8322 = vmatmul.mubr.msk.f32.gmra.mrb[60].mxu1 %vm153_vm0, %v10819_v17  ;;  %8374 = vmatmul.mubr.msk.f32.gmra.mrb[62].mxu0 %vm153_vm0, %v10819_v17 }
 0x69d   :  { %8324 = vmatprep.mubr.msk.f32.mxu1 %vm153_vm0, %v10824_v7  ;;  %8376 = vmatprep.mubr.msk.f32.mxu0 %vm153_vm0, %v10824_v7 }
 0x6a0   :  { %8325 = vmatmul.mubr.msk.f32.gmra.mrb[62].mxu1 %vm153_vm0, %v10837_v4  ;;  %8377 = vmatmul.mubr.msk.f32.gmra.mrb[64].mxu0 %vm153_vm0, %v10837_v4 }
 0x6a1   :  { %8327 = vmatprep.mubr.msk.f32.mxu1 %vm153_vm0, %v10842_v31  ;;  %8379 = vmatprep.mubr.msk.f32.mxu0 %vm153_vm0, %v10842_v31 }
 0x6a4   :  { %8328 = vmatmul.mubr.msk.f32.gmra.mrb[64].mxu1 %vm153_vm0, %v10855_v1  ;;  %8380 = vmatmul.mubr.msk.f32.gmra.mrb[66].mxu0 %vm153_vm0, %v10855_v1 }
 0x6a5   :  { %8330 = vmatprep.mubr.msk.f32.mxu1 %vm153_vm0, %v10860_v20  ;;  %8382 = vmatprep.mubr.msk.f32.mxu0 %vm153_vm0, %v10860_v20 }
 0x6a8   :  { %8331 = vmatmul.mubr.msk.f32.gmra.mrb[66].mxu1 %vm153_vm0, %v3121_v0  ;;  %8383 = vmatmul.mubr.msk.f32.gmra.mrb[68].mxu0 %vm153_vm0, %v3121_v0 }
 0x6a9   :  { %8333 = vmatprep.mubr.msk.f32.mxu1 %vm153_vm0, %v3122_v42  ;;  %8385 = vmatprep.mubr.msk.f32.mxu0 %vm153_vm0, %v3122_v42 }
 0x6ac   :  { %8334 = vmatmul.mubr.msk.f32.gmra.mrb[68].mxu1 %vm153_vm0, %v3123_v30  ;;  %8386 = vmatmul.mubr.msk.f32.gmra.mrb[70].mxu0 %vm153_vm0, %v3123_v30 }
 0x6ad   :  { %8336 = vmatprep.mubr.msk.f32.mxu1 %vm153_vm0, %v3124_v9  ;;  %8388 = vmatprep.mubr.msk.f32.mxu0 %vm153_vm0, %v3124_v9 }
 0x6b0   :  { %8337 = vmatmul.mubr.msk.f32.gmra.mrb[70].mxu1 %vm153_vm0, %v3125_v36  ;;  %8389 = vmatmul.mubr.msk.f32.gmra.mrb[72].mxu0 %vm153_vm0, %v3125_v36 }
 0x6b1   :  { %8339 = vmatprep.mubr.msk.f32.mxu1 %vm153_vm0, %v3126_v22  ;;  %8391 = vmatprep.mubr.msk.f32.mxu0 %vm153_vm0, %v3126_v22 }
 0x6b4   :  { %8340 = vmatmul.mubr.msk.f32.gmra.mrb[72].mxu1 %vm153_vm0, %v3127_v29  ;;  %8392 = vmatmul.mubr.msk.f32.gmra.mrb[74].mxu0 %vm153_vm0, %v3127_v29 }
 0x6b5   :  { %8342 = vmatprep.mubr.msk.f32.mxu1 %vm153_vm0, %v3128_v33  ;;  %8394 = vmatprep.mubr.msk.f32.mxu0 %vm153_vm0, %v3128_v33 }
 0x6b8   :  { %8343 = vmatmul.mubr.msk.f32.gmra.mrb[74].mxu1 %vm153_vm0, %v3129_v59  ;;  %8395 = vmatmul.mubr.msk.f32.gmra.mrb[76].mxu0 %vm153_vm0, %v3129_v59 }
 0x6b9   :  { %8401 = vmatprep.mubr.msk.f32.mxu0 %vm153_vm0, %v10667_v32 }
 0x6bc   :  { %8402 = vmatmul.mubr.msk.f32.vlgmr.msra.gmra.mrb[62].mxu0 %vm153_vm0, %v10665_v11 }
 0x6bd   :  { %8404 = vmatprep.mubr.msk.f32.mxu0 %vm153_vm0, %v10679_v34 }
 0x6c0   :  { %8405 = vmatmul.mubr.msk.f32.gmra.mrb[64].mxu0 %vm153_vm0, %v10693_v41 }
 0x6c1   :  { %8407 = vmatprep.mubr.msk.f32.mxu0 %vm153_vm0, %v10698_v48 }
 0x6c4   :  { %8408 = vmatmul.mubr.msk.f32.gmra.mrb[66].mxu0 %vm153_vm0, %v10711_v49 }
 0x6c5   :  { %8410 = vmatprep.mubr.msk.f32.mxu0 %vm153_vm0, %v10716_v52 }
 0x6c8   :  { %8411 = vmatmul.mubr.msk.f32.gmra.mrb[68].mxu0 %vm153_vm0, %v10729_v27 }
 0x6c9   :  { %8413 = vmatprep.mubr.msk.f32.mxu0 %vm153_vm0, %v10734_v26 }
 0x6cc   :  { %8414 = vmatmul.mubr.msk.f32.gmra.mrb[70].mxu0 %vm153_vm0, %v10747_v10 }
 0x6cd   :  { %8416 = vmatprep.mubr.msk.f32.mxu0 %vm153_vm0, %v10752_v16 }
 0x6d0   :  { %8417 = vmatmul.mubr.msk.f32.gmra.mrb[72].mxu0 %vm153_vm0, %v10765_v28 }
 0x6d1   :  { %8419 = vmatprep.mubr.msk.f32.mxu0 %vm153_vm0, %v10770_v40 }
 0x6d4   :  { %8420 = vmatmul.mubr.msk.f32.gmra.mrb[74].mxu0 %vm153_vm0, %v10783_v37 }
 0x6d5   :  { %8422 = vmatprep.mubr.msk.f32.mxu0 %vm153_vm0, %v10788_v39 }
 0x6d8   :  { %8423 = vmatmul.mubr.msk.f32.gmra.mrb[76].mxu0 %vm153_vm0, %v10801_v25 }
 0x6d9   :  { %8425 = vmatprep.mubr.msk.f32.mxu0 %vm153_vm0, %v10806_v57 }
 0x6dc   :  { %8426 = vmatmul.mubr.msk.f32.gmra.mrb[54].mxu0 %vm153_vm0, %v10819_v17 }
 0x6dd   :  { %8428 = vmatprep.mubr.msk.f32.mxu0 %vm153_vm0, %v10824_v7 }
 0x6e0   :  { %8429 = vmatmul.mubr.msk.f32.gmra.mrb[56].mxu0 %vm153_vm0, %v10837_v4 }
 0x6e1   :  { %8431 = vmatprep.mubr.msk.f32.mxu0 %vm153_vm0, %v10842_v31 }
 0x6e4   :  { %8432 = vmatmul.mubr.msk.f32.gmra.mrb[58].mxu0 %vm153_vm0, %v10855_v1 }
 0x6e5   :  { %8434 = vmatprep.mubr.msk.f32.mxu0 %vm153_vm0, %v10860_v20 }
 0x6e8   :  { %8435 = vmatmul.mubr.msk.f32.gmra.mrb[60].mxu0 %vm153_vm0, %v3121_v0 }
 0x6e9   :  { %8437 = vmatprep.mubr.msk.f32.mxu0 %vm153_vm0, %v3122_v42 }
 0x6ec   :  { %8438 = vmatmul.mubr.msk.f32.gmra.mrb[50].mxu0 %vm153_vm0, %v3123_v30 }
 0x6ed   :  { %8440 = vmatprep.mubr.msk.f32.mxu0 %vm153_vm0, %v3124_v9 }
 0x6f0   :  { %8441 = vmatmul.mubr.msk.f32.gmra.mrb[52].mxu0 %vm153_vm0, %v3125_v36 }
 0x6f1   :  { %8443 = vmatprep.mubr.msk.f32.mxu0 %vm153_vm0, %v3126_v22 }
 0x6f4   :  { %8444 = vmatmul.mubr.msk.f32.gmra.mrb[48].mxu0 %vm153_vm0, %v3127_v29 }
 0x6f5   :  { %8446 = vmatprep.mubr.msk.f32.mxu0 %vm153_vm0, %v3128_v33 }
 0x6f8   :  { %8447 = vmatmul.mubr.msk.f32.gmra.mrb[78].mxu0 %vm153_vm0, %v3129_v59 }
 0x74f   :  { %v10954_v11 = vpop.f32.mrb[44].mxu1  ;;  %v10956_v32 = vpop.f32.mrb[46].mxu0 }
 0x750   :  { %v3918_v34 = vsel %vm153_vm0, %v10954_v11, 0.0  ;;  %v13056_v41 = vrot.slane %v10956_v32, 2  ;;  %v10961_v48 = vpop.f32.mrb[45].mxu1  ;;  %v3525_v49 = vpop.f32.mrb[47].mxu0 }
 0x751   :  { %v3917_v52 = vsel %vm153_vm0, %v10961_v48, 0.0  ;;  %v3686_v27 = vrot.slane %v3525_v49, 2 }
 0x752   :  { %v3919_v26 = vadd.f32 %v3918_v34, %v3917_v52 }
 0x753   :  { %v10965_v10 = vpop.f32.mrb[46].mxu1  ;;  %v10970_v16 = vsel %vm893_vm3, %v3686_v27, %v13056_v41 }
 0x754   :  { %v10972_v28 = vpop.f32.mrb[47].mxu1  ;;  %v3922_v39 = vsel %vm153_vm0, %v10965_v10, 0.0 }
 0x755   :  { %v3920_v40 = vsel %vm153_vm0, %v10972_v28, 0.0 }
 0x756   :  { %v3921_v37 = vadd.f32 %v3920_v40, %v3919_v26 }
 0x757   :  { %v10978_v25 = vpop.f32.mrb[48].mxu1 }
 0x758   :  { %v10980_v57 = vpop.f32.mrb[49].mxu1  ;;  %v3923_v21 = vadd.f32 %v3922_v39, %v3921_v37  ;;  %v3926_v63 = vsel %vm153_vm0, %v10978_v25, 0.0 }
 0x759   :  { %v3924_v17 = vsel %vm153_vm0, %v10980_v57, 0.0 }
 0x75a   :  { %v3925_v44 = vadd.f32 %v3924_v17, %v3923_v21 }
 0x75b   :  { %v10986_v61 = vpop.f32.mrb[50].mxu1 }
 0x75c   :  { %v10988_v7 = vpop.f32.mrb[51].mxu1  ;;  %v3927_v45 = vadd.f32 %v3926_v63, %v3925_v44  ;;  %v3930_v4 = vsel %vm153_vm0, %v10986_v61, 0.0 }
 0x75d   :  { %v3928_v43 = vsel %vm153_vm0, %v10988_v7, 0.0 }
 0x75e   :  { %v3929_v60 = vadd.f32 %v3928_v43, %v3927_v45 }
 0x75f   :  { %v10994_v5 = vpop.f32.mrb[52].mxu1 }
 0x760   :  { %v10996_v24 = vpop.f32.mrb[53].mxu1  ;;  %v3931_v12 = vadd.f32 %v3930_v4, %v3929_v60  ;;  %v3934_v50 = vsel %vm153_vm0, %v10994_v5, 0.0 }
 0x761   :  { %v3932_v31 = vsel %vm153_vm0, %v10996_v24, 0.0 }
 0x762   :  { %v3933_v51 = vadd.f32 %v3932_v31, %v3931_v12 }
 0x763   :  { %v11002_v19 = vpop.f32.mrb[54].mxu1 }
 0x764   :  { %v11004_v1 = vpop.f32.mrb[55].mxu1  ;;  %v3935_v14 = vadd.f32 %v3934_v50, %v3933_v51  ;;  %v3938_v20 = vsel %vm153_vm0, %v11002_v19, 0.0 }
 0x765   :  { %v3936_v56 = vsel %vm153_vm0, %v11004_v1, 0.0 }
 0x766   :  { %v3937_v55 = vadd.f32 %v3936_v56, %v3935_v14 }
 0x767   :  { %v11010_v53 = vpop.f32.mrb[56].mxu1 }
 0x768   :  { %v11012_v35 = vpop.f32.mrb[57].mxu1  ;;  %v3939_v13 = vadd.f32 %v3938_v20, %v3937_v55  ;;  %v3942_v3 = vsel %vm153_vm0, %v11010_v53, 0.0 }
 0x769   :  { %v3940_v0 = vsel %vm153_vm0, %v11012_v35, 0.0 }
 0x76a   :  { %v3941_v18 = vadd.f32 %v3940_v0, %v3939_v13 }
 0x76b   :  { %v11018_v62 = vpop.f32.mrb[58].mxu1 }
 0x76c   :  { %v11020_v42 = vpop.f32.mrb[59].mxu1  ;;  %v3943_v58 = vadd.f32 %v3942_v3, %v3941_v18  ;;  %v3946_v30 = vsel %vm153_vm0, %v11018_v62, 0.0 }
 0x76d   :  { %v3944_v38 = vsel %vm153_vm0, %v11020_v42, 0.0 }
 0x76e   :  { %v3945_v8 = vadd.f32 %v3944_v38, %v3943_v58 }
 0x76f   :  { %v11026_v2 = vpop.f32.mrb[60].mxu1 }
 0x770   :  { %v11028_v15 = vpop.f32.mrb[61].mxu1  ;;  %v3947_v9 = vadd.f32 %v3946_v30, %v3945_v8  ;;  %v3950_v36 = vsel %vm153_vm0, %v11026_v2, 0.0 }
 0x771   :  { %v3948_v46 = vsel %vm153_vm0, %v11028_v15, 0.0 }
 0x772   :  { %v3949_v47 = vadd.f32 %v3948_v46, %v3947_v9 }
 0x773   :  { %v11034_v6 = vpop.f32.mrb[62].mxu1 }
 0x774   :  { %v11036_v22 = vpop.f32.mrb[63].mxu1  ;;  %v3951_v54 = vadd.f32 %v3950_v36, %v3949_v47  ;;  %v3954_v59 = vsel %vm153_vm0, %v11034_v6, 0.0 }
 0x775   :  { %v3952_v29 = vsel %vm153_vm0, %v11036_v22, 0.0 }
 0x776   :  { %v3953_v33 = vadd.f32 %v3952_v29, %v3951_v54 }
 0x777   :  { %v11042_v34 = vpop.f32.mrb[64].mxu1 }
 0x778   :  { %v11044_v49 = vpop.f32.mrb[65].mxu1  ;;  %v3955_v52 = vadd.f32 %v3954_v59, %v3953_v33  ;;  %v3958_v40 = vsel %vm153_vm0, %v11042_v34, 0.0 }
 0x779   :  { %v3956_v27 = vsel %vm153_vm0, %v11044_v49, 0.0 }
 0x77a   :  { %v3957_v26 = vadd.f32 %v3956_v27, %v3955_v52 }
 0x77b   :  { %v11050_v37 = vpop.f32.mrb[66].mxu1 }
 0x77c   :  { %v11052_v39 = vpop.f32.mrb[67].mxu1  ;;  %v3959_v21 = vadd.f32 %v3958_v40, %v3957_v26  ;;  %v3962_v63 = vsel %vm153_vm0, %v11050_v37, 0.0 }
 0x77d   :  { %v3960_v17 = vsel %vm153_vm0, %v11052_v39, 0.0 }
 0x77e   :  { %v3961_v44 = vadd.f32 %v3960_v17, %v3959_v21 }
 0x77f   :  { %v11058_v45 = vpop.f32.mrb[68].mxu1 }
 0x780   :  { %v11060_v43 = vpop.f32.mrb[69].mxu1  ;;  %v3963_v60 = vadd.f32 %v3962_v63, %v3961_v44  ;;  %v3966_v31 = vsel %vm153_vm0, %v11058_v45, 0.0 }
 0x781   :  { %v3964_v4 = vsel %vm153_vm0, %v11060_v43, 0.0 }
 0x782   :  { %v3965_v12 = vadd.f32 %v3964_v4, %v3963_v60 }
 0x783   :  { %v11066_v51 = vpop.f32.mrb[70].mxu1 }
 0x784   :  { %v11068_v50 = vpop.f32.mrb[71].mxu1  ;;  %v3967_v14 = vadd.f32 %v3966_v31, %v3965_v12  ;;  %v3970_v20 = vsel %vm153_vm0, %v11066_v51, 0.0 }
 0x785   :  { %v3968_v56 = vsel %vm153_vm0, %v11068_v50, 0.0 }
 0x786   :  { %v3969_v55 = vadd.f32 %v3968_v56, %v3967_v14 }
 0x787   :  { %v11074_v13 = vpop.f32.mrb[72].mxu1 }
 0x788   :  { %v11076_v0 = vpop.f32.mrb[73].mxu1  ;;  %v3971_v18 = vadd.f32 %v3970_v20, %v3969_v55  ;;  %v3974_v38 = vsel %vm153_vm0, %v11074_v13, 0.0 }
 0x789   :  { %v3972_v3 = vsel %vm153_vm0, %v11076_v0, 0.0 }
 0x78a   :  { %v3973_v58 = vadd.f32 %v3972_v3, %v3971_v18 }
 0x78b   :  { %v11082_v8 = vpop.f32.mrb[74].mxu1 }
 0x78c   :  { %v11084_v30 = vpop.f32.mrb[75].mxu1  ;;  %v3975_v9 = vadd.f32 %v3974_v38, %v3973_v58  ;;  %v3978_v36 = vsel %vm153_vm0, %v11082_v8, 0.0 }
 0x78d   :  { %v3976_v46 = vsel %vm153_vm0, %v11084_v30, 0.0 }
 0x78e   :  { %v3977_v47 = vadd.f32 %v3976_v46, %v3975_v9 }
 0x78f   :  { %v11090_v54 = vpop.f32.mrb[62].mxu0 }
 0x790   :  { %v11092_v29 = vpop.f32.mrb[63].mxu0  ;;  %v3979_v33 = vadd.f32 %v3978_v36, %v3977_v47  ;;  %v3982_v27 = vsel %vm153_vm0, %v11090_v54, 0.0 }
 0x791   :  { %v3980_v59 = vsel %vm153_vm0, %v11092_v29, 0.0 }
 0x792   :  { %v3981_v52 = vadd.f32 %v3980_v59, %v3979_v33 }
 0x793   :  { %v11098_v26 = vpop.f32.mrb[64].mxu0 }
 0x794   :  { %v11100_v40 = vpop.f32.mrb[65].mxu0  ;;  %v3983_v21 = vadd.f32 %v3982_v27, %v3981_v52  ;;  %v3986_v63 = vsel %vm153_vm0, %v11098_v26, 0.0 }
 0x795   :  { %v3984_v17 = vsel %vm153_vm0, %v11100_v40, 0.0 }
 0x796   :  { %v3985_v44 = vadd.f32 %v3984_v17, %v3983_v21 }
 0x797   :  { %v11106_v60 = vpop.f32.mrb[66].mxu0 }
 0x798   :  { %v11108_v4 = vpop.f32.mrb[67].mxu0  ;;  %v3987_v12 = vadd.f32 %v3986_v63, %v3985_v44  ;;  %v3990_v56 = vsel %vm153_vm0, %v11106_v60, 0.0 }
 0x799   :  { %v3988_v31 = vsel %vm153_vm0, %v11108_v4, 0.0 }
 0x79a   :  { %v3989_v14 = vadd.f32 %v3988_v31, %v3987_v12 }
 0x79b   :  { %v11114_v55 = vpop.f32.mrb[68].mxu0 }
 0x79c   :  { %v11116_v20 = vpop.f32.mrb[69].mxu0  ;;  %v3991_v18 = vadd.f32 %v3990_v56, %v3989_v14  ;;  %v3994_v38 = vsel %vm153_vm0, %v11114_v55, 0.0 }
 0x79d   :  { %v3992_v3 = vsel %vm153_vm0, %v11116_v20, 0.0 }
 0x79e   :  { %v3993_v58 = vadd.f32 %v3992_v3, %v3991_v18 }
 0x79f   :  { %v11122_v9 = vpop.f32.mrb[70].mxu0 }
 0x7a0   :  { %v11124_v46 = vpop.f32.mrb[71].mxu0  ;;  %v3995_v47 = vadd.f32 %v3994_v38, %v3993_v58  ;;  %v3998_v59 = vsel %vm153_vm0, %v11122_v9, 0.0 }
 0x7a1   :  { %v3996_v36 = vsel %vm153_vm0, %v11124_v46, 0.0 }
 0x7a2   :  { %v3997_v33 = vadd.f32 %v3996_v36, %v3995_v47 }
 0x7a3   :  { %v11130_v52 = vpop.f32.mrb[72].mxu0 }
 0x7a4   :  { %v11132_v27 = vpop.f32.mrb[73].mxu0  ;;  %v3999_v21 = vadd.f32 %v3998_v59, %v3997_v33  ;;  %v4002_v63 = vsel %vm153_vm0, %v11130_v52, 0.0 }
 0x7a5   :  { %v4000_v17 = vsel %vm153_vm0, %v11132_v27, 0.0 }
 0x7a6   :  { %v4001_v44 = vadd.f32 %v4000_v17, %v3999_v21 }
 0x7a7   :  { %v11138_v12 = vpop.f32.mrb[74].mxu0 }
 0x7a8   :  { %v11140_v31 = vpop.f32.mrb[75].mxu0  ;;  %v4003_v14 = vadd.f32 %v4002_v63, %v4001_v44  ;;  %v4006_v3 = vsel %vm153_vm0, %v11138_v12, 0.0 }
 0x7a9   :  { %v4004_v56 = vsel %vm153_vm0, %v11140_v31, 0.0 }
 0x7aa   :  { %v4005_v18 = vadd.f32 %v4004_v56, %v4003_v14 }
 0x7ab   :  { %v11146_v58 = vpop.f32.mrb[76].mxu0 }
 0x7ac   :  { %13121 = vst [vmem:[#allocation4_spill] sm:$0xff] %v11146_v58  ;;  %v11148_v38 = vpop.f32.mrb[77].mxu0  ;;  %v4007_v47 = vadd.f32 %v4006_v3, %v4005_v18  ;;  %v4010_v59 = vsel %vm153_vm0, %v11146_v58, 0.0 }
 0x7ad   :  { %13122 = vst [vmem:[#allocation5_spill] sm:$0xff] %v11148_v38  ;;  %v4008_v36 = vsel %vm153_vm0, %v11148_v38, 0.0 }
 0x7ae   :  { %v4009_v33 = vadd.f32 %v4008_v36, %v4007_v47 }
 0x7af   :  { %v11154_v21 = vpop.f32.mrb[54].mxu0 }
 0x7b0   :  { %13123 = vst [vmem:[#allocation6_spill] sm:$0xff] %v11154_v21  ;;  %v11156_v17 = vpop.f32.mrb[55].mxu0  ;;  %v4011_v44 = vadd.f32 %v4010_v59, %v4009_v33  ;;  %v4014_v56 = vsel %vm153_vm0, %v11154_v21, 0.0 }
 0x7b1   :  { %13124 = vst [vmem:[#allocation7_spill] sm:$0xff] %v11156_v17  ;;  %v4012_v63 = vsel %vm153_vm0, %v11156_v17, 0.0 }
 0x7b2   :  { %v4013_v14 = vadd.f32 %v4012_v63, %v4011_v44 }
 0x7b3   :  { %v11162_v18 = vpop.f32.mrb[56].mxu0 }
 0x7b4   :  { %13125 = vst [vmem:[#allocation8_spill] sm:$0xff] %v11162_v18  ;;  %v11164_v3 = vpop.f32.mrb[57].mxu0  ;;  %v4015_v47 = vadd.f32 %v4014_v56, %v4013_v14  ;;  %v4018_v23 = vsel %vm153_vm0, %v11162_v18, 0.0 }
 0x7b5   :  { %13126 = vst [vmem:[#allocation9_spill] sm:$0xff] %v11164_v3  ;;  %v4016_v36 = vsel %vm153_vm0, %v11164_v3, 0.0 }
 0x7b6   :  { %v4017_v41 = vadd.f32 %v4016_v36, %v4015_v47 }
 0x7b7   :  { %v11170_v33 = vpop.f32.mrb[58].mxu0 }
 0x7b8   :  { %13127 = vst [vmem:[#allocation10_spill] sm:$0xff] %v11170_v33  ;;  %v11172_v59 = vpop.f32.mrb[59].mxu0  ;;  %v4019_v44 = vadd.f32 %v4018_v23, %v4017_v41  ;;  %v4022_v17 = vsel %vm153_vm0, %v11170_v33, 0.0 }
 0x7b9   :  { %13128 = vst [vmem:[#allocation11_spill] sm:$0xff] %v11172_v59  ;;  %v4020_v63 = vsel %vm153_vm0, %v11172_v59, 0.0 }
 0x7ba   :  { %v4021_v21 = vadd.f32 %v4020_v63, %v4019_v44 }
 0x7bb   :  { %v11178_v14 = vpop.f32.mrb[60].mxu0 }
 0x7bc   :  { %13129 = vst [vmem:[#allocation12_spill] sm:$0xff] %v11178_v14  ;;  %v11180_v56 = vpop.f32.mrb[61].mxu0  ;;  %v4023_v47 = vadd.f32 %v4022_v17, %v4021_v21  ;;  %v4026_v3 = vsel %vm153_vm0, %v11178_v14, 0.0 }
 0x7bd   :  { %13130 = vst [vmem:[#allocation13_spill] sm:$0xff] %v11180_v56  ;;  %v4024_v36 = vsel %vm153_vm0, %v11180_v56, 0.0 }
 0x7be   :  { %v4025_v18 = vadd.f32 %v4024_v36, %v4023_v47 }
 0x7bf   :  { %v11186_v23 = vpop.f32.mrb[50].mxu0 }
 0x7c0   :  { %13131 = vst [vmem:[#allocation14_spill] sm:$0xff] %v11186_v23  ;;  %v11188_v41 = vpop.f32.mrb[51].mxu0  ;;  %v4027_v44 = vadd.f32 %v4026_v3, %v4025_v18  ;;  %v4030_v59 = vsel %vm153_vm0, %v11186_v23, 0.0 }
 0x7c1   :  { %13132 = vst [vmem:[#allocation15_spill] sm:$0xff] %v11188_v41  ;;  %v4028_v63 = vsel %vm153_vm0, %v11188_v41, 0.0 }
 0x7c2   :  { %v4029_v33 = vadd.f32 %v4028_v63, %v4027_v44 }
 0x7c3   :  { %v11194_v21 = vpop.f32.mrb[52].mxu0 }
 0x7c4   :  { %13133 = vst [vmem:[#allocation16_spill] sm:$0xff] %v11194_v21  ;;  %v11196_v17 = vpop.f32.mrb[53].mxu0  ;;  %v4031_v47 = vadd.f32 %v4030_v59, %v4029_v33  ;;  %v4034_v56 = vsel %vm153_vm0, %v11194_v21, 0.0  ;;  %v13137_v33 = vrot.slane %v10956_v32, 2 }
 0x7c5   :  { %13134 = vst [vmem:[#allocation17_spill] sm:$0xff] %v11196_v17  ;;  %v4032_v36 = vsel %vm153_vm0, %v11196_v17, 0.0 }
 0x7c6   :  { %v4033_v14 = vadd.f32 %v4032_v36, %v4031_v47  ;;  %v3691_v59 = vsel %vm893_vm3, %v13137_v33, 0.0 }
 0x7c7   :  { %v11202_v18 = vpop.f32.mrb[48].mxu0 }
 0x7c8   :  { %13135 = vst [vmem:[#allocation18_spill] sm:$0xff] %v11202_v18  ;;  %v11204_v3 = vpop.f32.mrb[49].mxu0  ;;  %v4035_v44 = vadd.f32 %v4034_v56, %v4033_v14  ;;  %v4038_v41 = vsel %vm153_vm0, %v11202_v18, 0.0 }
 0x7c9   :  { %13136 = vst [vmem:[#allocation19_spill] sm:$0xff] %v11204_v3  ;;  %v4036_v63 = vsel %vm153_vm0, %v11204_v3, 0.0 }
 0x7ca   :  { %v4037_v23 = vadd.f32 %v4036_v63, %v4035_v44 }
 0x7cb   :  { %v8448_v47 = vpop.f32.mrb[78].mxu0 }
 0x7cc   :  { %v4039_v36 = vadd.f32 %v4038_v41, %v4037_v23  ;;  %v11213_v17 = vadd.f32 %v8448_v47, %v3691_v59  ;;  %v3908_v21 = vpop.f32.mrb[79].mxu0  ;;  %v13159_v47 = vld [vmem:[#allocation4_spill] sm:$0xff] }
 0x7cd   :  { %v11216_v58 = vadd.f32 %v3908_v21, %v10970_v16 }
 0x7ce   :  { %v4042_v44 = vsel %vm153_vm0, %v11213_v17, 0.0 }
 0x7cf   :  { %v4040_v14 = vsel %vm153_vm0, %v11216_v58, 0.0 }
 0x7d0   :  { %v4041_v56 = vadd.f32 %v4040_v14, %v4039_v36  ;;  %v13160_v36 = vld [vmem:[#allocation7_spill] sm:$0xff]  ;;  %v13161_v14 = vld [vmem:[#allocation6_spill] sm:$0xff] }
 0x7d2   :  { %v4043_v63 = vadd.f32 %v4042_v44, %v4041_v56  ;;  %v13162_v56 = vld [vmem:[#allocation9_spill] sm:$0xff]  ;;  %v13164_v44 = vld [vmem:[#allocation8_spill] sm:$0xff] }
 0x7d4   :  { %v4044_v18 = vrot.slane %v4043_v63, 4 }
 0x7d6   :  { %v4045_v32 = vadd.f32 %v4044_v18, %v4043_v63 }
 0x7d8   :  { %v4046_v3 = vrot.slane %v4045_v32, 2 }
 0x7da   :  { %v4047_v33 = vadd.f32 %v4046_v3, %v4045_v32  ;;  %v13158_v3 = vld [vmem:[#allocation5_spill] sm:$0xff]  ;;  %v13166_v32 = vld [vmem:[#allocation11_spill] sm:$0xff] }
 0x7dc   :  { %v4048_v38 = vrot.slane %v4047_v33, 1 }
 0x7de   :  { %v4049_v23 = vadd.f32 %v4048_v38, %v4047_v33 }
 0x7e0   :  { %v11222_v41 = vmul.f32 0.001953125, %v4049_v23  ;;  %v13168_v23 = vld [vmem:[#allocation10_spill] sm:$0xff] }
 0x7e2   :  { %v11226_v16 = vsub.f32 %v10961_v48, %v11222_v41  ;;  %v11230_v21 = vsub.f32 %v10954_v11, %v11222_v41  ;;  %v11234_v59 = vsub.f32 %v10972_v28, %v11222_v41  ;;  %v11238_v18 = vsub.f32 %v10965_v10, %v11222_v41 }
 0x7e3   :  { %v11242_v38 = vsub.f32 %v10980_v57, %v11222_v41  ;;  %v11246_v48 = vsub.f32 %v10978_v25, %v11222_v41  ;;  %v11250_v11 = vsub.f32 %v10988_v7, %v11222_v41  ;;  %v11254_v28 = vsub.f32 %v10986_v61, %v11222_v41 }
 0x7e4   :  { %13138 = vst [vmem:[#allocation20_spill] sm:$0xff] %v11226_v16  ;;  %13139 = vst [vmem:[#allocation21_spill] sm:$0xff] %v11230_v21  ;;  %v11258_v10 = vsub.f32 %v10996_v24, %v11222_v41  ;;  %v11262_v57 = vsub.f32 %v10994_v5, %v11222_v41  ;;  %v11266_v25 = vsub.f32 %v11004_v1, %v11222_v41 }
 0x7e5   :  { %13140 = vst [vmem:[#allocation22_spill] sm:$0xff] %v11234_v59  ;;  %13141 = vst [vmem:[#allocation23_spill] sm:$0xff] %v11238_v18  ;;  %v11270_v7 = vsub.f32 %v11002_v19, %v11222_v41  ;;  %v11274_v61 = vsub.f32 %v11012_v35, %v11222_v41  ;;  %v11278_v24 = vsub.f32 %v11010_v53, %v11222_v41 }
 0x7e6   :  { %v11282_v5 = vsub.f32 %v11020_v42, %v11222_v41  ;;  %v11286_v1 = vsub.f32 %v11018_v62, %v11222_v41  ;;  %v11290_v19 = vsub.f32 %v11028_v15, %v11222_v41  ;;  %v11294_v35 = vsub.f32 %v11026_v2, %v11222_v41 }
 0x7e7   :  { %v11298_v53 = vsub.f32 %v11036_v22, %v11222_v41  ;;  %v11302_v42 = vsub.f32 %v11034_v6, %v11222_v41  ;;  %v11306_v62 = vsub.f32 %v11044_v49, %v11222_v41  ;;  %v11310_v15 = vsub.f32 %v11042_v34, %v11222_v41 }
 0x7e8   :  { %13142 = vst [vmem:[#allocation24_spill] sm:$0xff] %v11294_v35  ;;  %v11314_v2 = vsub.f32 %v11052_v39, %v11222_v41  ;;  %v11318_v22 = vsub.f32 %v11050_v37, %v11222_v41  ;;  %v11322_v6 = vsub.f32 %v11060_v43, %v11222_v41  ;;  %v11326_v49 = vsub.f32 %v11058_v45, %v11222_v41 }
 0x7e9   :  { %13143 = vst [vmem:[#allocation25_spill] sm:$0xff] %v11298_v53  ;;  %13144 = vst [vmem:[#allocation26_spill] sm:$0xff] %v11302_v42  ;;  %v11330_v34 = vsub.f32 %v11068_v50, %v11222_v41  ;;  %v11334_v39 = vsub.f32 %v11066_v51, %v11222_v41  ;;  %v11338_v37 = vsub.f32 %v11076_v0, %v11222_v41 }
 0x7ea   :  { %13145 = vst [vmem:[#allocation27_spill] sm:$0xff] %v11306_v62  ;;  %13146 = vst [vmem:[#allocation28_spill] sm:$0xff] %v11310_v15  ;;  %v11342_v43 = vsub.f32 %v11074_v13, %v11222_v41  ;;  %v11346_v45 = vsub.f32 %v11084_v30, %v11222_v41  ;;  %v11350_v50 = vsub.f32 %v11082_v8, %v11222_v41 }
 0x7eb   :  { %13147 = vst [vmem:[#allocation29_spill] sm:$0xff] %v11314_v2  ;;  %13148 = vst [vmem:[#allocation30_spill] sm:$0xff] %v11318_v22  ;;  %v11354_v51 = vsub.f32 %v11092_v29, %v11222_v41  ;;  %v11358_v0 = vsub.f32 %v11090_v54, %v11222_v41  ;;  %v11362_v13 = vsub.f32 %v11100_v40, %v11222_v41 }
 0x7ec   :  { %13149 = vst [vmem:[#allocation31_spill] sm:$0xff] %v11322_v6  ;;  %13150 = vst [vmem:[#allocation32_spill] sm:$0xff] %v11326_v49  ;;  %v11366_v30 = vsub.f32 %v11098_v26, %v11222_v41  ;;  %v11370_v8 = vsub.f32 %v11108_v4, %v11222_v41  ;;  %v11374_v29 = vsub.f32 %v11106_v60, %v11222_v41 }
 0x7ed   :  { %13151 = vst [vmem:[#allocation33_spill] sm:$0xff] %v11330_v34  ;;  %13152 = vst [vmem:[#allocation34_spill] sm:$0xff] %v11334_v39  ;;  %v11378_v54 = vsub.f32 %v11116_v20, %v11222_v41  ;;  %v11382_v40 = vsub.f32 %v11114_v55, %v11222_v41  ;;  %v11386_v26 = vsub.f32 %v11124_v46, %v11222_v41 }
 0x7ee   :  { %13153 = vst [vmem:[#allocation35_spill] sm:$0xff] %v11338_v37  ;;  %13154 = vst [vmem:[#allocation36_spill] sm:$0xff] %v11342_v43  ;;  %v11390_v4 = vsub.f32 %v11122_v9, %v11222_v41  ;;  %v11394_v60 = vsub.f32 %v11132_v27, %v11222_v41  ;;  %v11398_v20 = vsub.f32 %v11130_v52, %v11222_v41 }
 0x7ef   :  { %13155 = vst [vmem:[#allocation37_spill] sm:$0xff] %v11346_v45  ;;  %13156 = vst [vmem:[#allocation38_spill] sm:$0xff] %v11350_v50  ;;  %v11402_v55 = vsub.f32 %v11140_v31, %v11222_v41  ;;  %v11406_v46 = vsub.f32 %v11138_v12, %v11222_v41  ;;  %v11410_v9 = vsub.f32 %v13158_v3, %v11222_v41 }
 0x7f0   :  { %13157 = vst [vmem:[#allocation39_spill] sm:$0xff] %v11354_v51  ;;  %v11414_v27 = vsub.f32 %v13159_v47, %v11222_v41  ;;  %v11418_v52 = vsub.f32 %v13160_v36, %v11222_v41  ;;  %v11422_v31 = vsub.f32 %v13161_v14, %v11222_v41  ;;  %v11426_v12 = vsub.f32 %v13162_v56, %v11222_v41  ;;  %v13170_v47 = vld [vmem:[#allocation13_spill] sm:$0xff]  ;;  %v13172_v14 = vld [vmem:[#allocation12_spill] sm:$0xff] }
 0x7f1   :  { %v11430_v63 = vsub.f32 %v13164_v44, %v11222_v41  ;;  %v11434_v33 = vsub.f32 %v13166_v32, %v11222_v41  ;;  %v11438_v3 = vsub.f32 %v13168_v23, %v11222_v41  ;;  %v11442_v36 = vsub.f32 %v13170_v47, %v11222_v41 }
 0x7f2   :  { %13163 = vst [vmem:[#allocation5_spill] sm:$0xff] %v11426_v12  ;;  %v11446_v56 = vsub.f32 %v13172_v14, %v11222_v41  ;;  %v13174_v12 = vld [vmem:[#allocation15_spill] sm:$0xff] }
 0x7f3   :  { %13165 = vst [vmem:[#allocation4_spill] sm:$0xff] %v11430_v63  ;;  %13167 = vst [vmem:[#allocation7_spill] sm:$0xff] %v11434_v33  ;;  %v11450_v44 = vsub.f32 %v13174_v12, %v11222_v41  ;;  %v13175_v63 = vld [vmem:[#allocation14_spill] sm:$0xff]  ;;  %v13176_v33 = vld [vmem:[#allocation17_spill] sm:$0xff] }
 0x7f4   :  { %13169 = vst [vmem:[#allocation6_spill] sm:$0xff] %v11438_v3  ;;  %13171 = vst [vmem:[#allocation9_spill] sm:$0xff] %v11442_v36  ;;  %v11454_v32 = vsub.f32 %v13175_v63, %v11222_v41  ;;  %v11458_v23 = vsub.f32 %v13176_v33, %v11222_v41  ;;  %v13177_v3 = vld [vmem:[#allocation16_spill] sm:$0xff]  ;;  %v13179_v36 = vld [vmem:[#allocation19_spill] sm:$0xff]  ;;  %v11474_v63 = vsub.f32 %v11216_v58, %v11222_v41 }
 0x7f5   :  { %13173 = vst [vmem:[#allocation8_spill] sm:$0xff] %v11446_v56  ;;  %v11462_v47 = vsub.f32 %v13177_v3, %v11222_v41  ;;  %v11466_v14 = vsub.f32 %v13179_v36, %v11222_v41  ;;  %v13181_v56 = vld [vmem:[#allocation18_spill] sm:$0xff]  ;;  %v11478_v33 = vsub.f32 %v11213_v17, %v11222_v41  ;;  %v4116_v3 = vmul.f32 %v11226_v16, %v11226_v16 }
 0x7f6   :  { %v11470_v12 = vsub.f32 %v13181_v56, %v11222_v41  ;;  %13183 = vst [vmem:[#allocation12_spill] sm:$0xff] %v11474_v63  ;;  %v4118_v36 = vmul.f32 %v11234_v59, %v11234_v59  ;;  %v4119_v56 = vmul.f32 %v11238_v18, %v11238_v18  ;;  %v4120_v17 = vmul.f32 %v11242_v38, %v11242_v38 }
 0x7f7   :  { %13178 = vst [vmem:[#allocation11_spill] sm:$0xff] %v11462_v47  ;;  %13180 = vst [vmem:[#allocation10_spill] sm:$0xff] %v11466_v14  ;;  %v4117_v47 = vmul.f32 %v11230_v21, %v11230_v21  ;;  %v4121_v21 = vmul.f32 %v11246_v48, %v11246_v48  ;;  %v4122_v18 = vmul.f32 %v11250_v11, %v11250_v11 }
 0x7f8   :  { %13182 = vst [vmem:[#allocation13_spill] sm:$0xff] %v11470_v12  ;;  %13184 = vst [vmem:[#allocation15_spill] sm:$0xff] %v11478_v33  ;;  %v4180_v12 = vsel %vm153_vm0, %v4116_v3, 0.0  ;;  %v4183_v41 = vsel %vm153_vm0, %v4118_v36, 0.0  ;;  %v4185_v33 = vsel %vm153_vm0, %v4119_v56, 0.0  ;;  %v4187_v3 = vsel %vm153_vm0, %v4120_v17, 0.0 }
 0x7f9   :  { %v4181_v58 = vsel %vm153_vm0, %v4117_v47, 0.0  ;;  %v4123_v47 = vmul.f32 %v11254_v28, %v11254_v28  ;;  %v4191_v36 = vsel %vm153_vm0, %v4122_v18, 0.0  ;;  %v4128_v18 = vmul.f32 %v11274_v61, %v11274_v61 }
 0x7fa   :  { %v4182_v63 = vadd.f32 %v4181_v58, %v4180_v12  ;;  %v4189_v12 = vsel %vm153_vm0, %v4121_v21, 0.0  ;;  %v4127_v21 = vmul.f32 %v11270_v7, %v11270_v7 }
 0x7fc   :  { %v4184_v16 = vadd.f32 %v4183_v41, %v4182_v63  ;;  %v4124_v63 = vmul.f32 %v11258_v10, %v11258_v10 }
 0x7fe   :  { %v4186_v59 = vadd.f32 %v4185_v33, %v4184_v16  ;;  %v4125_v16 = vmul.f32 %v11262_v57, %v11262_v57  ;;  %v4193_v33 = vsel %vm153_vm0, %v4123_v47, 0.0  ;;  %v4195_v17 = vsel %vm153_vm0, %v4124_v63, 0.0 }
 0x7ff   :  { %v4129_v47 = vmul.f32 %v11278_v24, %v11278_v24  ;;  %v4130_v63 = vmul.f32 %v11282_v5, %v11282_v5 }
 0x800   :  { %v4188_v14 = vadd.f32 %v4187_v3, %v4186_v59  ;;  %v4126_v59 = vmul.f32 %v11266_v25, %v11266_v25 }
 0x802   :  { %v4190_v58 = vadd.f32 %v4189_v12, %v4188_v14  ;;  %v4197_v14 = vsel %vm153_vm0, %v4125_v16, 0.0  ;;  %v4131_v16 = vmul.f32 %v11286_v1, %v11286_v1 }
 0x804   :  { %v4192_v41 = vadd.f32 %v4191_v36, %v4190_v58  ;;  %v4199_v58 = vsel %vm153_vm0, %v4126_v59, 0.0  ;;  %v4132_v59 = vmul.f32 %v11290_v19, %v11290_v19 }
 0x806   :  { %v4194_v56 = vadd.f32 %v4193_v33, %v4192_v41  ;;  %v4201_v41 = vsel %vm153_vm0, %v4127_v21, 0.0  ;;  %v4133_v21 = vmul.f32 %v11294_v35, %v11294_v35 }
 0x808   :  { %v4196_v3 = vadd.f32 %v4195_v17, %v4194_v56  ;;  %v4203_v56 = vsel %vm153_vm0, %v4128_v18, 0.0  ;;  %v4134_v18 = vmul.f32 %v11298_v53, %v11298_v53 }
 0x80a   :  { %v4198_v12 = vadd.f32 %v4197_v14, %v4196_v3  ;;  %v4205_v3 = vsel %vm153_vm0, %v4129_v47, 0.0  ;;  %v4135_v47 = vmul.f32 %v11302_v42, %v11302_v42 }
 0x80c   :  { %v4200_v36 = vadd.f32 %v4199_v58, %v4198_v12  ;;  %v4207_v12 = vsel %vm153_vm0, %v4130_v63, 0.0  ;;  %v4136_v63 = vmul.f32 %v11306_v62, %v11306_v62 }
 0x80e   :  { %v4202_v33 = vadd.f32 %v4201_v41, %v4200_v36  ;;  %v4209_v36 = vsel %vm153_vm0, %v4131_v16, 0.0  ;;  %v4137_v16 = vmul.f32 %v11310_v15, %v11310_v15 }
 0x810   :  { %v4204_v17 = vadd.f32 %v4203_v56, %v4202_v33  ;;  %v4211_v33 = vsel %vm153_vm0, %v4132_v59, 0.0  ;;  %v4138_v59 = vmul.f32 %v11314_v2, %v11314_v2 }
 0x812   :  { %v4206_v14 = vadd.f32 %v4205_v3, %v4204_v17  ;;  %v4213_v17 = vsel %vm153_vm0, %v4133_v21, 0.0  ;;  %v4139_v21 = vmul.f32 %v11318_v22, %v11318_v22 }
 0x814   :  { %v4208_v58 = vadd.f32 %v4207_v12, %v4206_v14  ;;  %v4215_v14 = vsel %vm153_vm0, %v4134_v18, 0.0  ;;  %v4140_v18 = vmul.f32 %v11322_v6, %v11322_v6 }
 0x816   :  { %v4210_v41 = vadd.f32 %v4209_v36, %v4208_v58  ;;  %v4217_v58 = vsel %vm153_vm0, %v4135_v47, 0.0  ;;  %v4141_v47 = vmul.f32 %v11326_v49, %v11326_v49 }
 0x818   :  { %v4212_v56 = vadd.f32 %v4211_v33, %v4210_v41  ;;  %v4219_v41 = vsel %vm153_vm0, %v4136_v63, 0.0 }
 0x81a   :  { %v4214_v3 = vadd.f32 %v4213_v17, %v4212_v56  ;;  %v4221_v56 = vsel %vm153_vm0, %v4137_v16, 0.0  ;;  %v4142_v16 = vmul.f32 %v11330_v34, %v11330_v34  ;;  %v4145_v34 = vmul.f32 %v11342_v43, %v11342_v43 }
 0x81c   :  { %v4216_v12 = vadd.f32 %v4215_v14, %v4214_v3  ;;  %v4223_v3 = vsel %vm153_vm0, %v4138_v59, 0.0  ;;  %v4143_v59 = vmul.f32 %v11334_v39, %v11334_v39 }
 0x81e   :  { %v4218_v36 = vadd.f32 %v4217_v58, %v4216_v12  ;;  %v4225_v12 = vsel %vm153_vm0, %v4139_v21, 0.0  ;;  %v4227_v58 = vsel %vm153_vm0, %v4140_v18, 0.0  ;;  %v4144_v21 = vmul.f32 %v11338_v37, %v11338_v37 }
 0x81f   :  { %v4233_v18 = vsel %vm153_vm0, %v4143_v59, 0.0 }
 0x820   :  { %v4220_v33 = vadd.f32 %v4219_v41, %v4218_v36  ;;  %v4229_v41 = vsel %vm153_vm0, %v4141_v47, 0.0  ;;  %v4146_v47 = vmul.f32 %v11346_v45, %v11346_v45  ;;  %v13188_v45 = vld [vmem:[#allocation6_spill] sm:$0xff] }
 0x822   :  { %v4222_v17 = vadd.f32 %v4221_v56, %v4220_v33  ;;  %v4231_v56 = vsel %vm153_vm0, %v4142_v16, 0.0  ;;  %v4147_v16 = vmul.f32 %v11350_v50, %v11350_v50  ;;  %v4239_v59 = vsel %vm153_vm0, %v4146_v47, 0.0 }
 0x823   :  { %v4152_v47 = vmul.f32 %v11370_v8, %v11370_v8 }
 0x824   :  { %v4224_v14 = vadd.f32 %v4223_v3, %v4222_v17  ;;  %v5164_v17 = vld [vmem:[%s6939_s21] sm:$0xff]  ;;  %v5165_v3 = vld [vmem:[%s6939_s21 + $0x8] sm:$0xff] }
 0x826   :  { %v4226_v63 = vadd.f32 %v4225_v12, %v4224_v14  ;;  %v9061_v12 = vpack.c.bf16 %v5165_v3, %v5164_v17  ;;  %v4149_v3 = vmul.f32 %v11358_v0, %v11358_v0 }
 0x828   :  { %v4228_v36 = vadd.f32 %v4227_v58, %v4226_v63  ;;  %9062 = vmatprep.subr.bf16.mxu1 %v9061_v12  ;;  %v4235_v58 = vsel %vm153_vm0, %v4144_v21, 0.0 }
 0x829   :  { %9064 = vmatpush3.bf16.msra.mxu1 %v9061_v12  ;;  %v4150_v12 = vmul.f32 %v11362_v13, %v11362_v13 }
 0x82a   :  { %v4230_v33 = vadd.f32 %v4229_v41, %v4228_v36  ;;  %v4237_v41 = vsel %vm153_vm0, %v4145_v34, 0.0  ;;  %v4151_v34 = vmul.f32 %v11366_v30, %v11366_v30 }
 0x82c   :  { %v4232_v14 = vadd.f32 %v4231_v56, %v4230_v33  ;;  %v4148_v56 = vmul.f32 %v11354_v51, %v11354_v51  ;;  %v13186_v51 = vld [vmem:[#allocation4_spill] sm:$0xff] }
 0x82e   :  { %v4234_v63 = vadd.f32 %v4233_v18, %v4232_v14  ;;  %v4241_v14 = vsel %vm153_vm0, %v4147_v16, 0.0  ;;  %v4243_v18 = vsel %vm153_vm0, %v4148_v56, 0.0  ;;  %v4153_v16 = vmul.f32 %v11374_v29, %v11374_v29 }
 0x82f   :  { %v4154_v56 = vmul.f32 %v11378_v54, %v11378_v54 }
 0x830   :  { %v4236_v36 = vadd.f32 %v4235_v58, %v4234_v63  ;;  %v4245_v58 = vsel %vm153_vm0, %v4149_v3, 0.0  ;;  %v4155_v3 = vmul.f32 %v11382_v40, %v11382_v40 }
 0x832   :  { %v4238_v33 = vadd.f32 %v4237_v41, %v4236_v36  ;;  %v4247_v41 = vsel %vm153_vm0, %v4150_v12, 0.0  ;;  %v4156_v12 = vmul.f32 %v11386_v26, %v11386_v26 }
 0x834   :  { %v4240_v17 = vadd.f32 %v4239_v59, %v4238_v33  ;;  %v4249_v59 = vsel %vm153_vm0, %v4151_v34, 0.0 }
 0x836   :  { %v4242_v21 = vadd.f32 %v4241_v14, %v4240_v17  ;;  %v4251_v14 = vsel %vm153_vm0, %v4152_v47, 0.0  ;;  %v4257_v47 = vsel %vm153_vm0, %v4155_v3, 0.0 }
 0x838   :  { %v4244_v63 = vadd.f32 %v4243_v18, %v4242_v21  ;;  %v4253_v18 = vsel %vm153_vm0, %v4153_v16, 0.0  ;;  %v4259_v16 = vsel %vm153_vm0, %v4156_v12, 0.0  ;;  %v4161_v12 = vmul.f32 %v11406_v46, %v11406_v46 }
 0x83a   :  { %v4246_v36 = vadd.f32 %v4245_v58, %v4244_v63  ;;  %v4255_v58 = vsel %vm153_vm0, %v4154_v56, 0.0 }
 0x83c   :  { %v4248_v33 = vadd.f32 %v4247_v41, %v4246_v36  ;;  %v4157_v36 = vmul.f32 %v11390_v4, %v11390_v4 }
 0x83e   :  { %v4250_v17 = vadd.f32 %v4249_v59, %v4248_v33  ;;  %v4158_v33 = vmul.f32 %v11394_v60, %v11394_v60  ;;  %v4261_v56 = vsel %vm153_vm0, %v4157_v36, 0.0 }
 0x840   :  { %v4252_v21 = vadd.f32 %v4251_v14, %v4250_v17  ;;  %v4159_v17 = vmul.f32 %v11398_v20, %v11398_v20  ;;  %v4585_v14 = vld [vmem:[%s6938_s28] sm:$0xff]  ;;  %v4263_v3 = vsel %vm153_vm0, %v4158_v33, 0.0 }
 0x842   :  { %v4254_v63 = vadd.f32 %v4253_v18, %v4252_v21  ;;  %v4586_v21 = vld [vmem:[%s6938_s28 + $0x8] sm:$0xff]  ;;  %v4265_v36 = vsel %vm153_vm0, %v4159_v17, 0.0 }
 0x844   :  { %v4256_v34 = vadd.f32 %v4255_v58, %v4254_v63  ;;  %v9057_v63 = vpack.c.bf16 %v4586_v21, %v4585_v14  ;;  %v4160_v58 = vmul.f32 %v11402_v55, %v11402_v55  ;;  %v5551_v21 = vld [vmem:[%s6940_s8] sm:$0xff] }
 0x846   :  { %v4258_v41 = vadd.f32 %v4257_v47, %v4256_v34  ;;  %9058 = vmatprep.subr.bf16.mxu0 %v9057_v63 }
 0x847   :  { %9060 = vmatpush3.bf16.msra.mxu0 %v9057_v63 }
 0x848   :  { %v4260_v59 = vadd.f32 %v4259_v16, %v4258_v41  ;;  %v4162_v41 = vmul.f32 %v11410_v9, %v11410_v9  ;;  %v4267_v16 = vsel %vm153_vm0, %v4160_v58, 0.0  ;;  %v4165_v58 = vmul.f32 %v11422_v31, %v11422_v31 }
 0x84a   :  { %v4262_v18 = vadd.f32 %v4261_v56, %v4260_v59  ;;  %v4163_v59 = vmul.f32 %v11414_v27, %v11414_v27  ;;  %v4269_v56 = vsel %vm153_vm0, %v4161_v12, 0.0  ;;  %v4271_v17 = vsel %vm153_vm0, %v4162_v41, 0.0  ;;  %v13185_v12 = vld [vmem:[#allocation5_spill] sm:$0xff] }
 0x84b   :  { %v4167_v41 = vmul.f32 %v13186_v51, %v13186_v51 }
 0x84c   :  { %v4264_v34 = vadd.f32 %v4263_v3, %v4262_v18  ;;  %v5552_v18 = vld [vmem:[%s6940_s8 + $0x8] sm:$0xff]  ;;  %v4164_v3 = vmul.f32 %v11418_v52, %v11418_v52 }
 0x84d   :  { %v11634_v63 = vpack.c.bf16 %v5552_v18, %v5551_v21  ;;  %v4277_v21 = vsel %vm153_vm0, %v4165_v58, 0.0  ;;  %v13187_v18 = vld [vmem:[#allocation7_spill] sm:$0xff]  ;;  %v13190_v58 = vld [vmem:[#allocation8_spill] sm:$0xff] }
 0x84e   :  { %v4266_v47 = vadd.f32 %v4265_v36, %v4264_v34  ;;  %v4273_v36 = vsel %vm153_vm0, %v4163_v59, 0.0 }
 0x84f   :  { %9066 = vmatprep.subr.bf16.mxu1 %v11634_v63 }
 0x850   :  { %v4268_v33 = vadd.f32 %v4267_v16, %v4266_v47  ;;  %v4166_v16 = vmul.f32 %v13185_v12, %v13185_v12 }
 0x852   :  { %v4270_v14 = vadd.f32 %v4269_v56, %v4268_v33  ;;  %v4275_v33 = vsel %vm153_vm0, %v4164_v3, 0.0  ;;  %v4279_v59 = vsel %vm153_vm0, %v4166_v16, 0.0  ;;  %v13189_v3 = vld [vmem:[#allocation9_spill] sm:$0xff]  ;;  %v4172_v16 = vmul.f32 %v11450_v44, %v11450_v44 }
 0x854   :  { %v4272_v34 = vadd.f32 %v4271_v17, %v4270_v14  ;;  %v4168_v17 = vmul.f32 %v13187_v18, %v13187_v18 }
 0x856   :  { %v4274_v47 = vadd.f32 %v4273_v36, %v4272_v34  ;;  %v4169_v34 = vmul.f32 %v13188_v45, %v13188_v45  ;;  %v4281_v36 = vsel %vm153_vm0, %v4167_v41, 0.0 }
 0x858   :  { %v4276_v56 = vadd.f32 %v4275_v33, %v4274_v47  ;;  %v4170_v47 = vmul.f32 %v13189_v3, %v13189_v3  ;;  %v4283_v33 = vsel %vm153_vm0, %v4168_v17, 0.0  ;;  %v4291_v17 = vsel %vm153_vm0, %v4172_v16, 0.0  ;;  %v13194_v16 = vld [vmem:[#allocation12_spill] sm:$0xff] }
 0x85a   :  { %v4278_v14 = vadd.f32 %v4277_v21, %v4276_v56  ;;  %v4171_v56 = vmul.f32 %v13190_v58, %v13190_v58  ;;  %v4285_v21 = vsel %vm153_vm0, %v4169_v34, 0.0  ;;  %v13191_v34 = vld [vmem:[#allocation11_spill] sm:$0xff] }
 0x85c   :  { %v4280_v50 = vadd.f32 %v4279_v59, %v4278_v14  ;;  %v4287_v14 = vsel %vm153_vm0, %v4170_v47, 0.0  ;;  %v4289_v41 = vsel %vm153_vm0, %v4171_v56, 0.0  ;;  %v13192_v47 = vld [vmem:[#allocation10_spill] sm:$0xff]  ;;  %v13193_v56 = vld [vmem:[#allocation13_spill] sm:$0xff] }
 0x85e   :  { %v4282_v43 = vadd.f32 %v4281_v36, %v4280_v50  ;;  %v4173_v50 = vmul.f32 %v11454_v32, %v11454_v32 }
 0x860   :  { %v4284_v37 = vadd.f32 %v4283_v33, %v4282_v43  ;;  %v4174_v43 = vmul.f32 %v11458_v23, %v11458_v23 }
 0x862   :  { %v4286_v39 = vadd.f32 %v4285_v21, %v4284_v37  ;;  %v4175_v37 = vmul.f32 %v13191_v34, %v13191_v34  ;;  %v4293_v21 = vsel %vm153_vm0, %v4173_v50, 0.0  ;;  %v13195_v50 = vld [vmem:[#allocation15_spill] sm:$0xff] }
 0x864   :  { %v4288_v59 = vadd.f32 %v4287_v14, %v4286_v39  ;;  %v4176_v39 = vmul.f32 %v13192_v47, %v13192_v47  ;;  %v4295_v14 = vsel %vm153_vm0, %v4174_v43, 0.0 }
 0x866   :  { %v4290_v36 = vadd.f32 %v4289_v41, %v4288_v59  ;;  %v4177_v59 = vmul.f32 %v13193_v56, %v13193_v56  ;;  %v4297_v41 = vsel %vm153_vm0, %v4175_v37, 0.0 }
 0x868   :  { %v4292_v33 = vadd.f32 %v4291_v17, %v4290_v36  ;;  %v4178_v36 = vmul.f32 %v13194_v16, %v13194_v16  ;;  %v4299_v17 = vsel %vm153_vm0, %v4176_v39, 0.0 }
 0x86a   :  { %v4294_v49 = vadd.f32 %v4293_v21, %v4292_v33  ;;  %v4179_v33 = vmul.f32 %v13195_v50, %v13195_v50  ;;  %v4301_v21 = vsel %vm153_vm0, %v4177_v59, 0.0  ;;  %v13196_v59 = vld [vmem:[#allocation3_spill] sm:$0xff] }
 0x86c   :  { %v4296_v6 = vadd.f32 %v4295_v14, %v4294_v49  ;;  %v4303_v49 = vsel %vm153_vm0, %v4178_v36, 0.0  ;;  %v4305_v14 = vsel %vm153_vm0, %v4179_v33, 0.0 }
 0x86e   :  { %v4298_v22 = vadd.f32 %v4297_v41, %v4296_v6 }
 0x870   :  { %v4300_v2 = vadd.f32 %v4299_v17, %v4298_v22  ;;  %v13197_v17 = vld [vmem:[#allocation20_spill] sm:$0xff] }
 0x872   :  { %v4302_v15 = vadd.f32 %v4301_v21, %v4300_v2  ;;  %v13198_v21 = vld [vmem:[#allocation21_spill] sm:$0xff] }
 0x874   :  { %v4304_v43 = vadd.f32 %v4303_v49, %v4302_v15  ;;  %v3136_v15 = vld [vmem:[%s6936_s17] sm:$0x1] }
 0x876   :  { %v4306_v62 = vadd.f32 %v4305_v14, %v4304_v43  ;;  %v13199_v43 = vld [vmem:[#allocation22_spill] sm:$0xff] }
 0x878   :  { %v4307_v37 = vrot.slane %v4306_v62, 4 }
 0x87a   :  { %v4308_v6 = vadd.f32 %v4307_v37, %v4306_v62  ;;  %v13200_v37 = vld [vmem:[#allocation23_spill] sm:$0xff] }
 0x87c   :  { %v4309_v41 = vrot.slane %v4308_v6, 2 }
 0x87e   :  { %v4310_v42 = vadd.f32 %v4309_v41, %v4308_v6 }
 0x880   :  { %v4311_v53 = vrot.slane %v4310_v42, 1 }
 0x882   :  { %v4312_v35 = vadd.f32 %v4311_v53, %v4310_v42  ;;  %v11693_v53 = vld [vmem:[%s6937_s24] ss:$0 sm:$0xff] }
 0x884   :  { %v4313_v39 = vmul.f32 0.001953125, %v4312_v35 }
 0x886   :  { %v4314_v22 = vadd.f32 1e-05, %v4313_v39 }
 0x888   :  { %9294 = vrsqrt.f32 %v4314_v22 }
 0x892   :  { %v9295_v2 = vpop.eup %9294 }
 0x893   :  { %v4316_v62 = vmul.f32 %v9295_v2, %v3136_v15 }
 0x895   :  { %v11691_v36 = vrot.slane %v4316_v62, %v13196_v59 }
 0x897   :  { %v4385_v35 = vmul.f32 %v11691_v36, %v13194_v16  ;;  %v4323_v33 = vmul.f32 %v11691_v36, %v13197_v17  ;;  %v4324_v49 = vmul.f32 %v11691_v36, %v13198_v21  ;;  %v4325_v14 = vmul.f32 %v11691_v36, %v13199_v43 }
 0x898   :  { %v11708_v6 = vmul.f32 %v11691_v36, %v13200_v37  ;;  %v11712_v41 = vmul.f32 %v11691_v36, %v11242_v38  ;;  %v11716_v16 = vmul.f32 %v11691_v36, %v11246_v48  ;;  %v4356_v39 = vmul.f32 %v11691_v36, %v11358_v0 }
 0x899   :  { %v11698_v42 = vadd.f32 %v11693_v53, %v4385_v35  ;;  %v4357_v22 = vmul.f32 %v11691_v36, %v11362_v13  ;;  %v4358_v15 = vmul.f32 %v11691_v36, %v11366_v30  ;;  %v4359_v2 = vmul.f32 %v11691_v36, %v11370_v8 }
 0x89a   :  { %v4360_v38 = vmul.f32 %v11691_v36, %v11374_v29  ;;  %v4361_v62 = vmul.f32 %v11691_v36, %v11378_v54  ;;  %v4362_v48 = vmul.f32 %v11691_v36, %v11382_v40  ;;  %v4363_v0 = vmul.f32 %v11691_v36, %v11386_v26 }
 0x89b   :  { %v4364_v13 = vmul.f32 %v11691_v36, %v11390_v4  ;;  %v4365_v30 = vmul.f32 %v11691_v36, %v11394_v60  ;;  %v4366_v8 = vmul.f32 %v11691_v36, %v11398_v20  ;;  %v4367_v29 = vmul.f32 %v11691_v36, %v11402_v55 }
 0x89c   :  { %v4368_v54 = vmul.f32 %v11691_v36, %v11406_v46  ;;  %v4369_v40 = vmul.f32 %v11691_v36, %v11410_v9  ;;  %v4370_v26 = vmul.f32 %v11691_v36, %v11414_v27  ;;  %v4371_v4 = vmul.f32 %v11691_v36, %v11418_v52 }
 0x89d   :  { %v4372_v60 = vmul.f32 %v11691_v36, %v11422_v31  ;;  %v4373_v20 = vmul.f32 %v11691_v36, %v13185_v12  ;;  %v4374_v55 = vmul.f32 %v11691_v36, %v13186_v51  ;;  %v4375_v46 = vmul.f32 %v11691_v36, %v13187_v18 }
 0x89e   :  { %v4376_v9 = vmul.f32 %v11691_v36, %v13188_v45  ;;  %v4377_v27 = vmul.f32 %v11691_v36, %v13189_v3  ;;  %v4378_v52 = vmul.f32 %v11691_v36, %v13190_v58  ;;  %v4379_v31 = vmul.f32 %v11691_v36, %v11450_v44 }
 0x89f   :  { %v4380_v12 = vmul.f32 %v11691_v36, %v11454_v32  ;;  %v4381_v51 = vmul.f32 %v11691_v36, %v11458_v23  ;;  %v4382_v18 = vmul.f32 %v11691_v36, %v13191_v34  ;;  %v4383_v45 = vmul.f32 %v11691_v36, %v13192_v47 }
 0x8a0   :  { %v4384_v3 = vmul.f32 %v11691_v36, %v13193_v56  ;;  %v4386_v58 = vmul.f32 %v11691_v36, %v13195_v50  ;;  %v4393_v44 = vadd.f32 %v11693_v53, %v4323_v33  ;;  %v4394_v59 = vadd.f32 %v11693_v53, %v4324_v49 }
 0x8a1   :  { %v4395_v32 = vadd.f32 %v11693_v53, %v4325_v14  ;;  %v11782_v23 = vadd.f32 %v11693_v53, %v4356_v39  ;;  %v11785_v34 = vadd.f32 %v11693_v53, %v4357_v22  ;;  %v11788_v47 = vadd.f32 %v11693_v53, %v4358_v15 }
 0x8a2   :  { %v11791_v56 = vadd.f32 %v11693_v53, %v4359_v2  ;;  %v11794_v50 = vadd.f32 %v11693_v53, %v4360_v38  ;;  %v11797_v35 = vadd.f32 %v11693_v53, %v4361_v62  ;;  %v11800_v17 = vadd.f32 %v11693_v53, %v4362_v48 }
 0x8a3   :  { %v11803_v33 = vadd.f32 %v11693_v53, %v4363_v0  ;;  %v11806_v21 = vadd.f32 %v11693_v53, %v4364_v13  ;;  %v11809_v49 = vadd.f32 %v11693_v53, %v4365_v30  ;;  %v11812_v43 = vadd.f32 %v11693_v53, %v4366_v8 }
 0x8a4   :  { %v11815_v14 = vadd.f32 %v11693_v53, %v4367_v29  ;;  %v11818_v37 = vadd.f32 %v11693_v53, %v4368_v54  ;;  %v11821_v39 = vadd.f32 %v11693_v53, %v4369_v40  ;;  %v11824_v22 = vadd.f32 %v11693_v53, %v4370_v26 }
 0x8a5   :  { %v11827_v15 = vadd.f32 %v11693_v53, %v4371_v4  ;;  %v11830_v2 = vadd.f32 %v11693_v53, %v4372_v60  ;;  %v11833_v38 = vadd.f32 %v11693_v53, %v4373_v20  ;;  %v11836_v62 = vadd.f32 %v11693_v53, %v4374_v55 }
 0x8a6   :  { %v11839_v48 = vadd.f32 %v11693_v53, %v4375_v46  ;;  %v11842_v0 = vadd.f32 %v11693_v53, %v4376_v9  ;;  %v11845_v13 = vadd.f32 %v11693_v53, %v4377_v27  ;;  %v11848_v30 = vadd.f32 %v11693_v53, %v4378_v52 }
 0x8a7   :  { %v11851_v8 = vadd.f32 %v11693_v53, %v4379_v31  ;;  %v11854_v29 = vadd.f32 %v11693_v53, %v4380_v12  ;;  %v11857_v54 = vadd.f32 %v11693_v53, %v4381_v51  ;;  %v11860_v40 = vadd.f32 %v11693_v53, %v4382_v18 }
 0x8a8   :  { %v11863_v26 = vadd.f32 %v11693_v53, %v4383_v45  ;;  %v11866_v4 = vadd.f32 %v11693_v53, %v4384_v3  ;;  %v4396_v60 = vadd.f32 %v11693_v53, %v11708_v6  ;;  %v11871_v20 = vadd.f32 %v11693_v53, %v4386_v58 }
 0x8a9   :  { %v4457_v55 = vmul.f32 0.01, %v4393_v44  ;;  %v4458_v46 = vmul.f32 0.01, %v4394_v59  ;;  %v4329_v9 = vmul.f32 %v11691_v36, %v11250_v11  ;;  %v4397_v27 = vadd.f32 %v11693_v53, %v11712_v41 }
 0x8aa   :  { %v4459_v52 = vmul.f32 0.01, %v4395_v32  ;;  %v4330_v51 = vmul.f32 %v11691_v36, %v11254_v28  ;;  %v4398_v6 = vadd.f32 %v11693_v53, %v11716_v16  ;;  %v4460_v18 = vmul.f32 0.01, %v4396_v60 }
 0x8ab   :  { %v11877_v31 = vmax.f32 %v4394_v59, %v4458_v46  ;;  %v11879_v12 = vmax.f32 %v4393_v44, %v4457_v55  ;;  %v4331_v45 = vmul.f32 %v11691_v36, %v11258_v10  ;;  %v4399_v11 = vadd.f32 %v11693_v53, %v4329_v9 }
 0x8ac   :  { %v4461_v3 = vmul.f32 0.01, %v4397_v27  ;;  %v11892_v41 = vmax.f32 %v4395_v32, %v4459_v52  ;;  %v4332_v28 = vmul.f32 %v11691_v36, %v11262_v57  ;;  %v4400_v10 = vadd.f32 %v11693_v53, %v4330_v51 }
 0x8ad   :  { %8453 = vmatprep.mubr.msk.f32.mxu0 %vm153_vm0, %v11879_v12  ;;  %8553 = vmatprep.mubr.msk.f32.mxu1 %vm153_vm0, %v11879_v12  ;;  %v4462_v16 = vmul.f32 0.01, %v4398_v6  ;;  %v11906_v58 = vmax.f32 %v4396_v60, %v4460_v18  ;;  %v4333_v44 = vmul.f32 %v11691_v36, %v11266_v25  ;;  %v4401_v59 = vadd.f32 %v11693_v53, %v4331_v45 }
 0x8ae   :  { %8454 = vmatmul.mubr.msk.f32.vlgmr.msra.gmra.mrb[80].mxu0 %vm153_vm0, %v11877_v31  ;;  %8554 = vmatmul.mubr.msk.f32.vlgmr.msra.gmra.mrb[76].mxu1 %vm153_vm0, %v11877_v31  ;;  %v4463_v32 = vmul.f32 0.01, %v4399_v11  ;;  %v11911_v55 = vmax.f32 %v4397_v27, %v4461_v3  ;;  %v4334_v57 = vmul.f32 %v11691_v36, %v11270_v7  ;;  %v4402_v25 = vadd.f32 %v11693_v53, %v4332_v28 }
 0x8af   :  { %8456 = vmatprep.mubr.msk.f32.mxu0 %vm153_vm0, %v11892_v41  ;;  %8556 = vmatprep.mubr.msk.f32.mxu1 %vm153_vm0, %v11892_v41  ;;  %v11924_v60 = vmax.f32 %v4398_v6, %v4462_v16  ;;  %v4335_v46 = vmul.f32 %v11691_v36, %v11274_v61  ;;  %v4403_v9 = vadd.f32 %v11693_v53, %v4333_v44  ;;  %v4465_v27 = vmul.f32 0.01, %v4401_v59 }
 0x8b0   :  { %9068 = vmatpush3.bf16.msra.mxu1 %v11634_v63  ;;  %v4464_v63 = vmul.f32 0.01, %v4400_v10  ;;  %v11929_v52 = vmax.f32 %v4399_v11, %v4463_v32  ;;  %v4336_v7 = vmul.f32 %v11691_v36, %v11278_v24  ;;  %v4404_v61 = vadd.f32 %v11693_v53, %v4334_v57 }
 0x8b1   :  { %v4466_v51 = vmul.f32 0.01, %v4402_v25  ;;  %v4337_v18 = vmul.f32 %v11691_v36, %v11282_v5  ;;  %v4405_v45 = vadd.f32 %v11693_v53, %v4335_v46  ;;  %v4467_v11 = vmul.f32 0.01, %v4403_v9  ;;  %v13202_v46 = vld [vmem:[#allocation25_spill] sm:$0xff] }
 0x8b2   :  { %8457 = vmatmul.mubr.msk.f32.gmra.mrb[82].mxu0 %vm153_vm0, %v11906_v58  ;;  %8557 = vmatmul.mubr.msk.f32.gmra.mrb[78].mxu1 %vm153_vm0, %v11906_v58  ;;  %v11942_v6 = vmax.f32 %v4400_v10, %v4464_v63  ;;  %v11947_v3 = vmax.f32 %v4401_v59, %v4465_v27  ;;  %v4338_v24 = vmul.f32 %v11691_v36, %v11286_v1  ;;  %v4468_v28 = vmul.f32 0.01, %v4404_v61  ;;  %v13201_v1 = vld [vmem:[#allocation24_spill] sm:$0xff] }
 0x8b3   :  { %8459 = vmatprep.mubr.msk.f32.mxu0 %vm153_vm0, %v11911_v55  ;;  %8559 = vmatprep.mubr.msk.f32.mxu1 %vm153_vm0, %v11911_v55  ;;  %v4406_v5 = vadd.f32 %v11693_v53, %v4336_v7  ;;  %v11960_v10 = vmax.f32 %v4402_v25, %v4466_v51  ;;  %v4339_v16 = vmul.f32 %v11691_v36, %v11290_v19  ;;  %v4469_v59 = vmul.f32 0.01, %v4405_v45 }
 0x8b4   :  { %v4407_v44 = vadd.f32 %v11693_v53, %v4337_v18  ;;  %v11965_v32 = vmax.f32 %v4403_v9, %v4467_v11  ;;  %v4340_v19 = vmul.f32 %v11691_v36, %v13201_v1  ;;  %v4408_v57 = vadd.f32 %v11693_v53, %v4338_v24 }
 0x8b5   :  { %v4470_v25 = vmul.f32 0.01, %v4406_v5  ;;  %v11978_v63 = vmax.f32 %v4404_v61, %v4468_v28  ;;  %v4341_v9 = vmul.f32 %v11691_v36, %v13202_v46  ;;  %v4409_v27 = vadd.f32 %v11693_v53, %v4339_v16  ;;  %v13204_v61 = vld [vmem:[#allocation26_spill] sm:$0xff]  ;;  %v13206_v28 = vld [vmem:[#allocation27_spill] sm:$0xff] }
 0x8b6   :  { %8460 = vmatmul.mubr.msk.f32.gmra.mrb[84].mxu0 %vm153_vm0, %v11924_v60  ;;  %8560 = vmatmul.mubr.msk.f32.gmra.mrb[80].mxu1 %vm153_vm0, %v11924_v60  ;;  %v4471_v7 = vmul.f32 0.01, %v4407_v44  ;;  %v11983_v51 = vmax.f32 %v4405_v45, %v4469_v59  ;;  %v4342_v18 = vmul.f32 %v11691_v36, %v13204_v61  ;;  %v4410_v11 = vadd.f32 %v11693_v53, %v4340_v19 }
 0x8b7   :  { %8462 = vmatprep.mubr.msk.f32.mxu0 %vm153_vm0, %v11929_v52  ;;  %8562 = vmatprep.mubr.msk.f32.mxu1 %vm153_vm0, %v11929_v52  ;;  %v4472_v24 = vmul.f32 0.01, %v4408_v57  ;;  %v11996_v45 = vmax.f32 %v4406_v5, %v4470_v25  ;;  %v4343_v16 = vmul.f32 %v11691_v36, %v13206_v28  ;;  %v4411_v59 = vadd.f32 %v11693_v53, %v4341_v9  ;;  %v13208_v5 = vld [vmem:[#allocation28_spill] sm:$0xff] }
 0x8b8   :  { %13203 = vst [vmem:[#allocation14_spill] sm:$0xff] %v11983_v51  ;;  %v4473_v1 = vmul.f32 0.01, %v4409_v27  ;;  %v12001_v46 = vmax.f32 %v4407_v44, %v4471_v7  ;;  %v4344_v19 = vmul.f32 %v11691_v36, %v13208_v5  ;;  %v4412_v25 = vadd.f32 %v11693_v53, %v4342_v18  ;;  %v13210_v7 = vld [vmem:[#allocation29_spill] sm:$0xff] }
 0x8b9   :  { %13205 = vst [vmem:[#allocation17_spill] sm:$0xff] %v11996_v45  ;;  %v4474_v9 = vmul.f32 0.01, %v4410_v11  ;;  %v12014_v44 = vmax.f32 %v4408_v57, %v4472_v24  ;;  %v4345_v61 = vmul.f32 %v11691_v36, %v13210_v7  ;;  %v4413_v28 = vadd.f32 %v11693_v53, %v4343_v16  ;;  %v13212_v57 = vld [vmem:[#allocation30_spill] sm:$0xff] }
 0x8ba   :  { %8463 = vmatmul.mubr.msk.f32.gmra.mrb[86].mxu0 %vm153_vm0, %v11942_v6  ;;  %8563 = vmatmul.mubr.msk.f32.gmra.mrb[82].mxu1 %vm153_vm0, %v11942_v6  ;;  %13207 = vst [vmem:[#allocation16_spill] sm:$0xff] %v12001_v46  ;;  %v4346_v18 = vmul.f32 %v11691_v36, %v13212_v57  ;;  %v4414_v24 = vadd.f32 %v11693_v53, %v4344_v19  ;;  %v4476_v16 = vmul.f32 0.01, %v4412_v25 }
 0x8bb   :  { %8465 = vmatprep.mubr.msk.f32.mxu0 %vm153_vm0, %v11947_v3  ;;  %8565 = vmatprep.mubr.msk.f32.mxu1 %vm153_vm0, %v11947_v3  ;;  %13209 = vst [vmem:[#allocation19_spill] sm:$0xff] %v12014_v44  ;;  %v4415_v7 = vadd.f32 %v11693_v53, %v4345_v61 }
 0x8bc   :  { %v4478_v61 = vmul.f32 0.01, %v4414_v24 }
 0x8be   :  { %8466 = vmatmul.mubr.msk.f32.gmra.mrb[88].mxu0 %vm153_vm0, %v11960_v10  ;;  %8566 = vmatmul.mubr.msk.f32.gmra.mrb[84].mxu1 %vm153_vm0, %v11960_v10 }
 0x8bf   :  { %8468 = vmatprep.mubr.msk.f32.mxu0 %vm153_vm0, %v11965_v32  ;;  %8568 = vmatprep.mubr.msk.f32.mxu1 %vm153_vm0, %v11965_v32 }
 0x8c2   :  { %8469 = vmatmul.mubr.msk.f32.gmra.mrb[90].mxu0 %vm153_vm0, %v11978_v63  ;;  %8569 = vmatmul.mubr.msk.f32.gmra.mrb[86].mxu1 %vm153_vm0, %v11978_v63 }
 0x8c3   :  { %8471 = vmatprep.mubr.msk.f32.mxu0 %vm153_vm0, %v11983_v51  ;;  %8571 = vmatprep.mubr.msk.f32.mxu1 %vm153_vm0, %v11983_v51  ;;  %v12019_v51 = vmax.f32 %v4409_v27, %v4473_v1  ;;  %v12032_v27 = vmax.f32 %v4410_v11, %v4474_v9  ;;  %v13214_v1 = vld [vmem:[#allocation31_spill] sm:$0xff]  ;;  %v13216_v11 = vld [vmem:[#allocation32_spill] sm:$0xff]  ;;  %v4416_v9 = vadd.f32 %v11693_v53, %v4346_v18 }
 0x8c4   :  { %v4347_v5 = vmul.f32 %v11691_v36, %v13214_v1  ;;  %v4348_v19 = vmul.f32 %v11691_v36, %v13216_v11 }
 0x8c5   :  { %13211 = vst [vmem:[#allocation18_spill] sm:$0xff] %v12019_v51  ;;  %13213 = vst [vmem:[#allocation5_spill] sm:$0xff] %v12032_v27 }
 0x8c6   :  { %8472 = vmatmul.mubr.msk.f32.gmra.mrb[92].mxu0 %vm153_vm0, %v11996_v45  ;;  %8572 = vmatmul.mubr.msk.f32.gmra.mrb[88].mxu1 %vm153_vm0, %v11996_v45  ;;  %v4475_v45 = vmul.f32 0.01, %v4411_v59  ;;  %v4417_v1 = vadd.f32 %v11693_v53, %v4347_v5  ;;  %v4480_v5 = vmul.f32 0.01, %v4416_v9 }
 0x8c7   :  { %8474 = vmatprep.mubr.msk.f32.mxu0 %vm153_vm0, %v12001_v46  ;;  %8574 = vmatprep.mubr.msk.f32.mxu1 %vm153_vm0, %v12001_v46 }
 0x8c8   :  { %v12037_v46 = vmax.f32 %v4411_v59, %v4475_v45  ;;  %v12050_v45 = vmax.f32 %v4412_v25, %v4476_v16  ;;  %v13218_v59 = vld [vmem:[#allocation33_spill] sm:$0xff]  ;;  %v13220_v25 = vld [vmem:[#allocation34_spill] sm:$0xff]  ;;  %v4418_v16 = vadd.f32 %v11693_v53, %v4348_v19 }
 0x8c9   :  { %v4349_v57 = vmul.f32 %v11691_v36, %v13218_v59  ;;  %v4350_v18 = vmul.f32 %v11691_v36, %v13220_v25 }
 0x8ca   :  { %8475 = vmatmul.mubr.msk.f32.gmra.mrb[94].mxu0 %vm153_vm0, %v12014_v44  ;;  %8575 = vmatmul.mubr.msk.f32.gmra.mrb[90].mxu1 %vm153_vm0, %v12014_v44  ;;  %v4477_v44 = vmul.f32 0.01, %v4413_v28  ;;  %13215 = vst [vmem:[#allocation4_spill] sm:$0xff] %v12037_v46  ;;  %13217 = vst [vmem:[#allocation7_spill] sm:$0xff] %v12050_v45 }
 0x8cb   :  { %8477 = vmatprep.mubr.msk.f32.mxu0 %vm153_vm0, %v12019_v51  ;;  %8577 = vmatprep.mubr.msk.f32.mxu1 %vm153_vm0, %v12019_v51  ;;  %v4419_v59 = vadd.f32 %v11693_v53, %v4349_v57  ;;  %v4482_v57 = vmul.f32 0.01, %v4418_v16 }
 0x8cc   :  { %v12055_v51 = vmax.f32 %v4413_v28, %v4477_v44  ;;  %v12068_v44 = vmax.f32 %v4414_v24, %v4478_v61  ;;  %v13222_v28 = vld [vmem:[#allocation35_spill] sm:$0xff]  ;;  %v13224_v24 = vld [vmem:[#allocation36_spill] sm:$0xff]  ;;  %v4420_v61 = vadd.f32 %v11693_v53, %v4350_v18 }
 0x8cd   :  { %v4351_v11 = vmul.f32 %v11691_v36, %v13222_v28  ;;  %v4352_v19 = vmul.f32 %v11691_v36, %v13224_v24 }
 0x8ce   :  { %8478 = vmatmul.mubr.msk.f32.gmra.mrb[96].mxu0 %vm153_vm0, %v12032_v27  ;;  %8578 = vmatmul.mubr.msk.f32.gmra.mrb[92].mxu1 %vm153_vm0, %v12032_v27  ;;  %v4479_v27 = vmul.f32 0.01, %v4415_v7  ;;  %13219 = vst [vmem:[#allocation6_spill] sm:$0xff] %v12055_v51  ;;  %13221 = vst [vmem:[#allocation9_spill] sm:$0xff] %v12068_v44 }
 0x8cf   :  { %8480 = vmatprep.mubr.msk.f32.mxu0 %vm153_vm0, %v12037_v46  ;;  %8580 = vmatprep.mubr.msk.f32.mxu1 %vm153_vm0, %v12037_v46  ;;  %v4421_v28 = vadd.f32 %v11693_v53, %v4351_v11  ;;  %v4484_v11 = vmul.f32 0.01, %v4420_v61 }
 0x8d0   :  { %v12073_v46 = vmax.f32 %v4415_v7, %v4479_v27  ;;  %v12086_v27 = vmax.f32 %v4416_v9, %v4480_v5  ;;  %v13226_v7 = vld [vmem:[#allocation37_spill] sm:$0xff]  ;;  %v13227_v9 = vld [vmem:[#allocation38_spill] sm:$0xff]  ;;  %v4422_v5 = vadd.f32 %v11693_v53, %v4352_v19 }
 0x8d1   :  { %v4353_v25 = vmul.f32 %v11691_v36, %v13226_v7  ;;  %v4354_v18 = vmul.f32 %v11691_v36, %v13227_v9  ;;  %v12120_v19 = vmax.f32 %v4420_v61, %v4484_v11  ;;  %v4492_v11 = vmul.f32 0.01, %v11788_v47 }
 0x8d2   :  { %8481 = vmatmul.mubr.msk.f32.gmra.mrb[98].mxu0 %vm153_vm0, %v12050_v45  ;;  %8581 = vmatmul.mubr.msk.f32.gmra.mrb[94].mxu1 %vm153_vm0, %v12050_v45  ;;  %v4481_v45 = vmul.f32 0.01, %v4417_v1  ;;  %13223 = vst [vmem:[#allocation8_spill] sm:$0xff] %v12073_v46  ;;  %13225 = vst [vmem:[#allocation11_spill] sm:$0xff] %v12086_v27 }
 0x8d3   :  { %8483 = vmatprep.mubr.msk.f32.mxu0 %vm153_vm0, %v12055_v51  ;;  %8583 = vmatprep.mubr.msk.f32.mxu1 %vm153_vm0, %v12055_v51  ;;  %v4423_v7 = vadd.f32 %v11693_v53, %v4353_v25 }
 0x8d4   :  { %v12091_v51 = vmax.f32 %v4417_v1, %v4481_v45  ;;  %v12104_v45 = vmax.f32 %v4418_v16, %v4482_v57  ;;  %v13228_v1 = vld [vmem:[#allocation39_spill] sm:$0xff]  ;;  %v4424_v16 = vadd.f32 %v11693_v53, %v4354_v18  ;;  %v4491_v18 = vmul.f32 0.01, %v11785_v34 }
 0x8d5   :  { %v4355_v24 = vmul.f32 %v11691_v36, %v13228_v1  ;;  %v4486_v36 = vmul.f32 0.01, %v4422_v5 }
 0x8d6   :  { %8484 = vmatmul.mubr.msk.f32.gmra.mrb[100].mxu0 %vm153_vm0, %v12068_v44  ;;  %8584 = vmatmul.mubr.msk.f32.gmra.mrb[96].mxu1 %vm153_vm0, %v12068_v44  ;;  %v4483_v44 = vmul.f32 0.01, %v4419_v59  ;;  %v4488_v25 = vmul.f32 0.01, %v4424_v16 }
 0x8d7   :  { %8486 = vmatprep.mubr.msk.f32.mxu0 %vm153_vm0, %v12073_v46  ;;  %8586 = vmatprep.mubr.msk.f32.mxu1 %vm153_vm0, %v12073_v46  ;;  %v12133_v61 = vmax.f32 %v4422_v5, %v4486_v36 }
 0x8d8   :  { %v12109_v46 = vmax.f32 %v4419_v59, %v4483_v44  ;;  %v4425_v44 = vadd.f32 %v11693_v53, %v4355_v24  ;;  %v4487_v59 = vmul.f32 0.01, %v4423_v7  ;;  %v4493_v24 = vmul.f32 0.01, %v11791_v56 }
 0x8da   :  { %8487 = vmatmul.mubr.msk.f32.gmra.mrb[102].mxu0 %vm153_vm0, %v12086_v27  ;;  %8587 = vmatmul.mubr.msk.f32.gmra.mrb[98].mxu1 %vm153_vm0, %v12086_v27  ;;  %v4485_v27 = vmul.f32 0.01, %v4421_v28  ;;  %v4489_v9 = vmul.f32 0.01, %v4425_v44  ;;  %v12135_v53 = vmax.f32 %v4423_v7, %v4487_v59  ;;  %v12165_v7 = vmax.f32 %v11785_v34, %v4491_v18 }
 0x8db   :  { %8489 = vmatprep.mubr.msk.f32.mxu0 %vm153_vm0, %v12091_v51  ;;  %8589 = vmatprep.mubr.msk.f32.mxu1 %vm153_vm0, %v12091_v51  ;;  %v4495_v34 = vmul.f32 0.01, %v11797_v35  ;;  %v12181_v36 = vmax.f32 %v11791_v56, %v4493_v24  ;;  %v4497_v56 = vmul.f32 0.01, %v11803_v33 }
 0x8dc   :  { %v12123_v57 = vmax.f32 %v4421_v28, %v4485_v27  ;;  %v4490_v27 = vmul.f32 0.01, %v11782_v23  ;;  %v12146_v28 = vmax.f32 %v4424_v16, %v4488_v25  ;;  %v12149_v5 = vmax.f32 %v4425_v44, %v4489_v9 }
 0x8dd   :  { %v12177_v16 = vmax.f32 %v11788_v47, %v4492_v11  ;;  %v4496_v47 = vmul.f32 0.01, %v11800_v17  ;;  %v12197_v59 = vmax.f32 %v11797_v35, %v4495_v34  ;;  %v4499_v35 = vmul.f32 0.01, %v11809_v49 }
 0x8de   :  { %8490 = vmatmul.mubr.msk.f32.gmra.mrb[104].mxu0 %vm153_vm0, %v12104_v45  ;;  %8590 = vmatmul.mubr.msk.f32.gmra.mrb[100].mxu1 %vm153_vm0, %v12104_v45  ;;  %v12161_v1 = vmax.f32 %v11782_v23, %v4490_v27  ;;  %v4494_v23 = vmul.f32 0.01, %v11794_v50  ;;  %v12213_v9 = vmax.f32 %v11803_v33, %v4497_v56  ;;  %v4501_v33 = vmul.f32 0.01, %v11815_v14 }
 0x8df   :  { %8492 = vmatprep.mubr.msk.f32.mxu0 %vm153_vm0, %v12109_v46  ;;  %8592 = vmatprep.mubr.msk.f32.mxu1 %vm153_vm0, %v12109_v46  ;;  %v12209_v25 = vmax.f32 %v11800_v17, %v4496_v47  ;;  %v4500_v17 = vmul.f32 0.01, %v11812_v43  ;;  %v12229_v18 = vmax.f32 %v11809_v49, %v4499_v35  ;;  %v4503_v49 = vmul.f32 0.01, %v11821_v39 }
 0x8e0   :  { %v12193_v44 = vmax.f32 %v11794_v50, %v4494_v23  ;;  %v4498_v50 = vmul.f32 0.01, %v11806_v21  ;;  %v12245_v24 = vmax.f32 %v11815_v14, %v4501_v33  ;;  %v4505_v14 = vmul.f32 0.01, %v11827_v15 }
 0x8e1   :  { %v12241_v11 = vmax.f32 %v11812_v43, %v4500_v17  ;;  %v4504_v43 = vmul.f32 0.01, %v11824_v22  ;;  %v12261_v34 = vmax.f32 %v11821_v39, %v4503_v49  ;;  %v4507_v39 = vmul.f32 0.01, %v11833_v38 }
 0x8e2   :  { %8493 = vmatmul.mubr.msk.f32.gmra.mrb[106].mxu0 %vm153_vm0, %v12120_v19  ;;  %8593 = vmatmul.mubr.msk.f32.gmra.mrb[102].mxu1 %vm153_vm0, %v12120_v19  ;;  %v12225_v27 = vmax.f32 %v11806_v21, %v4498_v50  ;;  %v4502_v21 = vmul.f32 0.01, %v11818_v37  ;;  %v12277_v56 = vmax.f32 %v11827_v15, %v4505_v14  ;;  %v4509_v15 = vmul.f32 0.01, %v11839_v48 }
 0x8e3   :  { %8495 = vmatprep.mubr.msk.f32.mxu0 %vm153_vm0, %v12123_v57  ;;  %8595 = vmatprep.mubr.msk.f32.mxu1 %vm153_vm0, %v12123_v57  ;;  %v12273_v47 = vmax.f32 %v11824_v22, %v4504_v43  ;;  %v4508_v22 = vmul.f32 0.01, %v11836_v62  ;;  %v12293_v35 = vmax.f32 %v11833_v38, %v4507_v39  ;;  %v4511_v38 = vmul.f32 0.01, %v11845_v13 }
 0x8e4   :  { %v12257_v23 = vmax.f32 %v11818_v37, %v4502_v21  ;;  %v4506_v37 = vmul.f32 0.01, %v11830_v2  ;;  %v12309_v33 = vmax.f32 %v11839_v48, %v4509_v15  ;;  %v4513_v48 = vmul.f32 0.01, %v11851_v8 }
 0x8e5   :  { %v12305_v17 = vmax.f32 %v11836_v62, %v4508_v22  ;;  %v4512_v62 = vmul.f32 0.01, %v11848_v30  ;;  %v12325_v49 = vmax.f32 %v11845_v13, %v4511_v38  ;;  %v4515_v13 = vmul.f32 0.01, %v11857_v54 }
 0x8e6   :  { %8496 = vmatmul.mubr.msk.f32.gmra.mrb[108].mxu0 %vm153_vm0, %v12133_v61  ;;  %8596 = vmatmul.mubr.msk.f32.gmra.mrb[104].mxu1 %vm153_vm0, %v12133_v61  ;;  %v12289_v50 = vmax.f32 %v11830_v2, %v4506_v37  ;;  %v4510_v2 = vmul.f32 0.01, %v11842_v0  ;;  %v12341_v14 = vmax.f32 %v11851_v8, %v4513_v48  ;;  %v4517_v8 = vmul.f32 0.01, %v11863_v26 }
 0x8e7   :  { %8498 = vmatprep.mubr.msk.f32.mxu0 %vm153_vm0, %v12135_v53  ;;  %8598 = vmatprep.mubr.msk.f32.mxu1 %vm153_vm0, %v12135_v53  ;;  %v12337_v43 = vmax.f32 %v11848_v30, %v4512_v62  ;;  %v4516_v30 = vmul.f32 0.01, %v11860_v40  ;;  %v12357_v39 = vmax.f32 %v11857_v54, %v4515_v13  ;;  %v4519_v54 = vmul.f32 0.01, %v11698_v42 }
 0x8e8   :  { %v12321_v21 = vmax.f32 %v11842_v0, %v4510_v2  ;;  %v4514_v0 = vmul.f32 0.01, %v11854_v29  ;;  %v12373_v15 = vmax.f32 %v11863_v26, %v4517_v8 }
 0x8e9   :  { %v12369_v22 = vmax.f32 %v11860_v40, %v4516_v30  ;;  %v4520_v40 = vmul.f32 0.01, %v11871_v20  ;;  %v12388_v26 = vmax.f32 %v11698_v42, %v4519_v54  ;;  %v13229_v42 = vld [vmem:[#allocation14_spill] sm:$0xff] }
 0x8ea   :  { %8499 = vmatmul.mubr.msk.f32.gmra.mrb[110].mxu0 %vm153_vm0, %v12146_v28  ;;  %8599 = vmatmul.mubr.msk.f32.gmra.mrb[106].mxu1 %vm153_vm0, %v12146_v28  ;;  %v12353_v37 = vmax.f32 %v11854_v29, %v4514_v0  ;;  %v4518_v29 = vmul.f32 0.01, %v11866_v4 }
 0x8eb   :  { %8501 = vmatprep.mubr.msk.f32.mxu0 %vm153_vm0, %v12149_v5  ;;  %8601 = vmatprep.mubr.msk.f32.mxu1 %vm153_vm0, %v12149_v5  ;;  %v12399_v38 = vmax.f32 %v11871_v20, %v4520_v40  ;;  %v13231_v20 = vld [vmem:[#allocation16_spill] sm:$0xff] }
 0x8ec   :  { %v12385_v2 = vmax.f32 %v11866_v4, %v4518_v29  ;;  %v13230_v4 = vld [vmem:[#allocation17_spill] sm:$0xff] }
 0x8ee   :  { %8502 = vmatmul.mubr.msk.f32.gmra.mrb[112].mxu0 %vm153_vm0, %v12161_v1  ;;  %8602 = vmatmul.mubr.msk.f32.gmra.mrb[108].mxu1 %vm153_vm0, %v12161_v1 }
 0x8ef   :  { %8504 = vmatprep.mubr.msk.f32.mxu0 %vm153_vm0, %v12165_v7  ;;  %8604 = vmatprep.mubr.msk.f32.mxu1 %vm153_vm0, %v12165_v7 }
 0x8f2   :  { %8505 = vmatmul.mubr.msk.f32.gmra.mrb[114].mxu0 %vm153_vm0, %v12177_v16  ;;  %8605 = vmatmul.mubr.msk.f32.gmra.mrb[110].mxu1 %vm153_vm0, %v12177_v16 }
 0x8f3   :  { %8507 = vmatprep.mubr.msk.f32.mxu0 %vm153_vm0, %v12181_v36  ;;  %8607 = vmatprep.mubr.msk.f32.mxu1 %vm153_vm0, %v12181_v36 }
 0x8f6   :  { %8508 = vmatmul.mubr.msk.f32.gmra.mrb[116].mxu0 %vm153_vm0, %v12193_v44  ;;  %8608 = vmatmul.mubr.msk.f32.gmra.mrb[112].mxu1 %vm153_vm0, %v12193_v44 }
 0x8f7   :  { %8510 = vmatprep.mubr.msk.f32.mxu0 %vm153_vm0, %v12197_v59  ;;  %8610 = vmatprep.mubr.msk.f32.mxu1 %vm153_vm0, %v12197_v59 }
 0x8fa   :  { %8511 = vmatmul.mubr.msk.f32.gmra.mrb[118].mxu0 %vm153_vm0, %v12209_v25  ;;  %8611 = vmatmul.mubr.msk.f32.gmra.mrb[114].mxu1 %vm153_vm0, %v12209_v25 }
 0x8fb   :  { %8513 = vmatprep.mubr.msk.f32.mxu0 %vm153_vm0, %v12213_v9  ;;  %8613 = vmatprep.mubr.msk.f32.mxu1 %vm153_vm0, %v12213_v9 }
 0x8fe   :  { %8514 = vmatmul.mubr.msk.f32.gmra.mrb[120].mxu0 %vm153_vm0, %v12225_v27  ;;  %8614 = vmatmul.mubr.msk.f32.gmra.mrb[116].mxu1 %vm153_vm0, %v12225_v27 }
 0x8ff   :  { %8516 = vmatprep.mubr.msk.f32.mxu0 %vm153_vm0, %v12229_v18  ;;  %8616 = vmatprep.mubr.msk.f32.mxu1 %vm153_vm0, %v12229_v18 }
 0x902   :  { %8517 = vmatmul.mubr.msk.f32.gmra.mrb[122].mxu0 %vm153_vm0, %v12241_v11  ;;  %8617 = vmatmul.mubr.msk.f32.gmra.mrb[118].mxu1 %vm153_vm0, %v12241_v11 }
 0x903   :  { %8519 = vmatprep.mubr.msk.f32.mxu0 %vm153_vm0, %v12245_v24  ;;  %8619 = vmatprep.mubr.msk.f32.mxu1 %vm153_vm0, %v12245_v24 }
 0x906   :  { %8520 = vmatmul.mubr.msk.f32.gmra.mrb[124].mxu0 %vm153_vm0, %v12257_v23  ;;  %8620 = vmatmul.mubr.msk.f32.gmra.mrb[120].mxu1 %vm153_vm0, %v12257_v23 }
 0x907   :  { %8522 = vmatprep.mubr.msk.f32.mxu0 %vm153_vm0, %v12261_v34  ;;  %8622 = vmatprep.mubr.msk.f32.mxu1 %vm153_vm0, %v12261_v34 }
 0x90a   :  { %8523 = vmatmul.mubr.msk.f32.gmra.mrb[126].mxu0 %vm153_vm0, %v12273_v47  ;;  %8623 = vmatmul.mubr.msk.f32.gmra.mrb[122].mxu1 %vm153_vm0, %v12273_v47 }
 0x90b   :  { %8525 = vmatprep.mubr.msk.f32.mxu0 %vm153_vm0, %v12277_v56  ;;  %8625 = vmatprep.mubr.msk.f32.mxu1 %vm153_vm0, %v12277_v56 }
 0x90e   :  { %8526 = vmatmul.mubr.msk.f32.gmra.mrb[128].mxu0 %vm153_vm0, %v12289_v50  ;;  %8626 = vmatmul.mubr.msk.f32.gmra.mrb[124].mxu1 %vm153_vm0, %v12289_v50 }
 0x90f   :  { %8528 = vmatprep.mubr.msk.f32.mxu0 %vm153_vm0, %v12293_v35  ;;  %8628 = vmatprep.mubr.msk.f32.mxu1 %vm153_vm0, %v12293_v35 }
 0x912   :  { %8529 = vmatmul.mubr.msk.f32.gmra.mrb[130].mxu0 %vm153_vm0, %v12305_v17  ;;  %8629 = vmatmul.mubr.msk.f32.gmra.mrb[126].mxu1 %vm153_vm0, %v12305_v17 }
 0x913   :  { %8531 = vmatprep.mubr.msk.f32.mxu0 %vm153_vm0, %v12309_v33  ;;  %8631 = vmatprep.mubr.msk.f32.mxu1 %vm153_vm0, %v12309_v33 }
 0x916   :  { %8532 = vmatmul.mubr.msk.f32.gmra.mrb[132].mxu0 %vm153_vm0, %v12321_v21  ;;  %8632 = vmatmul.mubr.msk.f32.gmra.mrb[128].mxu1 %vm153_vm0, %v12321_v21 }
 0x917   :  { %8534 = vmatprep.mubr.msk.f32.mxu0 %vm153_vm0, %v12325_v49  ;;  %8634 = vmatprep.mubr.msk.f32.mxu1 %vm153_vm0, %v12325_v49 }
 0x91a   :  { %8535 = vmatmul.mubr.msk.f32.gmra.mrb[134].mxu0 %vm153_vm0, %v12337_v43  ;;  %8635 = vmatmul.mubr.msk.f32.gmra.mrb[130].mxu1 %vm153_vm0, %v12337_v43 }
 0x91b   :  { %8537 = vmatprep.mubr.msk.f32.mxu0 %vm153_vm0, %v12341_v14  ;;  %8637 = vmatprep.mubr.msk.f32.mxu1 %vm153_vm0, %v12341_v14 }
 0x91e   :  { %8538 = vmatmul.mubr.msk.f32.gmra.mrb[136].mxu0 %vm153_vm0, %v12353_v37  ;;  %8638 = vmatmul.mubr.msk.f32.gmra.mrb[132].mxu1 %vm153_vm0, %v12353_v37 }
 0x91f   :  { %8540 = vmatprep.mubr.msk.f32.mxu0 %vm153_vm0, %v12357_v39  ;;  %8640 = vmatprep.mubr.msk.f32.mxu1 %vm153_vm0, %v12357_v39 }
 0x922   :  { %8541 = vmatmul.mubr.msk.f32.gmra.mrb[138].mxu0 %vm153_vm0, %v12369_v22  ;;  %8641 = vmatmul.mubr.msk.f32.gmra.mrb[134].mxu1 %vm153_vm0, %v12369_v22 }
 0x923   :  { %8543 = vmatprep.mubr.msk.f32.mxu0 %vm153_vm0, %v12373_v15  ;;  %8643 = vmatprep.mubr.msk.f32.mxu1 %vm153_vm0, %v12373_v15 }
 0x926   :  { %8544 = vmatmul.mubr.msk.f32.gmra.mrb[140].mxu0 %vm153_vm0, %v12385_v2  ;;  %8644 = vmatmul.mubr.msk.f32.gmra.mrb[136].mxu1 %vm153_vm0, %v12385_v2 }
 0x927   :  { %8546 = vmatprep.mubr.msk.f32.mxu0 %vm153_vm0, %v12388_v26  ;;  %8646 = vmatprep.mubr.msk.f32.mxu1 %vm153_vm0, %v12388_v26 }
 0x92a   :  { %8547 = vmatmul.mubr.msk.f32.gmra.mrb[142].mxu0 %vm153_vm0, %v12399_v38  ;;  %8647 = vmatmul.mubr.msk.f32.gmra.mrb[138].mxu1 %vm153_vm0, %v12399_v38 }
 0x92b   :  { %8653 = vmatprep.mubr.msk.f32.mxu1 %vm153_vm0, %v11879_v12  ;;  %v13233_v12 = vld [vmem:[#allocation18_spill] sm:$0xff] }
 0x92e   :  { %8654 = vmatmul.mubr.msk.f32.vlgmr.msra.gmra.mrb[140].mxu1 %vm153_vm0, %v11877_v31  ;;  %v13232_v31 = vld [vmem:[#allocation19_spill] sm:$0xff] }
 0x92f   :  { %8656 = vmatprep.mubr.msk.f32.mxu1 %vm153_vm0, %v11892_v41  ;;  %v13234_v41 = vld [vmem:[#allocation5_spill] sm:$0xff] }
 0x932   :  { %8657 = vmatmul.mubr.msk.f32.gmra.mrb[136].mxu1 %vm153_vm0, %v11906_v58  ;;  %v13235_v58 = vld [vmem:[#allocation4_spill] sm:$0xff] }
 0x933   :  { %8659 = vmatprep.mubr.msk.f32.mxu1 %vm153_vm0, %v11911_v55  ;;  %v13236_v55 = vld [vmem:[#allocation7_spill] sm:$0xff] }
 0x936   :  { %8660 = vmatmul.mubr.msk.f32.gmra.mrb[132].mxu1 %vm153_vm0, %v11924_v60  ;;  %v13237_v60 = vld [vmem:[#allocation6_spill] sm:$0xff] }
 0x937   :  { %8662 = vmatprep.mubr.msk.f32.mxu1 %vm153_vm0, %v11929_v52  ;;  %v13238_v52 = vld [vmem:[#allocation9_spill] sm:$0xff] }
 0x93a   :  { %8663 = vmatmul.mubr.msk.f32.gmra.mrb[134].mxu1 %vm153_vm0, %v11942_v6  ;;  %v13239_v6 = vld [vmem:[#allocation8_spill] sm:$0xff] }
 0x93b   :  { %8665 = vmatprep.mubr.msk.f32.mxu1 %vm153_vm0, %v11947_v3  ;;  %v13240_v3 = vld [vmem:[#allocation11_spill] sm:$0xff] }
 0x93e   :  { %8666 = vmatmul.mubr.msk.f32.gmra.mrb[124].mxu1 %vm153_vm0, %v11960_v10 }
 0x93f   :  { %8668 = vmatprep.mubr.msk.f32.mxu1 %vm153_vm0, %v11965_v32 }
 0x942   :  { %8669 = vmatmul.mubr.msk.f32.gmra.mrb[126].mxu1 %vm153_vm0, %v11978_v63 }
 0x943   :  { %8671 = vmatprep.mubr.msk.f32.mxu1 %vm153_vm0, %v13229_v42 }
 0x946   :  { %8672 = vmatmul.mubr.msk.f32.gmra.mrb[128].mxu1 %vm153_vm0, %v13230_v4 }
 0x947   :  { %8674 = vmatprep.mubr.msk.f32.mxu1 %vm153_vm0, %v13231_v20 }
 0x94a   :  { %8675 = vmatmul.mubr.msk.f32.gmra.mrb[130].mxu1 %vm153_vm0, %v13232_v31 }
 0x94b   :  { %8677 = vmatprep.mubr.msk.f32.mxu1 %vm153_vm0, %v13233_v12 }
 0x94e   :  { %8678 = vmatmul.mubr.msk.f32.gmra.mrb[108].mxu1 %vm153_vm0, %v13234_v41 }
 0x94f   :  { %8680 = vmatprep.mubr.msk.f32.mxu1 %vm153_vm0, %v13235_v58 }
 0x952   :  { %8681 = vmatmul.mubr.msk.f32.gmra.mrb[110].mxu1 %vm153_vm0, %v13236_v55 }
 0x953   :  { %8683 = vmatprep.mubr.msk.f32.mxu1 %vm153_vm0, %v13237_v60 }
 0x956   :  { %8684 = vmatmul.mubr.msk.f32.gmra.mrb[112].mxu1 %vm153_vm0, %v13238_v52 }
 0x957   :  { %8686 = vmatprep.mubr.msk.f32.mxu1 %vm153_vm0, %v13239_v6 }
 0x95a   :  { %8687 = vmatmul.mubr.msk.f32.gmra.mrb[114].mxu1 %vm153_vm0, %v13240_v3 }
 0x95b   :  { %8689 = vmatprep.mubr.msk.f32.mxu1 %vm153_vm0, %v12091_v51 }
 0x95e   :  { %8690 = vmatmul.mubr.msk.f32.gmra.mrb[116].mxu1 %vm153_vm0, %v12104_v45 }
 0x95f   :  { %8692 = vmatprep.mubr.msk.f32.mxu1 %vm153_vm0, %v12109_v46  ;;  %v70_v46 = vstv %s6941_s2 }
 0x960   :  { %71 = vst [vmem:[#allocation2] sm:$0x1] %v70_v46 }
 0x962   :  { %8693 = vmatmul.mubr.msk.f32.gmra.mrb[118].mxu1 %vm153_vm0, %v12120_v19 }
 0x963   :  { %8695 = vmatprep.mubr.msk.f32.mxu1 %vm153_vm0, %v12123_v57 }
 0x966   :  { %8696 = vmatmul.mubr.msk.f32.gmra.mrb[120].mxu1 %vm153_vm0, %v12133_v61 }
 0x967   :  { %8698 = vmatprep.mubr.msk.f32.mxu1 %vm153_vm0, %v12135_v53 }
 0x96a   :  { %8699 = vmatmul.mubr.msk.f32.gmra.mrb[122].mxu1 %vm153_vm0, %v12146_v28 }
 0x96b   :  { %8701 = vmatprep.mubr.msk.f32.mxu1 %vm153_vm0, %v12149_v5 }
 0x96e   :  { %8702 = vmatmul.mubr.msk.f32.gmra.mrb[76].mxu1 %vm153_vm0, %v12161_v1 }
 0x96f   :  { %8704 = vmatprep.mubr.msk.f32.mxu1 %vm153_vm0, %v12165_v7 }
 0x972   :  { %8705 = vmatmul.mubr.msk.f32.gmra.mrb[78].mxu1 %vm153_vm0, %v12177_v16 }
 0x973   :  { %8707 = vmatprep.mubr.msk.f32.mxu1 %vm153_vm0, %v12181_v36 }
 0x976   :  { %8708 = vmatmul.mubr.msk.f32.gmra.mrb[80].mxu1 %vm153_vm0, %v12193_v44 }
 0x977   :  { %8710 = vmatprep.mubr.msk.f32.mxu1 %vm153_vm0, %v12197_v59 }
 0x97a   :  { %8711 = vmatmul.mubr.msk.f32.gmra.mrb[82].mxu1 %vm153_vm0, %v12209_v25 }
 0x97b   :  { %8713 = vmatprep.mubr.msk.f32.mxu1 %vm153_vm0, %v12213_v9 }
 0x97e   :  { %8714 = vmatmul.mubr.msk.f32.gmra.mrb[84].mxu1 %vm153_vm0, %v12225_v27 }
 0x97f   :  { %8716 = vmatprep.mubr.msk.f32.mxu1 %vm153_vm0, %v12229_v18 }
 0x981   :  { %v12494_v10 = vpop.f32.mrb[80].mxu0 }
 0x982   :  { %v12496_v32 = vpop.f32.mrb[81].mxu0  ;;  %8717 = vmatmul.mubr.msk.f32.gmra.mrb[86].mxu1 %vm153_vm0, %v12241_v11 }
 0x983   :  { %8719 = vmatprep.mubr.msk.f32.mxu1 %vm153_vm0, %v12245_v24 }
 0x985   :  { %v12502_v63 = vpop.f32.mrb[82].mxu0 }
 0x986   :  { %v12504_v51 = vpop.f32.mrb[83].mxu0  ;;  %8720 = vmatmul.mubr.msk.f32.gmra.mrb[88].mxu1 %vm153_vm0, %v12257_v23 }
 0x987   :  { %8722 = vmatprep.mubr.msk.f32.mxu1 %vm153_vm0, %v12261_v34 }
 0x989   :  { %v12510_v45 = vpop.f32.mrb[84].mxu0 }
 0x98a   :  { %v12512_v19 = vpop.f32.mrb[85].mxu0  ;;  %8723 = vmatmul.mubr.msk.f32.gmra.mrb[90].mxu1 %vm153_vm0, %v12273_v47 }
 0x98b   :  { %8725 = vmatprep.mubr.msk.f32.mxu1 %vm153_vm0, %v12277_v56 }
 0x98d   :  { %v12518_v57 = vpop.f32.mrb[86].mxu0 }
 0x98e   :  { %v12520_v61 = vpop.f32.mrb[87].mxu0  ;;  %8726 = vmatmul.mubr.msk.f32.gmra.mrb[92].mxu1 %vm153_vm0, %v12289_v50 }
 0x98f   :  { %8728 = vmatprep.mubr.msk.f32.mxu1 %vm153_vm0, %v12293_v35 }
 0x991   :  { %v12526_v53 = vpop.f32.mrb[88].mxu0 }
 0x992   :  { %v12528_v28 = vpop.f32.mrb[89].mxu0  ;;  %8729 = vmatmul.mubr.msk.f32.gmra.mrb[94].mxu1 %vm153_vm0, %v12305_v17 }
 0x993   :  { %8731 = vmatprep.mubr.msk.f32.mxu1 %vm153_vm0, %v12309_v33 }
 0x995   :  { %v12534_v5 = vpop.f32.mrb[90].mxu0 }
 0x996   :  { %v12536_v1 = vpop.f32.mrb[91].mxu0  ;;  %8732 = vmatmul.mubr.msk.f32.gmra.mrb[96].mxu1 %vm153_vm0, %v12321_v21 }
 0x997   :  { %8734 = vmatprep.mubr.msk.f32.mxu1 %vm153_vm0, %v12325_v49 }
 0x999   :  { %v12542_v7 = vpop.f32.mrb[92].mxu0 }
 0x99a   :  { %v12544_v16 = vpop.f32.mrb[93].mxu0  ;;  %8735 = vmatmul.mubr.msk.f32.gmra.mrb[98].mxu1 %vm153_vm0, %v12337_v43 }
 0x99b   :  { %8737 = vmatprep.mubr.msk.f32.mxu1 %vm153_vm0, %v12341_v14 }
 0x99d   :  { %v12550_v36 = vpop.f32.mrb[94].mxu0 }
 0x99e   :  { %v12552_v44 = vpop.f32.mrb[95].mxu0  ;;  %8738 = vmatmul.mubr.msk.f32.gmra.mrb[100].mxu1 %vm153_vm0, %v12353_v37 }
 0x99f   :  { %8740 = vmatprep.mubr.msk.f32.mxu1 %vm153_vm0, %v12357_v39 }
 0x9a1   :  { %v12558_v59 = vpop.f32.mrb[96].mxu0 }
 0x9a2   :  { %v12560_v25 = vpop.f32.mrb[97].mxu0  ;;  %8741 = vmatmul.mubr.msk.f32.gmra.mrb[102].mxu1 %vm153_vm0, %v12369_v22 }
 0x9a3   :  { %8743 = vmatprep.mubr.msk.f32.mxu1 %vm153_vm0, %v12373_v15 }
 0x9a5   :  { %v12566_v9 = vpop.f32.mrb[98].mxu0 }
 0x9a6   :  { %v12568_v27 = vpop.f32.mrb[99].mxu0  ;;  %8744 = vmatmul.mubr.msk.f32.gmra.mrb[104].mxu1 %vm153_vm0, %v12385_v2 }
 0x9a7   :  { %8746 = vmatprep.mubr.msk.f32.mxu1 %vm153_vm0, %v12388_v26 }
 0x9a9   :  { %v12574_v18 = vpop.f32.mrb[100].mxu0 }
 0x9aa   :  { %v12576_v11 = vpop.f32.mrb[101].mxu0  ;;  %8747 = vmatmul.mubr.msk.f32.gmra.mrb[106].mxu1 %vm153_vm0, %v12399_v38 }
 0x9ad   :  { %v12580_v24 = vpop.f32.mrb[102].mxu0 }
 0x9ae   :  { %v12582_v23 = vpop.f32.mrb[103].mxu0 }
 0x9b1   :  { %v12584_v34 = vpop.f32.mrb[104].mxu0 }
 0x9b2   :  { %v12586_v47 = vpop.f32.mrb[105].mxu0 }
 0x9b5   :  { %v12588_v56 = vpop.f32.mrb[106].mxu0 }
 0x9b6   :  { %v12590_v50 = vpop.f32.mrb[107].mxu0 }
 0x9b9   :  { %v8497_v35 = vpop.f32.mrb[108].mxu0 }
 0x9ba   :  { %v4985_v17 = vpop.f32.mrb[109].mxu0 }
 0x9bd   :  { %v8500_v33 = vpop.f32.mrb[110].mxu0 }
 0x9be   :  { %v4995_v62 = vpop.f32.mrb[111].mxu0 }
 0x9c1   :  { %v12592_v21 = vpop.f32.mrb[112].mxu0 }
 0x9c2   :  { %13241 = vst [vmem:[#allocation10_spill] sm:$0xff] %v12592_v21  ;;  %v12594_v48 = vpop.f32.mrb[113].mxu0 }
 0x9c3   :  { %13242 = vst [vmem:[#allocation13_spill] sm:$0xff] %v12594_v48 }
 0x9c5   :  { %v12596_v49 = vpop.f32.mrb[114].mxu0 }
 0x9c6   :  { %13243 = vst [vmem:[#allocation12_spill] sm:$0xff] %v12596_v49  ;;  %v12598_v0 = vpop.f32.mrb[115].mxu0 }
 0x9c7   :  { %13244 = vst [vmem:[#allocation15_spill] sm:$0xff] %v12598_v0  ;;  %v12661_v0 = vld [vmem:[#allocation2] ss:$0 sm:$0xff] }
 0x9c9   :  { %v12600_v43 = vpop.f32.mrb[116].mxu0 }
 0x9ca   :  { %13245 = vst [vmem:[#allocation3_spill] sm:$0xff] %v12600_v43  ;;  %v12602_v13 = vpop.f32.mrb[117].mxu0 }
 0x9cb   :  { %13246 = vst [vmem:[#allocation20_spill] sm:$0xff] %v12602_v13 }
 0x9cd   :  { %v12604_v14 = vpop.f32.mrb[118].mxu0 }
 0x9ce   :  { %13247 = vst [vmem:[#allocation21_spill] sm:$0xff] %v12604_v14  ;;  %v12606_v30 = vpop.f32.mrb[119].mxu0 }
 0x9cf   :  { %13248 = vst [vmem:[#allocation22_spill] sm:$0xff] %v12606_v30 }
 0x9d1   :  { %v12608_v37 = vpop.f32.mrb[120].mxu0 }
 0x9d2   :  { %13249 = vst [vmem:[#allocation23_spill] sm:$0xff] %v12608_v37  ;;  %v12610_v8 = vpop.f32.mrb[121].mxu0 }
 0x9d3   :  { %13250 = vst [vmem:[#allocation24_spill] sm:$0xff] %v12610_v8 }
 0x9d5   :  { %v12612_v39 = vpop.f32.mrb[122].mxu0 }
 0x9d6   :  { %13251 = vst [vmem:[#allocation25_spill] sm:$0xff] %v12612_v39  ;;  %v12614_v29 = vpop.f32.mrb[123].mxu0 }
 0x9d7   :  { %13252 = vst [vmem:[#allocation26_spill] sm:$0xff] %v12614_v29 }
 0x9d9   :  { %v12616_v22 = vpop.f32.mrb[124].mxu0 }
 0x9da   :  { %13253 = vst [vmem:[#allocation27_spill] sm:$0xff] %v12616_v22  ;;  %v12618_v54 = vpop.f32.mrb[125].mxu0 }
 0x9db   :  { %13254 = vst [vmem:[#allocation28_spill] sm:$0xff] %v12618_v54 }
 0x9dd   :  { %v12620_v15 = vpop.f32.mrb[126].mxu0 }
 0x9de   :  { %13255 = vst [vmem:[#allocation29_spill] sm:$0xff] %v12620_v15  ;;  %v12622_v40 = vpop.f32.mrb[127].mxu0 }
 0x9df   :  { %13256 = vst [vmem:[#allocation30_spill] sm:$0xff] %v12622_v40 }
 0x9e1   :  { %v12624_v2 = vpop.f32.mrb[128].mxu0 }
 0x9e2   :  { %v12626_v26 = vpop.f32.mrb[129].mxu0 }
 0x9e5   :  { %v12628_v38 = vpop.f32.mrb[130].mxu0 }
 0x9e6   :  { %v12630_v42 = vpop.f32.mrb[131].mxu0 }
 0x9e9   :  { %v12632_v4 = vpop.f32.mrb[132].mxu0 }
 0x9ea   :  { %v12634_v20 = vpop.f32.mrb[133].mxu0 }
 0x9ed   :  { %v12636_v31 = vpop.f32.mrb[134].mxu0 }
 0x9ee   :  { %v12638_v12 = vpop.f32.mrb[135].mxu0 }
 0x9f1   :  { %v12640_v41 = vpop.f32.mrb[136].mxu0 }
 0x9f2   :  { %v12642_v58 = vpop.f32.mrb[137].mxu0 }
 0x9f5   :  { %v12644_v55 = vpop.f32.mrb[138].mxu0 }
 0x9f6   :  { %v12646_v60 = vpop.f32.mrb[139].mxu0 }
 0x9f9   :  { %v12648_v52 = vpop.f32.mrb[140].mxu0 }
 0x9fa   :  { %v12650_v6 = vpop.f32.mrb[141].mxu0 }
 0x9fd   :  { %v8548_v3 = vpop.f32.mrb[142].mxu0  ;;  %v8648_v46 = vpop.f32.mrb[138].mxu1 }
 0x9fe   :  { %v5941_v40 = vrot.slane %v8548_v3, 6  ;;  %v6009_v15 = vadd.f32 %v8648_v46, %v8500_v33  ;;  %v12652_v54 = vpop.f32.mrb[143].mxu0  ;;  %v5542_v22 = vpop.f32.mrb[139].mxu1 }
 0x9ff   :  { %v13117_v29 = vrot.slane %v12652_v54, 6  ;;  %v6008_v39 = vadd.f32 %v5542_v22, %v4995_v62 }
 0xa01   :  { %v8655_v8 = vpop.f32.mrb[140].mxu1  ;;  %v12658_v37 = vsel %vm887_vm1, %v13117_v29, %v5941_v40 }
 0xa02   :  { %v6013_v30 = vrot.slane %v8655_v8, 2  ;;  %v5619_v14 = vpop.f32.mrb[141].mxu1 }
 0xa03   :  { %v6012_v13 = vrot.slane %v5619_v14, 2 }
 0xa04   :  { %v6017_v43 = vsel %vm893_vm3, %v6013_v30, 0.0 }
 0xa05   :  { %v6081_v33 = vadd.f32 %v6017_v43, %v6009_v15  ;;  %v6014_v3 = vsel %vm893_vm3, %v6012_v13, %v6013_v30  ;;  %v8658_v46 = vpop.f32.mrb[136].mxu1  ;;  %vm6693_vm3 = vcmask 105472  }
 0xa06   :  { %v6080_v49 = vadd.f32 %v6014_v3, %v6008_v39  ;;  %v12664_v48 = vadd.f32 %v8658_v46, %v8497_v35  ;;  %v5629_v62 = vpop.f32.mrb[137].mxu1 }
 0xa07   :  { %v6152_v22 = vadd.f32 %v12661_v0, %v6081_v33  ;;  %v12667_v21 = vadd.f32 %v5629_v62, %v4985_v17 }
 0xa08   :  { %v6151_v33 = vadd.f32 %v12661_v0, %v6080_v49 }
 0xa09   :  { %v7415_v40 = vmul.f32 -1.442695, %v6152_v22  ;;  %v8661_v8 = vpop.f32.mrb[132].mxu1 }
 0xa0a   :  { %v12670_v14 = vadd.f32 %v8661_v8, %v12584_v34  ;;  %v5639_v29 = vpop.f32.mrb[133].mxu1 }
 0xa0b   :  { %9296 = vpow2.f32 %v7415_v40  ;;  %v12673_v43 = vadd.f32 %v5639_v29, %v12586_v47 }
 0xa0d   :  { %v8664_v13 = vpop.f32.mrb[134].mxu1 }
 0xa0e   :  { %v9099_v30 = vadd.f32 %v8664_v13, %v12588_v56  ;;  %v5649_v35 = vpop.f32.mrb[135].mxu1 }
 0xa0f   :  { %v9100_v39 = vadd.f32 %v5649_v35, %v12590_v50  ;;  %v7414_v50 = vmul.f32 -1.442695, %v6151_v33 }
 0xa10   :  { %v6148_v15 = vadd.f32 %v9099_v30, %v12661_v0 }
 0xa11   :  { %v8667_v17 = vpop.f32.mrb[124].mxu1  ;;  %v6147_v47 = vadd.f32 %v9100_v39, %v12661_v0 }
 0xa12   :  { %v7411_v3 = vmul.f32 -1.442695, %v6148_v15  ;;  %v12680_v34 = vadd.f32 %v8667_v17, %v12558_v59  ;;  %v5659_v46 = vpop.f32.mrb[125].mxu1 }
 0xa13   :  { %v12683_v62 = vadd.f32 %v5659_v46, %v12560_v25  ;;  %v7410_v13 = vmul.f32 -1.442695, %v6147_v47 }
 0xa14   :  { %9298 = vpow2.f32 %v7411_v3 }
 0xa15   :  { %v9297_v56 = vpop.eup %9296  ;;  %v8670_v29 = vpop.f32.mrb[126].mxu1 }
 0xa16   :  { %v6408_v22 = vadd.f32 1.0, %v9297_v56  ;;  %v9091_v40 = vadd.f32 %v8670_v29, %v12566_v9  ;;  %v5669_v8 = vpop.f32.mrb[127].mxu1 }
 0xa17   :  { %v9092_v49 = vadd.f32 %v5669_v8, %v12568_v27 }
 0xa18   :  { %9300 = vrcp.f32 %v6408_v22  ;;  %v6140_v59 = vadd.f32 %v9091_v40, %v12661_v0 }
 0xa19   :  { %v6139_v30 = vadd.f32 %v9092_v49, %v12661_v0  ;;  %v8673_v25 = vpop.f32.mrb[128].mxu1  ;;  %9302 = vpow2.f32 %v7414_v50 }
 0xa1a   :  { %v12691_v35 = vadd.f32 %v8673_v25, %v12574_v18  ;;  %v5679_v39 = vpop.f32.mrb[129].mxu1  ;;  %v7403_v15 = vmul.f32 -1.442695, %v6140_v59  ;;  %9304 = vpow2.f32 %v7410_v13 }
 0xa1b   :  { %v12694_v17 = vadd.f32 %v5679_v39, %v12576_v11  ;;  %v7402_v9 = vmul.f32 -1.442695, %v6139_v30 }
 0xa1c   :  { %9306 = vpow2.f32 %v7403_v15 }
 0xa1d   :  { %v8676_v33 = vpop.f32.mrb[130].mxu1  ;;  %9308 = vpow2.f32 %v7402_v9 }
 0xa1e   :  { %v9299_v27 = vpop.eup %9298  ;;  %v9095_v3 = vadd.f32 %v8676_v33, %v12580_v24  ;;  %v5689_v46 = vpop.f32.mrb[131].mxu1 }
 0xa1f   :  { %v6404_v47 = vadd.f32 1.0, %v9299_v27  ;;  %v9096_v56 = vadd.f32 %v5689_v46, %v12582_v23 }
 0xa20   :  { %v6144_v18 = vadd.f32 %v9095_v3, %v12661_v0 }
 0xa21   :  { %9310 = vrcp.f32 %v6404_v47  ;;  %v6143_v29 = vadd.f32 %v9096_v56, %v12661_v0  ;;  %v8679_v22 = vpop.f32.mrb[108].mxu1 }
 0xa22   :  { %v9301_v11 = vpop.eup %9300  ;;  %v7407_v50 = vmul.f32 -1.442695, %v6144_v18  ;;  %v12701_v40 = vadd.f32 %v8679_v22, %v12494_v10  ;;  %v5699_v8 = vpop.f32.mrb[109].mxu1 }
 0xa23   :  { %v7406_v49 = vmul.f32 -1.442695, %v6143_v29  ;;  %v12704_v24 = vadd.f32 %v5699_v8, %v12496_v32  ;;  %6818 = vrot.lane.b32.xlu1 %v9301_v11, %s9568_s13  ;;  %v9303_v23 = vpop.eup %9302 }
 0xa24   :  { %9312 = vpow2.f32 %v7407_v50  ;;  %v9305_v59 = vpop.eup %9304  ;;  %v6407_v39 = vadd.f32 1.0, %v9303_v23 }
 0xa25   :  { %v8682_v13 = vpop.f32.mrb[110].mxu1  ;;  %9314 = vpow2.f32 %v7406_v49  ;;  %v6403_v33 = vadd.f32 1.0, %v9305_v59 }
 0xa26   :  { %v9075_v30 = vadd.f32 %v8682_v13, %v12502_v63  ;;  %v5709_v25 = vpop.f32.mrb[111].mxu1  ;;  %v9307_v9 = vpop.eup %9306  ;;  %9316 = vrcp.f32 %v6407_v39 }
 0xa27   :  { %v9076_v15 = vadd.f32 %v5709_v25, %v12504_v51  ;;  %v9309_v3 = vpop.eup %9308  ;;  %v6396_v46 = vadd.f32 1.0, %v9307_v9 }
 0xa28   :  { %v6124_v10 = vadd.f32 %v9075_v30, %v12661_v0  ;;  %v6395_v51 = vadd.f32 1.0, %v9309_v3 }
 0xa29   :  { %v6123_v32 = vadd.f32 %v9076_v15, %v12661_v0  ;;  %v8685_v27 = vpop.f32.mrb[112].mxu1  ;;  %9318 = vrcp.f32 %v6396_v46 }
 0xa2a   :  { %v7387_v47 = vmul.f32 -1.442695, %v6124_v10  ;;  %v12712_v56 = vadd.f32 %v8685_v27, %v12510_v45  ;;  %v5719_v18 = vpop.f32.mrb[113].mxu1  ;;  %9320 = vrcp.f32 %v6403_v33 }
 0xa2b   :  { %v9311_v63 = vpop.eup %9310  ;;  %v7386_v29 = vmul.f32 -1.442695, %v6123_v32  ;;  %v12715_v22 = vadd.f32 %v5719_v18, %v12512_v19 }
 0xa2c   :  { %6754 = vrot.lane.b32.xlu1 %v9311_v63, %s9563_s15  ;;  %9322 = vpow2.f32 %v7387_v47 }
 0xa2d   :  { %v8688_v11 = vpop.f32.mrb[114].mxu1  ;;  %9324 = vpow2.f32 %v7386_v29 }
 0xa2e   :  { %v9079_v50 = vadd.f32 %v8688_v11, %v12518_v57  ;;  %v5729_v8 = vpop.f32.mrb[115].mxu1  ;;  %v9313_v49 = vpop.eup %9312  ;;  %9326 = vrcp.f32 %v6395_v51 }
 0xa2f   :  { %v9080_v45 = vadd.f32 %v5729_v8, %v12520_v61  ;;  %v6400_v23 = vadd.f32 1.0, %v9313_v49  ;;  %v9315_v59 = vpop.eup %9314 }
 0xa30   :  { %v6128_v13 = vadd.f32 %v9079_v50, %v12661_v0  ;;  %v6399_v25 = vadd.f32 1.0, %v9315_v59  ;;  %v9317_v9 = vpop.eup %9316 }
 0xa31   :  { %v6127_v19 = vadd.f32 %v9080_v45, %v12661_v0  ;;  %v8691_v30 = vpop.f32.mrb[116].mxu1  ;;  %9328 = vrcp.f32 %v6400_v23  ;;  %6816 = vrot.lane.b32.xlu0 %v9317_v9, %s9568_s13 }
 0xa32   :  { %v12723_v39 = vadd.f32 %v8691_v30, %v12526_v53  ;;  %v5739_v15 = vpop.f32.mrb[117].mxu1  ;;  %v7391_v10 = vmul.f32 -1.442695, %v6128_v13  ;;  %9330 = vrcp.f32 %v6399_v25 }
 0xa33   :  { %v12726_v57 = vadd.f32 %v5739_v15, %v12528_v28  ;;  %v7390_v61 = vmul.f32 -1.442695, %v6127_v19  ;;  %v9319_v32 = vpop.eup %9318 }
 0xa34   :  { %v9321_v46 = vpop.eup %9320  ;;  %6722 = vrot.lane.b32.xlu1 %v9319_v32, %s9556_s14  ;;  %9332 = vpow2.f32 %v7391_v10 }
 0xa35   :  { %v8694_v33 = vpop.f32.mrb[118].mxu1  ;;  %9334 = vpow2.f32 %v7390_v61  ;;  %6752 = vrot.lane.b32.xlu0 %v9321_v46, %s9563_s15 }
 0xa36   :  { %v9083_v27 = vadd.f32 %v8694_v33, %v12534_v5  ;;  %v5749_v3 = vpop.f32.mrb[119].mxu1  ;;  %v9323_v47 = vpop.eup %9322 }
 0xa37   :  { %v9084_v53 = vadd.f32 %v5749_v3, %v12536_v1  ;;  %v9325_v18 = vpop.eup %9324  ;;  %v6380_v63 = vadd.f32 1.0, %v9323_v47 }
 0xa38   :  { %v6132_v28 = vadd.f32 %v9083_v27, %v12661_v0  ;;  %v6379_v11 = vadd.f32 1.0, %v9325_v18  ;;  %v9327_v49 = vpop.eup %9326 }
 0xa39   :  { %v6131_v29 = vadd.f32 %v9084_v53, %v12661_v0  ;;  %v8697_v51 = vpop.f32.mrb[120].mxu1  ;;  %9336 = vrcp.f32 %v6380_v63  ;;  %6720 = vrot.lane.b32.xlu0 %v9327_v49, %s9556_s14 }
 0xa3a   :  { %v7395_v5 = vmul.f32 -1.442695, %v6132_v28  ;;  %v12736_v50 = vadd.f32 %v8697_v51, %v12542_v7  ;;  %v5759_v8 = vpop.f32.mrb[121].mxu1  ;;  %9338 = vrcp.f32 %v6379_v11 }
 0xa3b   :  { %v7394_v1 = vmul.f32 -1.442695, %v6131_v29  ;;  %v12739_v45 = vadd.f32 %v5759_v8, %v12544_v16  ;;  %v9329_v23 = vpop.eup %9328 }
 0xa3c   :  { %6786 = vrot.lane.b32.xlu1 %v9329_v23, %s9566_s1  ;;  %9340 = vpow2.f32 %v7395_v5  ;;  %v9331_v7 = vpop.eup %9330 }
 0xa3d   :  { %v8700_v13 = vpop.f32.mrb[122].mxu1  ;;  %9342 = vpow2.f32 %v7394_v1  ;;  %6784 = vrot.lane.b32.xlu0 %v9331_v7, %s9566_s1 }
 0xa3e   :  { %v9087_v59 = vadd.f32 %v8700_v13, %v12550_v36  ;;  %v5769_v19 = vpop.f32.mrb[123].mxu1  ;;  %v9333_v10 = vpop.eup %9332  ;;  %v13257_v36 = vrot.slane %v12652_v54, 6 }
 0xa3f   :  { %v9088_v30 = vadd.f32 %v5769_v19, %v12552_v44  ;;  %v9335_v27 = vpop.eup %9334  ;;  %v6384_v3 = vadd.f32 1.0, %v9333_v10 }
 0xa40   :  { %v6136_v25 = vadd.f32 %v9087_v59, %v12661_v0  ;;  %v5945_v32 = vsel %vm887_vm1, 0.0, %v13257_v36  ;;  %v6383_v46 = vadd.f32 1.0, %v9335_v27  ;;  %vm6687_vm1 = vcmask 89088  }
 0xa41   :  { %v6135_v16 = vadd.f32 %v9088_v30, %v12661_v0  ;;  %v8703_v15 = vpop.f32.mrb[76].mxu1 }
 0xa42   :  { %v7399_v9 = vmul.f32 -1.442695, %v6136_v25  ;;  %v12749_v61 = vadd.f32 %v8703_v15, %v12658_v37  ;;  %v5779_v33 = vpop.f32.mrb[77].mxu1 }
 0xa43   :  { %v12754_v44 = vadd.f32 %v5945_v32, %v5779_v33  ;;  %v7398_v53 = vmul.f32 -1.442695, %v6135_v16  ;;  %v9337_v47 = vpop.eup %9336 }
 0xa44   :  { %9344 = vpow2.f32 %v7399_v9  ;;  %6706 = vrot.lane.b32.xlu0 %v9337_v47, %s9553_s3  ;;  %v9339_v54 = vpop.eup %9338 }
 0xa45   :  { %9346 = vrcp.f32 %v6384_v3  ;;  %v8706_v28 = vpop.f32.mrb[78].mxu1 }
 0xa46   :  { %9348 = vrcp.f32 %v6383_v46  ;;  %v12758_v37 = vadd.f32 %v8706_v28, %v12648_v52  ;;  %v5789_v18 = vpop.f32.mrb[79].mxu1  ;;  %v9341_v29 = vpop.eup %9340 }
 0xa47   :  { %v12761_v63 = vadd.f32 %v5789_v18, %v12650_v6  ;;  %9350 = vpow2.f32 %v7398_v53  ;;  %v9343_v51 = vpop.eup %9342  ;;  %v6388_v11 = vadd.f32 1.0, %v9341_v29 }
 0xa48   :  { %v6387_v8 = vadd.f32 1.0, %v9343_v51  ;;  %6704 = vrot.lane.b32.xlu0 %v9339_v54, %s9553_s3 }
 0xa49   :  { %v8709_v5 = vpop.f32.mrb[80].mxu1  ;;  %9352 = vrcp.f32 %v6388_v11 }
 0xa4a   :  { %v12765_v49 = vadd.f32 %v8709_v5, %v12640_v41  ;;  %v5799_v1 = vpop.f32.mrb[81].mxu1  ;;  %9354 = vrcp.f32 %v6387_v8 }
 0xa4b   :  { %v12768_v52 = vadd.f32 %v5799_v1, %v12642_v58 }
 0xa4d   :  { %v8712_v23 = vpop.f32.mrb[82].mxu1 }
 0xa4e   :  { %v9345_v6 = vpop.eup %9344  ;;  %v9131_v13 = vadd.f32 %v8712_v23, %v12644_v55  ;;  %v5809_v59 = vpop.f32.mrb[83].mxu1 }
 0xa4f   :  { %v9347_v19 = vpop.eup %9346  ;;  %v6392_v7 = vadd.f32 1.0, %v9345_v6  ;;  %v9132_v30 = vadd.f32 %v5809_v59, %v12646_v60 }
 0xa50   :  { %v9349_v25 = vpop.eup %9348  ;;  %6770 = vrot.lane.b32.xlu1 %v9347_v19, %s9560_s30  ;;  %v6096_v41 = vadd.f32 %v9131_v13, %v12661_v0 }
 0xa51   :  { %9356 = vrcp.f32 %v6392_v7  ;;  %6768 = vrot.lane.b32.xlu0 %v9349_v25, %s9560_s30  ;;  %v6095_v58 = vadd.f32 %v9132_v30, %v12661_v0  ;;  %v8715_v16 = vpop.f32.mrb[84].mxu1  ;;  %v9351_v15 = vpop.eup %9350  ;;  %v13258_v7 = vld [vmem:[#allocation10_spill] sm:$0xff] }
 0xa52   :  { %v12777_v10 = vadd.f32 %v8715_v16, %v12624_v2  ;;  %v5819_v55 = vpop.f32.mrb[85].mxu1  ;;  %v6391_v9 = vadd.f32 1.0, %v9351_v15  ;;  %v7359_v33 = vmul.f32 -1.442695, %v6096_v41 }
 0xa53   :  { %v12780_v60 = vadd.f32 %v5819_v55, %v12626_v26  ;;  %v7358_v36 = vmul.f32 -1.442695, %v6095_v58  ;;  %v9353_v32 = vpop.eup %9352  ;;  %v13259_v58 = vld [vmem:[#allocation13_spill] sm:$0xff] }
 0xa54   :  { %9358 = vrcp.f32 %v6391_v9  ;;  %v9355_v3 = vpop.eup %9354  ;;  %6738 = vrot.lane.b32.xlu1 %v9353_v32, %s9557_s18  ;;  %v13260_v9 = vld [vmem:[#allocation12_spill] sm:$0xff] }
 0xa55   :  { %v8718_v27 = vpop.f32.mrb[86].mxu1  ;;  %9360 = vpow2.f32 %v7359_v33  ;;  %6736 = vrot.lane.b32.xlu0 %v9355_v3, %s9557_s18 }
 0xa56   :  { %v9123_v46 = vadd.f32 %v8718_v27, %v12628_v38  ;;  %v5829_v53 = vpop.f32.mrb[87].mxu1  ;;  %9362 = vpow2.f32 %v7358_v36  ;;  %v13261_v27 = vld [vmem:[#allocation15_spill] sm:$0xff] }
 0xa57   :  { %v9124_v2 = vadd.f32 %v5829_v53, %v12630_v42 }
 0xa58   :  { %v6100_v47 = vadd.f32 %v9123_v46, %v12661_v0 }
 0xa59   :  { %v6099_v26 = vadd.f32 %v9124_v2, %v12661_v0  ;;  %v8721_v28 = vpop.f32.mrb[88].mxu1 }
 0xa5a   :  { %v7363_v18 = vmul.f32 -1.442695, %v6100_v47  ;;  %v12789_v54 = vadd.f32 %v8721_v28, %v12632_v4  ;;  %v5839_v29 = vpop.f32.mrb[89].mxu1 }
 0xa5b   :  { %v9357_v51 = vpop.eup %9356  ;;  %v7362_v11 = vmul.f32 -1.442695, %v6099_v26  ;;  %v12792_v38 = vadd.f32 %v5839_v29, %v12634_v20 }
 0xa5c   :  { %9364 = vpow2.f32 %v7363_v18  ;;  %6802 = vrot.lane.b32.xlu1 %v9357_v51, %s9565_s25  ;;  %v13262_v18 = vld [vmem:[#allocation3_spill] sm:$0xff] }
 0xa5d   :  { %v8724_v42 = vpop.f32.mrb[90].mxu1  ;;  %9366 = vpow2.f32 %v7362_v11  ;;  %v13263_v11 = vld [vmem:[#allocation20_spill] sm:$0xff] }
 0xa5e   :  { %v9127_v5 = vadd.f32 %v8724_v42, %v12636_v31  ;;  %v5849_v8 = vpop.f32.mrb[91].mxu1  ;;  %v9359_v1 = vpop.eup %9358 }
 0xa5f   :  { %v9128_v23 = vadd.f32 %v5849_v8, %v12638_v12  ;;  %6800 = vrot.lane.b32.xlu0 %v9359_v1, %s9565_s25  ;;  %v9361_v6 = vpop.eup %9360 }
 0xa60   :  { %v6104_v4 = vadd.f32 %v9127_v5, %v12661_v0  ;;  %v9363_v59 = vpop.eup %9362  ;;  %v6352_v20 = vadd.f32 1.0, %v9361_v6 }
 0xa61   :  { %v8727_v13 = vpop.f32.mrb[92].mxu1  ;;  %v6103_v19 = vadd.f32 %v9128_v23, %v12661_v0  ;;  %v6351_v41 = vadd.f32 1.0, %v9363_v59  ;;  %v13264_v23 = vld [vmem:[#allocation21_spill] sm:$0xff]  ;;  %v13265_v59 = vld [vmem:[#allocation22_spill] sm:$0xff] }
 0xa62   :  { %v12801_v30 = vadd.f32 %v8727_v13, %v13258_v7  ;;  %v5859_v25 = vpop.f32.mrb[93].mxu1  ;;  %v7367_v31 = vmul.f32 -1.442695, %v6104_v4  ;;  %9368 = vrcp.f32 %v6352_v20 }
 0xa63   :  { %v12804_v16 = vadd.f32 %v5859_v25, %v13259_v58  ;;  %9370 = vrcp.f32 %v6351_v41  ;;  %v7366_v55 = vmul.f32 -1.442695, %v6103_v19 }
 0xa64   :  { %9372 = vpow2.f32 %v7367_v31 }
 0xa65   :  { %v8730_v12 = vpop.f32.mrb[94].mxu1 }
 0xa66   :  { %v9365_v15 = vpop.eup %9364  ;;  %v9107_v33 = vadd.f32 %v8730_v12, %v13260_v9  ;;  %v5869_v36 = vpop.f32.mrb[95].mxu1  ;;  %v13266_v12 = vld [vmem:[#allocation23_spill] sm:$0xff] }
 0xa67   :  { %v6356_v32 = vadd.f32 1.0, %v9365_v15  ;;  %v9108_v3 = vadd.f32 %v5869_v36, %v13261_v27  ;;  %v9367_v46 = vpop.eup %9366  ;;  %v13267_v36 = vld [vmem:[#allocation24_spill] sm:$0xff] }
 0xa68   :  { %v6108_v53 = vadd.f32 %v9107_v33, %v12661_v0  ;;  %v6355_v2 = vadd.f32 1.0, %v9367_v46 }
 0xa69   :  { %9374 = vrcp.f32 %v6356_v32  ;;  %v6107_v47 = vadd.f32 %v9108_v3, %v12661_v0  ;;  %v8733_v26 = vpop.f32.mrb[96].mxu1  ;;  %v6122_v3 = vadd.f32 %v12701_v40, %v12661_v0 }
 0xa6a   :  { %9376 = vpow2.f32 %v7366_v55  ;;  %v7371_v28 = vmul.f32 -1.442695, %v6108_v53  ;;  %v12811_v29 = vadd.f32 %v8733_v26, %v13262_v18  ;;  %v5879_v51 = vpop.f32.mrb[97].mxu1  ;;  %v13268_v26 = vld [vmem:[#allocation25_spill] sm:$0xff] }
 0xa6b   :  { %9378 = vrcp.f32 %v6355_v2  ;;  %v12814_v42 = vadd.f32 %v5879_v51, %v13263_v11  ;;  %v7370_v5 = vmul.f32 -1.442695, %v6107_v47  ;;  %v6121_v47 = vadd.f32 %v12704_v24, %v12661_v0  ;;  %v13269_v51 = vld [vmem:[#allocation26_spill] sm:$0xff]  ;;  %v13270_v24 = vld [vmem:[#allocation27_spill] sm:$0xff] }
 0xa6c   :  { %v9369_v1 = vpop.eup %9368  ;;  %9380 = vpow2.f32 %v7371_v28 }
 0xa6d   :  { %v8736_v8 = vpop.f32.mrb[98].mxu1  ;;  %v9371_v13 = vpop.eup %9370  ;;  %6762 = vrot.lane.b32.xlu1 %v9369_v1, %s9559_s26  ;;  %9382 = vpow2.f32 %v7370_v5  ;;  %v7385_v5 = vmul.f32 -1.442695, %v6122_v3  ;;  %v13273_v3 = vld [vmem:[#allocation30_spill] sm:$0xff] }
 0xa6e   :  { %v9111_v4 = vadd.f32 %v8736_v8, %v13264_v23  ;;  %v5889_v6 = vpop.f32.mrb[99].mxu1  ;;  %6760 = vrot.lane.b32.xlu0 %v9371_v13, %s9559_s26  ;;  %v9373_v7 = vpop.eup %9372 }
 0xa6f   :  { %v9112_v20 = vadd.f32 %v5889_v6, %v13265_v59  ;;  %v6360_v31 = vadd.f32 1.0, %v9373_v7  ;;  %v7384_v6 = vmul.f32 -1.442695, %v6121_v47  ;;  %v13271_v7 = vld [vmem:[#allocation28_spill] sm:$0xff] }
 0xa70   :  { %v6112_v19 = vadd.f32 %v9111_v4, %v12661_v0 }
 0xa71   :  { %v6111_v25 = vadd.f32 %v9112_v20, %v12661_v0  ;;  %v8739_v41 = vpop.f32.mrb[100].mxu1  ;;  %9384 = vrcp.f32 %v6360_v31 }
 0xa72   :  { %v7375_v58 = vmul.f32 -1.442695, %v6112_v19  ;;  %v12823_v15 = vadd.f32 %v8739_v41, %v13266_v12  ;;  %v5899_v55 = vpop.f32.mrb[101].mxu1 }
 0xa73   :  { %v9375_v9 = vpop.eup %9374  ;;  %v7374_v33 = vmul.f32 -1.442695, %v6111_v25  ;;  %v12826_v32 = vadd.f32 %v5899_v55, %v13267_v36  ;;  %v6106_v55 = vadd.f32 %v12801_v30, %v12661_v0 }
 0xa74   :  { %v9377_v27 = vpop.eup %9376  ;;  %6730 = vrot.lane.b32.xlu1 %v9375_v9, %s9555_s10  ;;  %9386 = vpow2.f32 %v7375_v58  ;;  %v13272_v9 = vld [vmem:[#allocation29_spill] sm:$0xff] }
 0xa75   :  { %v9379_v46 = vpop.eup %9378  ;;  %v6359_v53 = vadd.f32 1.0, %v9377_v27  ;;  %v8742_v2 = vpop.f32.mrb[102].mxu1  ;;  %9388 = vpow2.f32 %v7374_v33 }
 0xa76   :  { %v9115_v28 = vadd.f32 %v8742_v2, %v13268_v26  ;;  %6728 = vrot.lane.b32.xlu0 %v9379_v46, %s9555_s10  ;;  %v5909_v18 = vpop.f32.mrb[103].mxu1  ;;  %v9381_v40 = vpop.eup %9380 }
 0xa77   :  { %9390 = vrcp.f32 %v6359_v53  ;;  %v9116_v11 = vadd.f32 %v5909_v18, %v13269_v51  ;;  %v6364_v1 = vadd.f32 1.0, %v9381_v40  ;;  %v9383_v19 = vpop.eup %9382  ;;  %v7369_v51 = vmul.f32 -1.442695, %v6106_v55 }
 0xa78   :  { %v6116_v8 = vadd.f32 %v9115_v28, %v12661_v0  ;;  %v6363_v41 = vadd.f32 1.0, %v9383_v19  ;;  %v6105_v28 = vadd.f32 %v12804_v16, %v12661_v0 }
 0xa79   :  { %v6115_v23 = vadd.f32 %v9116_v11, %v12661_v0  ;;  %v8745_v4 = vpop.f32.mrb[104].mxu1  ;;  %9392 = vrcp.f32 %v6364_v1  ;;  %v6138_v11 = vadd.f32 %v12680_v34, %v12661_v0 }
 0xa7a   :  { %v7379_v13 = vmul.f32 -1.442695, %v6116_v8  ;;  %v12839_v59 = vadd.f32 %v8745_v4, %v13270_v24  ;;  %v5919_v20 = vpop.f32.mrb[105].mxu1  ;;  %9394 = vpow2.f32 %v7385_v5  ;;  %v6137_v5 = vadd.f32 %v12683_v62, %v12661_v0 }
 0xa7b   :  { %v12842_v25 = vadd.f32 %v5919_v20, %v13271_v7  ;;  %v7378_v31 = vmul.f32 -1.442695, %v6115_v23  ;;  %v9385_v12 = vpop.eup %9384  ;;  %v7368_v23 = vmul.f32 -1.442695, %v6105_v28  ;;  %v6097_v62 = vadd.f32 %v12780_v60, %v12661_v0 }
 0xa7c   :  { %9396 = vpow2.f32 %v7379_v13  ;;  %6794 = vrot.lane.b32.xlu1 %v9385_v12, %s9567_s7  ;;  %v6098_v13 = vadd.f32 %v12777_v10, %v12661_v0  ;;  %v7400_v34 = vmul.f32 -1.442695, %v6137_v5  ;;  %v6129_v10 = vadd.f32 %v12726_v57, %v12661_v0 }
 0xa7d   :  { %v8748_v58 = vpop.f32.mrb[106].mxu1  ;;  %9398 = vpow2.f32 %v7384_v6  ;;  %v7401_v6 = vmul.f32 -1.442695, %v6138_v11  ;;  %v7360_v60 = vmul.f32 -1.442695, %v6097_v62  ;;  %v6145_v11 = vadd.f32 %v12673_v43, %v12661_v0 }
 0xa7e   :  { %v9119_v33 = vadd.f32 %v8748_v58, %v13272_v9  ;;  %v5929_v36 = vpop.f32.mrb[107].mxu1  ;;  %v9387_v27 = vpop.eup %9386  ;;  %9400 = vrcp.f32 %v6363_v41  ;;  %v6130_v41 = vadd.f32 %v12723_v39, %v12661_v0  ;;  %v7361_v58 = vmul.f32 -1.442695, %v6098_v13 }
 0xa7f   :  { %v9120_v46 = vadd.f32 %v5929_v36, %v13273_v3  ;;  %v9389_v53 = vpop.eup %9388  ;;  %v6368_v2 = vadd.f32 1.0, %v9387_v27  ;;  %9402 = vpow2.f32 %v7378_v31  ;;  %v7392_v39 = vmul.f32 -1.442695, %v6129_v10 }
 0xa80   :  { %v6120_v47 = vadd.f32 %v9119_v33, %v12661_v0  ;;  %v6367_v18 = vadd.f32 1.0, %v9389_v53  ;;  %v7393_v36 = vmul.f32 -1.442695, %v6130_v41  ;;  %v6114_v27 = vadd.f32 %v12823_v15, %v12661_v0 }
 0xa81   :  { %v9391_v26 = vpop.eup %9390  ;;  %v6119_v30 = vadd.f32 %v9120_v46, %v12661_v0  ;;  %9404 = vrcp.f32 %v6368_v2  ;;  %v6113_v46 = vadd.f32 %v12826_v32, %v12661_v0  ;;  %v6093_v43 = vadd.f32 %v12768_v52, %v12661_v0 }
 0xa82   :  { %6792 = vrot.lane.b32.xlu0 %v9391_v26, %s9567_s7  ;;  %9406 = vrcp.f32 %v6367_v18  ;;  %v7383_v40 = vmul.f32 -1.442695, %v6120_v47  ;;  %v6146_v26 = vadd.f32 %v12670_v14, %v12661_v0  ;;  %v7377_v28 = vmul.f32 -1.442695, %v6114_v27 }
 0xa83   :  { %v7382_v8 = vmul.f32 -1.442695, %v6119_v30  ;;  %v9393_v1 = vpop.eup %9392  ;;  %9408 = vpow2.f32 %v7369_v51  ;;  %v6094_v14 = vadd.f32 %v12765_v49, %v12661_v0  ;;  %v6126_v49 = vadd.f32 %v12712_v56, %v12661_v0 }
 0xa84   :  { %v9395_v16 = vpop.eup %9394  ;;  %6714 = vrot.lane.b32.xlu1 %v9393_v1, %s9558_s22  ;;  %9410 = vpow2.f32 %v7383_v40  ;;  %v7376_v40 = vmul.f32 -1.442695, %v6113_v46  ;;  %v7409_v1 = vmul.f32 -1.442695, %v6146_v26  ;;  %v6125_v52 = vadd.f32 %v12715_v22, %v12661_v0 }
 0xa85   :  { %9412 = vpow2.f32 %v7382_v8  ;;  %v6378_v7 = vadd.f32 1.0, %v9395_v16  ;;  %v7356_v41 = vmul.f32 -1.442695, %v6093_v43  ;;  %v6110_v56 = vadd.f32 %v12811_v29, %v12661_v0 }
 0xa86   :  { %v9397_v4 = vpop.eup %9396  ;;  %9414 = vpow2.f32 %v7368_v23  ;;  %v6109_v22 = vadd.f32 %v12814_v42, %v12661_v0  ;;  %v6142_v27 = vadd.f32 %v12691_v35, %v12661_v0  ;;  %v6141_v42 = vadd.f32 %v12694_v17, %v12661_v0 }
 0xa87   :  { %v9399_v24 = vpop.eup %9398  ;;  %v6372_v20 = vadd.f32 1.0, %v9397_v4  ;;  %v7373_v29 = vmul.f32 -1.442695, %v6110_v56 }
 0xa88   :  { %v9401_v19 = vpop.eup %9400  ;;  %v6377_v55 = vadd.f32 1.0, %v9399_v24  ;;  %v7405_v35 = vmul.f32 -1.442695, %v6142_v27  ;;  %v7404_v17 = vmul.f32 -1.442695, %v6141_v42 }
 0xa89   :  { %9416 = vrcp.f32 %v6372_v20  ;;  %6712 = vrot.lane.b32.xlu1 %v9401_v19, %s9558_s22  ;;  %v9403_v31 = vpop.eup %9402  ;;  %v7357_v20 = vmul.f32 -1.442695, %v6094_v14 }
 0xa8a   :  { %9418 = vpow2.f32 %v7401_v6  ;;  %v6371_v9 = vadd.f32 1.0, %v9403_v31  ;;  %v7408_v6 = vmul.f32 -1.442695, %v6145_v11 }
 0xa8b   :  { %v9405_v12 = vpop.eup %9404  ;;  %9420 = vpow2.f32 %v7400_v34 }
 0xa8c   :  { %v9407_v33 = vpop.eup %9406  ;;  %9422 = vrcp.f32 %v6378_v7 }
 0xa8d   :  { %9424 = vrcp.f32 %v6371_v9  ;;  %6778 = vrot.lane.b32.xlu1 %v9405_v12, %s9561_s5  ;;  %6776 = vrot.lane.b32.xlu0 %v9407_v33, %s9561_s5  ;;  %v9409_v57 = vpop.eup %9408  ;;  %v7389_v12 = vmul.f32 -1.442695, %v6126_v49  ;;  %v7388_v33 = vmul.f32 -1.442695, %v6125_v52 }
 0xa8e   :  { %9426 = vpow2.f32 %v7361_v58  ;;  %v9411_v3 = vpop.eup %9410  ;;  %v6362_v51 = vadd.f32 1.0, %v9409_v57 }
 0xa8f   :  { %9428 = vrcp.f32 %v6377_v55  ;;  %v9413_v53 = vpop.eup %9412  ;;  %v6376_v2 = vadd.f32 1.0, %v9411_v3 }
 0xa90   :  { %9430 = vpow2.f32 %v7360_v60  ;;  %v9415_v47 = vpop.eup %9414  ;;  %v6375_v18 = vadd.f32 1.0, %v9413_v53  ;;  %v7372_v53 = vmul.f32 -1.442695, %v6109_v22 }
 0xa91   :  { %9432 = vpow2.f32 %v7393_v36  ;;  %v6361_v5 = vadd.f32 1.0, %v9415_v47 }
 0xa92   :  { %9434 = vpow2.f32 %v7392_v39 }
 0xa93   :  { %v9417_v30 = vpop.eup %9416  ;;  %9436 = vrcp.f32 %v6376_v2 }
 0xa94   :  { %v9419_v15 = vpop.eup %9418  ;;  %9438 = vrcp.f32 %v6375_v18  ;;  %6746 = vrot.lane.b32.xlu1 %v9417_v30, %s9562_s9 }
 0xa95   :  { %v9421_v32 = vpop.eup %9420  ;;  %9440 = vpow2.f32 %v7377_v28  ;;  %v6394_v16 = vadd.f32 1.0, %v9419_v15  ;;  %v6102_v28 = vadd.f32 %v12789_v54, %v12661_v0  ;;  %v6101_v15 = vadd.f32 %v12792_v38, %v12661_v0 }
 0xa96   :  { %v9423_v8 = vpop.eup %9422  ;;  %9442 = vrcp.f32 %v6362_v51  ;;  %v6393_v24 = vadd.f32 1.0, %v9421_v32  ;;  %v6134_v54 = vadd.f32 %v12736_v50, %v12661_v0  ;;  %v6133_v38 = vadd.f32 %v12739_v45, %v12661_v0  ;;  %v12917_v45 = vld [vmem:[#allocation2] ss:$0 sm:$0xff] }
 0xa97   :  { %v9425_v23 = vpop.eup %9424  ;;  %9444 = vpow2.f32 %v7376_v40  ;;  %v6118_v50 = vadd.f32 %v12839_v59, %v12661_v0  ;;  %v6150_v0 = vadd.f32 %v12917_v45, %v12664_v48 }
 0xa98   :  { %v9427_v4 = vpop.eup %9426  ;;  %6744 = vrot.lane.b32.xlu0 %v9425_v23, %s9562_s9  ;;  %6541 = vrot.lane.b32.xlu1 %v9423_v8, %s9553_s3  ;;  %9446 = vrcp.f32 %v6361_v5  ;;  %v7365_v5 = vmul.f32 -1.442695, %v6102_v28  ;;  %v7364_v23 = vmul.f32 -1.442695, %v6101_v15  ;;  %v7397_v43 = vmul.f32 -1.442695, %v6134_v54 }
 0xa99   :  { %v9429_v13 = vpop.eup %9428  ;;  %9448 = vpow2.f32 %v7409_v1  ;;  %v6354_v7 = vadd.f32 1.0, %v9427_v4  ;;  %v7396_v49 = vmul.f32 -1.442695, %v6133_v38  ;;  %v7381_v59 = vmul.f32 -1.442695, %v6118_v50 }
 0xa9a   :  { %v9431_v34 = vpop.eup %9430  ;;  %9450 = vrcp.f32 %v6394_v16  ;;  %v7413_v48 = vmul.f32 -1.442695, %v6150_v0 }
 0xa9b   :  { %v9433_v19 = vpop.eup %9432  ;;  %9452 = vpow2.f32 %v7408_v6  ;;  %v6353_v10 = vadd.f32 1.0, %v9431_v34 }
 0xa9c   :  { %v9435_v62 = vpop.eup %9434  ;;  %6539 = vrot.lane.b32.xlu0 %v9429_v13, %s9553_s3  ;;  %9454 = vrcp.f32 %v6393_v24  ;;  %v6386_v55 = vadd.f32 1.0, %v9433_v19  ;;  %s9585_s3 = smov 32  }
 0xa9d   :  { %v9437_v31 = vpop.eup %9436  ;;  %9456 = vpow2.f32 %v7357_v20  ;;  %v6385_v36 = vadd.f32 1.0, %v9435_v62  ;;  %v6117_v20 = vadd.f32 %v12917_v45, %v12842_v25  ;;  %v6149_v25 = vadd.f32 %v12917_v45, %v12667_v21 }
 0xa9e   :  { %v9439_v58 = vpop.eup %9438  ;;  %6810 = vrot.lane.b32.xlu1 %v9437_v31, %s9564_s20  ;;  %9458 = vrcp.f32 %v6354_v7 }
 0xa9f   :  { %v9441_v9 = vpop.eup %9440  ;;  %9460 = vpow2.f32 %v7356_v41  ;;  %v7412_v22 = vmul.f32 -1.442695, %v6149_v25 }
 0xaa0   :  { %6808 = vrot.lane.b32.xlu0 %v9439_v58, %s9564_s20  ;;  %v9443_v60 = vpop.eup %9442  ;;  %9462 = vrcp.f32 %v6353_v10  ;;  %v6370_v3 = vadd.f32 1.0, %v9441_v9  ;;  %v7380_v10 = vmul.f32 -1.442695, %v6117_v20 }
 0xaa1   :  { %v9445_v39 = vpop.eup %9444  ;;  %9464 = vpow2.f32 %v7389_v12 }
 0xaa2   :  { %6549 = vrot.lane.b32.xlu1 %v9443_v60, %s9558_s22  ;;  %v9447_v57 = vpop.eup %9446  ;;  %9466 = vrcp.f32 %v6386_v55  ;;  %v6369_v47 = vadd.f32 1.0, %v9445_v39 }
 0xaa3   :  { %v9449_v46 = vpop.eup %9448  ;;  %9468 = vpow2.f32 %v7388_v33 }
 0xaa4   :  { %6547 = vrot.lane.b32.xlu0 %v9447_v57, %s9558_s22  ;;  %v9451_v2 = vpop.eup %9450  ;;  %9470 = vrcp.f32 %v6385_v36  ;;  %v6402_v30 = vadd.f32 1.0, %v9449_v46 }
 0xaa5   :  { %v9453_v26 = vpop.eup %9452  ;;  %9472 = vpow2.f32 %v7373_v29 }
 0xaa6   :  { %6557 = vrot.lane.b32.xlu1 %v9451_v2, %s9556_s14  ;;  %v9455_v18 = vpop.eup %9454  ;;  %9474 = vrcp.f32 %v6370_v3  ;;  %v6401_v40 = vadd.f32 1.0, %v9453_v26 }
 0xaa7   :  { %v9457_v51 = vpop.eup %9456  ;;  %9476 = vpow2.f32 %v7372_v53 }
 0xaa8   :  { %6555 = vrot.lane.b32.xlu0 %v9455_v18, %s9556_s14  ;;  %v9459_v11 = vpop.eup %9458  ;;  %9478 = vrcp.f32 %v6369_v47  ;;  %v6350_v1 = vadd.f32 1.0, %v9457_v51  ;;  %s9587_s14 = smov 96  }
 0xaa9   :  { %v9461_v32 = vpop.eup %9460  ;;  %9480 = vpow2.f32 %v7405_v35 }
 0xaaa   :  { %6565 = vrot.lane.b32.xlu1 %v9459_v11, %s9555_s10  ;;  %v9463_v8 = vpop.eup %9462  ;;  %9482 = vrcp.f32 %v6402_v30  ;;  %v6349_v4 = vadd.f32 1.0, %v9461_v32 }
 0xaab   :  { %v9465_v14 = vpop.eup %9464  ;;  %9484 = vpow2.f32 %v7404_v17 }
 0xaac   :  { %6563 = vrot.lane.b32.xlu0 %v9463_v8, %s9555_s10  ;;  %v9467_v16 = vpop.eup %9466  ;;  %9486 = vrcp.f32 %v6401_v40  ;;  %v6382_v24 = vadd.f32 1.0, %v9465_v14  ;;  %v12941_v14 = vpop.permute.xlu1 %6818  ;;  %s9586_s10 = smov 64  }
 0xaad   :  { %v9469_v6 = vpop.eup %9468  ;;  %9488 = vpow2.f32 %v7365_v5 }
 0xaae   :  { %6573 = vrot.lane.b32.xlu1 %v9467_v16, %s9557_s18  ;;  %v9471_v13 = vpop.eup %9470  ;;  %9490 = vrcp.f32 %v6350_v1  ;;  %v6381_v7 = vadd.f32 1.0, %v9469_v6 }
 0xaaf   :  { %v9473_v34 = vpop.eup %9472  ;;  %9492 = vpow2.f32 %v7364_v23  ;;  %v12944_v23 = vpop.permute.xlu0 %6816 }
 0xab0   :  { %6571 = vrot.lane.b32.xlu0 %v9471_v13, %s9557_s18  ;;  %v9475_v19 = vpop.eup %9474  ;;  %9494 = vrcp.f32 %v6349_v4  ;;  %v6366_v41 = vadd.f32 1.0, %v9473_v34  ;;  %v12947_v4 = vpop.permute.xlu1 %6754 }
 0xab1   :  { %v9477_v62 = vpop.eup %9476  ;;  %9496 = vpow2.f32 %v7397_v43 }
 0xab2   :  { %6581 = vrot.lane.b32.xlu1 %v9475_v19, %s9562_s9  ;;  %v9479_v52 = vpop.eup %9478  ;;  %9498 = vrcp.f32 %v6382_v24  ;;  %v6365_v12 = vadd.f32 1.0, %v9477_v62  ;;  %v6092_v24 = vadd.f32 %v12917_v45, %v12758_v37  ;;  %v6091_v19 = vadd.f32 %v12917_v45, %v12761_v63 }
 0xab3   :  { %v9481_v31 = vpop.eup %9480  ;;  %9500 = vpow2.f32 %v7396_v49  ;;  %v12950_v43 = vpop.permute.xlu0 %6752  ;;  %v6090_v37 = vadd.f32 %v12917_v45, %v12749_v61  ;;  %v6089_v63 = vadd.f32 %v12917_v45, %v12754_v44 }
 0xab4   :  { %6579 = vrot.lane.b32.xlu0 %v9479_v52, %s9562_s9  ;;  %v9483_v58 = vpop.eup %9482  ;;  %9502 = vrcp.f32 %v6381_v7  ;;  %v6398_v9 = vadd.f32 1.0, %v9481_v31  ;;  %v6723_v13 = vpop.permute.xlu1 %6722  ;;  %v7355_v20 = vmul.f32 -1.442695, %v6092_v24  ;;  %v7354_v0 = vmul.f32 -1.442695, %v6091_v19 }
 0xab5   :  { %v9485_v56 = vpop.eup %9484  ;;  %9504 = vpow2.f32 %v7381_v59 }
 0xab6   :  { %6589 = vrot.lane.b32.xlu1 %v9483_v58, %s9563_s15  ;;  %v9487_v55 = vpop.eup %9486  ;;  %9506 = vrcp.f32 %v6366_v41  ;;  %v6397_v60 = vadd.f32 1.0, %v9485_v56 }
 0xab7   :  { %v9489_v33 = vpop.eup %9488  ;;  %9508 = vpow2.f32 %v7380_v10  ;;  %v6721_v34 = vpop.permute.xlu0 %6720  ;;  %v7353_v10 = vmul.f32 -1.442695, %v6090_v37 }
 0xab8   :  { %6587 = vrot.lane.b32.xlu0 %v9487_v55, %s9563_s15  ;;  %v9491_v21 = vpop.eup %9490  ;;  %9510 = vrcp.f32 %v6365_v12  ;;  %v6358_v27 = vadd.f32 1.0, %v9489_v33  ;;  %v12956_v49 = vpop.permute.xlu1 %6786  ;;  %v7352_v55 = vmul.f32 -1.442695, %v6089_v63 }
 0xab9   :  { %v9493_v36 = vpop.eup %9492  ;;  %9512 = vpow2.f32 %v7413_v48 }
 0xaba   :  { %6597 = vrot.lane.b32.xlu1 %v9491_v21, %s9559_s26  ;;  %v9495_v39 = vpop.eup %9494  ;;  %9514 = vrcp.f32 %v6398_v9  ;;  %v6357_v3 = vadd.f32 1.0, %v9493_v36 }
 0xabb   :  { %v9497_v29 = vpop.eup %9496  ;;  %9516 = vpow2.f32 %v7412_v22  ;;  %v12960_v7 = vpop.permute.xlu0 %6784 }
 0xabc   :  { %6595 = vrot.lane.b32.xlu0 %v9495_v39, %s9559_s26  ;;  %v9499_v57 = vpop.eup %9498  ;;  %9518 = vrcp.f32 %v6397_v60  ;;  %v6390_v53 = vadd.f32 1.0, %v9497_v29  ;;  %s6942_s26 = sld [smem:[%s13055_s0 + %s9585_s3]]  }
 0xabd   :  { %v9501_v46 = vpop.eup %9500  ;;  %9520 = vrcp.f32 %v6358_v27 }
 0xabe   :  { %6605 = vrot.lane.b32.xlu1 %v9499_v57, %s9560_s30  ;;  %v9503_v42 = vpop.eup %9502  ;;  %v6389_v26 = vadd.f32 1.0, %v9501_v46  ;;  %9522 = vrcp.f32 %v6357_v3 }
 0xabf   :  { %v9505_v2 = vpop.eup %9504  ;;  %9524 = vrcp.f32 %v6390_v53  ;;  %v6707_v59 = vpop.permute.xlu0 %6706 }
 0xac0   :  { %6603 = vrot.lane.b32.xlu0 %v9503_v42, %s9560_s30  ;;  %v9507_v47 = vpop.eup %9506  ;;  %v6374_v18 = vadd.f32 1.0, %v9505_v2  ;;  %9526 = vrcp.f32 %v6389_v26 }
 0xac1   :  { %v9509_v35 = vpop.eup %9508 }
 0xac2   :  { %6613 = vrot.lane.b32.xlu1 %v9507_v47, %s9561_s5  ;;  %v9511_v28 = vpop.eup %9510  ;;  %v6373_v17 = vadd.f32 1.0, %v9509_v35  ;;  %9528 = vrcp.f32 %v6374_v18  ;;  %v12962_v62 = vpop.permute.xlu1 %6770 }
 0xac3   :  { %v9513_v30 = vpop.eup %9512  ;;  %v6705_v31 = vpop.permute.xlu0 %6704 }
 0xac4   :  { %6611 = vrot.lane.b32.xlu0 %v9511_v28, %s9561_s5  ;;  %v9515_v51 = vpop.eup %9514  ;;  %v6406_v40 = vadd.f32 1.0, %v9513_v30  ;;  %9530 = vrcp.f32 %v6373_v17 }
 0xac5   :  { %v9517_v15 = vpop.eup %9516 }
 0xac6   :  { %6621 = vrot.lane.b32.xlu1 %v9515_v51, %s9566_s1  ;;  %v9519_v11 = vpop.eup %9518  ;;  %v6405_v54 = vadd.f32 1.0, %v9517_v15  ;;  %9532 = vrcp.f32 %v6406_v40  ;;  %v6739_v52 = vpop.permute.xlu1 %6738 }
 0xac7   :  { %v9521_v32 = vpop.eup %9520  ;;  %v12970_v48 = vpop.permute.xlu0 %6768 }
 0xac8   :  { %6619 = vrot.lane.b32.xlu0 %v9519_v11, %s9566_s1  ;;  %v9523_v5 = vpop.eup %9522  ;;  %9534 = vrcp.f32 %v6405_v54 }
 0xac9   :  { %v9525_v8 = vpop.eup %9524  ;;  %9536 = vpow2.f32 %v7355_v20 }
 0xaca   :  { %6629 = vrot.lane.b32.xlu1 %v9521_v32, %s9567_s7  ;;  %v9527_v1 = vpop.eup %9526  ;;  %9538 = vpow2.f32 %v7354_v0 }
 0xacb   :  { %9540 = vpow2.f32 %v7353_v10  ;;  %v6737_v22 = vpop.permute.xlu0 %6736 }
 0xacc   :  { %6627 = vrot.lane.b32.xlu0 %v9523_v5, %s9567_s7  ;;  %v9529_v38 = vpop.eup %9528 }
 0xace   :  { %6637 = vrot.lane.b32.xlu1 %v9525_v8, %s9565_s25  ;;  %v9531_v16 = vpop.eup %9530  ;;  %v12966_v41 = vpop.permute.xlu1 %6802 }
 0xad0   :  { %6635 = vrot.lane.b32.xlu0 %v9527_v1, %s9565_s25  ;;  %v9533_v6 = vpop.eup %9532 }
 0xad1   :  { %v12972_v21 = vpop.permute.xlu0 %6800 }
 0xad2   :  { %6645 = vrot.lane.b32.xlu1 %v9529_v38, %s9564_s20  ;;  %v9535_v50 = vpop.eup %9534 }
 0xad3   :  { %v9537_v25 = vpop.eup %9536 }
 0xad4   :  { %6643 = vrot.lane.b32.xlu0 %v9531_v16, %s9564_s20  ;;  %v6348_v12 = vadd.f32 1.0, %v9537_v25  ;;  %v9539_v56 = vpop.eup %9538 }
 0xad5   :  { %v6347_v33 = vadd.f32 1.0, %v9539_v56  ;;  %v9541_v36 = vpop.eup %9540 }
 0xad6   :  { %6653 = vrot.lane.b32.xlu1 %v9533_v6, %s9568_s13  ;;  %9542 = vrcp.f32 %v6348_v12  ;;  %v6346_v39 = vadd.f32 1.0, %v9541_v36 }
 0xad7   :  { %9544 = vpow2.f32 %v7352_v55 }
 0xad8   :  { %6651 = vrot.lane.b32.xlu0 %v9535_v50, %s9568_s13  ;;  %9546 = vrcp.f32 %v6347_v33 }
 0xad9   :  { %9548 = vrcp.f32 %v6346_v39 }
 0xadf   :  { %v6763_v58 = vpop.permute.xlu1 %6762 }
 0xae0   :  { %v6761_v44 = vpop.permute.xlu0 %6760  ;;  %v9543_v45 = vpop.eup %9542 }
 0xae1   :  { %v6823_v27 = vsel %vm6657_vm6, %v9543_v45, %v6707_v59  ;;  %v9545_v57 = vpop.eup %9544 }
 0xae2   :  { %v9547_v42 = vpop.eup %9546  ;;  %v6345_v53 = vadd.f32 1.0, %v9545_v57 }
 0xae3   :  { %v6822_v2 = vsel %vm6657_vm6, %v9547_v42, %v6705_v31  ;;  %v9549_v54 = vpop.eup %9548 }
 0xae4   :  { %9550 = vrcp.f32 %v6345_v53 }
 0xae6   :  { %v6731_v9 = vpop.permute.xlu1 %6730 }
 0xae8   :  { %v6729_v46 = vpop.permute.xlu0 %6728 }
 0xaee   :  { %v6795_v61 = vpop.permute.xlu1 %6794  ;;  %v9551_v19 = vpop.eup %9550 }
 0xaf4   :  { %v6793_v35 = vpop.permute.xlu0 %6792 }
 0xaf6   :  { %v6715_v60 = vpop.permute.xlu1 %6714 }
 0xaf7   :  { %v6825_v3 = vsel %vm6660_vm7, %v6823_v27, %v6715_v60 }
 0xaf8   :  { %v6827_v47 = vsel %vm6663_vm8, %v6825_v3, %v6723_v13 }
 0xaf9   :  { %v6829_v18 = vsel %vm6666_vm9, %v6827_v47, %v6731_v9 }
 0xafa   :  { %v6831_v15 = vsel %vm6669_vm10, %v6829_v18, %v6739_v52 }
 0xafb   :  { %v6713_v29 = vpop.permute.xlu1 %6712 }
 0xafc   :  { %v6824_v26 = vsel %vm6660_vm7, %v6822_v2, %v6713_v29 }
 0xafd   :  { %v6826_v30 = vsel %vm6663_vm8, %v6824_v26, %v6721_v34 }
 0xafe   :  { %v6828_v40 = vsel %vm6666_vm9, %v6826_v30, %v6729_v46 }
 0xaff   :  { %v6779_v28 = vpop.permute.xlu1 %6778  ;;  %v6777_v51 = vpop.permute.xlu0 %6776  ;;  %v6830_v38 = vsel %vm6669_vm10, %v6828_v40, %v6737_v22 }
 0xb06   :  { %v6747_v17 = vpop.permute.xlu1 %6746 }
 0xb07   :  { %v6833_v11 = vsel %vm6672_vm11, %v6831_v15, %v6747_v17 }
 0xb08   :  { %v6835_v32 = vsel %vm6675_vm12, %v6833_v11, %v12947_v4 }
 0xb09   :  { %v6837_v5 = vsel %vm6678_vm13, %v6835_v32, %v6763_v58 }
 0xb0a   :  { %v6839_v8 = vsel %vm6681_vm14, %v6837_v5, %v12962_v62  ;;  %v6745_v1 = vpop.permute.xlu0 %6744  ;;  %v6542_v16 = vpop.permute.xlu1 %6541 }
 0xb0b   :  { %v6832_v6 = vsel %vm6672_vm11, %v6830_v38, %v6745_v1  ;;  %v6659_v50 = vsel %vm6657_vm6, %v9549_v54, %v6542_v16  ;;  %v6841_v4 = vsel %vm6684_vm15, %v6839_v8, %v6779_v28 }
 0xb0c   :  { %v6834_v13 = vsel %vm6675_vm12, %v6832_v6, %v12950_v43  ;;  %v6843_v24 = vsel %vm6687_vm1, %v6841_v4, %v12956_v49 }
 0xb0d   :  { %v6836_v34 = vsel %vm6678_vm13, %v6834_v13, %v6761_v44  ;;  %v6845_v20 = vsel %vm6690_vm2, %v6843_v24, %v6795_v61 }
 0xb0e   :  { %v6838_v62 = vsel %vm6681_vm14, %v6836_v34, %v12970_v48  ;;  %v6540_v0 = vpop.permute.xlu0 %6539  ;;  %v6847_v59 = vsel %vm6693_vm3, %v6845_v20, %v12966_v41 }
 0xb0f   :  { %v6658_v52 = vsel %vm6657_vm6, %v9551_v19, %v6540_v0  ;;  %v6840_v43 = vsel %vm6684_vm15, %v6838_v62, %v6777_v51 }
 0xb10   :  { %v6811_v37 = vpop.permute.xlu1 %6810  ;;  %v6842_v49 = vsel %vm6687_vm1, %v6840_v43, %v12960_v7 }
 0xb11   :  { %v6849_v31 = vsel %vm6696_vm4, %v6847_v59, %v6811_v37  ;;  %v6844_v25 = vsel %vm6690_vm2, %v6842_v49, %v6793_v35 }
 0xb12   :  { %v6809_v10 = vpop.permute.xlu0 %6808  ;;  %v6846_v63 = vsel %vm6693_vm3, %v6844_v25, %v12972_v21  ;;  %v6851_v41 = vsel %vm6699_vm5, %v6849_v31, %v12941_v14 }
 0xb13   :  { %v6848_v58 = vsel %vm6696_vm4, %v6846_v63, %v6809_v10  ;;  %6856 = vrot.lane.b32.xlu1 %v6851_v41, %s9571_s6 }
 0xb14   :  { %v6550_v12 = vpop.permute.xlu1 %6549  ;;  %v6850_v56 = vsel %vm6699_vm5, %v6848_v58, %v12944_v23 }
 0xb15   :  { %v6662_v7 = vsel %vm6660_vm7, %v6659_v50, %v6550_v12  ;;  %6854 = vrot.lane.b32.xlu0 %v6850_v56, %s9571_s6 }
 0xb16   :  { %v6548_v48 = vpop.permute.xlu0 %6547 }
 0xb17   :  { %v6661_v55 = vsel %vm6660_vm7, %v6658_v52, %v6548_v48 }
 0xb18   :  { %v6558_v9 = vpop.permute.xlu1 %6557 }
 0xb19   :  { %v6665_v33 = vsel %vm6663_vm8, %v6662_v7, %v6558_v9 }
 0xb1a   :  { %v6556_v22 = vpop.permute.xlu0 %6555 }
 0xb1b   :  { %v6664_v14 = vsel %vm6663_vm8, %v6661_v55, %v6556_v22 }
 0xb1c   :  { %v6566_v61 = vpop.permute.xlu1 %6565 }
 0xb1d   :  { %v6668_v21 = vsel %vm6666_vm9, %v6665_v33, %v6566_v61 }
 0xb1e   :  { %v6564_v60 = vpop.permute.xlu0 %6563 }
 0xb1f   :  { %v6667_v36 = vsel %vm6666_vm9, %v6664_v14, %v6564_v60 }
 0xb20   :  { %v6574_v23 = vpop.permute.xlu1 %6573 }
 0xb21   :  { %v6671_v44 = vsel %vm6669_vm10, %v6668_v21, %v6574_v23 }
 0xb22   :  { %v6572_v45 = vpop.permute.xlu0 %6571 }
 0xb23   :  { %v6670_v39 = vsel %vm6669_vm10, %v6667_v36, %v6572_v45 }
 0xb24   :  { %v6582_v27 = vpop.permute.xlu1 %6581 }
 0xb25   :  { %v6674_v29 = vsel %vm6672_vm11, %v6671_v44, %v6582_v27 }
 0xb26   :  { %v6580_v57 = vpop.permute.xlu0 %6579 }
 0xb27   :  { %v6673_v3 = vsel %vm6672_vm11, %v6670_v39, %v6580_v57 }
 0xb28   :  { %v6590_v46 = vpop.permute.xlu1 %6589 }
 0xb29   :  { %v6677_v42 = vsel %vm6675_vm12, %v6674_v29, %v6590_v46 }
 0xb2a   :  { %v6588_v53 = vpop.permute.xlu0 %6587 }
 0xb2b   :  { %v6676_v2 = vsel %vm6675_vm12, %v6673_v3, %v6588_v53 }
 0xb2c   :  { %v6598_v47 = vpop.permute.xlu1 %6597 }
 0xb2d   :  { %v6680_v26 = vsel %vm6678_vm13, %v6677_v42, %v6598_v47 }
 0xb2e   :  { %v6596_v35 = vpop.permute.xlu0 %6595 }
 0xb2f   :  { %v6679_v28 = vsel %vm6678_vm13, %v6676_v2, %v6596_v35 }
 0xb30   :  { %v6606_v18 = vpop.permute.xlu1 %6605 }
 0xb31   :  { %v6683_v30 = vsel %vm6681_vm14, %v6680_v26, %v6606_v18 }
 0xb32   :  { %v6604_v51 = vpop.permute.xlu0 %6603 }
 0xb33   :  { %v6682_v17 = vsel %vm6681_vm14, %v6679_v28, %v6604_v51 }
 0xb34   :  { %v6614_v15 = vpop.permute.xlu1 %6613 }
 0xb35   :  { %v6686_v11 = vsel %vm6684_vm15, %v6683_v30, %v6614_v15 }
 0xb36   :  { %v6612_v40 = vpop.permute.xlu0 %6611 }
 0xb37   :  { %v6685_v32 = vsel %vm6684_vm15, %v6682_v17, %v6612_v40 }
 0xb38   :  { %v6622_v54 = vpop.permute.xlu1 %6621 }
 0xb39   :  { %v6689_v5 = vsel %vm6687_vm1, %v6686_v11, %v6622_v54 }
 0xb3a   :  { %v6620_v8 = vpop.permute.xlu0 %6619 }
 0xb3b   :  { %v6688_v1 = vsel %vm6687_vm1, %v6685_v32, %v6620_v8 }
 0xb3c   :  { %v6630_v38 = vpop.permute.xlu1 %6629 }
 0xb3d   :  { %v6692_v16 = vsel %vm6690_vm2, %v6689_v5, %v6630_v38 }
 0xb3e   :  { %v6628_v6 = vpop.permute.xlu0 %6627 }
 0xb3f   :  { %v6691_v50 = vsel %vm6690_vm2, %v6688_v1, %v6628_v6 }
 0xb40   :  { %v6638_v4 = vpop.permute.xlu1 %6637 }
 0xb41   :  { %v6695_v13 = vsel %vm6693_vm3, %v6692_v16, %v6638_v4 }
 0xb42   :  { %v6636_v24 = vpop.permute.xlu0 %6635 }
 0xb43   :  { %v6694_v34 = vsel %vm6693_vm3, %v6691_v50, %v6636_v24 }
 0xb44   :  { %v6646_v20 = vpop.permute.xlu1 %6645 }
 0xb45   :  { %v6698_v19 = vsel %vm6696_vm4, %v6695_v13, %v6646_v20 }
 0xb46   :  { %v6644_v62 = vpop.permute.xlu0 %6643 }
 0xb47   :  { %v6697_v0 = vsel %vm6696_vm4, %v6694_v34, %v6644_v62  ;;  %vm13274_vm4 = vcmask 261120  }
 0xb48   :  { %v6654_v59 = vpop.permute.xlu1 %6653  ;;  %vm13276_vm6 = vmmov %vm13274_vm4 }
 0xb49   :  { %v6701_v52 = vsel %vm6699_vm5, %v6698_v19, %v6654_v59 }
 0xb4a   :  { %v6652_v43 = vpop.permute.xlu0 %6651 }
 0xb4b   :  { %v6700_v37 = vsel %vm6699_vm5, %v6697_v0, %v6652_v43  ;;  %vm13275_vm5 = vcmask 523264  }
 0xb4c   :  { %vm13277_vm7 = vmmov %vm13275_vm5 }
 0xb85   :  { %v6857_v49 = vpop.permute.xlu1 %6856 }
 0xb86   :  { %v6861_v31 = vsel %vm153_vm0, %v6701_v52, %v6857_v49 }
 0xb87   :  { %v6855_v25 = vpop.permute.xlu0 %6854  ;;  %v6876_v10 = vrot.slane %v6861_v31, 2  ;;  %v6880_v58 = vrot.slane %v6861_v31, 4  ;;  %v6884_v56 = vrot.slane %v6861_v31, 6 }
 0xb88   :  { %v6860_v63 = vsel %vm153_vm0, %v6700_v37, %v6855_v25  ;;  %vm6890_vm0 = vcmask 785408  }
 0xb89   :  { %6877 = vrot.lane.b32.xlu1 %v6876_v10, %s9585_s3  ;;  %v6863_v41 = vrot.slane %v6860_v63, 2  ;;  %v6867_v12 = vrot.slane %v6860_v63, 4  ;;  %v6871_v7 = vrot.slane %v6860_v63, 6 }
 0xb8b   :  { %6864 = vrot.lane.b32.xlu0 %v6863_v41, %s9585_s3 }
 0xb8d   :  { %6881 = vrot.lane.b32.xlu1 %v6880_v58, %s9586_s10 }
 0xb8f   :  { %6868 = vrot.lane.b32.xlu0 %v6867_v12, %s9586_s10 }
 0xb91   :  { %6885 = vrot.lane.b32.xlu1 %v6884_v56, %s9587_s14 }
 0xb93   :  { %6872 = vrot.lane.b32.xlu0 %v6871_v7, %s9587_s14 }
 0xbfb   :  { %v6878_v48 = vpop.permute.xlu1 %6877 }
 0xbfc   :  { %v6892_v22 = vsel %vm13274_vm4, %v6861_v31, %v6878_v48 }
 0xbfd   :  { %v6865_v55 = vpop.permute.xlu0 %6864 }
 0xbfe   :  { %v6888_v21 = vsel %vm13276_vm6, %v6860_v63, %v6865_v55 }
 0xbff   :  { %v6882_v9 = vpop.permute.xlu1 %6881 }
 0xc00   :  { %v6893_v14 = vsel %vm13275_vm5, %v6892_v22, %v6882_v9 }
 0xc01   :  { %v6869_v33 = vpop.permute.xlu0 %6868 }
 0xc02   :  { %v6889_v36 = vsel %vm13277_vm7, %v6888_v21, %v6869_v33 }
 0xc03   :  { %v6886_v61 = vpop.permute.xlu1 %6885 }
 0xc04   :  { %v6894_v60 = vsel %vm6890_vm0, %v6893_v14, %v6886_v61 }
 0xc05   :  { %v6873_v23 = vpop.permute.xlu0 %6872 }
 0xc06   :  { %v6891_v44 = vsel %vm6890_vm0, %v6889_v36, %v6873_v23 }
 0xc07   :  { %v6897_v45 = vcombine.low %v6891_v44, %v6894_v60 }
 0xc09   :  { %7416 = vst.sshfl [vmem:[%s6942_s26] sm:$0x33 pattern:$0x76325410] %v6897_v45 }

</bundles_post_ra>
